<compile_context>
chip_gen: v5e
topology: v5e:2x2
jax: 0.10.0
libtpu: 0.0.40
codegen_flags: <defaults>
</compile_context>

<pallas_src>
import jax
import jax.numpy as jnp
from jax.experimental import pallas as pl
from jax.experimental.pallas import tpu as pltpu

# geometry implied by Linear(16*10*10, 16) after two k=2, pad=1 convs:
_H1 = 9            # conv1 output spatial (from 8x8 input)
_H2 = 10           # conv2 output spatial
_NFEAT = 16 * _H2 * _H2        # 1600
_NFEAT_P = 1664                # lane-padded
_HID1, _HID2 = 26, 32
_LANES = 128


def _round_up(x, m):
    return (x + m - 1) // m * m


def _sigmoid(x):
    # exp on the EUP; reciprocal via pl.reciprocal. approx=False keeps full
    # precision so the tightened correctness tolerance below holds.
    return pl.reciprocal(1.0 + jnp.exp(-x), approx=False)


# ------------------------------ fused kernel --------------------------------

def _net_kernel(p1_ref, act_ref,
                w1_ref, b1_ref,
                g_ref, w2_ref, b2_ref,
                spread_ref, mask_ref, wfc_ref, bfc_ref, bsel_ref,
                wl1_ref, bl1_ref, wl2_ref, bl2_ref,
                wo_ref, bo_ref,
                out_ref):
    """Entire Net.forward in one VMEM-resident kernel invocation."""
    f32 = jnp.float32

    def mm(a, b):
        return jnp.dot(a, b, preferred_element_type=f32)

    # conv1 (3->16, k=2, p=1) on host-built im2col patches.
    # rows = (b, y1, x1), lanes = out channel.
    y1 = jnp.maximum(mm(p1_ref[...], w1_ref[...]) + b1_ref[...], 0.0)

    # conv2 (16->16, k=2, p=1): 4 kernel taps. G[t] is a 0/1 row-gather that
    # picks conv1 row (b, y+dy-1, x+dx-1) for output row (b, y, x) (zero where
    # the tap falls in the zero-padding ring); W2[t] is the 16x16 channel mix.
    acc = mm(g_ref[0], mm(y1, w2_ref[0]))
    for t in range(1, 4):
        acc = acc + mm(g_ref[t], mm(y1, w2_ref[t]))
    y2 = jnp.maximum(acc + b2_ref[...], 0.0)          # rows=(b,y,x), lanes=c

    # NCHW flatten + Linear(1600,16) without leaving the row layout:
    #   spread tiles the 16 channels across the 1600 flat-feature lanes,
    #   mask keeps only the 16-lane slot of each row's own spatial position,
    #   wfc is the fc weight permuted to that lane order,
    #   bsel row-sums the 100 spatial rows of each batch element.
    m = mm(y2, spread_ref[...])                       # (R2, 1664)
    m = m * mask_ref[...]
    cfc = mm(m, wfc_ref[...])                         # (R2, 128)
    enc = jnp.maximum(mm(bsel_ref[...], cfc) + bfc_ref[...], 0.0)   # (8, 128)

    # concat(enc, action): action is pre-placed at lanes 16:20, enc is 0 there.
    sa = enc + act_ref[...]

    lane = jax.lax.broadcasted_iota(jnp.int32, sa.shape, 1)

    # LSTMCell(20, 26), zero initial (h, c). Gates packed contiguously
    # [i | f | g | o] at lanes 0:104 of one 128-lane tile; the g / o blocks are
    # rotated down to lane 0 with pltpu.roll (f gate is unused since c0 = 0).
    g1 = mm(sa, wl1_ref[...]) + bl1_ref[...]
    c1 = _sigmoid(g1) * jnp.tanh(pltpu.roll(g1, _LANES - 2 * _HID1, 1))
    h1 = _sigmoid(pltpu.roll(g1, _LANES - 3 * _HID1, 1)) * jnp.tanh(c1)
    h1 = jnp.where(lane < _HID1, h1, 0.0)

    # LSTMCell(26, 32), zero initial (h, c). 4*32 = 128 lanes exactly.
    g2 = mm(h1, wl2_ref[...]) + bl2_ref[...]
    c2 = _sigmoid(g2) * jnp.tanh(pltpu.roll(g2, _LANES - 2 * _HID2, 1))
    h2 = _sigmoid(pltpu.roll(g2, _LANES - 3 * _HID2, 1)) * jnp.tanh(c2)
    h2 = jnp.where(lane < _HID2, h2, 0.0)

    # Linear(32, 4) + Sigmoid.
    out_ref[...] = _sigmoid(mm(h2, wo_ref[...]) + bo_ref[...])


# ------------------------- init-time weight packing --------------------------

def pack_params(params, batch):
    """Pad / permute / pack every weight once (jit-time constants)."""
    f32 = jnp.float32
    BP = _round_up(batch, 8)
    R1 = _round_up(batch * _H1 * _H1, 128)     # conv1-output rows (padded)
    R2 = _round_up(batch * _H2 * _H2, 128)     # conv2-output rows (padded)

    # conv1 weight: OIHW (16,3,2,2) -> (12,16) matching im2col column order.
    w1 = jnp.zeros((_LANES, _LANES), f32).at[:12, :16].set(
        params["w1"].reshape(16, 12).T.astype(f32))
    b1 = jnp.zeros((1, _LANES), f32).at[0, :16].set(params["b1"].astype(f32))

    # conv2: per-tap 16x16 channel matrices + 0/1 row-gather matrices.
    r2 = jnp.arange(R2)
    b_idx = r2 // (_H2 * _H2)
    s = r2 % (_H2 * _H2)
    y, x = s // _H2, s % _H2
    w2taps, gtaps = [], []
    for dy in range(2):
        for dx in range(2):
            w2taps.append(jnp.zeros((_LANES, _LANES), f32).at[:16, :16].set(
                params["w2"][:, :, dy, dx].T.astype(f32)))
            yy, xx = y + dy - 1, x + dx - 1
            ok = ((r2 < batch * _H2 * _H2) & (yy >= 0) & (yy < _H1)
                  & (xx >= 0) & (xx < _H1))
            src = jnp.where(ok, b_idx * (_H1 * _H1) + yy * _H1 + xx, 0)
            gtaps.append(jax.nn.one_hot(src, R1, dtype=f32)
                         * ok.astype(f32)[:, None])
    w2 = jnp.stack(w2taps)                     # (4, 128, 128)
    g = jnp.stack(gtaps)                       # (4, R2, R1)
    b2 = jnp.zeros((1, _LANES), f32).at[0, :16].set(params["b2"].astype(f32))

    # fc (1600 -> 16): flatten handled on the MXU (spread/mask/bsel) with the
    # weight permuted from NCHW-flatten order to the (spatial, channel) lanes.
    spread = jnp.zeros((_LANES, _NFEAT_P), f32).at[:16, :_NFEAT].set(
        jnp.tile(jnp.eye(16, dtype=f32), (1, _H2 * _H2)))
    rr = jnp.arange(R2)[:, None]
    jj = jnp.arange(_NFEAT_P)[None, :]
    mask = ((rr < batch * _H2 * _H2) & (jj < _NFEAT)
            & ((jj // 16) == (rr % (_H2 * _H2)))).astype(f32)
    wfc3 = params["fc_w"].astype(f32).reshape(16, 16, _H2 * _H2)   # [o, c, s]
    wfc3 = wfc3.transpose(2, 1, 0).reshape(_NFEAT, 16)             # [(s,c), o]
    wfc = jnp.zeros((_NFEAT_P, _LANES), f32).at[:_NFEAT, :16].set(wfc3)
    bfc = jnp.zeros((1, _LANES), f32).at[0, :16].set(params["fc_b"].astype(f32))
    bb = jnp.arange(BP)[:, None]
    rr2 = jnp.arange(R2)[None, :]
    bsel = ((bb < batch) & (rr2 < batch * _H2 * _H2)
            & (rr2 // (_H2 * _H2) == bb)).astype(f32)

    # LSTM cells: gates packed contiguously [i|f|g|o]; recurrent weights are
    # included for layout fidelity but multiply the zero initial hidden state.
    def pack_lstm(wih, whh, bih, bhh, n_in, hid):
        w = jnp.zeros((_LANES, _LANES), f32)
        w = w.at[:n_in, :4 * hid].set(wih.T.astype(f32))
        w = w.at[n_in:n_in + hid, :4 * hid].set(whh.T.astype(f32))
        b = jnp.zeros((1, _LANES), f32).at[0, :4 * hid].set(
            (bih + bhh).astype(f32))
        return w, b

    wl1, bl1 = pack_lstm(params["l1_wih"], params["l1_whh"],
                         params["l1_bih"], params["l1_bhh"], 20, _HID1)
    wl2, bl2 = pack_lstm(params["l2_wih"], params["l2_whh"],
                         params["l2_bih"], params["l2_bhh"], _HID1, _HID2)

    wo = jnp.zeros((_LANES, _LANES), f32).at[:_HID2, :4].set(
        params["out_w"].T.astype(f32))
    bo = jnp.zeros((1, _LANES), f32).at[0, :4].set(params["out_b"].astype(f32))

    return {"w1": w1, "b1": b1, "g": g, "w2": w2, "b2": b2,
            "spread": spread, "mask": mask, "wfc": wfc, "bfc": bfc,
            "bsel": bsel, "wl1": wl1, "bl1": bl1, "wl2": wl2, "bl2": bl2,
            "wo": wo, "bo": bo}


# ------------------------------- host wrapper --------------------------------

def _conv1_patches(image):
    """im2col of the raw image for conv1: (B*81, 12), col = ci*4 + dy*2 + dx."""
    B = image.shape[0]
    xpad = jnp.pad(image.astype(jnp.float32), ((0, 0), (0, 0), (1, 1), (1, 1)))
    cols = [xpad[:, :, dy:dy + _H1, dx:dx + _H1]
            for dy in range(2) for dx in range(2)]
    p = jnp.stack(cols, axis=2)              # (B, 3, 4, 9, 9)
    p = p.transpose(0, 3, 4, 1, 2)           # (B, 9, 9, 3, 4)
    return p.reshape(B * _H1 * _H1, 12)


def _full_spec(shape):
    zeros = (0,) * len(shape)
    return pl.BlockSpec(shape, lambda i, _z=zeros: _z)


@jax.jit
def pallas_forward(packed, image, action):
    f32 = jnp.float32
    B = image.shape[0]
    BP, R2 = packed["bsel"].shape
    R1 = packed["g"].shape[2]

    patches = _conv1_patches(image)
    p1 = jnp.zeros((R1, _LANES), f32).at[:B * _H1 * _H1, :12].set(patches)
    # action pre-placed at lanes 16:20 (right after the 16-dim encoder output).
    act = jnp.zeros((BP, _LANES), f32).at[:B, 16:20].set(action.astype(f32))

    args = (p1, act,
            packed["w1"], packed["b1"],
            packed["g"], packed["w2"], packed["b2"],
            packed["spread"], packed["mask"], packed["wfc"], packed["bfc"],
            packed["bsel"],
            packed["wl1"], packed["bl1"], packed["wl2"], packed["bl2"],
            packed["wo"], packed["bo"])

    out = pl.pallas_call(
        _net_kernel,
        out_shape=jax.ShapeDtypeStruct((BP, _LANES), f32),
        grid=(1,),
        in_specs=[_full_spec(a.shape) for a in args],
        out_specs=_full_spec((BP, _LANES)),
        compiler_params=pltpu.CompilerParams(
            dimension_semantics=("arbitrary",),
            vmem_limit_bytes=32 * 1024 * 1024),
    )(*args)
    return out[:B, :4]


# --------------------------- reference + test harness ------------------------

def init_params(key):
    ks = jax.random.split(key, 16)

    def norm(k, shape, fan_in):
        return jax.random.normal(k, shape, jnp.float32) / jnp.sqrt(float(fan_in))

    return {
        "w1": norm(ks[0], (16, 3, 2, 2), 12), "b1": norm(ks[1], (16,), 12),
        "w2": norm(ks[2], (16, 16, 2, 2), 64), "b2": norm(ks[3], (16,), 64),
        "fc_w": norm(ks[4], (16, 1600), 1600), "fc_b": norm(ks[5], (16,), 1600),
        "l1_wih": norm(ks[6], (4 * 26, 20), 26), "l1_whh": norm(ks[7], (4 * 26, 26), 26),
        "l1_bih": norm(ks[8], (4 * 26,), 26), "l1_bhh": norm(ks[9], (4 * 26,), 26),
        "l2_wih": norm(ks[10], (4 * 32, 26), 32), "l2_whh": norm(ks[11], (4 * 32, 32), 32),
        "l2_bih": norm(ks[12], (4 * 32,), 32), "l2_bhh": norm(ks[13], (4 * 32,), 32),
        "out_w": norm(ks[14], (4, 32), 32), "out_b": norm(ks[15], (4,), 32),
    }


def reference_forward(params, image, action):
    """Pure-JAX reference mirroring the PyTorch forward (f32, HIGHEST precision)."""
    f32 = jnp.float32
    hp = jax.lax.Precision.HIGHEST
    dn = ("NCHW", "OIHW", "NCHW")
    x = image.astype(f32)
    x = jax.lax.conv_general_dilated(x, params["w1"], (1, 1), ((1, 1), (1, 1)),
                                     dimension_numbers=dn, precision=hp)
    x = jax.nn.relu(x + params["b1"][None, :, None, None])
    x = jax.lax.conv_general_dilated(x, params["w2"], (1, 1), ((1, 1), (1, 1)),
                                     dimension_numbers=dn, precision=hp)
    x = jax.nn.relu(x + params["b2"][None, :, None, None])
    x = x.reshape(x.shape[0], -1)
    enc = jax.nn.relu(jnp.dot(x, params["fc_w"].T, precision=hp) + params["fc_b"])
    sa = jnp.concatenate([enc, action.astype(f32)], axis=1)

    def lstm_ref(xin, h, c, wih, whh, bih, bhh):
        gates = (jnp.dot(xin, wih.T, precision=hp) + bih
                 + jnp.dot(h, whh.T, precision=hp) + bhh)
        i, f, g, o = jnp.split(gates, 4, axis=1)
        c_new = jax.nn.sigmoid(f) * c + jax.nn.sigmoid(i) * jnp.tanh(g)
        return jax.nn.sigmoid(o) * jnp.tanh(c_new), c_new

    B = image.shape[0]
    h1, _ = lstm_ref(sa, jnp.zeros((B, 26), f32), jnp.zeros((B, 26), f32),
                     params["l1_wih"], params["l1_whh"],
                     params["l1_bih"], params["l1_bhh"])
    h2, _ = lstm_ref(h1, jnp.zeros((B, 32), f32), jnp.zeros((B, 32), f32),
                     params["l2_wih"], params["l2_whh"],
                     params["l2_bih"], params["l2_bhh"])
    return jax.nn.sigmoid(jnp.dot(h2, params["out_w"].T, precision=hp)
                          + params["out_b"])


if __name__ == "__main__":
    key = jax.random.PRNGKey(0)
    k_param, k_img, k_act = jax.random.split(key, 3)

    params = init_params(k_param)
    # Linear(16*10*10) after two pad-1/k-2 convs implies 8x8 input images.
    image = jax.random.normal(k_img, (2, 3, 8, 8), jnp.float32)
    action = jax.random.uniform(k_act, (2, 4), jnp.float32)

    packed = pack_params(params, image.shape[0])     # one-time weight packing

    out = jax.block_until_ready(pallas_forward(packed, image, action))
    ref = jax.block_until_ready(reference_forward(params, image, action))

    assert out.shape == (2, 4) and out.dtype == jnp.float32
    # Tightened from 5e-2; 2e-3 (instead of 1e-4) leaves headroom for MXU f32
    # pass-decomposition differences between the Pallas and XLA matmul paths
    # while still catching any flatten-order / gate-packing mistake.
    assert jnp.allclose(out, ref, atol=2e-3, rtol=0.0), (out, ref)

    print("KERNEL_OK")
</pallas_src>

<mosaic_0001>
module attributes {stable_mosaic.version = 11 : i64} {
  func.func @_net_kernel(%arg0: i32, %arg1: memref<256x128xf32, #tpu.memory_space<vmem>>, %arg2: memref<8x128xf32, #tpu.memory_space<vmem>>, %arg3: memref<128x128xf32, #tpu.memory_space<vmem>>, %arg4: memref<1x128xf32, #tpu.memory_space<vmem>>, %arg5: memref<4x256x256xf32, #tpu.memory_space<vmem>>, %arg6: memref<4x128x128xf32, #tpu.memory_space<vmem>>, %arg7: memref<1x128xf32, #tpu.memory_space<vmem>>, %arg8: memref<128x1664xf32, #tpu.memory_space<vmem>>, %arg9: memref<256x1664xf32, #tpu.memory_space<vmem>>, %arg10: memref<1664x128xf32, #tpu.memory_space<vmem>>, %arg11: memref<1x128xf32, #tpu.memory_space<vmem>>, %arg12: memref<8x256xf32, #tpu.memory_space<vmem>>, %arg13: memref<128x128xf32, #tpu.memory_space<vmem>>, %arg14: memref<1x128xf32, #tpu.memory_space<vmem>>, %arg15: memref<128x128xf32, #tpu.memory_space<vmem>>, %arg16: memref<1x128xf32, #tpu.memory_space<vmem>>, %arg17: memref<128x128xf32, #tpu.memory_space<vmem>>, %arg18: memref<1x128xf32, #tpu.memory_space<vmem>>, %arg19: memref<8x128xf32, #tpu.memory_space<vmem>>) attributes {dimension_semantics = [#tpu.dimension_semantics<arbitrary>], iteration_bounds = array<i64: 1>, scalar_prefetch = 0 : i64, scratch_operands = 0 : i64, tpu.core_type = #tpu.core_type<tc>, window_params = [{pipeline_mode = #tpu.pipeline_mode<synchronous>, transform_indices = @transform_0, window_bounds = array<i64: 256, 128>}, {pipeline_mode = #tpu.pipeline_mode<synchronous>, transform_indices = @transform_1, window_bounds = array<i64: 8, 128>}, {pipeline_mode = #tpu.pipeline_mode<synchronous>, transform_indices = @transform_2, window_bounds = array<i64: 128, 128>}, {pipeline_mode = #tpu.pipeline_mode<synchronous>, transform_indices = @transform_3, window_bounds = array<i64: 1, 128>}, {pipeline_mode = #tpu.pipeline_mode<synchronous>, transform_indices = @transform_4, window_bounds = array<i64: 4, 256, 256>}, {pipeline_mode = #tpu.pipeline_mode<synchronous>, transform_indices = @transform_5, window_bounds = array<i64: 4, 128, 128>}, {pipeline_mode = #tpu.pipeline_mode<synchronous>, transform_indices = @transform_6, window_bounds = array<i64: 1, 128>}, {pipeline_mode = #tpu.pipeline_mode<synchronous>, transform_indices = @transform_7, window_bounds = array<i64: 128, 1664>}, {pipeline_mode = #tpu.pipeline_mode<synchronous>, transform_indices = @transform_8, window_bounds = array<i64: 256, 1664>}, {pipeline_mode = #tpu.pipeline_mode<synchronous>, transform_indices = @transform_9, window_bounds = array<i64: 1664, 128>}, {pipeline_mode = #tpu.pipeline_mode<synchronous>, transform_indices = @transform_10, window_bounds = array<i64: 1, 128>}, {pipeline_mode = #tpu.pipeline_mode<synchronous>, transform_indices = @transform_11, window_bounds = array<i64: 8, 256>}, {pipeline_mode = #tpu.pipeline_mode<synchronous>, transform_indices = @transform_12, window_bounds = array<i64: 128, 128>}, {pipeline_mode = #tpu.pipeline_mode<synchronous>, transform_indices = @transform_13, window_bounds = array<i64: 1, 128>}, {pipeline_mode = #tpu.pipeline_mode<synchronous>, transform_indices = @transform_14, window_bounds = array<i64: 128, 128>}, {pipeline_mode = #tpu.pipeline_mode<synchronous>, transform_indices = @transform_15, window_bounds = array<i64: 1, 128>}, {pipeline_mode = #tpu.pipeline_mode<synchronous>, transform_indices = @transform_16, window_bounds = array<i64: 128, 128>}, {pipeline_mode = #tpu.pipeline_mode<synchronous>, transform_indices = @transform_17, window_bounds = array<i64: 1, 128>}, {pipeline_mode = #tpu.pipeline_mode<synchronous>, transform_indices = @transform_18, window_bounds = array<i64: 8, 128>}]} {
    %c0 = arith.constant 0 : index
    %c0_0 = arith.constant 0 : index
    %0 = vector.load %arg1[%c0, %c0_0] : memref<256x128xf32, #tpu.memory_space<vmem>>, vector<256x128xf32>
    %c0_1 = arith.constant 0 : index
    %c0_2 = arith.constant 0 : index
    %1 = vector.load %arg3[%c0_1, %c0_2] : memref<128x128xf32, #tpu.memory_space<vmem>>, vector<128x128xf32>
    %cst = arith.constant dense<0.000000e+00> : vector<256x128xf32>
    %2 = tpu.matmul %0, %1, %cst {dimension_numbers = #tpu.dot_dimension_numbers<[1], [0], [0], [1], [0, 0, 1, 1], [], []>} : vector<256x128xf32>, vector<128x128xf32>, vector<256x128xf32> -> vector<256x128xf32>
    %c0_3 = arith.constant 0 : index
    %c0_4 = arith.constant 0 : index
    %3 = vector.load %arg4[%c0_3, %c0_4] : memref<1x128xf32, #tpu.memory_space<vmem>>, vector<1x128xf32>
    %4 = vector.broadcast %3 : vector<1x128xf32> to vector<256x128xf32>
    %5 = arith.addf %2, %4 : vector<256x128xf32>
    %cst_5 = arith.constant 0.000000e+00 : f32
    %6 = vector.broadcast %cst_5 : f32 to vector<256x128xf32>
    %7 = arith.maximumf %5, %6 : vector<256x128xf32>
    %c0_6 = arith.constant 0 : index
    %c0_7 = arith.constant 0 : index
    %c0_8 = arith.constant 0 : index
    %8 = vector.load %arg5[%c0_6, %c0_7, %c0_8] : memref<4x256x256xf32, #tpu.memory_space<vmem>>, vector<1x256x256xf32>
    %9 = vector.shape_cast %8 : vector<1x256x256xf32> to vector<256x256xf32>
    %c0_9 = arith.constant 0 : index
    %c0_10 = arith.constant 0 : index
    %c0_11 = arith.constant 0 : index
    %10 = vector.load %arg6[%c0_9, %c0_10, %c0_11] : memref<4x128x128xf32, #tpu.memory_space<vmem>>, vector<1x128x128xf32>
    %11 = vector.shape_cast %10 : vector<1x128x128xf32> to vector<128x128xf32>
    %cst_12 = arith.constant dense<0.000000e+00> : vector<256x128xf32>
    %12 = tpu.matmul %7, %11, %cst_12 {dimension_numbers = #tpu.dot_dimension_numbers<[1], [0], [0], [1], [0, 0, 1, 1], [], []>} : vector<256x128xf32>, vector<128x128xf32>, vector<256x128xf32> -> vector<256x128xf32>
    %cst_13 = arith.constant dense<0.000000e+00> : vector<256x128xf32>
    %13 = tpu.matmul %9, %12, %cst_13 {dimension_numbers = #tpu.dot_dimension_numbers<[1], [0], [0], [1], [0, 0, 1, 1], [], []>} : vector<256x256xf32>, vector<256x128xf32>, vector<256x128xf32> -> vector<256x128xf32>
    %c1 = arith.constant 1 : index
    %c0_14 = arith.constant 0 : index
    %c0_15 = arith.constant 0 : index
    %14 = vector.load %arg5[%c1, %c0_14, %c0_15] : memref<4x256x256xf32, #tpu.memory_space<vmem>>, vector<1x256x256xf32>
    %15 = vector.shape_cast %14 : vector<1x256x256xf32> to vector<256x256xf32>
    %c1_16 = arith.constant 1 : index
    %c0_17 = arith.constant 0 : index
    %c0_18 = arith.constant 0 : index
    %16 = vector.load %arg6[%c1_16, %c0_17, %c0_18] : memref<4x128x128xf32, #tpu.memory_space<vmem>>, vector<1x128x128xf32>
    %17 = vector.shape_cast %16 : vector<1x128x128xf32> to vector<128x128xf32>
    %cst_19 = arith.constant dense<0.000000e+00> : vector<256x128xf32>
    %18 = tpu.matmul %7, %17, %cst_19 {dimension_numbers = #tpu.dot_dimension_numbers<[1], [0], [0], [1], [0, 0, 1, 1], [], []>} : vector<256x128xf32>, vector<128x128xf32>, vector<256x128xf32> -> vector<256x128xf32>
    %cst_20 = arith.constant dense<0.000000e+00> : vector<256x128xf32>
    %19 = tpu.matmul %15, %18, %cst_20 {dimension_numbers = #tpu.dot_dimension_numbers<[1], [0], [0], [1], [0, 0, 1, 1], [], []>} : vector<256x256xf32>, vector<256x128xf32>, vector<256x128xf32> -> vector<256x128xf32>
    %20 = arith.addf %13, %19 : vector<256x128xf32>
    %c2 = arith.constant 2 : index
    %c0_21 = arith.constant 0 : index
    %c0_22 = arith.constant 0 : index
    %21 = vector.load %arg5[%c2, %c0_21, %c0_22] : memref<4x256x256xf32, #tpu.memory_space<vmem>>, vector<1x256x256xf32>
    %22 = vector.shape_cast %21 : vector<1x256x256xf32> to vector<256x256xf32>
    %c2_23 = arith.constant 2 : index
    %c0_24 = arith.constant 0 : index
    %c0_25 = arith.constant 0 : index
    %23 = vector.load %arg6[%c2_23, %c0_24, %c0_25] : memref<4x128x128xf32, #tpu.memory_space<vmem>>, vector<1x128x128xf32>
    %24 = vector.shape_cast %23 : vector<1x128x128xf32> to vector<128x128xf32>
    %cst_26 = arith.constant dense<0.000000e+00> : vector<256x128xf32>
    %25 = tpu.matmul %7, %24, %cst_26 {dimension_numbers = #tpu.dot_dimension_numbers<[1], [0], [0], [1], [0, 0, 1, 1], [], []>} : vector<256x128xf32>, vector<128x128xf32>, vector<256x128xf32> -> vector<256x128xf32>
    %cst_27 = arith.constant dense<0.000000e+00> : vector<256x128xf32>
    %26 = tpu.matmul %22, %25, %cst_27 {dimension_numbers = #tpu.dot_dimension_numbers<[1], [0], [0], [1], [0, 0, 1, 1], [], []>} : vector<256x256xf32>, vector<256x128xf32>, vector<256x128xf32> -> vector<256x128xf32>
    %27 = arith.addf %20, %26 : vector<256x128xf32>
    %c3 = arith.constant 3 : index
    %c0_28 = arith.constant 0 : index
    %c0_29 = arith.constant 0 : index
    %28 = vector.load %arg5[%c3, %c0_28, %c0_29] : memref<4x256x256xf32, #tpu.memory_space<vmem>>, vector<1x256x256xf32>
    %29 = vector.shape_cast %28 : vector<1x256x256xf32> to vector<256x256xf32>
    %c3_30 = arith.constant 3 : index
    %c0_31 = arith.constant 0 : index
    %c0_32 = arith.constant 0 : index
    %30 = vector.load %arg6[%c3_30, %c0_31, %c0_32] : memref<4x128x128xf32, #tpu.memory_space<vmem>>, vector<1x128x128xf32>
    %31 = vector.shape_cast %30 : vector<1x128x128xf32> to vector<128x128xf32>
    %cst_33 = arith.constant dense<0.000000e+00> : vector<256x128xf32>
    %32 = tpu.matmul %7, %31, %cst_33 {dimension_numbers = #tpu.dot_dimension_numbers<[1], [0], [0], [1], [0, 0, 1, 1], [], []>} : vector<256x128xf32>, vector<128x128xf32>, vector<256x128xf32> -> vector<256x128xf32>
    %cst_34 = arith.constant dense<0.000000e+00> : vector<256x128xf32>
    %33 = tpu.matmul %29, %32, %cst_34 {dimension_numbers = #tpu.dot_dimension_numbers<[1], [0], [0], [1], [0, 0, 1, 1], [], []>} : vector<256x256xf32>, vector<256x128xf32>, vector<256x128xf32> -> vector<256x128xf32>
    %34 = arith.addf %27, %33 : vector<256x128xf32>
    %c0_35 = arith.constant 0 : index
    %c0_36 = arith.constant 0 : index
    %35 = vector.load %arg7[%c0_35, %c0_36] : memref<1x128xf32, #tpu.memory_space<vmem>>, vector<1x128xf32>
    %36 = vector.broadcast %35 : vector<1x128xf32> to vector<256x128xf32>
    %37 = arith.addf %34, %36 : vector<256x128xf32>
    %cst_37 = arith.constant 0.000000e+00 : f32
    %38 = vector.broadcast %cst_37 : f32 to vector<256x128xf32>
    %39 = arith.maximumf %37, %38 : vector<256x128xf32>
    %c0_38 = arith.constant 0 : index
    %c0_39 = arith.constant 0 : index
    %40 = vector.load %arg8[%c0_38, %c0_39] : memref<128x1664xf32, #tpu.memory_space<vmem>>, vector<128x1664xf32>
    %cst_40 = arith.constant dense<0.000000e+00> : vector<256x1664xf32>
    %41 = tpu.matmul %39, %40, %cst_40 {dimension_numbers = #tpu.dot_dimension_numbers<[1], [0], [0], [1], [0, 0, 1, 1], [], []>} : vector<256x128xf32>, vector<128x1664xf32>, vector<256x1664xf32> -> vector<256x1664xf32>
    %c0_41 = arith.constant 0 : index
    %c0_42 = arith.constant 0 : index
    %42 = vector.load %arg9[%c0_41, %c0_42] : memref<256x1664xf32, #tpu.memory_space<vmem>>, vector<256x1664xf32>
    %43 = arith.mulf %41, %42 : vector<256x1664xf32>
    %c0_43 = arith.constant 0 : index
    %c0_44 = arith.constant 0 : index
    %44 = vector.load %arg10[%c0_43, %c0_44] : memref<1664x128xf32, #tpu.memory_space<vmem>>, vector<1664x128xf32>
    %cst_45 = arith.constant dense<0.000000e+00> : vector<256x128xf32>
    %45 = tpu.matmul %43, %44, %cst_45 {dimension_numbers = #tpu.dot_dimension_numbers<[1], [0], [0], [1], [0, 0, 1, 1], [], []>} : vector<256x1664xf32>, vector<1664x128xf32>, vector<256x128xf32> -> vector<256x128xf32>
    %c0_46 = arith.constant 0 : index
    %c0_47 = arith.constant 0 : index
    %46 = vector.load %arg12[%c0_46, %c0_47] : memref<8x256xf32, #tpu.memory_space<vmem>>, vector<8x256xf32>
    %cst_48 = arith.constant dense<0.000000e+00> : vector<8x128xf32>
    %47 = tpu.matmul %46, %45, %cst_48 {dimension_numbers = #tpu.dot_dimension_numbers<[1], [0], [0], [1], [0, 0, 1, 1], [], []>} : vector<8x256xf32>, vector<256x128xf32>, vector<8x128xf32> -> vector<8x128xf32>
    %c0_49 = arith.constant 0 : index
    %c0_50 = arith.constant 0 : index
    %48 = vector.load %arg11[%c0_49, %c0_50] : memref<1x128xf32, #tpu.memory_space<vmem>>, vector<1x128xf32>
    %49 = vector.broadcast %48 : vector<1x128xf32> to vector<8x128xf32>
    %50 = arith.addf %47, %49 : vector<8x128xf32>
    %cst_51 = arith.constant 0.000000e+00 : f32
    %51 = vector.broadcast %cst_51 : f32 to vector<8x128xf32>
    %52 = arith.maximumf %50, %51 : vector<8x128xf32>
    %c0_52 = arith.constant 0 : index
    %c0_53 = arith.constant 0 : index
    %53 = vector.load %arg2[%c0_52, %c0_53] : memref<8x128xf32, #tpu.memory_space<vmem>>, vector<8x128xf32>
    %54 = arith.addf %52, %53 : vector<8x128xf32>
    %55 = tpu.iota {dimensions = array<i32: 1>} : vector<8x128xi32>
    %c0_54 = arith.constant 0 : index
    %c0_55 = arith.constant 0 : index
    %56 = vector.load %arg13[%c0_54, %c0_55] : memref<128x128xf32, #tpu.memory_space<vmem>>, vector<128x128xf32>
    %cst_56 = arith.constant dense<0.000000e+00> : vector<8x128xf32>
    %57 = tpu.matmul %54, %56, %cst_56 {dimension_numbers = #tpu.dot_dimension_numbers<[1], [0], [0], [1], [0, 0, 1, 1], [], []>} : vector<8x128xf32>, vector<128x128xf32>, vector<8x128xf32> -> vector<8x128xf32>
    %c0_57 = arith.constant 0 : index
    %c0_58 = arith.constant 0 : index
    %58 = vector.load %arg14[%c0_57, %c0_58] : memref<1x128xf32, #tpu.memory_space<vmem>>, vector<1x128xf32>
    %59 = vector.broadcast %58 : vector<1x128xf32> to vector<8x128xf32>
    %60 = arith.addf %57, %59 : vector<8x128xf32>
    %cst_59 = arith.constant 0.000000e+00 : f32
    %61 = vector.broadcast %cst_59 : f32 to vector<8x128xf32>
    %62 = arith.subf %61, %60 : vector<8x128xf32>
    %63 = math.exp %62 : vector<8x128xf32>
    %cst_60 = arith.constant 1.000000e+00 : f32
    %64 = vector.broadcast %cst_60 : f32 to vector<8x128xf32>
    %65 = arith.addf %64, %63 : vector<8x128xf32>
    %66 = tpu.reciprocal %65 : vector<8x128xf32> -> vector<8x128xf32>
    %c76_i32 = arith.constant 76 : i32
    %67 = tpu.dynamic_rotate %60 by %c76_i32 dim 1 : vector<8x128xf32>, i32 -> vector<8x128xf32>
    %68 = math.tanh %67 : vector<8x128xf32>
    %69 = arith.mulf %66, %68 : vector<8x128xf32>
    %c50_i32 = arith.constant 50 : i32
    %70 = tpu.dynamic_rotate %60 by %c50_i32 dim 1 : vector<8x128xf32>, i32 -> vector<8x128xf32>
    %cst_61 = arith.constant 0.000000e+00 : f32
    %71 = vector.broadcast %cst_61 : f32 to vector<8x128xf32>
    %72 = arith.subf %71, %70 : vector<8x128xf32>
    %73 = math.exp %72 : vector<8x128xf32>
    %cst_62 = arith.constant 1.000000e+00 : f32
    %74 = vector.broadcast %cst_62 : f32 to vector<8x128xf32>
    %75 = arith.addf %74, %73 : vector<8x128xf32>
    %76 = tpu.reciprocal %75 : vector<8x128xf32> -> vector<8x128xf32>
    %77 = math.tanh %69 : vector<8x128xf32>
    %78 = arith.mulf %76, %77 : vector<8x128xf32>
    %c26_i32 = arith.constant 26 : i32
    %79 = vector.broadcast %c26_i32 : i32 to vector<8x128xi32>
    %80 = arith.cmpi slt, %55, %79 : vector<8x128xi32>
    %cst_63 = arith.constant 0.000000e+00 : f32
    %81 = vector.broadcast %cst_63 : f32 to vector<8x128xf32>
    %82 = arith.select %80, %78, %81 : vector<8x128xi1>, vector<8x128xf32>
    %c0_64 = arith.constant 0 : index
    %c0_65 = arith.constant 0 : index
    %83 = vector.load %arg15[%c0_64, %c0_65] : memref<128x128xf32, #tpu.memory_space<vmem>>, vector<128x128xf32>
    %cst_66 = arith.constant dense<0.000000e+00> : vector<8x128xf32>
    %84 = tpu.matmul %82, %83, %cst_66 {dimension_numbers = #tpu.dot_dimension_numbers<[1], [0], [0], [1], [0, 0, 1, 1], [], []>} : vector<8x128xf32>, vector<128x128xf32>, vector<8x128xf32> -> vector<8x128xf32>
    %c0_67 = arith.constant 0 : index
    %c0_68 = arith.constant 0 : index
    %85 = vector.load %arg16[%c0_67, %c0_68] : memref<1x128xf32, #tpu.memory_space<vmem>>, vector<1x128xf32>
    %86 = vector.broadcast %85 : vector<1x128xf32> to vector<8x128xf32>
    %87 = arith.addf %84, %86 : vector<8x128xf32>
    %cst_69 = arith.constant 0.000000e+00 : f32
    %88 = vector.broadcast %cst_69 : f32 to vector<8x128xf32>
    %89 = arith.subf %88, %87 : vector<8x128xf32>
    %90 = math.exp %89 : vector<8x128xf32>
    %cst_70 = arith.constant 1.000000e+00 : f32
    %91 = vector.broadcast %cst_70 : f32 to vector<8x128xf32>
    %92 = arith.addf %91, %90 : vector<8x128xf32>
    %93 = tpu.reciprocal %92 : vector<8x128xf32> -> vector<8x128xf32>
    %c64_i32 = arith.constant 64 : i32
    %94 = tpu.dynamic_rotate %87 by %c64_i32 dim 1 : vector<8x128xf32>, i32 -> vector<8x128xf32>
    %95 = math.tanh %94 : vector<8x128xf32>
    %96 = arith.mulf %93, %95 : vector<8x128xf32>
    %c32_i32 = arith.constant 32 : i32
    %97 = tpu.dynamic_rotate %87 by %c32_i32 dim 1 : vector<8x128xf32>, i32 -> vector<8x128xf32>
    %cst_71 = arith.constant 0.000000e+00 : f32
    %98 = vector.broadcast %cst_71 : f32 to vector<8x128xf32>
    %99 = arith.subf %98, %97 : vector<8x128xf32>
    %100 = math.exp %99 : vector<8x128xf32>
    %cst_72 = arith.constant 1.000000e+00 : f32
    %101 = vector.broadcast %cst_72 : f32 to vector<8x128xf32>
    %102 = arith.addf %101, %100 : vector<8x128xf32>
    %103 = tpu.reciprocal %102 : vector<8x128xf32> -> vector<8x128xf32>
    %104 = math.tanh %96 : vector<8x128xf32>
    %105 = arith.mulf %103, %104 : vector<8x128xf32>
    %c32_i32_73 = arith.constant 32 : i32
    %106 = vector.broadcast %c32_i32_73 : i32 to vector<8x128xi32>
    %107 = arith.cmpi slt, %55, %106 : vector<8x128xi32>
    %cst_74 = arith.constant 0.000000e+00 : f32
    %108 = vector.broadcast %cst_74 : f32 to vector<8x128xf32>
    %109 = arith.select %107, %105, %108 : vector<8x128xi1>, vector<8x128xf32>
    %c0_75 = arith.constant 0 : index
    %c0_76 = arith.constant 0 : index
    %110 = vector.load %arg17[%c0_75, %c0_76] : memref<128x128xf32, #tpu.memory_space<vmem>>, vector<128x128xf32>
    %cst_77 = arith.constant dense<0.000000e+00> : vector<8x128xf32>
    %111 = tpu.matmul %109, %110, %cst_77 {dimension_numbers = #tpu.dot_dimension_numbers<[1], [0], [0], [1], [0, 0, 1, 1], [], []>} : vector<8x128xf32>, vector<128x128xf32>, vector<8x128xf32> -> vector<8x128xf32>
    %c0_78 = arith.constant 0 : index
    %c0_79 = arith.constant 0 : index
    %112 = vector.load %arg18[%c0_78, %c0_79] : memref<1x128xf32, #tpu.memory_space<vmem>>, vector<1x128xf32>
    %113 = vector.broadcast %112 : vector<1x128xf32> to vector<8x128xf32>
    %114 = arith.addf %111, %113 : vector<8x128xf32>
    %cst_80 = arith.constant 0.000000e+00 : f32
    %115 = vector.broadcast %cst_80 : f32 to vector<8x128xf32>
    %116 = arith.subf %115, %114 : vector<8x128xf32>
    %117 = math.exp %116 : vector<8x128xf32>
    %cst_81 = arith.constant 1.000000e+00 : f32
    %118 = vector.broadcast %cst_81 : f32 to vector<8x128xf32>
    %119 = arith.addf %118, %117 : vector<8x128xf32>
    %120 = tpu.reciprocal %119 : vector<8x128xf32> -> vector<8x128xf32>
    %c0_82 = arith.constant 0 : index
    %c0_83 = arith.constant 0 : index
    %121 = vector.load %arg19[%c0_82, %c0_83] : memref<8x128xf32, #tpu.memory_space<vmem>>, vector<8x128xf32>
    tpu.vector_store %arg19[%c0_82, %c0_83], %120 {strides = array<i32>} : memref<8x128xf32, #tpu.memory_space<vmem>>, vector<8x128xf32>,
    return
  }
  func.func @transform_0(%arg0: i32) -> (i32, i32) {
    %c0_i32 = arith.constant 0 : i32
    %c0_i32_0 = arith.constant 0 : i32
    %c0_i32_1 = arith.constant 0 : i32
    return %c0_i32, %c0_i32_0 : i32, i32
  }
  func.func @transform_1(%arg0: i32) -> (i32, i32) {
    %c0_i32 = arith.constant 0 : i32
    %c0_i32_0 = arith.constant 0 : i32
    %c0_i32_1 = arith.constant 0 : i32
    return %c0_i32, %c0_i32_0 : i32, i32
  }
  func.func @transform_2(%arg0: i32) -> (i32, i32) {
    %c0_i32 = arith.constant 0 : i32
    %c0_i32_0 = arith.constant 0 : i32
    %c0_i32_1 = arith.constant 0 : i32
    return %c0_i32, %c0_i32_0 : i32, i32
  }
  func.func @transform_3(%arg0: i32) -> (i32, i32) {
    %c0_i32 = arith.constant 0 : i32
    %c0_i32_0 = arith.constant 0 : i32
    %c0_i32_1 = arith.constant 0 : i32
    return %c0_i32, %c0_i32_0 : i32, i32
  }
  func.func @transform_4(%arg0: i32) -> (i32, i32, i32) {
    %c0_i32 = arith.constant 0 : i32
    %c0_i32_0 = arith.constant 0 : i32
    %c0_i32_1 = arith.constant 0 : i32
    %c0_i32_2 = arith.constant 0 : i32
    return %c0_i32, %c0_i32_0, %c0_i32_1 : i32, i32, i32
  }
  func.func @transform_5(%arg0: i32) -> (i32, i32, i32) {
    %c0_i32 = arith.constant 0 : i32
    %c0_i32_0 = arith.constant 0 : i32
    %c0_i32_1 = arith.constant 0 : i32
    %c0_i32_2 = arith.constant 0 : i32
    return %c0_i32, %c0_i32_0, %c0_i32_1 : i32, i32, i32
  }
  func.func @transform_6(%arg0: i32) -> (i32, i32) {
    %c0_i32 = arith.constant 0 : i32
    %c0_i32_0 = arith.constant 0 : i32
    %c0_i32_1 = arith.constant 0 : i32
    return %c0_i32, %c0_i32_0 : i32, i32
  }
  func.func @transform_7(%arg0: i32) -> (i32, i32) {
    %c0_i32 = arith.constant 0 : i32
    %c0_i32_0 = arith.constant 0 : i32
    %c0_i32_1 = arith.constant 0 : i32
    return %c0_i32, %c0_i32_0 : i32, i32
  }
  func.func @transform_8(%arg0: i32) -> (i32, i32) {
    %c0_i32 = arith.constant 0 : i32
    %c0_i32_0 = arith.constant 0 : i32
    %c0_i32_1 = arith.constant 0 : i32
    return %c0_i32, %c0_i32_0 : i32, i32
  }
  func.func @transform_9(%arg0: i32) -> (i32, i32) {
    %c0_i32 = arith.constant 0 : i32
    %c0_i32_0 = arith.constant 0 : i32
    %c0_i32_1 = arith.constant 0 : i32
    return %c0_i32, %c0_i32_0 : i32, i32
  }
  func.func @transform_10(%arg0: i32) -> (i32, i32) {
    %c0_i32 = arith.constant 0 : i32
    %c0_i32_0 = arith.constant 0 : i32
    %c0_i32_1 = arith.constant 0 : i32
    return %c0_i32, %c0_i32_0 : i32, i32
  }
  func.func @transform_11(%arg0: i32) -> (i32, i32) {
    %c0_i32 = arith.constant 0 : i32
    %c0_i32_0 = arith.constant 0 : i32
    %c0_i32_1 = arith.constant 0 : i32
    return %c0_i32, %c0_i32_0 : i32, i32
  }
  func.func @transform_12(%arg0: i32) -> (i32, i32) {
    %c0_i32 = arith.constant 0 : i32
    %c0_i32_0 = arith.constant 0 : i32
    %c0_i32_1 = arith.constant 0 : i32
    return %c0_i32, %c0_i32_0 : i32, i32
  }
  func.func @transform_13(%arg0: i32) -> (i32, i32) {
    %c0_i32 = arith.constant 0 : i32
    %c0_i32_0 = arith.constant 0 : i32
    %c0_i32_1 = arith.constant 0 : i32
    return %c0_i32, %c0_i32_0 : i32, i32
  }
  func.func @transform_14(%arg0: i32) -> (i32, i32) {
    %c0_i32 = arith.constant 0 : i32
    %c0_i32_0 = arith.constant 0 : i32
    %c0_i32_1 = arith.constant 0 : i32
    return %c0_i32, %c0_i32_0 : i32, i32
  }
  func.func @transform_15(%arg0: i32) -> (i32, i32) {
    %c0_i32 = arith.constant 0 : i32
    %c0_i32_0 = arith.constant 0 : i32
    %c0_i32_1 = arith.constant 0 : i32
    return %c0_i32, %c0_i32_0 : i32, i32
  }
  func.func @transform_16(%arg0: i32) -> (i32, i32) {
    %c0_i32 = arith.constant 0 : i32
    %c0_i32_0 = arith.constant 0 : i32
    %c0_i32_1 = arith.constant 0 : i32
    return %c0_i32, %c0_i32_0 : i32, i32
  }
  func.func @transform_17(%arg0: i32) -> (i32, i32) {
    %c0_i32 = arith.constant 0 : i32
    %c0_i32_0 = arith.constant 0 : i32
    %c0_i32_1 = arith.constant 0 : i32
    return %c0_i32, %c0_i32_0 : i32, i32
  }
  func.func @transform_18(%arg0: i32) -> (i32, i32) {
    %c0_i32 = arith.constant 0 : i32
    %c0_i32_0 = arith.constant 0 : i32
    %c0_i32_1 = arith.constant 0 : i32
    return %c0_i32, %c0_i32_0 : i32, i32
  }
}

</mosaic_0001>

<bundles_post_ra>
// kernel: pallas_forward.1
= control target key start
LH: loop header
LB: loop body
LE: loop exit
PB: predicated region body
PF: predicated region fallthrough
CT: control target
= control target key end

     0   :  { %s11001_s0 = inlined_call_operand.vmem [shape: f32[256,128], index: 0, kind: input, shape index: {}]   ;;  %s11002_s1 = inlined_call_operand.vmem [shape: f32[8,128], index: 1, kind: input, shape index: {}]   ;;  %s11003_s2 = inlined_call_operand.hbm [shape: f32[128,128], index: 2, kind: input, shape index: {}]   ;;  %s11004_s3 = inlined_call_operand.hbm [shape: f32[1,128], index: 3, kind: input, shape index: {}]   ;;  %s11005_s4 = inlined_call_operand.hbm [shape: f32[4,256,256], index: 4, kind: input, shape index: {}]   ;;  %s11006_s5 = inlined_call_operand.hbm [shape: f32[4,128,128], index: 5, kind: input, shape index: {}]   ;;  %s11007_s6 = inlined_call_operand.hbm [shape: f32[1,128], index: 6, kind: input, shape index: {}]   ;;  %s11008_s7 = inlined_call_operand.hbm [shape: f32[128,1664], index: 7, kind: input, shape index: {}]   ;;  %s11009_s8 = inlined_call_operand.hbm [shape: f32[256,1664], index: 8, kind: input, shape index: {}]   ;;  %s11010_s9 = inlined_call_operand.hbm [shape: f32[1664,128], index: 9, kind: input, shape index: {}]   ;;  %s11011_s10 = inlined_call_operand.hbm [shape: f32[1,128], index: 10, kind: input, shape index: {}]   ;;  %s11012_s11 = inlined_call_operand.hbm [shape: f32[8,256], index: 11, kind: input, shape index: {}]   ;;  %s11013_s12 = inlined_call_operand.hbm [shape: f32[128,128], index: 12, kind: input, shape index: {}]   ;;  %s11014_s13 = inlined_call_operand.hbm [shape: f32[1,128], index: 13, kind: input, shape index: {}]   ;;  %s11015_s14 = inlined_call_operand.hbm [shape: f32[128,128], index: 14, kind: input, shape index: {}]   ;;  %s11016_s15 = inlined_call_operand.hbm [shape: f32[1,128], index: 15, kind: input, shape index: {}]   ;;  %s11017_s16 = inlined_call_operand.hbm [shape: f32[128,128], index: 16, kind: input, shape index: {}]   ;;  %s11018_s17 = inlined_call_operand.hbm [shape: f32[1,128], index: 17, kind: input, shape index: {}]   ;;  %s11019_s18 = inlined_call_operand.vmem [shape: f32[8,128], index: 18, kind: output, shape index: {}]  }
   0x1   :  { %11033 = sst [smem:[#allocation373_spill]] %s11001_s0 }
   0x2   :  { %11034 = sst [smem:[#allocation374_spill]] %s11002_s1 }
   0x3   :  { %11035 = sst [smem:[#allocation375_spill]] %s11003_s2 }
   0x4   :  { %23 = vsyncpa [#allocation3], 0 }
   0x5   :  { %24 = vsyncpa [#allocation5], 0 }
   0x6   :  { %25 = vsyncpa [#allocation8], 0 }
   0x7   :  { %26 = vsyncpa [#allocation11], 0 }
   0x8   :  { %27 = vsyncpa [#allocation14], 0 }
   0x9   :  { %28 = vsyncpa [#allocation17], 0 }
   0xa   :  { %29 = vsyncpa [#allocation20], 0 }
   0xb   :  { %30 = vsyncpa [#allocation23], 0  ;;  %s54_s29 = sshll.u32 %s11004_s3, 4  ;;  %s55_s29 = int_to_ptr.hbm [resolvable:$true] %s54_s29 }
   0xc   :  { %31 = vsyncpa [#allocation26], 0  ;;  %s7251_s30 = smov [#allocation4]   ;;  %s77_s20 = sshll.u32 %s11006_s5, 4  ;;  %s78_s20 = int_to_ptr.hbm [resolvable:$true] %s77_s20 }
   0xd   :  { %s56_s0 = sshll.u32 %s7251_s30, 4  ;;  %s7252_s21 = smov [#allocation7]   ;;  %s57_s0 = int_to_ptr.vmem [resolvable:$true] %s56_s0 }
   0xe   :  { %59 = dma.hbm_to_vmem [thread:$0]  %s55_s29, 16, %s57_s0, [#allocation5]  }
   0xf   :  { %s79_s22 = sshll.u32 %s7252_s21, 4  ;;  %s101_s24 = sshll.u32 %s11008_s7, 4  ;;  %s80_s22 = int_to_ptr.vmem [resolvable:$true] %s79_s22  ;;  %s102_s24 = int_to_ptr.hbm [resolvable:$true] %s101_s24 }
  0x10   :  { %s7253_s3 = smov 128   ;;  %s7254_s25 = smov 8  }
  0x11   :  { %85 = dma.hbm_to_vmem [thread:$0]  %s78_s20, 8192, %s80_s22, [#allocation8], %s7253_s3, %s7253_s3, %s7254_s25  }
  0x12   :  { %s7255_s26 = smov [#allocation10]   ;;  %s127_s29 = sshll.u32 %s11010_s9, 4  ;;  %s128_s29 = int_to_ptr.hbm [resolvable:$true] %s127_s29 }
  0x13   :  { %s103_s27 = sshll.u32 %s7255_s26, 4  ;;  %s7256_s30 = smov 1664   ;;  %s104_s27 = int_to_ptr.vmem [resolvable:$true] %s103_s27 }
  0x14   :  { %s7257_s0 = smov 104   ;;  %s7258_s7 = smov [#allocation13]  }
  0x15   :  { %109 = dma.hbm_to_vmem [thread:$0]  %s102_s24, 26624, %s104_s27, [#allocation11], %s7256_s30, %s7256_s30, %s7257_s0  }
  0x16   :  { %s129_s19 = sshll.u32 %s7258_s7, 4  ;;  %s152_s20 = sshll.u32 %s11012_s11, 4  ;;  %s130_s19 = int_to_ptr.vmem [resolvable:$true] %s129_s19  ;;  %s153_s20 = int_to_ptr.hbm [resolvable:$true] %s152_s20 }
  0x17   :  { %135 = dma.hbm_to_vmem [thread:$0]  %s128_s29, 26624, %s130_s19, [#allocation14], %s7253_s3, %s7253_s3, %s7254_s25  }
  0x18   :  { %s176_s2 = sshll.u32 %s11014_s13, 4  ;;  %s7259_s23 = smov [#allocation16]   ;;  %s177_s2 = int_to_ptr.hbm [resolvable:$true] %s176_s2 }
  0x19   :  { %s154_s26 = sshll.u32 %s7259_s23, 4  ;;  %s7260_s24 = smov [#allocation19]   ;;  %s155_s26 = int_to_ptr.vmem [resolvable:$true] %s154_s26 }
  0x1a   :  { %157 = dma.hbm_to_vmem [thread:$0]  %s153_s20, 256, %s155_s26, [#allocation17]  }
  0x1b   :  { %s178_s27 = sshll.u32 %s7260_s24, 4  ;;  %s200_s11 = sshll.u32 %s11016_s15, 4  ;;  %s179_s27 = int_to_ptr.vmem [resolvable:$true] %s178_s27  ;;  %s201_s11 = int_to_ptr.hbm [resolvable:$true] %s200_s11 }
  0x1c   :  { %181 = dma.hbm_to_vmem [thread:$0]  %s177_s2, 16, %s179_s27, [#allocation20]  }
  0x1d   :  { %s11036_s19 = sld [smem:[#allocation375_spill]]  ;;  %s7261_s21 = smov [#allocation22]  }
  0x1e   :  { %s202_s13 = sshll.u32 %s7261_s21, 4  ;;  %s7262_s9 = smov [#allocation2]   ;;  %s203_s13 = int_to_ptr.vmem [resolvable:$true] %s202_s13 }
  0x1f   :  { %205 = dma.hbm_to_vmem [thread:$0]  %s201_s11, 16, %s203_s13, [#allocation23]  }
  0x20   :  { %s42_s20 = sshll.u32 %s7262_s9, 4  ;;  %s64_s26 = sshll.u32 %s11005_s4, 4  ;;  %s43_s20 = int_to_ptr.vmem [resolvable:$true] %s42_s20  ;;  %s65_s26 = int_to_ptr.hbm [resolvable:$true] %s64_s26 }
  0x21   :  { %s7263_s15 = smov [#allocation6]   ;;  %s91_s28 = sshll.u32 %s11007_s6, 4  ;;  %s92_s28 = int_to_ptr.hbm [resolvable:$true] %s91_s28 }
  0x22   :  { %s66_s2 = sshll.u32 %s7263_s15, 4  ;;  %s7264_s5 = smov 256   ;;  %s67_s2 = int_to_ptr.vmem [resolvable:$true] %s66_s2 }
  0x23   :  { %s40_s1 = sshll.u32 %s11036_s19, 4  ;;  %s7265_s11 = smov 16   ;;  %s41_s1 = int_to_ptr.hbm [resolvable:$true] %s40_s1 }
  0x24   :  { %48 = dma.hbm_to_vmem [thread:$0]  %s41_s1, 2048, %s43_s20, [#allocation3], %s7253_s3, %s7253_s3, %s7254_s25  }
  0x25   :  { %72 = dma.hbm_to_vmem [thread:$0]  %s65_s26, 32768, %s67_s2, [#allocation5], %s7264_s5, %s7264_s5, %s7265_s11  }
  0x26   :  { %s7266_s7 = smov [#allocation9]   ;;  %s114_s21 = sshll.u32 %s11009_s8, 4  ;;  %s115_s21 = int_to_ptr.hbm [resolvable:$true] %s114_s21 }
  0x27   :  { %s93_s29 = sshll.u32 %s7266_s7, 4  ;;  %s141_s9 = sshll.u32 %s11011_s10, 4  ;;  %s94_s29 = int_to_ptr.vmem [resolvable:$true] %s93_s29  ;;  %s142_s9 = int_to_ptr.hbm [resolvable:$true] %s141_s9 }
  0x28   :  { %96 = dma.hbm_to_vmem [thread:$0]  %s92_s28, 16, %s94_s29, [#allocation8]  }
  0x29   :  { %s7267_s20 = smov [#allocation12]   ;;  %s7268_s6 = smov [#allocation15]  }
  0x2a   :  { %s116_s22 = sshll.u32 %s7267_s20, 4  ;;  %s143_s23 = sshll.u32 %s7268_s6, 4  ;;  %s117_s22 = int_to_ptr.vmem [resolvable:$true] %s116_s22  ;;  %s144_s23 = int_to_ptr.vmem [resolvable:$true] %s143_s23 }
  0x2b   :  { %122 = dma.hbm_to_vmem [thread:$0]  %s115_s21, 53248, %s117_s22, [#allocation11], %s7256_s30, %s7256_s30, %s7257_s0  }
  0x2c   :  { %s162_s8 = sshll.u32 %s11013_s12, 4  ;;  %s186_s10 = sshll.u32 %s11015_s14, 4  ;;  %s163_s8 = int_to_ptr.hbm [resolvable:$true] %s162_s8  ;;  %s187_s10 = int_to_ptr.hbm [resolvable:$true] %s186_s10 }
  0x2d   :  { %146 = dma.hbm_to_vmem [thread:$0]  %s142_s9, 16, %s144_s23, [#allocation14]  }
  0x2e   :  { %s7269_s27 = smov [#allocation18]   ;;  %s7270_s30 = smov [#allocation21]  }
  0x2f   :  { %s164_s28 = sshll.u32 %s7269_s27, 4  ;;  %s188_s0 = sshll.u32 %s7270_s30, 4  ;;  %s165_s28 = int_to_ptr.vmem [resolvable:$true] %s164_s28  ;;  %s189_s0 = int_to_ptr.vmem [resolvable:$true] %s188_s0 }
  0x30   :  { %170 = dma.hbm_to_vmem [thread:$0]  %s163_s8, 2048, %s165_s28, [#allocation17], %s7253_s3, %s7253_s3, %s7254_s25  }
  0x31   :  { %s210_s12 = sshll.u32 %s11017_s16, 4  ;;  %s224_s29 = sshll.u32 %s11018_s17, 4  ;;  %s211_s12 = int_to_ptr.hbm [resolvable:$true] %s210_s12  ;;  %s225_s29 = int_to_ptr.hbm [resolvable:$true] %s224_s29 }
  0x32   :  { %194 = dma.hbm_to_vmem [thread:$0]  %s187_s10, 2048, %s189_s0, [#allocation20], %s7253_s3, %s7253_s3, %s7254_s25  }
  0x33   :  { %s7271_s4 = smov [#allocation24]   ;;  %s7272_s21 = smov [#allocation25]  }
  0x34   :  { %s212_s19 = sshll.u32 %s7271_s4, 4  ;;  %s226_s16 = sshll.u32 %s7272_s21, 4  ;;  %s213_s19 = int_to_ptr.vmem [resolvable:$true] %s212_s19  ;;  %s227_s16 = int_to_ptr.vmem [resolvable:$true] %s226_s16 }
  0x35   :  { %218 = dma.hbm_to_vmem [thread:$0]  %s211_s12, 2048, %s213_s19, [#allocation23], %s7253_s3, %s7253_s3, %s7254_s25  }
  0x36   :  { %229 = dma.hbm_to_vmem [thread:$0]  %s225_s29, 16, %s227_s16, [#allocation26]  }
  0x37   :  { %7233 = dma.done.wait [#allocation3], 2048  }
  0x38   :  { %7234 = vsyncadd [#allocation3], 4294965248 }
  0x39   :  { %7235 = dma.done.wait [#allocation5], 32784  }
  0x3a   :  { %7236 = vsyncadd [#allocation5], 4294934512 }
  0x3b   :  { %7237 = dma.done.wait [#allocation8], 8208  }
  0x3c   :  { %7238 = vsyncadd [#allocation8], 4294959088 }
  0x3d   :  { %7239 = dma.done.wait [#allocation11], 79872  }
  0x3e   :  { %7240 = vsyncadd [#allocation11], 4294887424 }
  0x3f   :  { %7241 = dma.done.wait [#allocation14], 26640  }
  0x40   :  { %7242 = vsyncadd [#allocation14], 4294940656 }
  0x41   :  { %7243 = dma.done.wait [#allocation17], 2304  }
  0x42   :  { %7244 = vsyncadd [#allocation17], 4294964992 }
  0x43   :  { %7245 = dma.done.wait [#allocation20], 2064  }
  0x44   :  { %7246 = vsyncadd [#allocation20], 4294965232 }
  0x45   :  { %7247 = dma.done.wait [#allocation23], 2064  }
  0x46   :  { %7248 = vsyncadd [#allocation23], 4294965232 }
  0x47   :  { %7249 = dma.done.wait [#allocation26], 16  }
  0x48   :  { %7250 = vsyncadd [#allocation26], 4294967280  ;;  %v341_v0 = vld [vmem:[#allocation2 + $0x78] sm:$0xff]  ;;  %v340_v1 = vld [vmem:[#allocation2 + $0x70] sm:$0xff]  ;;  %s11037_s25 = sld [smem:[#allocation373_spill]]  ;;  %s7273_s23 = smov 50  }
  0x49   :  { %346 = vmatpush.msra.mxu0 %v341_v0  ;;  %v339_v2 = vld [vmem:[#allocation2 + $0x68] sm:$0xff]  ;;  %v338_v3 = vld [vmem:[#allocation2 + $0x60] sm:$0xff]  ;;  %v337_v4 = vld [vmem:[#allocation2 + $0x58] sm:$0xff]  ;;  %s12128_s6 = sld [smem:[#allocation374_spill]]  ;;  %s7274_s26 = smov 76  }
  0x4a   :  { %v336_v5 = vld [vmem:[#allocation2 + $0x50] sm:$0xff]  ;;  %v335_v6 = vld [vmem:[#allocation2 + $0x48] sm:$0xff]  ;;  %v334_v7 = vld [vmem:[#allocation2 + $0x40] sm:$0xff]  ;;  %s7275_s15 = smov 32   ;;  %s7276_s8 = smov 64  }
  0x4b   :  { %347 = vmatpush.msra.mxu0 %v340_v1  ;;  %v333_v8 = vld [vmem:[#allocation2 + $0x38] sm:$0xff]  ;;  %v332_v9 = vld [vmem:[#allocation2 + $0x30] sm:$0xff]  ;;  %v331_v10 = vld [vmem:[#allocation2 + $0x28] sm:$0xff] }
  0x4c   :  { %v330_v11 = vld [vmem:[#allocation2 + $0x20] sm:$0xff]  ;;  %v329_v12 = vld [vmem:[#allocation2 + $0x18] sm:$0xff]  ;;  %v328_v13 = vld [vmem:[#allocation2 + $0x10] sm:$0xff] }
  0x4d   :  { %348 = vmatpush.msra.mxu0 %v339_v2  ;;  %v327_v14 = vld [vmem:[#allocation2 + $0x8] sm:$0xff]  ;;  %v326_v15 = vld [vmem:[#allocation2] sm:$0xff]  ;;  %v569_v27 = vld [vmem:[#allocation7 + $0x70] sm:$0xff] }
  0x4e   :  { %v294_v16 = vld [vmem:[%s11037_s25] sm:$0xff]  ;;  %v295_v17 = vld [vmem:[%s11037_s25 + $0x8] sm:$0xff]  ;;  %v296_v18 = vld [vmem:[%s11037_s25 + $0x10] sm:$0xff] }
  0x4f   :  { %349 = vmatpush.msra.mxu0 %v338_v3  ;;  %v297_v19 = vld [vmem:[%s11037_s25 + $0x18] sm:$0xff]  ;;  %v298_v20 = vld [vmem:[%s11037_s25 + $0x20] sm:$0xff]  ;;  %v299_v21 = vld [vmem:[%s11037_s25 + $0x28] sm:$0xff] }
  0x50   :  { %v300_v22 = vld [vmem:[%s11037_s25 + $0x30] sm:$0xff]  ;;  %v301_v23 = vld [vmem:[%s11037_s25 + $0x38] sm:$0xff]  ;;  %v302_v24 = vld [vmem:[%s11037_s25 + $0x40] sm:$0xff] }
  0x51   :  { %350 = vmatpush.msra.mxu0 %v337_v4  ;;  %v570_v25 = vld [vmem:[#allocation7 + $0x78] sm:$0xff]  ;;  %v764_v28 = vld [vmem:[#allocation7 + $0xf0] sm:$0xff]  ;;  %v568_v29 = vld [vmem:[#allocation7 + $0x68] sm:$0xff] }
  0x52   :  { %v765_v26 = vld [vmem:[#allocation7 + $0xf8] sm:$0xff]  ;;  %571 = vmatpush.msra.mxu1 %v570_v25  ;;  %v763_v30 = vld [vmem:[#allocation7 + $0xe8] sm:$0xff]  ;;  %v567_v32 = vld [vmem:[#allocation7 + $0x60] sm:$0xff] }
  0x53   :  { %351 = vmatpush.msra.mxu0 %v336_v5  ;;  %766 = vmatpush.msra.mxu2 %v765_v26  ;;  %v303_v31 = vld [vmem:[%s11037_s25 + $0x48] sm:$0xff]  ;;  %v566_v34 = vld [vmem:[#allocation7 + $0x58] sm:$0xff]  ;;  %v565_v36 = vld [vmem:[#allocation7 + $0x50] sm:$0xff] }
  0x54   :  { %572 = vmatpush.msra.mxu1 %v569_v27  ;;  %v762_v33 = vld [vmem:[#allocation7 + $0xe0] sm:$0xff]  ;;  %v761_v35 = vld [vmem:[#allocation7 + $0xd8] sm:$0xff]  ;;  %v760_v37 = vld [vmem:[#allocation7 + $0xd0] sm:$0xff] }
  0x55   :  { %352 = vmatpush.msra.mxu0 %v335_v6  ;;  %767 = vmatpush.msra.mxu2 %v764_v28  ;;  %v564_v38 = vld [vmem:[#allocation7 + $0x48] sm:$0xff]  ;;  %v563_v41 = vld [vmem:[#allocation7 + $0x40] sm:$0xff]  ;;  %v562_v43 = vld [vmem:[#allocation7 + $0x38] sm:$0xff] }
  0x56   :  { %573 = vmatpush.msra.mxu1 %v568_v29  ;;  %v759_v39 = vld [vmem:[#allocation7 + $0xc8] sm:$0xff]  ;;  %v758_v42 = vld [vmem:[#allocation7 + $0xc0] sm:$0xff]  ;;  %v757_v44 = vld [vmem:[#allocation7 + $0xb8] sm:$0xff] }
  0x57   :  { %353 = vmatpush.msra.mxu0 %v334_v7  ;;  %768 = vmatpush.msra.mxu2 %v763_v30  ;;  %v304_v40 = vld [vmem:[%s11037_s25 + $0x50] sm:$0xff]  ;;  %v305_v49 = vld [vmem:[%s11037_s25 + $0x58] sm:$0xff]  ;;  %v559_v50 = vld [vmem:[#allocation7 + $0x20] sm:$0xff] }
  0x58   :  { %574 = vmatpush.msra.mxu1 %v567_v32  ;;  %v561_v45 = vld [vmem:[#allocation7 + $0x30] sm:$0xff]  ;;  %v560_v47 = vld [vmem:[#allocation7 + $0x28] sm:$0xff]  ;;  %v754_v51 = vld [vmem:[#allocation7 + $0xa0] sm:$0xff] }
  0x59   :  { %354 = vmatpush.msra.mxu0 %v333_v8  ;;  %769 = vmatpush.msra.mxu2 %v762_v33  ;;  %v756_v46 = vld [vmem:[#allocation7 + $0xb0] sm:$0xff]  ;;  %v755_v48 = vld [vmem:[#allocation7 + $0xa8] sm:$0xff]  ;;  %v558_v52 = vld [vmem:[#allocation7 + $0x18] sm:$0xff] }
  0x5a   :  { %575 = vmatpush.msra.mxu1 %v566_v34  ;;  %v753_v53 = vld [vmem:[#allocation7 + $0x98] sm:$0xff]  ;;  %v557_v54 = vld [vmem:[#allocation7 + $0x10] sm:$0xff]  ;;  %v556_v57 = vld [vmem:[#allocation7 + $0x8] sm:$0xff] }
  0x5b   :  { %355 = vmatpush.msra.mxu0 %v332_v9  ;;  %770 = vmatpush.msra.mxu2 %v761_v35  ;;  %v752_v55 = vld [vmem:[#allocation7 + $0x90] sm:$0xff]  ;;  %v306_v56 = vld [vmem:[%s11037_s25 + $0x60] sm:$0xff]  ;;  %v751_v58 = vld [vmem:[#allocation7 + $0x88] sm:$0xff] }
  0x5c   :  { %576 = vmatpush.msra.mxu1 %v565_v36  ;;  %v555_v59 = vld [vmem:[#allocation7] sm:$0xff]  ;;  %v308_v62 = vld [vmem:[%s11037_s25 + $0x70] sm:$0xff]  ;;  %v309_v63 = vld [vmem:[%s11037_s25 + $0x78] sm:$0xff] }
  0x5d   :  { %356 = vmatpush.msra.mxu0 %v331_v10  ;;  %771 = vmatpush.msra.mxu2 %v760_v37  ;;  %v750_v60 = vld [vmem:[#allocation7 + $0x80] sm:$0xff]  ;;  %v7492_v0 = vld [vmem:[#allocation4] ss:$0 sm:$0xff]  ;;  %v312_v10 = vld [vmem:[%s11037_s25 + $0x90] sm:$0xff] }
  0x5e   :  { %577 = vmatpush.msra.mxu1 %v564_v38  ;;  %v307_v61 = vld [vmem:[%s11037_s25 + $0x68] sm:$0xff]  ;;  %v310_v2 = vld [vmem:[%s11037_s25 + $0x80] sm:$0xff]  ;;  %v316_v26 = vld [vmem:[%s11037_s25 + $0xb0] sm:$0xff] }
  0x5f   :  { %357 = vmatpush.msra.mxu0 %v330_v11  ;;  %772 = vmatpush.msra.mxu2 %v759_v39  ;;  %v311_v6 = vld [vmem:[%s11037_s25 + $0x88] sm:$0xff]  ;;  %v317_v30 = vld [vmem:[%s11037_s25 + $0xb8] sm:$0xff]  ;;  %v318_v34 = vld [vmem:[%s11037_s25 + $0xc0] sm:$0xff] }
  0x60   :  { %578 = vmatpush.msra.mxu1 %v563_v41  ;;  %v319_v38 = vld [vmem:[%s11037_s25 + $0xc8] sm:$0xff] }
  0x61   :  { %358 = vmatpush.msra.mxu0 %v329_v12  ;;  %773 = vmatpush.msra.mxu2 %v758_v42  ;;  %v320_v42 = vld [vmem:[%s11037_s25 + $0xd0] sm:$0xff] }
  0x62   :  { %579 = vmatpush.msra.mxu1 %v562_v43 }
  0x63   :  { %359 = vmatpush.msra.mxu0 %v328_v13  ;;  %774 = vmatpush.msra.mxu2 %v757_v44 }
  0x64   :  { %580 = vmatpush.msra.mxu1 %v561_v45 }
  0x65   :  { %360 = vmatpush.msra.mxu0 %v327_v14  ;;  %775 = vmatpush.msra.mxu2 %v756_v46  ;;  %v313_v14 = vld [vmem:[%s11037_s25 + $0x98] sm:$0xff] }
  0x66   :  { %581 = vmatpush.msra.mxu1 %v560_v47  ;;  %v321_v46 = vld [vmem:[%s11037_s25 + $0xd8] sm:$0xff] }
  0x67   :  { %361 = vmatpush.msra.mxu0 %v326_v15  ;;  %776 = vmatpush.msra.mxu2 %v755_v48 }
  0x68   :  { %362 = vmatmul.f32.vlgmr.msra.gmra.mxu0 %v294_v16  ;;  %582 = vmatpush.msra.mxu1 %v559_v50  ;;  %v322_v50 = vld [vmem:[%s11037_s25 + $0xe0] sm:$0xff] }
  0x69   :  { %777 = vmatpush.msra.mxu2 %v754_v51 }
  0x6a   :  { %583 = vmatpush.msra.mxu1 %v558_v52 }
  0x6b   :  { %778 = vmatpush.msra.mxu2 %v753_v53 }
  0x6c   :  { %584 = vmatpush.msra.mxu1 %v557_v54  ;;  %v323_v54 = vld [vmem:[%s11037_s25 + $0xe8] sm:$0xff] }
  0x6d   :  { %779 = vmatpush.msra.mxu2 %v752_v55 }
  0x6e   :  { %585 = vmatpush.msra.mxu1 %v556_v57 }
  0x6f   :  { %780 = vmatpush.msra.mxu2 %v751_v58  ;;  %v324_v58 = vld [vmem:[%s11037_s25 + $0xf0] sm:$0xff] }
  0x70   :  { %365 = vmatmul.f32.gmra.mxu0 %v295_v17  ;;  %586 = vmatpush.msra.mxu1 %v555_v59 }
  0x71   :  { %781 = vmatpush.msra.mxu2 %v750_v60 }
  0x78   :  { %368 = vmatmul.f32.gmra.mxu0 %v296_v18  ;;  %v314_v18 = vld [vmem:[%s11037_s25 + $0xa0] sm:$0xff] }
  0x80   :  { %371 = vmatmul.f32.gmra.mxu0 %v297_v19 }
  0x88   :  { %374 = vmatmul.f32.gmra.mxu0 %v298_v20 }
  0x90   :  { %377 = vmatmul.f32.gmra.mxu0 %v299_v21 }
  0x98   :  { %380 = vmatmul.f32.gmra.mxu0 %v300_v22  ;;  %v315_v22 = vld [vmem:[%s11037_s25 + $0xa8] sm:$0xff] }
  0xa0   :  { %383 = vmatmul.f32.gmra.mxu0 %v301_v23 }
  0xa8   :  { %386 = vmatmul.f32.gmra.mxu0 %v302_v24 }
  0xb0   :  { %389 = vmatmul.f32.gmra.mxu0 %v303_v31 }
  0xb8   :  { %392 = vmatmul.f32.gmra.mxu0 %v304_v40 }
  0xc0   :  { %395 = vmatmul.f32.gmra.mxu0 %v305_v49 }
  0xc8   :  { %398 = vmatmul.f32.gmra.mxu0 %v306_v56 }
  0xd0   :  { %401 = vmatmul.f32.gmra.mxu0 %v307_v61 }
  0xd8   :  { %404 = vmatmul.f32.gmra.mxu0 %v308_v62  ;;  %v325_v62 = vld [vmem:[%s11037_s25 + $0xf8] sm:$0xff] }
  0xe0   :  { %407 = vmatmul.f32.gmra.mxu0 %v309_v63 }
  0xe5   :  { %v363_v1 = vpop.f32.mrf.mxu0 }
  0xe6   :  { %v364_v3 = vadd.f32 %v7492_v0, %v363_v1 }
  0xe8   :  { %v7498_v4 = vmax.f32 %v364_v3, 0.0  ;;  %410 = vmatmul.f32.gmra.mxu0 %v310_v2 }
  0xea   :  { %587 = vmatmul.f32.vlgmr.msra.gmra.mxu1 %v7498_v4  ;;  %782 = vmatmul.f32.vlgmr.msra.gmra.mxu2 %v7498_v4 }
  0xed   :  { %v366_v5 = vpop.f32.mrf.mxu0 }
  0xee   :  { %v367_v7 = vadd.f32 %v7492_v0, %v366_v5 }
  0xf0   :  { %v7506_v8 = vmax.f32 %v367_v7, 0.0  ;;  %413 = vmatmul.f32.gmra.mxu0 %v311_v6 }
  0xf2   :  { %590 = vmatmul.f32.gmra.mxu1 %v7506_v8  ;;  %785 = vmatmul.f32.gmra.mxu2 %v7506_v8 }
  0xf5   :  { %v369_v9 = vpop.f32.mrf.mxu0 }
  0xf6   :  { %v370_v11 = vadd.f32 %v7492_v0, %v369_v9 }
  0xf8   :  { %v7514_v12 = vmax.f32 %v370_v11, 0.0  ;;  %416 = vmatmul.f32.gmra.mxu0 %v312_v10 }
  0xfa   :  { %593 = vmatmul.f32.gmra.mxu1 %v7514_v12  ;;  %788 = vmatmul.f32.gmra.mxu2 %v7514_v12 }
  0xfd   :  { %v372_v13 = vpop.f32.mrf.mxu0 }
  0xfe   :  { %v373_v15 = vadd.f32 %v7492_v0, %v372_v13 }
 0x100   :  { %v7522_v16 = vmax.f32 %v373_v15, 0.0  ;;  %419 = vmatmul.f32.gmra.mxu0 %v313_v14 }
 0x102   :  { %596 = vmatmul.f32.gmra.mxu1 %v7522_v16  ;;  %791 = vmatmul.f32.gmra.mxu2 %v7522_v16 }
 0x105   :  { %v375_v17 = vpop.f32.mrf.mxu0 }
 0x106   :  { %v376_v19 = vadd.f32 %v7492_v0, %v375_v17 }
 0x108   :  { %v7530_v20 = vmax.f32 %v376_v19, 0.0  ;;  %422 = vmatmul.f32.gmra.mxu0 %v314_v18 }
 0x10a   :  { %599 = vmatmul.f32.gmra.mxu1 %v7530_v20  ;;  %794 = vmatmul.f32.gmra.mxu2 %v7530_v20 }
 0x10d   :  { %v378_v21 = vpop.f32.mrf.mxu0 }
 0x10e   :  { %v379_v23 = vadd.f32 %v7492_v0, %v378_v21 }
 0x110   :  { %v7538_v24 = vmax.f32 %v379_v23, 0.0  ;;  %425 = vmatmul.f32.gmra.mxu0 %v315_v22 }
 0x112   :  { %602 = vmatmul.f32.gmra.mxu1 %v7538_v24  ;;  %797 = vmatmul.f32.gmra.mxu2 %v7538_v24 }
 0x115   :  { %v381_v25 = vpop.f32.mrf.mxu0 }
 0x116   :  { %v382_v27 = vadd.f32 %v7492_v0, %v381_v25 }
 0x118   :  { %v7546_v28 = vmax.f32 %v382_v27, 0.0  ;;  %428 = vmatmul.f32.gmra.mxu0 %v316_v26 }
 0x11a   :  { %605 = vmatmul.f32.gmra.mxu1 %v7546_v28  ;;  %800 = vmatmul.f32.gmra.mxu2 %v7546_v28 }
 0x11d   :  { %v384_v29 = vpop.f32.mrf.mxu0 }
 0x11e   :  { %v385_v31 = vadd.f32 %v7492_v0, %v384_v29 }
 0x120   :  { %v7554_v32 = vmax.f32 %v385_v31, 0.0  ;;  %431 = vmatmul.f32.gmra.mxu0 %v317_v30 }
 0x122   :  { %608 = vmatmul.f32.gmra.mxu1 %v7554_v32  ;;  %803 = vmatmul.f32.gmra.mxu2 %v7554_v32 }
 0x125   :  { %v387_v33 = vpop.f32.mrf.mxu0 }
 0x126   :  { %v388_v35 = vadd.f32 %v7492_v0, %v387_v33 }
 0x128   :  { %v7562_v36 = vmax.f32 %v388_v35, 0.0  ;;  %434 = vmatmul.f32.gmra.mxu0 %v318_v34 }
 0x12a   :  { %611 = vmatmul.f32.gmra.mxu1 %v7562_v36  ;;  %806 = vmatmul.f32.gmra.mxu2 %v7562_v36 }
 0x12d   :  { %v390_v37 = vpop.f32.mrf.mxu0 }
 0x12e   :  { %v391_v39 = vadd.f32 %v7492_v0, %v390_v37 }
 0x130   :  { %v7570_v40 = vmax.f32 %v391_v39, 0.0  ;;  %437 = vmatmul.f32.gmra.mxu0 %v319_v38 }
 0x132   :  { %614 = vmatmul.f32.gmra.mxu1 %v7570_v40  ;;  %809 = vmatmul.f32.gmra.mxu2 %v7570_v40 }
 0x135   :  { %v393_v41 = vpop.f32.mrf.mxu0 }
 0x136   :  { %v394_v43 = vadd.f32 %v7492_v0, %v393_v41 }
 0x138   :  { %v7578_v44 = vmax.f32 %v394_v43, 0.0  ;;  %440 = vmatmul.f32.gmra.mxu0 %v320_v42 }
 0x13a   :  { %617 = vmatmul.f32.gmra.mxu1 %v7578_v44  ;;  %812 = vmatmul.f32.gmra.mxu2 %v7578_v44 }
 0x13d   :  { %v396_v45 = vpop.f32.mrf.mxu0 }
 0x13e   :  { %v397_v47 = vadd.f32 %v7492_v0, %v396_v45 }
 0x140   :  { %v7586_v48 = vmax.f32 %v397_v47, 0.0  ;;  %443 = vmatmul.f32.gmra.mxu0 %v321_v46 }
 0x142   :  { %620 = vmatmul.f32.gmra.mxu1 %v7586_v48  ;;  %815 = vmatmul.f32.gmra.mxu2 %v7586_v48 }
 0x145   :  { %v399_v49 = vpop.f32.mrf.mxu0 }
 0x146   :  { %v400_v51 = vadd.f32 %v7492_v0, %v399_v49 }
 0x148   :  { %v7594_v52 = vmax.f32 %v400_v51, 0.0  ;;  %446 = vmatmul.f32.gmra.mxu0 %v322_v50 }
 0x14a   :  { %623 = vmatmul.f32.gmra.mxu1 %v7594_v52  ;;  %818 = vmatmul.f32.gmra.mxu2 %v7594_v52 }
 0x14d   :  { %v402_v53 = vpop.f32.mrf.mxu0 }
 0x14e   :  { %v403_v55 = vadd.f32 %v7492_v0, %v402_v53 }
 0x150   :  { %v7602_v56 = vmax.f32 %v403_v55, 0.0  ;;  %449 = vmatmul.f32.gmra.mxu0 %v323_v54 }
 0x152   :  { %626 = vmatmul.f32.gmra.mxu1 %v7602_v56  ;;  %821 = vmatmul.f32.gmra.mxu2 %v7602_v56 }
 0x155   :  { %v405_v57 = vpop.f32.mrf.mxu0 }
 0x156   :  { %v406_v59 = vadd.f32 %v7492_v0, %v405_v57 }
 0x158   :  { %v7610_v60 = vmax.f32 %v406_v59, 0.0  ;;  %452 = vmatmul.f32.gmra.mxu0 %v324_v58 }
 0x15a   :  { %629 = vmatmul.f32.gmra.mxu1 %v7610_v60  ;;  %824 = vmatmul.f32.gmra.mxu2 %v7610_v60 }
 0x15d   :  { %v408_v61 = vpop.f32.mrf.mxu0 }
 0x15e   :  { %v409_v63 = vadd.f32 %v7492_v0, %v408_v61 }
 0x160   :  { %v7618_v1 = vmax.f32 %v409_v63, 0.0  ;;  %455 = vmatmul.f32.gmra.mxu0 %v325_v62 }
 0x162   :  { %632 = vmatmul.f32.gmra.mxu1 %v7618_v1  ;;  %827 = vmatmul.f32.gmra.mxu2 %v7618_v1 }
 0x165   :  { %v411_v2 = vpop.f32.mrf.mxu0 }
 0x166   :  { %v412_v3 = vadd.f32 %v7492_v0, %v411_v2 }
 0x167   :  { %v7623_v5 = vpop.f32.mrf.mxu1 }
 0x168   :  { %v7625_v6 = vmax.f32 %v412_v3, 0.0 }
 0x16a   :  { %635 = vmatmul.f32.gmra.mxu1 %v7625_v6  ;;  %830 = vmatmul.f32.gmra.mxu2 %v7625_v6 }
 0x16d   :  { %v414_v7 = vpop.f32.mrf.mxu0  ;;  %v7629_v9 = vpop.f32.mrf.mxu2 }
 0x16e   :  { %v415_v10 = vadd.f32 %v7492_v0, %v414_v7 }
 0x16f   :  { %v7632_v11 = vpop.f32.mrf.mxu1 }
 0x170   :  { %v7634_v13 = vmax.f32 %v415_v10, 0.0 }
 0x172   :  { %638 = vmatmul.f32.gmra.mxu1 %v7634_v13  ;;  %833 = vmatmul.f32.gmra.mxu2 %v7634_v13 }
 0x175   :  { %v417_v14 = vpop.f32.mrf.mxu0  ;;  %v7638_v15 = vpop.f32.mrf.mxu2 }
 0x176   :  { %v418_v17 = vadd.f32 %v7492_v0, %v417_v14 }
 0x177   :  { %v7641_v18 = vpop.f32.mrf.mxu1 }
 0x178   :  { %v7643_v19 = vmax.f32 %v418_v17, 0.0 }
 0x17a   :  { %641 = vmatmul.f32.gmra.mxu1 %v7643_v19  ;;  %836 = vmatmul.f32.gmra.mxu2 %v7643_v19 }
 0x17d   :  { %v420_v21 = vpop.f32.mrf.mxu0  ;;  %v7647_v22 = vpop.f32.mrf.mxu2 }
 0x17e   :  { %v421_v23 = vadd.f32 %v7492_v0, %v420_v21 }
 0x17f   :  { %v7650_v25 = vpop.f32.mrf.mxu1 }
 0x180   :  { %v7652_v26 = vmax.f32 %v421_v23, 0.0 }
 0x182   :  { %644 = vmatmul.f32.gmra.mxu1 %v7652_v26  ;;  %839 = vmatmul.f32.gmra.mxu2 %v7652_v26 }
 0x185   :  { %v423_v27 = vpop.f32.mrf.mxu0  ;;  %v7656_v29 = vpop.f32.mrf.mxu2 }
 0x186   :  { %v424_v30 = vadd.f32 %v7492_v0, %v423_v27 }
 0x187   :  { %v7659_v31 = vpop.f32.mrf.mxu1 }
 0x188   :  { %v7661_v33 = vmax.f32 %v424_v30, 0.0 }
 0x18a   :  { %647 = vmatmul.f32.gmra.mxu1 %v7661_v33  ;;  %842 = vmatmul.f32.gmra.mxu2 %v7661_v33 }
 0x18d   :  { %v426_v34 = vpop.f32.mrf.mxu0  ;;  %v7665_v35 = vpop.f32.mrf.mxu2 }
 0x18e   :  { %v427_v37 = vadd.f32 %v7492_v0, %v426_v34 }
 0x18f   :  { %v7668_v38 = vpop.f32.mrf.mxu1 }
 0x190   :  { %v7670_v39 = vmax.f32 %v427_v37, 0.0 }
 0x192   :  { %650 = vmatmul.f32.gmra.mxu1 %v7670_v39  ;;  %845 = vmatmul.f32.gmra.mxu2 %v7670_v39 }
 0x195   :  { %v429_v41 = vpop.f32.mrf.mxu0  ;;  %v7674_v42 = vpop.f32.mrf.mxu2 }
 0x196   :  { %v430_v43 = vadd.f32 %v7492_v0, %v429_v41 }
 0x197   :  { %v7677_v45 = vpop.f32.mrf.mxu1 }
 0x198   :  { %v7679_v46 = vmax.f32 %v430_v43, 0.0 }
 0x19a   :  { %653 = vmatmul.f32.gmra.mxu1 %v7679_v46  ;;  %848 = vmatmul.f32.gmra.mxu2 %v7679_v46 }
 0x19d   :  { %v432_v47 = vpop.f32.mrf.mxu0  ;;  %v7683_v49 = vpop.f32.mrf.mxu2 }
 0x19e   :  { %v433_v50 = vadd.f32 %v7492_v0, %v432_v47 }
 0x19f   :  { %v7686_v51 = vpop.f32.mrf.mxu1 }
 0x1a0   :  { %v7688_v53 = vmax.f32 %v433_v50, 0.0 }
 0x1a2   :  { %656 = vmatmul.f32.gmra.mxu1 %v7688_v53  ;;  %851 = vmatmul.f32.gmra.mxu2 %v7688_v53 }
 0x1a5   :  { %v435_v54 = vpop.f32.mrf.mxu0  ;;  %v7692_v55 = vpop.f32.mrf.mxu2 }
 0x1a6   :  { %v436_v57 = vadd.f32 %v7492_v0, %v435_v54 }
 0x1a7   :  { %v7695_v58 = vpop.f32.mrf.mxu1 }
 0x1a8   :  { %v7697_v59 = vmax.f32 %v436_v57, 0.0 }
 0x1aa   :  { %659 = vmatmul.f32.gmra.mxu1 %v7697_v59  ;;  %854 = vmatmul.f32.gmra.mxu2 %v7697_v59 }
 0x1ad   :  { %v438_v61 = vpop.f32.mrf.mxu0  ;;  %v7701_v62 = vpop.f32.mrf.mxu2 }
 0x1ae   :  { %v439_v63 = vadd.f32 %v7492_v0, %v438_v61 }
 0x1af   :  { %v615_v2 = vpop.f32.mrf.mxu1 }
 0x1b0   :  { %v7704_v3 = vmax.f32 %v439_v63, 0.0 }
 0x1b2   :  { %11038 = vst [vmem:[#allocation36_spill] sm:$0xff] %v7704_v3  ;;  %662 = vmatmul.f32.gmra.mxu1 %v7704_v3  ;;  %857 = vmatmul.f32.gmra.mxu2 %v7704_v3 }
 0x1b5   :  { %v441_v7 = vpop.f32.mrf.mxu0  ;;  %v810_v10 = vpop.f32.mrf.mxu2 }
 0x1b6   :  { %v442_v14 = vadd.f32 %v7492_v0, %v441_v7 }
 0x1b7   :  { %v618_v17 = vpop.f32.mrf.mxu1 }
 0x1b8   :  { %v7709_v21 = vmax.f32 %v442_v14, 0.0 }
 0x1ba   :  { %11039 = vst [vmem:[#allocation37_spill] sm:$0xff] %v7709_v21  ;;  %665 = vmatmul.f32.gmra.mxu1 %v7709_v21  ;;  %860 = vmatmul.f32.gmra.mxu2 %v7709_v21 }
 0x1bd   :  { %v444_v23 = vpop.f32.mrf.mxu0  ;;  %v813_v27 = vpop.f32.mrf.mxu2 }
 0x1be   :  { %v445_v30 = vadd.f32 %v7492_v0, %v444_v23 }
 0x1bf   :  { %v621_v34 = vpop.f32.mrf.mxu1 }
 0x1c0   :  { %v7714_v37 = vmax.f32 %v445_v30, 0.0 }
 0x1c2   :  { %11040 = vst [vmem:[#allocation38_spill] sm:$0xff] %v7714_v37  ;;  %668 = vmatmul.f32.gmra.mxu1 %v7714_v37  ;;  %863 = vmatmul.f32.gmra.mxu2 %v7714_v37 }
 0x1c5   :  { %v447_v41 = vpop.f32.mrf.mxu0  ;;  %v816_v43 = vpop.f32.mrf.mxu2 }
 0x1c6   :  { %v448_v47 = vadd.f32 %v7492_v0, %v447_v41 }
 0x1c7   :  { %v624_v50 = vpop.f32.mrf.mxu1 }
 0x1c8   :  { %v7719_v54 = vmax.f32 %v448_v47, 0.0 }
 0x1ca   :  { %11041 = vst [vmem:[#allocation39_spill] sm:$0xff] %v7719_v54  ;;  %671 = vmatmul.f32.gmra.mxu1 %v7719_v54  ;;  %866 = vmatmul.f32.gmra.mxu2 %v7719_v54 }
 0x1cd   :  { %v450_v57 = vpop.f32.mrf.mxu0  ;;  %v819_v61 = vpop.f32.mrf.mxu2 }
 0x1ce   :  { %v451_v63 = vadd.f32 %v7492_v0, %v450_v57 }
 0x1cf   :  { %v627_v7 = vpop.f32.mrf.mxu1 }
 0x1d0   :  { %v7724_v14 = vmax.f32 %v451_v63, 0.0 }
 0x1d2   :  { %674 = vmatmul.f32.gmra.mxu1 %v7724_v14  ;;  %869 = vmatmul.f32.gmra.mxu2 %v7724_v14 }
 0x1d5   :  { %v453_v23 = vpop.f32.mrf.mxu0  ;;  %v822_v30 = vpop.f32.mrf.mxu2 }
 0x1d6   :  { %v454_v41 = vadd.f32 %v7492_v0, %v453_v23 }
 0x1d7   :  { %v630_v47 = vpop.f32.mrf.mxu1 }
 0x1d8   :  { %v7729_v37 = vmax.f32 %v454_v41, 0.0 }
 0x1da   :  { %677 = vmatmul.f32.gmra.mxu1 %v7729_v37  ;;  %872 = vmatmul.f32.gmra.mxu2 %v7729_v37 }
 0x1dd   :  { %v456_v54 = vpop.f32.mrf.mxu0  ;;  %v825_v57 = vpop.f32.mrf.mxu2 }
 0x1de   :  { %v457_v63 = vadd.f32 %v7492_v0, %v456_v54  ;;  %v699_v54 = vld [vmem:[#allocation6 + $0x270] sm:$0xff] }
 0x1df   :  { %v633_v21 = vpop.f32.mrf.mxu1 }
 0x1e0   :  { %v7734_v3 = vmax.f32 %v457_v63, 0.0  ;;  %1105 = vmatpush.msrb.mxu1 %v633_v21  ;;  %v703_v63 = vld [vmem:[#allocation6 + $0x290] sm:$0xff] }
 0x1e2   :  { %11042 = vst [vmem:[#allocation40_spill] sm:$0xff] %v7734_v3  ;;  %680 = vmatmul.f32.gmra.mxu1 %v7734_v3  ;;  %875 = vmatmul.f32.gmra.mxu2 %v7734_v3 }
 0x1e3   :  { %1106 = vmatpush.msrb.mxu1 %v630_v47 }
 0x1e5   :  { %1107 = vmatpush.msrb.mxu1 %v627_v7  ;;  %v828_v23 = vpop.f32.mrf.mxu2 }
 0x1e6   :  { %879 = vmatpush.msra.mxu3 %v828_v23 }
 0x1e7   :  { %1108 = vmatpush.msrb.mxu1 %v624_v50  ;;  %v7738_v41 = vpop.f32.mrf.mxu1 }
 0x1e8   :  { %880 = vmatpush.msra.mxu3 %v825_v57 }
 0x1e9   :  { %1109 = vmatpush.msrb.mxu1 %v621_v34  ;;  %v697_v34 = vld [vmem:[#allocation6 + $0x260] sm:$0xff] }
 0x1ea   :  { %881 = vmatpush.msra.mxu3 %v822_v30  ;;  %v701_v30 = vld [vmem:[#allocation6 + $0x280] sm:$0xff] }
 0x1eb   :  { %1110 = vmatpush.msrb.mxu1 %v618_v17 }
 0x1ec   :  { %882 = vmatpush.msra.mxu3 %v819_v61 }
 0x1ed   :  { %1111 = vmatpush.msrb.mxu1 %v615_v2  ;;  %v7740_v0 = vpop.f32.mrf.mxu2 }
 0x1ee   :  { %883 = vmatpush.msra.mxu3 %v816_v43 }
 0x1ef   :  { %1112 = vmatpush.msrb.mxu1 %v7695_v58  ;;  %v7743_v21 = vpop.f32.mrf.mxu1 }
 0x1f0   :  { %884 = vmatpush.msra.mxu3 %v813_v27 }
 0x1f1   :  { %1113 = vmatpush.msrb.mxu1 %v7686_v51  ;;  %v693_v51 = vld [vmem:[#allocation6 + $0x240] sm:$0xff] }
 0x1f2   :  { %885 = vmatpush.msra.mxu3 %v810_v10 }
 0x1f3   :  { %1114 = vmatpush.msrb.mxu1 %v7677_v45 }
 0x1f4   :  { %886 = vmatpush.msra.mxu3 %v7701_v62  ;;  %v695_v62 = vld [vmem:[#allocation6 + $0x250] sm:$0xff] }
 0x1f5   :  { %1115 = vmatpush.msrb.mxu1 %v7668_v38  ;;  %v7749_v17 = vpop.f32.mrf.mxu2 }
 0x1f6   :  { %887 = vmatpush.msra.mxu3 %v7692_v55 }
 0x1f7   :  { %1116 = vmatpush.msrb.mxu1 %v7659_v31  ;;  %v7753_v2 = vpop.f32.mrf.mxu1 }
 0x1f8   :  { %888 = vmatpush.msra.mxu3 %v7683_v49 }
 0x1f9   :  { %1117 = vmatpush.msrb.mxu1 %v7650_v25  ;;  %v685_v25 = vld [vmem:[#allocation6 + $0x200] sm:$0xff] }
 0x1fa   :  { %889 = vmatpush.msra.mxu3 %v7674_v42 }
 0x1fb   :  { %1118 = vmatpush.msrb.mxu1 %v7641_v18 }
 0x1fc   :  { %890 = vmatpush.msra.mxu3 %v7665_v35 }
 0x1fd   :  { %1119 = vmatpush.msrb.mxu1 %v7632_v11  ;;  %v7761_v38 = vpop.f32.mrf.mxu2  ;;  %v687_v11 = vld [vmem:[#allocation6 + $0x210] sm:$0xff] }
 0x1fe   :  { %891 = vmatpush.msra.mxu3 %v7656_v29 }
 0x1ff   :  { %1120 = vmatpush.msrb.mxu1 %v7623_v5  ;;  %v7765_v31 = vpop.f32.mrf.mxu1  ;;  %v689_v5 = vld [vmem:[#allocation6 + $0x220] sm:$0xff] }
 0x200   :  { %892 = vmatpush.msra.mxu3 %v7647_v22 }
 0x202   :  { %893 = vmatpush.msra.mxu3 %v7638_v15  ;;  %v691_v15 = vld [vmem:[#allocation6 + $0x230] sm:$0xff] }
 0x204   :  { %894 = vmatpush.msra.mxu3 %v7629_v9 }
 0x205   :  { %v7770_v18 = vpop.f32.mrf.mxu2  ;;  %895 = vmatmul.f32.vlgmr.msra.gmra.mxu3 %v685_v25 }
 0x207   :  { %v7772_v35 = vpop.f32.mrf.mxu1 }
 0x20d   :  { %v7774_v42 = vpop.f32.mrf.mxu2  ;;  %898 = vmatmul.f32.gmra.mxu3 %v687_v11  ;;  %v705_v11 = vld [vmem:[#allocation6 + $0x2a0] sm:$0xff] }
 0x20f   :  { %v7776_v29 = vpop.f32.mrf.mxu1 }
 0x215   :  { %v7778_v45 = vpop.f32.mrf.mxu2  ;;  %901 = vmatmul.f32.gmra.mxu3 %v689_v5 }
 0x217   :  { %v654_v22 = vpop.f32.mrf.mxu1 }
 0x21d   :  { %v7780_v49 = vpop.f32.mrf.mxu2  ;;  %904 = vmatmul.f32.gmra.mxu3 %v691_v15 }
 0x21f   :  { %v657_v9 = vpop.f32.mrf.mxu1 }
 0x225   :  { %v852_v55 = vpop.f32.mrf.mxu2  ;;  %907 = vmatmul.f32.gmra.mxu3 %v693_v51  ;;  %v707_v51 = vld [vmem:[#allocation6 + $0x2b0] sm:$0xff] }
 0x227   :  { %v660_v58 = vpop.f32.mrf.mxu1 }
 0x22d   :  { %v855_v10 = vpop.f32.mrf.mxu2  ;;  %910 = vmatmul.f32.gmra.mxu3 %v695_v62 }
 0x22f   :  { %v663_v27 = vpop.f32.mrf.mxu1 }
 0x235   :  { %v858_v43 = vpop.f32.mrf.mxu2  ;;  %913 = vmatmul.f32.gmra.mxu3 %v697_v34 }
 0x237   :  { %v666_v50 = vpop.f32.mrf.mxu1 }
 0x23d   :  { %v861_v61 = vpop.f32.mrf.mxu2  ;;  %916 = vmatmul.f32.gmra.mxu3 %v699_v54  ;;  %v709_v54 = vld [vmem:[#allocation6 + $0x2c0] sm:$0xff] }
 0x23f   :  { %v669_v7 = vpop.f32.mrf.mxu1 }
 0x245   :  { %v864_v47 = vpop.f32.mrf.mxu2  ;;  %919 = vmatmul.f32.gmra.mxu3 %v701_v30  ;;  %v491_v30 = vld [vmem:[#allocation6] sm:$0xff] }
 0x246   :  { %1121 = vmatmul.f32.vlgmr.msrb.gmra.mxu1 %v491_v30 }
 0x247   :  { %v672_v57 = vpop.f32.mrf.mxu1 }
 0x24d   :  { %v867_v23 = vpop.f32.mrf.mxu2  ;;  %922 = vmatmul.f32.gmra.mxu3 %v703_v63  ;;  %v711_v63 = vld [vmem:[#allocation6 + $0x2d0] sm:$0xff] }
 0x24f   :  { %v675_v25 = vpop.f32.mrf.mxu1 }
 0x255   :  { %v870_v5 = vpop.f32.mrf.mxu2  ;;  %925 = vmatmul.f32.gmra.mxu3 %v705_v11  ;;  %v493_v11 = vld [vmem:[#allocation6 + $0x10] sm:$0xff] }
 0x256   :  { %1124 = vmatmul.f32.gmra.mxu1 %v493_v11  ;;  %v698_v11 = vld [vmem:[#allocation6 + $0x268] sm:$0xff] }
 0x257   :  { %v678_v15 = vpop.f32.mrf.mxu1 }
 0x25d   :  { %v873_v62 = vpop.f32.mrf.mxu2  ;;  %928 = vmatmul.f32.gmra.mxu3 %v707_v51  ;;  %v727_v51 = vld [vmem:[#allocation6 + $0x350] sm:$0xff] }
 0x25f   :  { %v681_v34 = vpop.f32.mrf.mxu1 }
 0x260   :  { %1218 = vmatpush.msrb.mxu2 %v681_v34  ;;  %v504_v34 = vld [vmem:[#allocation6 + $0x68] sm:$0xff] }
 0x262   :  { %1219 = vmatpush.msrb.mxu2 %v678_v15 }
 0x264   :  { %1220 = vmatpush.msrb.mxu2 %v675_v25  ;;  %v713_v25 = vld [vmem:[#allocation6 + $0x2e0] sm:$0xff] }
 0x265   :  { %v876_v3 = vpop.f32.mrf.mxu2  ;;  %931 = vmatmul.f32.gmra.mxu3 %v709_v54  ;;  %v509_v54 = vld [vmem:[#allocation6 + $0x90] sm:$0xff] }
 0x266   :  { %992 = vmatpush.msrb.mxu0 %v876_v3  ;;  %1221 = vmatpush.msrb.mxu2 %v672_v57  ;;  %v495_v3 = vld [vmem:[#allocation6 + $0x20] sm:$0xff]  ;;  %v694_v57 = vld [vmem:[#allocation6 + $0x248] sm:$0xff] }
 0x267   :  { %1127 = vmatmul.f32.gmra.mxu1 %v495_v3  ;;  %v511_v3 = vld [vmem:[#allocation6 + $0xa0] sm:$0xff] }
 0x268   :  { %993 = vmatpush.msrb.mxu0 %v873_v62  ;;  %1222 = vmatpush.msrb.mxu2 %v669_v7  ;;  %v696_v62 = vld [vmem:[#allocation6 + $0x258] sm:$0xff] }
 0x26a   :  { %994 = vmatpush.msrb.mxu0 %v870_v5  ;;  %1223 = vmatpush.msrb.mxu2 %v666_v50  ;;  %v500_v50 = vld [vmem:[#allocation6 + $0x48] sm:$0xff]  ;;  %v507_v5 = vld [vmem:[#allocation6 + $0x80] sm:$0xff] }
 0x26c   :  { %995 = vmatpush.msrb.mxu0 %v867_v23  ;;  %1224 = vmatpush.msrb.mxu2 %v663_v27  ;;  %v723_v27 = vld [vmem:[#allocation6 + $0x330] sm:$0xff]  ;;  %v502_v23 = vld [vmem:[#allocation6 + $0x58] sm:$0xff] }
 0x26d   :  { %934 = vmatmul.f32.gmra.mxu3 %v711_v63  ;;  %v729_v63 = vld [vmem:[#allocation6 + $0x360] sm:$0xff] }
 0x26e   :  { %996 = vmatpush.msrb.mxu0 %v864_v47  ;;  %1225 = vmatpush.msrb.mxu2 %v660_v58  ;;  %v503_v58 = vld [vmem:[#allocation6 + $0x60] sm:$0xff] }
 0x26f   :  { %v725_v47 = vld [vmem:[#allocation6 + $0x340] sm:$0xff] }
 0x270   :  { %997 = vmatpush.msrb.mxu0 %v861_v61  ;;  %1226 = vmatpush.msrb.mxu2 %v657_v9  ;;  %v715_v9 = vld [vmem:[#allocation6 + $0x2f0] sm:$0xff] }
 0x271   :  { %v505_v61 = vld [vmem:[#allocation6 + $0x70] sm:$0xff] }
 0x272   :  { %998 = vmatpush.msrb.mxu0 %v858_v43  ;;  %1227 = vmatpush.msrb.mxu2 %v654_v22  ;;  %v497_v22 = vld [vmem:[#allocation6 + $0x30] sm:$0xff]  ;;  %v692_v43 = vld [vmem:[#allocation6 + $0x238] sm:$0xff] }
 0x273   :  { %1130 = vmatmul.f32.gmra.mxu1 %v497_v22  ;;  %v700_v22 = vld [vmem:[#allocation6 + $0x278] sm:$0xff] }
 0x274   :  { %999 = vmatpush.msrb.mxu0 %v855_v10  ;;  %1228 = vmatpush.msrb.mxu2 %v7776_v29  ;;  %v492_v29 = vld [vmem:[#allocation6 + $0x8] sm:$0xff] }
 0x275   :  { %937 = vmatmul.f32.gmra.mxu3 %v713_v25  ;;  %v506_v25 = vld [vmem:[#allocation6 + $0x78] sm:$0xff] }
 0x276   :  { %1000 = vmatpush.msrb.mxu0 %v852_v55  ;;  %1229 = vmatpush.msrb.mxu2 %v7772_v35  ;;  %v494_v35 = vld [vmem:[#allocation6 + $0x18] sm:$0xff] }
 0x277   :  { %v498_v55 = vld [vmem:[#allocation6 + $0x38] sm:$0xff] }
 0x278   :  { %1001 = vmatpush.msrb.mxu0 %v7780_v49  ;;  %1230 = vmatpush.msrb.mxu2 %v7765_v31  ;;  %v717_v31 = vld [vmem:[#allocation6 + $0x300] sm:$0xff] }
 0x279   :  { %v721_v49 = vld [vmem:[#allocation6 + $0x320] sm:$0xff] }
 0x27a   :  { %1002 = vmatpush.msrb.mxu0 %v7778_v45  ;;  %1231 = vmatpush.msrb.mxu2 %v7753_v2  ;;  %v686_v2 = vld [vmem:[#allocation6 + $0x208] sm:$0xff] }
 0x27b   :  { %v496_v45 = vld [vmem:[#allocation6 + $0x28] sm:$0xff] }
 0x27c   :  { %1003 = vmatpush.msrb.mxu0 %v7774_v42  ;;  %1232 = vmatpush.msrb.mxu2 %v7743_v21  ;;  %v499_v21 = vld [vmem:[#allocation6 + $0x40] sm:$0xff] }
 0x27d   :  { %940 = vmatmul.f32.gmra.mxu3 %v715_v9  ;;  %1133 = vmatmul.f32.gmra.mxu1 %v499_v21  ;;  %v733_v21 = vld [vmem:[#allocation6 + $0x380] sm:$0xff] }
 0x27e   :  { %1004 = vmatpush.msrb.mxu0 %v7770_v18  ;;  %1233 = vmatpush.msrb.mxu2 %v7738_v41  ;;  %v719_v18 = vld [vmem:[#allocation6 + $0x310] sm:$0xff]  ;;  %v688_v41 = vld [vmem:[#allocation6 + $0x218] sm:$0xff] }
 0x27f   :  { %1234 = vmatmul.f32.vlgmr.msrb.gmra.mxu2 %v492_v29  ;;  %v731_v29 = vld [vmem:[#allocation6 + $0x370] sm:$0xff] }
 0x280   :  { %1005 = vmatpush.msrb.mxu0 %v7761_v38  ;;  %v501_v38 = vld [vmem:[#allocation6 + $0x50] sm:$0xff] }
 0x282   :  { %1006 = vmatpush.msrb.mxu0 %v7749_v17 }
 0x284   :  { %1007 = vmatpush.msrb.mxu0 %v7740_v0  ;;  %v690_v0 = vld [vmem:[#allocation6 + $0x228] sm:$0xff] }
 0x285   :  { %943 = vmatmul.f32.gmra.mxu3 %v717_v31  ;;  %1008 = vmatmul.f32.vlgmr.msrb.gmra.mxu0 %v686_v2  ;;  %v508_v31 = vld [vmem:[#allocation6 + $0x88] sm:$0xff]  ;;  %v513_v2 = vld [vmem:[#allocation6 + $0xb0] sm:$0xff] }
 0x286   :  { %1136 = vmatmul.f32.gmra.mxu1 %v501_v38  ;;  %v515_v38 = vld [vmem:[#allocation6 + $0xc0] sm:$0xff] }
 0x287   :  { %1237 = vmatmul.f32.gmra.mxu2 %v494_v35 }
 0x288   :  { %v7795_v42 = vpop.f32.mrf.mxu3 }
 0x28d   :  { %946 = vmatmul.f32.gmra.mxu3 %v719_v18  ;;  %1011 = vmatmul.f32.gmra.mxu0 %v688_v41  ;;  %v702_v18 = vld [vmem:[#allocation6 + $0x288] sm:$0xff]  ;;  %v510_v41 = vld [vmem:[#allocation6 + $0x98] sm:$0xff] }
 0x28e   :  { %1139 = vmatmul.f32.gmra.mxu1 %v503_v58  ;;  %v735_v58 = vld [vmem:[#allocation6 + $0x390] sm:$0xff] }
 0x28f   :  { %1240 = vmatmul.f32.gmra.mxu2 %v496_v45  ;;  %v1412_v45 = vld [vmem:[#allocation7 + $0x178] sm:$0xff] }
 0x290   :  { %v7797_v17 = vpop.f32.mrf.mxu3  ;;  %1413 = vmatpush.msrb.mxu3 %v1412_v45 }
 0x295   :  { %949 = vmatmul.f32.gmra.mxu3 %v721_v49  ;;  %1014 = vmatmul.f32.gmra.mxu0 %v690_v0  ;;  %v1411_v0 = vld [vmem:[#allocation7 + $0x170] sm:$0xff] }
 0x296   :  { %1142 = vmatmul.f32.gmra.mxu1 %v505_v61  ;;  %1414 = vmatpush.msrb.mxu3 %v1411_v0  ;;  %v1408_v61 = vld [vmem:[#allocation7 + $0x158] sm:$0xff]  ;;  %v741_v0 = vld [vmem:[#allocation6 + $0x3c0] sm:$0xff] }
 0x297   :  { %1243 = vmatmul.f32.gmra.mxu2 %v498_v55  ;;  %v1410_v55 = vld [vmem:[#allocation7 + $0x168] sm:$0xff] }
 0x298   :  { %v7799_v10 = vpop.f32.mrf.mxu3  ;;  %1415 = vmatpush.msrb.mxu3 %v1410_v55  ;;  %v710_v55 = vld [vmem:[#allocation6 + $0x2c8] sm:$0xff] }
 0x29d   :  { %952 = vmatmul.f32.gmra.mxu3 %v723_v27  ;;  %1017 = vmatmul.f32.gmra.mxu0 %v692_v43  ;;  %v704_v27 = vld [vmem:[#allocation6 + $0x298] sm:$0xff]  ;;  %v1409_v43 = vld [vmem:[#allocation7 + $0x160] sm:$0xff] }
 0x29e   :  { %1145 = vmatmul.f32.gmra.mxu1 %v507_v5  ;;  %1416 = vmatpush.msrb.mxu3 %v1409_v43  ;;  %v1406_v5 = vld [vmem:[#allocation7 + $0x148] sm:$0xff]  ;;  %v1397_v43 = vld [vmem:[#allocation7 + $0x100] sm:$0xff] }
 0x29f   :  { %1246 = vmatmul.f32.gmra.mxu2 %v500_v50  ;;  %v512_v50 = vld [vmem:[#allocation6 + $0xa8] sm:$0xff] }
 0x2a0   :  { %v7801_v7 = vpop.f32.mrf.mxu3  ;;  %1417 = vmatpush.msrb.mxu3 %v1408_v61 }
 0x2a5   :  { %955 = vmatmul.f32.gmra.mxu3 %v725_v47  ;;  %1020 = vmatmul.f32.gmra.mxu0 %v694_v57  ;;  %v517_v47 = vld [vmem:[#allocation6 + $0xd0] sm:$0xff] }
 0x2a6   :  { %1148 = vmatmul.f32.gmra.mxu1 %v509_v54  ;;  %v514_v54 = vld [vmem:[#allocation6 + $0xb8] sm:$0xff] }
 0x2a7   :  { %1249 = vmatmul.f32.gmra.mxu2 %v502_v23  ;;  %v1407_v23 = vld [vmem:[#allocation7 + $0x150] sm:$0xff] }
 0x2a8   :  { %v7803_v15 = vpop.f32.mrf.mxu3  ;;  %1418 = vmatpush.msrb.mxu3 %v1407_v23  ;;  %v712_v23 = vld [vmem:[#allocation6 + $0x2d8] sm:$0xff] }
 0x2aa   :  { %1419 = vmatpush.msrb.mxu3 %v1406_v5  ;;  %v520_v5 = vld [vmem:[#allocation6 + $0xe8] sm:$0xff] }
 0x2ad   :  { %958 = vmatmul.f32.gmra.mxu3 %v727_v51  ;;  %1023 = vmatmul.f32.gmra.mxu0 %v696_v62  ;;  %v737_v51 = vld [vmem:[#allocation6 + $0x3a0] sm:$0xff]  ;;  %v706_v62 = vld [vmem:[#allocation6 + $0x2a8] sm:$0xff] }
 0x2ae   :  { %1151 = vmatmul.f32.gmra.mxu1 %v511_v3  ;;  %v1403_v3 = vld [vmem:[#allocation7 + $0x130] sm:$0xff] }
 0x2af   :  { %1252 = vmatmul.f32.gmra.mxu2 %v504_v34  ;;  %v1405_v34 = vld [vmem:[#allocation7 + $0x140] sm:$0xff] }
 0x2b0   :  { %v7805_v30 = vpop.f32.mrf.mxu3  ;;  %1420 = vmatpush.msrb.mxu3 %v1405_v34  ;;  %v745_v34 = vld [vmem:[#allocation6 + $0x3e0] sm:$0xff] }
 0x2b5   :  { %961 = vmatmul.f32.gmra.mxu3 %v729_v63  ;;  %1026 = vmatmul.f32.gmra.mxu0 %v698_v11  ;;  %v1404_v63 = vld [vmem:[#allocation7 + $0x138] sm:$0xff]  ;;  %v519_v11 = vld [vmem:[#allocation6 + $0xe0] sm:$0xff] }
 0x2b6   :  { %1154 = vmatmul.f32.gmra.mxu1 %v513_v2  ;;  %1421 = vmatpush.msrb.mxu3 %v1404_v63  ;;  %v1401_v2 = vld [vmem:[#allocation7 + $0x120] sm:$0xff] }
 0x2b7   :  { %1255 = vmatmul.f32.gmra.mxu2 %v506_v25 }
 0x2b8   :  { %v7807_v9 = vpop.f32.mrf.mxu3  ;;  %1422 = vmatpush.msrb.mxu3 %v1403_v3  ;;  %v527_v3 = vld [vmem:[#allocation6 + $0x120] sm:$0xff] }
 0x2bd   :  { %964 = vmatmul.f32.gmra.mxu3 %v731_v29  ;;  %1029 = vmatmul.f32.gmra.mxu0 %v700_v22  ;;  %v1402_v29 = vld [vmem:[#allocation7 + $0x128] sm:$0xff]  ;;  %v739_v22 = vld [vmem:[#allocation6 + $0x3b0] sm:$0xff] }
 0x2be   :  { %1157 = vmatmul.f32.gmra.mxu1 %v515_v38  ;;  %1423 = vmatpush.msrb.mxu3 %v1402_v29  ;;  %v1399_v38 = vld [vmem:[#allocation7 + $0x110] sm:$0xff] }
 0x2bf   :  { %1258 = vmatmul.f32.gmra.mxu2 %v508_v31  ;;  %v708_v31 = vld [vmem:[#allocation6 + $0x2b8] sm:$0xff] }
 0x2c0   :  { %v7809_v35 = vpop.f32.mrf.mxu3  ;;  %1424 = vmatpush.msrb.mxu3 %v1401_v2  ;;  %v524_v2 = vld [vmem:[#allocation6 + $0x108] sm:$0xff] }
 0x2c3   :  { %v1122_v63 = vpop.f32.mrf.mxu1 }
 0x2c5   :  { %967 = vmatmul.f32.gmra.mxu3 %v733_v21  ;;  %1032 = vmatmul.f32.gmra.mxu0 %v702_v18  ;;  %v516_v21 = vld [vmem:[#allocation6 + $0xc8] sm:$0xff]  ;;  %v1400_v18 = vld [vmem:[#allocation7 + $0x118] sm:$0xff] }
 0x2c6   :  { %1160 = vmatmul.f32.gmra.mxu1 %v517_v47  ;;  %1425 = vmatpush.msrb.mxu3 %v1400_v18  ;;  %v743_v47 = vld [vmem:[#allocation6 + $0x3d0] sm:$0xff] }
 0x2c7   :  { %1261 = vmatmul.f32.gmra.mxu2 %v510_v41  ;;  %v521_v41 = vld [vmem:[#allocation6 + $0xf0] sm:$0xff] }
 0x2c8   :  { %v7811_v49 = vpop.f32.mrf.mxu3  ;;  %1426 = vmatpush.msrb.mxu3 %v1399_v38  ;;  %v529_v18 = vld [vmem:[#allocation6 + $0x130] sm:$0xff] }
 0x2cd   :  { %970 = vmatmul.f32.gmra.mxu3 %v735_v58  ;;  %1035 = vmatmul.f32.gmra.mxu0 %v704_v27  ;;  %v1398_v58 = vld [vmem:[#allocation7 + $0x108] sm:$0xff]  ;;  %v518_v27 = vld [vmem:[#allocation6 + $0xd8] sm:$0xff] }
 0x2ce   :  { %1163 = vmatmul.f32.gmra.mxu1 %v519_v11  ;;  %1427 = vmatpush.msrb.mxu3 %v1398_v58  ;;  %v522_v11 = vld [vmem:[#allocation6 + $0xf8] sm:$0xff] }
 0x2cf   :  { %1264 = vmatmul.f32.gmra.mxu2 %v512_v50  ;;  %v523_v50 = vld [vmem:[#allocation6 + $0x100] sm:$0xff] }
 0x2d0   :  { %v7813_v57 = vpop.f32.mrf.mxu3  ;;  %1428 = vmatpush.msrb.mxu3 %v1397_v43 }
 0x2d5   :  { %973 = vmatmul.f32.gmra.mxu3 %v737_v51  ;;  %1038 = vmatmul.f32.gmra.mxu0 %v706_v62  ;;  %v525_v51 = vld [vmem:[#allocation6 + $0x110] sm:$0xff] }
 0x2d6   :  { %1166 = vmatmul.f32.gmra.mxu1 %v521_v41 }
 0x2d7   :  { %1267 = vmatmul.f32.gmra.mxu2 %v514_v54  ;;  %v714_v54 = vld [vmem:[#allocation6 + $0x2e8] sm:$0xff] }
 0x2d8   :  { %v7815_v25 = vpop.f32.mrf.mxu3 }
 0x2dd   :  { %976 = vmatmul.f32.gmra.mxu3 %v739_v22  ;;  %1041 = vmatmul.f32.gmra.mxu0 %v708_v31  ;;  %v747_v22 = vld [vmem:[#allocation6 + $0x3f0] sm:$0xff]  ;;  %v716_v31 = vld [vmem:[#allocation6 + $0x2f8] sm:$0xff] }
 0x2de   :  { %1169 = vmatmul.f32.gmra.mxu1 %v523_v50 }
 0x2df   :  { %1270 = vmatmul.f32.gmra.mxu2 %v516_v21  ;;  %v1125_v21 = vpop.f32.mrf.mxu1 }
 0x2e0   :  { %v7817_v45 = vpop.f32.mrf.mxu3 }
 0x2e1   :  { %11043 = vst [vmem:[#allocation41_spill] sm:$0xff] %v7817_v45 }
 0x2e5   :  { %979 = vmatmul.f32.gmra.mxu3 %v741_v0  ;;  %1044 = vmatmul.f32.gmra.mxu0 %v710_v55  ;;  %v718_v55 = vld [vmem:[#allocation6 + $0x308] sm:$0xff] }
 0x2e6   :  { %1172 = vmatmul.f32.gmra.mxu1 %v525_v51 }
 0x2e7   :  { %1273 = vmatmul.f32.gmra.mxu2 %v518_v27  ;;  %v526_v27 = vld [vmem:[#allocation6 + $0x118] sm:$0xff] }
 0x2e8   :  { %v7819_v61 = vpop.f32.mrf.mxu3 }
 0x2e9   :  { %11044 = vst [vmem:[#allocation42_spill] sm:$0xff] %v7819_v61  ;;  %v1383_v61 = vld [vmem:[#allocation6 + $0x598] sm:$0xff] }
 0x2ed   :  { %982 = vmatmul.f32.gmra.mxu3 %v743_v47  ;;  %1047 = vmatmul.f32.gmra.mxu0 %v712_v23  ;;  %v1128_v47 = vpop.f32.mrf.mxu1  ;;  %v531_v23 = vld [vmem:[#allocation6 + $0x140] sm:$0xff] }
 0x2ee   :  { %1175 = vmatmul.f32.gmra.mxu1 %v527_v3  ;;  %v528_v3 = vld [vmem:[#allocation6 + $0x128] sm:$0xff] }
 0x2ef   :  { %1276 = vmatmul.f32.gmra.mxu2 %v520_v5 }
 0x2f0   :  { %v7821_v62 = vpop.f32.mrf.mxu3 }
 0x2f1   :  { %11045 = vst [vmem:[#allocation43_spill] sm:$0xff] %v7821_v62  ;;  %v1350_v62 = vld [vmem:[#allocation6 + $0x490] sm:$0xff] }
 0x2f5   :  { %985 = vmatmul.f32.gmra.mxu3 %v745_v34  ;;  %1050 = vmatmul.f32.gmra.mxu0 %v714_v54  ;;  %v720_v54 = vld [vmem:[#allocation6 + $0x318] sm:$0xff] }
 0x2f6   :  { %1178 = vmatmul.f32.gmra.mxu1 %v529_v18 }
 0x2f7   :  { %1279 = vmatmul.f32.gmra.mxu2 %v522_v11 }
 0x2f8   :  { %v7823_v29 = vpop.f32.mrf.mxu3 }
 0x2f9   :  { %11046 = vst [vmem:[#allocation44_spill] sm:$0xff] %v7823_v29  ;;  %v11095_v29 = vld [vmem:[#allocation40_spill] sm:$0xff] }
 0x2fd   :  { %988 = vmatmul.f32.gmra.mxu3 %v747_v22  ;;  %1053 = vmatmul.f32.gmra.mxu0 %v716_v31  ;;  %v533_v22 = vld [vmem:[#allocation6 + $0x150] sm:$0xff] }
 0x2fe   :  { %1181 = vmatmul.f32.gmra.mxu1 %v531_v23 }
 0x2ff   :  { %1282 = vmatmul.f32.gmra.mxu2 %v524_v2  ;;  %v1131_v2 = vpop.f32.mrf.mxu1 }
 0x300   :  { %v7825_v41 = vpop.f32.mrf.mxu3 }
 0x301   :  { %11047 = vst [vmem:[#allocation45_spill] sm:$0xff] %v7825_v41 }
 0x302   :  { %v1009_v38 = vpop.f32.mrf.mxu0  ;;  %v1235_v0 = vpop.f32.mrf.mxu2 }
 0x303   :  { %v1010_v58 = vadd.f32 %v1009_v38, %v7795_v42 }
 0x305   :  { %v1123_v43 = vadd.f32 %v1122_v63, %v1010_v58  ;;  %1056 = vmatmul.f32.gmra.mxu0 %v718_v55  ;;  %1429 = vmatmul.f32.vlgmr.msrb.gmra.mxu3 %v7498_v4  ;;  %v530_v58 = vld [vmem:[#allocation6 + $0x138] sm:$0xff] }
 0x306   :  { %1184 = vmatmul.f32.gmra.mxu1 %v533_v22 }
 0x307   :  { %v7829_v50 = vadd.f32 %v1235_v0, %v1123_v43  ;;  %1285 = vmatmul.f32.gmra.mxu2 %v526_v27  ;;  %v722_v0 = vld [vmem:[#allocation6 + $0x328] sm:$0xff]  ;;  %v535_v27 = vld [vmem:[#allocation6 + $0x160] sm:$0xff] }
 0x308   :  { %v7831_v5 = vpop.f32.mrf.mxu3 }
 0x309   :  { %11048 = vst [vmem:[#allocation46_spill] sm:$0xff] %v7831_v5 }
 0x30a   :  { %v1012_v51 = vpop.f32.mrf.mxu0  ;;  %v1238_v34 = vpop.f32.mrf.mxu2 }
 0x30b   :  { %v1013_v11 = vadd.f32 %v1012_v51, %v7797_v17 }
 0x30d   :  { %v1126_v42 = vadd.f32 %v1125_v21, %v1013_v11  ;;  %1059 = vmatmul.f32.gmra.mxu0 %v720_v54  ;;  %1432 = vmatmul.f32.gmra.mxu3 %v7506_v8  ;;  %v1134_v11 = vpop.f32.mrf.mxu1 }
 0x30e   :  { %1187 = vmatmul.f32.gmra.mxu1 %v535_v27  ;;  %v539_v27 = vld [vmem:[#allocation6 + $0x180] sm:$0xff] }
 0x30f   :  { %v7835_v63 = vadd.f32 %v1238_v34, %v1126_v42  ;;  %1288 = vmatmul.f32.gmra.mxu2 %v528_v3  ;;  %v724_v34 = vld [vmem:[#allocation6 + $0x338] sm:$0xff]  ;;  %v532_v3 = vld [vmem:[#allocation6 + $0x148] sm:$0xff]  ;;  %v537_v42 = vld [vmem:[#allocation6 + $0x170] sm:$0xff] }
 0x310   :  { %v7837_v31 = vpop.f32.mrf.mxu3 }
 0x311   :  { %11049 = vst [vmem:[#allocation47_spill] sm:$0xff] %v7837_v31 }
 0x312   :  { %v1015_v18 = vpop.f32.mrf.mxu0  ;;  %v1241_v38 = vpop.f32.mrf.mxu2 }
 0x313   :  { %v1016_v55 = vadd.f32 %v1015_v18, %v7799_v10 }
 0x315   :  { %v1129_v17 = vadd.f32 %v1128_v47, %v1016_v55  ;;  %1062 = vmatmul.f32.gmra.mxu0 %v722_v0  ;;  %1435 = vmatmul.f32.gmra.mxu3 %v7514_v12  ;;  %v726_v0 = vld [vmem:[#allocation6 + $0x348] sm:$0xff] }
 0x316   :  { %1190 = vmatmul.f32.gmra.mxu1 %v537_v42 }
 0x317   :  { %v7841_v21 = vadd.f32 %v1241_v38, %v1129_v17  ;;  %1291 = vmatmul.f32.gmra.mxu2 %v530_v58  ;;  %v534_v58 = vld [vmem:[#allocation6 + $0x158] sm:$0xff] }
 0x318   :  { %v7843_v43 = vpop.f32.mrf.mxu3 }
 0x319   :  { %11050 = vst [vmem:[#allocation48_spill] sm:$0xff] %v7843_v43  ;;  %v11081_v43 = vld [vmem:[#allocation36_spill] sm:$0xff] }
 0x31a   :  { %v1018_v23 = vpop.f32.mrf.mxu0  ;;  %v1244_v51 = vpop.f32.mrf.mxu2 }
 0x31b   :  { %v1019_v54 = vadd.f32 %v1018_v23, %v7801_v7 }
 0x31d   :  { %v1132_v10 = vadd.f32 %v1131_v2, %v1019_v54  ;;  %1065 = vmatmul.f32.gmra.mxu0 %v724_v34  ;;  %1438 = vmatmul.f32.gmra.mxu3 %v7522_v16  ;;  %v1137_v2 = vpop.f32.mrf.mxu1  ;;  %v728_v54 = vld [vmem:[#allocation6 + $0x358] sm:$0xff] }
 0x31e   :  { %1193 = vmatmul.f32.gmra.mxu1 %v539_v27  ;;  %v538_v27 = vld [vmem:[#allocation6 + $0x178] sm:$0xff] }
 0x31f   :  { %v7847_v47 = vadd.f32 %v1244_v51, %v1132_v10  ;;  %1294 = vmatmul.f32.gmra.mxu2 %v532_v3  ;;  %v536_v10 = vld [vmem:[#allocation6 + $0x168] sm:$0xff] }
 0x320   :  { %v7849_v22 = vpop.f32.mrf.mxu3 }
 0x321   :  { %11051 = vst [vmem:[#allocation49_spill] sm:$0xff] %v7849_v22 }
 0x322   :  { %v1021_v18 = vpop.f32.mrf.mxu0  ;;  %v1247_v38 = vpop.f32.mrf.mxu2 }
 0x323   :  { %v1022_v55 = vadd.f32 %v1021_v18, %v7803_v15  ;;  %v541_v18 = vld [vmem:[#allocation6 + $0x190] sm:$0xff] }
 0x325   :  { %v1135_v7 = vadd.f32 %v1134_v11, %v1022_v55  ;;  %1068 = vmatmul.f32.gmra.mxu0 %v726_v0  ;;  %1441 = vmatmul.f32.gmra.mxu3 %v7530_v20  ;;  %v1140_v42 = vpop.f32.mrf.mxu1 }
 0x326   :  { %1196 = vmatmul.f32.gmra.mxu1 %v541_v18 }
 0x327   :  { %v7853_v17 = vadd.f32 %v1247_v38, %v1135_v7  ;;  %1297 = vmatmul.f32.gmra.mxu2 %v534_v58  ;;  %v730_v58 = vld [vmem:[#allocation6 + $0x368] sm:$0xff] }
 0x328   :  { %v7855_v23 = vpop.f32.mrf.mxu3 }
 0x329   :  { %11052 = vst [vmem:[#allocation50_spill] sm:$0xff] %v7855_v23 }
 0x32a   :  { %v1024_v51 = vpop.f32.mrf.mxu0  ;;  %v1250_v34 = vpop.f32.mrf.mxu2 }
 0x32b   :  { %v1025_v3 = vadd.f32 %v1024_v51, %v7805_v30  ;;  %v543_v51 = vld [vmem:[#allocation6 + $0x1a0] sm:$0xff] }
 0x32d   :  { %v1138_v15 = vadd.f32 %v1137_v2, %v1025_v3  ;;  %1071 = vmatmul.f32.gmra.mxu0 %v728_v54  ;;  %1444 = vmatmul.f32.gmra.mxu3 %v7538_v24  ;;  %v1143_v54 = vpop.f32.mrf.mxu1 }
 0x32e   :  { %1199 = vmatmul.f32.gmra.mxu1 %v543_v51  ;;  %v1863_v51 = vld [vmem:[#allocation7 + $0x1e8] sm:$0xff] }
 0x32f   :  { %v7859_v11 = vadd.f32 %v1250_v34, %v1138_v15  ;;  %1300 = vmatmul.f32.gmra.mxu2 %v536_v10  ;;  %v732_v15 = vld [vmem:[#allocation6 + $0x378] sm:$0xff] }
 0x330   :  { %v7861_v38 = vpop.f32.mrf.mxu3 }
 0x331   :  { %11053 = vst [vmem:[#allocation51_spill] sm:$0xff] %v7861_v38  ;;  %v540_v38 = vld [vmem:[#allocation6 + $0x188] sm:$0xff] }
 0x332   :  { %v1027_v0 = vpop.f32.mrf.mxu0  ;;  %v1253_v55 = vpop.f32.mrf.mxu2 }
 0x333   :  { %v1028_v7 = vadd.f32 %v1027_v0, %v7807_v9  ;;  %v545_v0 = vld [vmem:[#allocation6 + $0x1b0] sm:$0xff] }
 0x335   :  { %v1141_v30 = vadd.f32 %v1140_v42, %v1028_v7  ;;  %1074 = vmatmul.f32.gmra.mxu0 %v730_v58  ;;  %1447 = vmatmul.f32.gmra.mxu3 %v7546_v28  ;;  %v1865_v58 = vld [vmem:[#allocation7 + $0x1f8] sm:$0xff] }
 0x336   :  { %1202 = vmatmul.f32.gmra.mxu1 %v545_v0  ;;  %1866 = vmatpush.msra.mxu2 %v1865_v58  ;;  %v544_v0 = vld [vmem:[#allocation6 + $0x1a8] sm:$0xff] }
 0x337   :  { %v7865_v2 = vadd.f32 %v1253_v55, %v1141_v30  ;;  %1303 = vmatmul.f32.gmra.mxu2 %v538_v27  ;;  %v734_v27 = vld [vmem:[#allocation6 + $0x388] sm:$0xff]  ;;  %v1864_v30 = vld [vmem:[#allocation7 + $0x1f0] sm:$0xff] }
 0x338   :  { %v7867_v34 = vpop.f32.mrf.mxu3  ;;  %1867 = vmatpush.msra.mxu2 %v1864_v30  ;;  %v1859_v58 = vld [vmem:[#allocation7 + $0x1c8] sm:$0xff]  ;;  %v549_v30 = vld [vmem:[#allocation6 + $0x1d0] sm:$0xff] }
 0x339   :  { %11054 = vst [vmem:[#allocation52_spill] sm:$0xff] %v7867_v34 }
 0x33a   :  { %v1030_v3 = vpop.f32.mrf.mxu0  ;;  %v1256_v10 = vpop.f32.mrf.mxu2  ;;  %1868 = vmatpush.msra.mxu2 %v1863_v51  ;;  %v1857_v51 = vld [vmem:[#allocation7 + $0x1b8] sm:$0xff] }
 0x33b   :  { %v1031_v18 = vadd.f32 %v1030_v3, %v7809_v35  ;;  %v542_v35 = vld [vmem:[#allocation6 + $0x198] sm:$0xff] }
 0x33d   :  { %v1144_v9 = vadd.f32 %v1143_v54, %v1031_v18  ;;  %1077 = vmatmul.f32.gmra.mxu0 %v732_v15  ;;  %1450 = vmatmul.f32.gmra.mxu3 %v7554_v32  ;;  %v1862_v54 = vld [vmem:[#allocation7 + $0x1e0] sm:$0xff]  ;;  %v736_v18 = vld [vmem:[#allocation6 + $0x398] sm:$0xff] }
 0x33e   :  { %1869 = vmatpush.msra.mxu2 %v1862_v54 }
 0x33f   :  { %v7871_v42 = vadd.f32 %v1256_v10, %v1144_v9  ;;  %1306 = vmatmul.f32.gmra.mxu2 %v540_v38  ;;  %v547_v38 = vld [vmem:[#allocation6 + $0x1c0] sm:$0xff]  ;;  %v1861_v10 = vld [vmem:[#allocation7 + $0x1d8] sm:$0xff]  ;;  %v1860_v9 = vld [vmem:[#allocation7 + $0x1d0] sm:$0xff] }
 0x340   :  { %v7873_v55 = vpop.f32.mrf.mxu3  ;;  %1205 = vmatmul.f32.gmra.mxu1 %v547_v38  ;;  %1870 = vmatpush.msra.mxu2 %v1861_v10  ;;  %v738_v38 = vld [vmem:[#allocation6 + $0x3a8] sm:$0xff]  ;;  %v1856_v10 = vld [vmem:[#allocation7 + $0x1b0] sm:$0xff] }
 0x341   :  { %11055 = vst [vmem:[#allocation53_spill] sm:$0xff] %v7873_v55  ;;  %v548_v55 = vld [vmem:[#allocation6 + $0x1c8] sm:$0xff] }
 0x342   :  { %v7875_v7 = vpop.f32.mrf.mxu2  ;;  %1871 = vmatpush.msra.mxu2 %v1860_v9  ;;  %v1855_v9 = vld [vmem:[#allocation7 + $0x1a8] sm:$0xff] }
 0x344   :  { %1872 = vmatpush.msra.mxu2 %v1859_v58 }
 0x345   :  { %1080 = vmatmul.f32.gmra.mxu0 %v734_v27  ;;  %1453 = vmatmul.f32.gmra.mxu3 %v7562_v36  ;;  %v1858_v27 = vld [vmem:[#allocation7 + $0x1c0] sm:$0xff] }
 0x346   :  { %1873 = vmatpush.msra.mxu2 %v1858_v27  ;;  %v1853_v27 = vld [vmem:[#allocation7 + $0x198] sm:$0xff] }
 0x347   :  { %1309 = vmatmul.f32.gmra.mxu2 %v542_v35 }
 0x348   :  { %v7878_v3 = vpop.f32.mrf.mxu3  ;;  %1208 = vmatmul.f32.gmra.mxu1 %v549_v30  ;;  %1874 = vmatpush.msra.mxu2 %v1857_v51  ;;  %v1852_v51 = vld [vmem:[#allocation7 + $0x190] sm:$0xff] }
 0x349   :  { %11056 = vst [vmem:[#allocation54_spill] sm:$0xff] %v7878_v3  ;;  %v546_v3 = vld [vmem:[#allocation6 + $0x1b8] sm:$0xff] }
 0x34a   :  { %v7880_v15 = vpop.f32.mrf.mxu2  ;;  %1875 = vmatpush.msra.mxu2 %v1856_v10  ;;  %v1851_v10 = vld [vmem:[#allocation7 + $0x188] sm:$0xff] }
 0x34c   :  { %1876 = vmatpush.msra.mxu2 %v1855_v9 }
 0x34d   :  { %1083 = vmatmul.f32.gmra.mxu0 %v736_v18  ;;  %1456 = vmatmul.f32.gmra.mxu3 %v7570_v40  ;;  %v1854_v18 = vld [vmem:[#allocation7 + $0x1a0] sm:$0xff] }
 0x34e   :  { %1877 = vmatpush.msra.mxu2 %v1854_v18 }
 0x34f   :  { %1312 = vmatmul.f32.gmra.mxu2 %v544_v0  ;;  %v551_v0 = vld [vmem:[#allocation6 + $0x1e0] sm:$0xff] }
 0x350   :  { %v7883_v35 = vpop.f32.mrf.mxu3  ;;  %1211 = vmatmul.f32.gmra.mxu1 %v551_v0  ;;  %1878 = vmatpush.msra.mxu2 %v1853_v27  ;;  %v742_v0 = vld [vmem:[#allocation6 + $0x3c8] sm:$0xff] }
 0x351   :  { %11057 = vst [vmem:[#allocation55_spill] sm:$0xff] %v7883_v35  ;;  %v740_v35 = vld [vmem:[#allocation6 + $0x3b8] sm:$0xff] }
 0x352   :  { %v7885_v54 = vpop.f32.mrf.mxu2  ;;  %1879 = vmatpush.msra.mxu2 %v1852_v51  ;;  %v744_v51 = vld [vmem:[#allocation6 + $0x3d8] sm:$0xff] }
 0x353   :  { %11058 = vst [vmem:[#allocation56_spill] sm:$0xff] %v7885_v54 }
 0x354   :  { %1880 = vmatpush.msra.mxu2 %v1851_v10  ;;  %v552_v10 = vld [vmem:[#allocation6 + $0x1e8] sm:$0xff] }
 0x355   :  { %1086 = vmatmul.f32.gmra.mxu0 %v738_v38  ;;  %1459 = vmatmul.f32.gmra.mxu3 %v7578_v44  ;;  %v1850_v38 = vld [vmem:[#allocation7 + $0x180] sm:$0xff] }
 0x356   :  { %1881 = vmatpush.msra.mxu2 %v1850_v38 }
 0x357   :  { %1315 = vmatmul.f32.gmra.mxu2 %v546_v3  ;;  %v553_v3 = vld [vmem:[#allocation6 + $0x1f0] sm:$0xff] }
 0x358   :  { %v7888_v58 = vpop.f32.mrf.mxu3  ;;  %1214 = vmatmul.f32.gmra.mxu1 %v553_v3  ;;  %v746_v3 = vld [vmem:[#allocation6 + $0x3e8] sm:$0xff] }
 0x359   :  { %11059 = vst [vmem:[#allocation57_spill] sm:$0xff] %v7888_v58  ;;  %v550_v58 = vld [vmem:[#allocation6 + $0x1d8] sm:$0xff] }
 0x35a   :  { %v7890_v30 = vpop.f32.mrf.mxu2 }
 0x35b   :  { %11060 = vst [vmem:[#allocation58_spill] sm:$0xff] %v7890_v30  ;;  %v2501_v30 = vld [vmem:[#allocation10 + $0x620] sm:$0xff] }
 0x35c   :  { %2626 = vmatpush.msrb.mxu2 %v2501_v30  ;;  %v2462_v30 = vld [vmem:[#allocation10 + $0x4e8] sm:$0xff] }
 0x35d   :  { %1089 = vmatmul.f32.gmra.mxu0 %v740_v35  ;;  %1462 = vmatmul.f32.gmra.mxu3 %v7586_v48 }
 0x35f   :  { %1318 = vmatmul.f32.gmra.mxu2 %v548_v55 }
 0x360   :  { %v7893_v9 = vpop.f32.mrf.mxu3 }
 0x361   :  { %11061 = vst [vmem:[#allocation59_spill] sm:$0xff] %v7893_v9  ;;  %v554_v9 = vld [vmem:[#allocation6 + $0x1f8] sm:$0xff] }
 0x362   :  { %v7895_v18 = vpop.f32.mrf.mxu2 }
 0x363   :  { %11062 = vst [vmem:[#allocation60_spill] sm:$0xff] %v7895_v18 }
 0x365   :  { %1092 = vmatmul.f32.gmra.mxu0 %v742_v0  ;;  %1465 = vmatmul.f32.gmra.mxu3 %v7594_v52 }
 0x367   :  { %1321 = vmatmul.f32.gmra.mxu2 %v550_v58 }
 0x368   :  { %v7898_v27 = vpop.f32.mrf.mxu3 }
 0x369   :  { %11063 = vst [vmem:[#allocation61_spill] sm:$0xff] %v7898_v27  ;;  %v748_v27 = vld [vmem:[#allocation6 + $0x3f8] sm:$0xff] }
 0x36a   :  { %v7900_v35 = vpop.f32.mrf.mxu2 }
 0x36b   :  { %11064 = vst [vmem:[#allocation62_spill] sm:$0xff] %v7900_v35  ;;  %v1348_v35 = vld [vmem:[#allocation6 + $0x480] sm:$0xff] }
 0x36d   :  { %1095 = vmatmul.f32.gmra.mxu0 %v744_v51  ;;  %1468 = vmatmul.f32.gmra.mxu3 %v7602_v56 }
 0x36f   :  { %1324 = vmatmul.f32.gmra.mxu2 %v552_v10 }
 0x370   :  { %v7903_v55 = vpop.f32.mrf.mxu3 }
 0x371   :  { %11065 = vst [vmem:[#allocation63_spill] sm:$0xff] %v7903_v55 }
 0x372   :  { %v7905_v38 = vpop.f32.mrf.mxu2 }
 0x373   :  { %11066 = vst [vmem:[#allocation64_spill] sm:$0xff] %v7905_v38 }
 0x375   :  { %1098 = vmatmul.f32.gmra.mxu0 %v746_v3  ;;  %1471 = vmatmul.f32.gmra.mxu3 %v7610_v60 }
 0x377   :  { %1327 = vmatmul.f32.gmra.mxu2 %v554_v9 }
 0x378   :  { %v7908_v58 = vpop.f32.mrf.mxu3 }
 0x379   :  { %11067 = vst [vmem:[#allocation65_spill] sm:$0xff] %v7908_v58 }
 0x37a   :  { %v7910_v0 = vpop.f32.mrf.mxu2 }
 0x37b   :  { %11068 = vst [vmem:[#allocation66_spill] sm:$0xff] %v7910_v0  ;;  %v11089_v0 = vld [vmem:[#allocation39_spill] sm:$0xff] }
 0x37d   :  { %1101 = vmatmul.f32.gmra.mxu0 %v748_v27  ;;  %1474 = vmatmul.f32.gmra.mxu3 %v7618_v1 }
 0x37f   :  { %1882 = vmatmul.f32.vlgmr.msra.gmra.mxu2 %v7498_v4 }
 0x380   :  { %v7914_v51 = vpop.f32.mrf.mxu3 }
 0x381   :  { %11069 = vst [vmem:[#allocation67_spill] sm:$0xff] %v7914_v51 }
 0x382   :  { %v7916_v10 = vpop.f32.mrf.mxu2 }
 0x383   :  { %11070 = vst [vmem:[#allocation68_spill] sm:$0xff] %v7916_v10  ;;  %v11086_v10 = vld [vmem:[#allocation38_spill] sm:$0xff] }
 0x385   :  { %1477 = vmatmul.f32.gmra.mxu3 %v7625_v6 }
 0x387   :  { %1885 = vmatmul.f32.gmra.mxu2 %v7506_v8 }
 0x388   :  { %v7920_v3 = vpop.f32.mrf.mxu3 }
 0x38a   :  { %v7922_v9 = vpop.f32.mrf.mxu2 }
 0x38b   :  { %11071 = vst [vmem:[#allocation69_spill] sm:$0xff] %v7922_v9  ;;  %v11083_v9 = vld [vmem:[#allocation37_spill] sm:$0xff] }
 0x38d   :  { %1480 = vmatmul.f32.gmra.mxu3 %v7634_v13 }
 0x38f   :  { %1888 = vmatmul.f32.gmra.mxu2 %v7514_v12 }
 0x390   :  { %v7926_v27 = vpop.f32.mrf.mxu3 }
 0x392   :  { %v7928_v58 = vpop.f32.mrf.mxu2 }
 0x393   :  { %11072 = vst [vmem:[#allocation70_spill] sm:$0xff] %v7928_v58 }
 0x395   :  { %1483 = vmatmul.f32.gmra.mxu3 %v7643_v19 }
 0x397   :  { %1891 = vmatmul.f32.gmra.mxu2 %v7522_v16  ;;  %v7949_v16 = vpop.f32.mrf.mxu0 }
 0x398   :  { %v7932_v4 = vpop.f32.mrf.mxu3 }
 0x39a   :  { %v7934_v51 = vpop.f32.mrf.mxu2 }
 0x39b   :  { %11073 = vst [vmem:[#allocation71_spill] sm:$0xff] %v7934_v51 }
 0x39d   :  { %1486 = vmatmul.f32.gmra.mxu3 %v7652_v26 }
 0x39f   :  { %1894 = vmatmul.f32.gmra.mxu2 %v7530_v20 }
 0x3a0   :  { %v7938_v8 = vpop.f32.mrf.mxu3 }
 0x3a2   :  { %v7940_v55 = vpop.f32.mrf.mxu2 }
 0x3a3   :  { %11074 = vst [vmem:[#allocation72_spill] sm:$0xff] %v7940_v55 }
 0x3a5   :  { %1489 = vmatmul.f32.gmra.mxu3 %v7661_v33 }
 0x3a7   :  { %1897 = vmatmul.f32.gmra.mxu2 %v7538_v24  ;;  %v7958_v24 = vpop.f32.mrf.mxu0 }
 0x3a8   :  { %v7944_v12 = vpop.f32.mrf.mxu3 }
 0x3aa   :  { %v7946_v34 = vpop.f32.mrf.mxu2 }
 0x3ab   :  { %11075 = vst [vmem:[#allocation73_spill] sm:$0xff] %v7946_v34 }
 0x3ad   :  { %1492 = vmatmul.f32.gmra.mxu3 %v7670_v39 }
 0x3af   :  { %1900 = vmatmul.f32.gmra.mxu2 %v7546_v28  ;;  %v7966_v28 = vpop.f32.mrf.mxu0 }
 0x3b0   :  { %v7952_v23 = vpop.f32.mrf.mxu3 }
 0x3b2   :  { %v7954_v20 = vpop.f32.mrf.mxu2 }
 0x3b3   :  { %11076 = vst [vmem:[#allocation74_spill] sm:$0xff] %v7954_v20 }
 0x3b5   :  { %1495 = vmatmul.f32.gmra.mxu3 %v7679_v46 }
 0x3b7   :  { %1903 = vmatmul.f32.gmra.mxu2 %v7554_v32  ;;  %v7972_v58 = vpop.f32.mrf.mxu0 }
 0x3b8   :  { %v1448_v55 = vpop.f32.mrf.mxu3  ;;  %11080 = vst [vmem:[#allocation78_spill] sm:$0xff] %v7972_v58  ;;  %v2476_v58 = vld [vmem:[#allocation10 + $0x558] sm:$0xff] }
 0x3ba   :  { %v7960_v51 = vpop.f32.mrf.mxu2 }
 0x3bb   :  { %11077 = vst [vmem:[#allocation75_spill] sm:$0xff] %v7960_v51 }
 0x3bd   :  { %1498 = vmatmul.f32.gmra.mxu3 %v7688_v53 }
 0x3bf   :  { %1906 = vmatmul.f32.gmra.mxu2 %v7562_v36 }
 0x3c0   :  { %v1451_v34 = vpop.f32.mrf.mxu3 }
 0x3c2   :  { %v7964_v22 = vpop.f32.mrf.mxu2 }
 0x3c3   :  { %11078 = vst [vmem:[#allocation76_spill] sm:$0xff] %v7964_v22  ;;  %v7979_v22 = vpop.f32.mrf.mxu0 }
 0x3c4   :  { %11084 = vst [vmem:[#allocation37_spill] sm:$0xff] %v7979_v22  ;;  %v1354_v22 = vld [vmem:[#allocation6 + $0x4b0] sm:$0xff] }
 0x3c5   :  { %1501 = vmatmul.f32.gmra.mxu3 %v7697_v59 }
 0x3c7   :  { %1909 = vmatmul.f32.gmra.mxu2 %v7570_v40 }
 0x3c8   :  { %v1454_v20 = vpop.f32.mrf.mxu3 }
 0x3ca   :  { %v7970_v32 = vpop.f32.mrf.mxu2 }
 0x3cb   :  { %11079 = vst [vmem:[#allocation77_spill] sm:$0xff] %v7970_v32  ;;  %v7986_v5 = vpop.f32.mrf.mxu0 }
 0x3cc   :  { %11087 = vst [vmem:[#allocation38_spill] sm:$0xff] %v7986_v5 }
 0x3cd   :  { %1504 = vmatmul.f32.gmra.mxu3 %v11081_v43 }
 0x3cf   :  { %1912 = vmatmul.f32.gmra.mxu2 %v7578_v44 }
 0x3d0   :  { %v1457_v51 = vpop.f32.mrf.mxu3 }
 0x3d2   :  { %v7976_v36 = vpop.f32.mrf.mxu2 }
 0x3d3   :  { %11082 = vst [vmem:[#allocation36_spill] sm:$0xff] %v7976_v36 }
 0x3d5   :  { %1507 = vmatmul.f32.gmra.mxu3 %v11083_v9 }
 0x3d7   :  { %1915 = vmatmul.f32.gmra.mxu2 %v7586_v48  ;;  %v7994_v48 = vpop.f32.mrf.mxu0 }
 0x3d8   :  { %v1460_v31 = vpop.f32.mrf.mxu3  ;;  %11091 = vst [vmem:[#allocation81_spill] sm:$0xff] %v7994_v48 }
 0x3da   :  { %v7982_v40 = vpop.f32.mrf.mxu2 }
 0x3db   :  { %11085 = vst [vmem:[#allocation79_spill] sm:$0xff] %v7982_v40 }
 0x3dd   :  { %1510 = vmatmul.f32.gmra.mxu3 %v11086_v10 }
 0x3df   :  { %1918 = vmatmul.f32.gmra.mxu2 %v7594_v52  ;;  %v8000_v38 = vpop.f32.mrf.mxu0 }
 0x3e0   :  { %v1463_v32 = vpop.f32.mrf.mxu3  ;;  %11093 = vst [vmem:[#allocation83_spill] sm:$0xff] %v8000_v38 }
 0x3e2   :  { %v7988_v44 = vpop.f32.mrf.mxu2 }
 0x3e3   :  { %11088 = vst [vmem:[#allocation80_spill] sm:$0xff] %v7988_v44 }
 0x3e5   :  { %1513 = vmatmul.f32.gmra.mxu3 %v11089_v0 }
 0x3e7   :  { %1921 = vmatmul.f32.gmra.mxu2 %v7602_v56 }
 0x3e8   :  { %v1466_v36 = vpop.f32.mrf.mxu3 }
 0x3ea   :  { %v7992_v41 = vpop.f32.mrf.mxu2 }
 0x3eb   :  { %11090 = vst [vmem:[#allocation39_spill] sm:$0xff] %v7992_v41  ;;  %v8007_v41 = vpop.f32.mrf.mxu0 }
 0x3ec   :  { %11096 = vst [vmem:[#allocation40_spill] sm:$0xff] %v8007_v41  ;;  %v1346_v41 = vld [vmem:[#allocation6 + $0x470] sm:$0xff] }
 0x3ed   :  { %1516 = vmatmul.f32.gmra.mxu3 %v7724_v14 }
 0x3ef   :  { %1924 = vmatmul.f32.gmra.mxu2 %v7610_v60 }
 0x3f0   :  { %v1469_v40 = vpop.f32.mrf.mxu3 }
 0x3f2   :  { %v7998_v52 = vpop.f32.mrf.mxu2 }
 0x3f3   :  { %11092 = vst [vmem:[#allocation82_spill] sm:$0xff] %v7998_v52 }
 0x3f5   :  { %1519 = vmatmul.f32.gmra.mxu3 %v7729_v37 }
 0x3f7   :  { %1927 = vmatmul.f32.gmra.mxu2 %v7618_v1  ;;  %v8015_v1 = vpop.f32.mrf.mxu0 }
 0x3f8   :  { %v1472_v44 = vpop.f32.mrf.mxu3  ;;  %11097 = vst [vmem:[#allocation85_spill] sm:$0xff] %v8015_v1 }
 0x3fa   :  { %v8004_v56 = vpop.f32.mrf.mxu2 }
 0x3fb   :  { %11094 = vst [vmem:[#allocation84_spill] sm:$0xff] %v8004_v56 }
 0x3fd   :  { %1522 = vmatmul.f32.gmra.mxu3 %v11095_v29 }
 0x3ff   :  { %1930 = vmatmul.f32.gmra.mxu2 %v7625_v6 }
 0x400   :  { %v1475_v48 = vpop.f32.mrf.mxu3 }
 0x401   :  { %1526 = vmatpush.msra.mxu0 %v1475_v48 }
 0x402   :  { %v8010_v60 = vpop.f32.mrf.mxu2 }
 0x403   :  { %1527 = vmatpush.msra.mxu0 %v1472_v44 }
 0x405   :  { %1528 = vmatpush.msra.mxu0 %v1469_v40 }
 0x407   :  { %1529 = vmatpush.msra.mxu0 %v1466_v36  ;;  %1933 = vmatmul.f32.gmra.mxu2 %v7634_v13  ;;  %v8024_v36 = vpop.f32.mrf.mxu0 }
 0x408   :  { %v8013_v52 = vpop.f32.mrf.mxu3  ;;  %11098 = vst [vmem:[#allocation86_spill] sm:$0xff] %v8024_v36  ;;  %v1344_v36 = vld [vmem:[#allocation6 + $0x460] sm:$0xff] }
 0x409   :  { %1530 = vmatpush.msra.mxu0 %v1463_v32  ;;  %v1338_v32 = vld [vmem:[#allocation6 + $0x430] sm:$0xff] }
 0x40a   :  { %v8017_v56 = vpop.f32.mrf.mxu2 }
 0x40b   :  { %1531 = vmatpush.msra.mxu0 %v1460_v31 }
 0x40d   :  { %1532 = vmatpush.msra.mxu0 %v1457_v51 }
 0x40f   :  { %1533 = vmatpush.msra.mxu0 %v1454_v20  ;;  %1936 = vmatmul.f32.gmra.mxu2 %v7643_v19  ;;  %v8035_v19 = vpop.f32.mrf.mxu0 }
 0x410   :  { %v8020_v6 = vpop.f32.mrf.mxu3  ;;  %11099 = vst [vmem:[#allocation87_spill] sm:$0xff] %v8035_v19 }
 0x411   :  { %1534 = vmatpush.msra.mxu0 %v1451_v34  ;;  %v1332_v34 = vld [vmem:[#allocation6 + $0x400] sm:$0xff] }
 0x412   :  { %v8022_v44 = vpop.f32.mrf.mxu2 }
 0x413   :  { %1535 = vmatpush.msra.mxu0 %v1448_v55  ;;  %v1334_v55 = vld [vmem:[#allocation6 + $0x410] sm:$0xff] }
 0x415   :  { %1536 = vmatpush.msra.mxu0 %v7952_v23 }
 0x417   :  { %1537 = vmatpush.msra.mxu0 %v7944_v12  ;;  %1939 = vmatmul.f32.gmra.mxu2 %v7652_v26  ;;  %v8044_v51 = vpop.f32.mrf.mxu0  ;;  %v8051_v12 = vpop.f32.mrf.mxu1 }
 0x418   :  { %v8029_v13 = vpop.f32.mrf.mxu3  ;;  %11100 = vst [vmem:[#allocation88_spill] sm:$0xff] %v8044_v51  ;;  %v1342_v51 = vld [vmem:[#allocation6 + $0x450] sm:$0xff] }
 0x419   :  { %1538 = vmatpush.msra.mxu0 %v7938_v8 }
 0x41a   :  { %v8032_v31 = vpop.f32.mrf.mxu2 }
 0x41b   :  { %1539 = vmatpush.msra.mxu0 %v7932_v4 }
 0x41d   :  { %1540 = vmatpush.msra.mxu0 %v7926_v27  ;;  %v1336_v27 = vld [vmem:[#allocation6 + $0x420] sm:$0xff] }
 0x41f   :  { %1541 = vmatpush.msra.mxu0 %v7920_v3  ;;  %1942 = vmatmul.f32.gmra.mxu2 %v7661_v33  ;;  %v8056_v3 = vpop.f32.mrf.mxu0  ;;  %v8063_v40 = vpop.f32.mrf.mxu1 }
 0x420   :  { %v8040_v23 = vpop.f32.mrf.mxu3  ;;  %1542 = vmatmul.f32.vlgmr.msra.gmra.mxu0 %v1332_v34  ;;  %11101 = vst [vmem:[#allocation89_spill] sm:$0xff] %v8056_v3 }
 0x422   :  { %v8042_v26 = vpop.f32.mrf.mxu2 }
 0x427   :  { %1945 = vmatmul.f32.gmra.mxu2 %v7670_v39  ;;  %v8067_v34 = vpop.f32.mrf.mxu0  ;;  %v8074_v3 = vpop.f32.mrf.mxu1 }
 0x428   :  { %v8047_v4 = vpop.f32.mrf.mxu3  ;;  %1545 = vmatmul.f32.gmra.mxu0 %v1334_v55  ;;  %11102 = vst [vmem:[#allocation90_spill] sm:$0xff] %v8067_v34 }
 0x429   :  { %11103 = vst [vmem:[#allocation91_spill] sm:$0xff] %v8074_v3  ;;  %v1839_v3 = vld [vmem:[#allocation6 + $0x7b0] sm:$0xff] }
 0x42a   :  { %v8049_v8 = vpop.f32.mrf.mxu2 }
 0x42f   :  { %1948 = vmatmul.f32.gmra.mxu2 %v7679_v46  ;;  %v1340_v46 = vld [vmem:[#allocation6 + $0x440] sm:$0xff]  ;;  %v8081_v34 = vpop.f32.mrf.mxu1 }
 0x430   :  { %v8054_v33 = vpop.f32.mrf.mxu3  ;;  %1548 = vmatmul.f32.gmra.mxu0 %v1336_v27  ;;  %11105 = vst [vmem:[#allocation93_spill] sm:$0xff] %v8081_v34  ;;  %v2487_v34 = vld [vmem:[#allocation10 + $0x5b0] sm:$0xff] }
 0x432   :  { %v8058_v20 = vpop.f32.mrf.mxu2 }
 0x437   :  { %1951 = vmatmul.f32.gmra.mxu2 %v7688_v53  ;;  %v8076_v53 = vpop.f32.mrf.mxu0  ;;  %v8086_v38 = vpop.f32.mrf.mxu1 }
 0x438   :  { %v8061_v39 = vpop.f32.mrf.mxu3  ;;  %1551 = vmatmul.f32.gmra.mxu0 %v1338_v32  ;;  %11104 = vst [vmem:[#allocation92_spill] sm:$0xff] %v8076_v53 }
 0x439   :  { %11107 = vst [vmem:[#allocation95_spill] sm:$0xff] %v8086_v38  ;;  %v1352_v38 = vld [vmem:[#allocation6 + $0x4a0] sm:$0xff] }
 0x43a   :  { %v8065_v48 = vpop.f32.mrf.mxu2 }
 0x43f   :  { %1954 = vmatmul.f32.gmra.mxu2 %v7697_v59  ;;  %v8083_v59 = vpop.f32.mrf.mxu0 }
 0x440   :  { %v8070_v55 = vpop.f32.mrf.mxu3  ;;  %1554 = vmatmul.f32.gmra.mxu0 %v1340_v46  ;;  %11106 = vst [vmem:[#allocation94_spill] sm:$0xff] %v8083_v59  ;;  %v8092_v59 = vpop.f32.mrf.mxu1 }
 0x441   :  { %11109 = vst [vmem:[#allocation97_spill] sm:$0xff] %v8092_v59 }
 0x442   :  { %v8072_v27 = vpop.f32.mrf.mxu2 }
 0x447   :  { %1957 = vmatmul.f32.gmra.mxu2 %v11081_v43  ;;  %v8089_v53 = vpop.f32.mrf.mxu0 }
 0x448   :  { %v8079_v32 = vpop.f32.mrf.mxu3  ;;  %1557 = vmatmul.f32.gmra.mxu0 %v1342_v51  ;;  %11108 = vst [vmem:[#allocation96_spill] sm:$0xff] %v8089_v53 }
 0x44a   :  { %v1910_v19 = vpop.f32.mrf.mxu2 }
 0x44f   :  { %1960 = vmatmul.f32.gmra.mxu2 %v11083_v9 }
 0x450   :  { %v1505_v46 = vpop.f32.mrf.mxu3  ;;  %1560 = vmatmul.f32.gmra.mxu0 %v1344_v36  ;;  %v8094_v36 = vpop.f32.mrf.mxu0 }
 0x451   :  { %11110 = vst [vmem:[#allocation98_spill] sm:$0xff] %v8094_v36 }
 0x452   :  { %v1913_v1 = vpop.f32.mrf.mxu2 }
 0x457   :  { %1963 = vmatmul.f32.gmra.mxu2 %v11086_v10 }
 0x458   :  { %v1508_v43 = vpop.f32.mrf.mxu3  ;;  %1563 = vmatmul.f32.gmra.mxu0 %v1346_v41  ;;  %v8097_v41 = vpop.f32.mrf.mxu1 }
 0x459   :  { %11111 = vst [vmem:[#allocation99_spill] sm:$0xff] %v8097_v41  ;;  %v8099_v53 = vpop.f32.mrf.mxu0  ;;  %v1356_v41 = vld [vmem:[#allocation6 + $0x4c0] sm:$0xff] }
 0x45a   :  { %v1916_v51 = vpop.f32.mrf.mxu2  ;;  %11112 = vst [vmem:[#allocation100_spill] sm:$0xff] %v8099_v53 }
 0x45f   :  { %1966 = vmatmul.f32.gmra.mxu2 %v11089_v0 }
 0x460   :  { %v1511_v5 = vpop.f32.mrf.mxu3  ;;  %1566 = vmatmul.f32.gmra.mxu0 %v1348_v35  ;;  %v8102_v59 = vpop.f32.mrf.mxu1 }
 0x461   :  { %11113 = vst [vmem:[#allocation101_spill] sm:$0xff] %v8102_v59  ;;  %v8104_v36 = vpop.f32.mrf.mxu0 }
 0x462   :  { %v1919_v9 = vpop.f32.mrf.mxu2  ;;  %11114 = vst [vmem:[#allocation102_spill] sm:$0xff] %v8104_v36  ;;  %v1349_v36 = vld [vmem:[#allocation6 + $0x488] sm:$0xff] }
 0x467   :  { %1969 = vmatmul.f32.gmra.mxu2 %v7724_v14 }
 0x468   :  { %v1514_v18 = vpop.f32.mrf.mxu3  ;;  %1569 = vmatmul.f32.gmra.mxu0 %v1350_v62  ;;  %v8107_v53 = vpop.f32.mrf.mxu1 }
 0x469   :  { %11115 = vst [vmem:[#allocation103_spill] sm:$0xff] %v8107_v53 }
 0x46a   :  { %v1922_v10 = vpop.f32.mrf.mxu2 }
 0x46f   :  { %1972 = vmatmul.f32.gmra.mxu2 %v7729_v37 }
 0x470   :  { %v1517_v0 = vpop.f32.mrf.mxu3  ;;  %1572 = vmatmul.f32.gmra.mxu0 %v1352_v38  ;;  %v8109_v38 = vpop.f32.mrf.mxu0 }
 0x471   :  { %11116 = vst [vmem:[#allocation104_spill] sm:$0xff] %v8109_v38  ;;  %v1380_v38 = vld [vmem:[#allocation6 + $0x580] sm:$0xff] }
 0x472   :  { %v1925_v35 = vpop.f32.mrf.mxu2 }
 0x477   :  { %1975 = vmatmul.f32.gmra.mxu2 %v11095_v29  ;;  %v1358_v29 = vld [vmem:[#allocation6 + $0x4d0] sm:$0xff] }
 0x478   :  { %v1520_v14 = vpop.f32.mrf.mxu3  ;;  %1575 = vmatmul.f32.gmra.mxu0 %v1354_v22  ;;  %v8113_v22 = vpop.f32.mrf.mxu1 }
 0x479   :  { %11117 = vst [vmem:[#allocation105_spill] sm:$0xff] %v8113_v22 }
 0x47a   :  { %v1928_v62 = vpop.f32.mrf.mxu2 }
 0x47b   :  { %1979 = vmatpush.msra.mxu3 %v1928_v62 }
 0x47d   :  { %1980 = vmatpush.msra.mxu3 %v1925_v35  ;;  %v1339_v35 = vld [vmem:[#allocation6 + $0x438] sm:$0xff] }
 0x47f   :  { %1981 = vmatpush.msra.mxu3 %v1922_v10 }
 0x480   :  { %v1523_v37 = vpop.f32.mrf.mxu3  ;;  %1578 = vmatmul.f32.gmra.mxu0 %v1356_v41  ;;  %v8118_v41 = vpop.f32.mrf.mxu0 }
 0x481   :  { %1639 = vmatpush.msra.mxu1 %v1523_v37  ;;  %1982 = vmatpush.msra.mxu3 %v1919_v9  ;;  %11118 = vst [vmem:[#allocation106_spill] sm:$0xff] %v8118_v41 }
 0x482   :  { %v8111_v59 = vpop.f32.mrf.mxu2 }
 0x483   :  { %1640 = vmatpush.msra.mxu1 %v1520_v14  ;;  %1983 = vmatpush.msra.mxu3 %v1916_v51  ;;  %v1793_v14 = vld [vmem:[#allocation6 + $0x640] sm:$0xff] }
 0x485   :  { %1641 = vmatpush.msra.mxu1 %v1517_v0  ;;  %1984 = vmatpush.msra.mxu3 %v1913_v1  ;;  %v1360_v1 = vld [vmem:[#allocation6 + $0x4e0] sm:$0xff]  ;;  %v1370_v0 = vld [vmem:[#allocation6 + $0x530] sm:$0xff] }
 0x487   :  { %1642 = vmatpush.msra.mxu1 %v1514_v18  ;;  %1985 = vmatpush.msra.mxu3 %v1910_v19  ;;  %v8128_v18 = vpop.f32.mrf.mxu1 }
 0x488   :  { %1581 = vmatmul.f32.gmra.mxu0 %v1358_v29  ;;  %11119 = vst [vmem:[#allocation107_spill] sm:$0xff] %v8128_v18  ;;  %v8132_v19 = vpop.f32.mrf.mxu0 }
 0x489   :  { %1643 = vmatpush.msra.mxu1 %v1511_v5  ;;  %1986 = vmatpush.msra.mxu3 %v8072_v27  ;;  %11120 = vst [vmem:[#allocation108_spill] sm:$0xff] %v8132_v19  ;;  %v1347_v19 = vld [vmem:[#allocation6 + $0x478] sm:$0xff] }
 0x48a   :  { %v8116_v10 = vpop.f32.mrf.mxu2 }
 0x48b   :  { %1644 = vmatpush.msra.mxu1 %v1508_v43  ;;  %1987 = vmatpush.msra.mxu3 %v8065_v48 }
 0x48d   :  { %1645 = vmatpush.msra.mxu1 %v1505_v46  ;;  %1988 = vmatpush.msra.mxu3 %v8058_v20  ;;  %v1791_v46 = vld [vmem:[#allocation6 + $0x630] sm:$0xff] }
 0x48f   :  { %1646 = vmatpush.msra.mxu1 %v8079_v32  ;;  %1989 = vmatpush.msra.mxu3 %v8049_v8  ;;  %v1362_v8 = vld [vmem:[#allocation6 + $0x4f0] sm:$0xff]  ;;  %v1337_v32 = vld [vmem:[#allocation6 + $0x428] sm:$0xff] }
 0x490   :  { %1584 = vmatmul.f32.gmra.mxu0 %v1360_v1  ;;  %v1372_v1 = vld [vmem:[#allocation6 + $0x540] sm:$0xff] }
 0x491   :  { %1647 = vmatpush.msra.mxu1 %v8070_v55  ;;  %1990 = vmatpush.msra.mxu3 %v8042_v26  ;;  %v1785_v26 = vld [vmem:[#allocation6 + $0x600] sm:$0xff] }
 0x492   :  { %v8126_v5 = vpop.f32.mrf.mxu2  ;;  %v1789_v55 = vld [vmem:[#allocation6 + $0x620] sm:$0xff] }
 0x493   :  { %1648 = vmatpush.msra.mxu1 %v8061_v39  ;;  %1991 = vmatpush.msra.mxu3 %v8032_v31  ;;  %v8143_v31 = vpop.f32.mrf.mxu1  ;;  %v1366_v39 = vld [vmem:[#allocation6 + $0x510] sm:$0xff] }
 0x494   :  { %11121 = vst [vmem:[#allocation109_spill] sm:$0xff] %v8143_v31  ;;  %v1355_v31 = vld [vmem:[#allocation6 + $0x4b8] sm:$0xff] }
 0x495   :  { %1649 = vmatpush.msra.mxu1 %v8054_v33  ;;  %1992 = vmatpush.msra.mxu3 %v8022_v44  ;;  %v1364_v44 = vld [vmem:[#allocation6 + $0x500] sm:$0xff] }
 0x497   :  { %1650 = vmatpush.msra.mxu1 %v8047_v4  ;;  %1993 = vmatpush.msra.mxu3 %v8017_v56  ;;  %v1333_v4 = vld [vmem:[#allocation6 + $0x408] sm:$0xff]  ;;  %v1787_v56 = vld [vmem:[#allocation6 + $0x610] sm:$0xff] }
 0x498   :  { %1587 = vmatmul.f32.gmra.mxu0 %v1362_v8  ;;  %v1341_v8 = vld [vmem:[#allocation6 + $0x448] sm:$0xff] }
 0x499   :  { %1651 = vmatpush.msra.mxu1 %v8040_v23  ;;  %1994 = vmatpush.msra.mxu3 %v8010_v60 }
 0x49a   :  { %v8140_v20 = vpop.f32.mrf.mxu2  ;;  %1995 = vmatmul.f32.vlgmr.msra.gmra.mxu3 %v1785_v26  ;;  %v1795_v26 = vld [vmem:[#allocation6 + $0x650] sm:$0xff] }
 0x49b   :  { %1652 = vmatpush.msra.mxu1 %v8029_v13  ;;  %v1335_v13 = vld [vmem:[#allocation6 + $0x418] sm:$0xff]  ;;  %v8153_v48 = vpop.f32.mrf.mxu1 }
 0x49c   :  { %11122 = vst [vmem:[#allocation110_spill] sm:$0xff] %v8153_v48  ;;  %v1386_v48 = vld [vmem:[#allocation6 + $0x5b0] sm:$0xff] }
 0x49d   :  { %v8145_v33 = vpop.f32.mrf.mxu0  ;;  %1653 = vmatpush.msra.mxu1 %v8020_v6 }
 0x49f   :  { %1654 = vmatpush.msra.mxu1 %v8013_v52  ;;  %v1368_v52 = vld [vmem:[#allocation6 + $0x520] sm:$0xff] }
 0x4a0   :  { %1590 = vmatmul.f32.gmra.mxu0 %v1364_v44  ;;  %1655 = vmatmul.f32.vlgmr.msra.gmra.mxu1 %v1333_v4 }
 0x4a2   :  { %v8149_v23 = vpop.f32.mrf.mxu2  ;;  %1998 = vmatmul.f32.gmra.mxu3 %v1787_v56 }
 0x4a3   :  { %v8159_v43 = vpop.f32.mrf.mxu1 }
 0x4a4   :  { %11123 = vst [vmem:[#allocation111_spill] sm:$0xff] %v8159_v43  ;;  %v1384_v43 = vld [vmem:[#allocation6 + $0x5a0] sm:$0xff] }
 0x4a5   :  { %v8151_v60 = vpop.f32.mrf.mxu0 }
 0x4a8   :  { %1593 = vmatmul.f32.gmra.mxu0 %v1366_v39  ;;  %1658 = vmatmul.f32.gmra.mxu1 %v1335_v13  ;;  %v1374_v39 = vld [vmem:[#allocation6 + $0x550] sm:$0xff]  ;;  %v1343_v13 = vld [vmem:[#allocation6 + $0x458] sm:$0xff] }
 0x4aa   :  { %v8155_v6 = vpop.f32.mrf.mxu2  ;;  %2001 = vmatmul.f32.gmra.mxu3 %v1789_v55  ;;  %v1797_v55 = vld [vmem:[#allocation6 + $0x660] sm:$0xff] }
 0x4ab   :  { %v8167_v37 = vpop.f32.mrf.mxu1 }
 0x4ac   :  { %11124 = vst [vmem:[#allocation112_spill] sm:$0xff] %v8167_v37 }
 0x4ad   :  { %v8157_v27 = vpop.f32.mrf.mxu0 }
 0x4b0   :  { %1596 = vmatmul.f32.gmra.mxu0 %v1368_v52  ;;  %1661 = vmatmul.f32.gmra.mxu1 %v1337_v32 }
 0x4b2   :  { %v8161_v51 = vpop.f32.mrf.mxu2  ;;  %2004 = vmatmul.f32.gmra.mxu3 %v1791_v46  ;;  %v1376_v46 = vld [vmem:[#allocation6 + $0x560] sm:$0xff] }
 0x4b3   :  { %v8173_v4 = vpop.f32.mrf.mxu1 }
 0x4b4   :  { %11125 = vst [vmem:[#allocation113_spill] sm:$0xff] %v8173_v4  ;;  %v1382_v4 = vld [vmem:[#allocation6 + $0x590] sm:$0xff] }
 0x4b5   :  { %v8163_v9 = vpop.f32.mrf.mxu0 }
 0x4b8   :  { %1599 = vmatmul.f32.gmra.mxu0 %v1370_v0  ;;  %1664 = vmatmul.f32.gmra.mxu1 %v1339_v35  ;;  %v1345_v0 = vld [vmem:[#allocation6 + $0x468] sm:$0xff] }
 0x4ba   :  { %v8165_v62 = vpop.f32.mrf.mxu2  ;;  %2007 = vmatmul.f32.gmra.mxu3 %v1793_v14  ;;  %v1799_v14 = vld [vmem:[#allocation6 + $0x670] sm:$0xff] }
 0x4bb   :  { %v8181_v35 = vpop.f32.mrf.mxu1 }
 0x4bc   :  { %11126 = vst [vmem:[#allocation114_spill] sm:$0xff] %v8181_v35  ;;  %v1803_v35 = vld [vmem:[#allocation6 + $0x690] sm:$0xff] }
 0x4bd   :  { %v8169_v29 = vpop.f32.mrf.mxu0 }
 0x4c0   :  { %1602 = vmatmul.f32.gmra.mxu0 %v1372_v1  ;;  %1667 = vmatmul.f32.gmra.mxu1 %v1341_v8 }
 0x4c2   :  { %v8171_v44 = vpop.f32.mrf.mxu2  ;;  %2010 = vmatmul.f32.gmra.mxu3 %v1795_v26  ;;  %v1378_v26 = vld [vmem:[#allocation6 + $0x570] sm:$0xff] }
 0x4c5   :  { %v8175_v56 = vpop.f32.mrf.mxu0 }
 0x4c8   :  { %1605 = vmatmul.f32.gmra.mxu0 %v1374_v39  ;;  %1670 = vmatmul.f32.gmra.mxu1 %v1343_v13  ;;  %v1801_v39 = vld [vmem:[#allocation6 + $0x680] sm:$0xff]  ;;  %v8185_v13 = vpop.f32.mrf.mxu1 }
 0x4c9   :  { %11127 = vst [vmem:[#allocation115_spill] sm:$0xff] %v8185_v13 }
 0x4ca   :  { %v8177_v52 = vpop.f32.mrf.mxu2  ;;  %2013 = vmatmul.f32.gmra.mxu3 %v1797_v55 }
 0x4cd   :  { %v8179_v32 = vpop.f32.mrf.mxu0 }
 0x4d0   :  { %1608 = vmatmul.f32.gmra.mxu0 %v1376_v46  ;;  %1673 = vmatmul.f32.gmra.mxu1 %v1345_v0  ;;  %v8189_v0 = vpop.f32.mrf.mxu1 }
 0x4d1   :  { %11128 = vst [vmem:[#allocation116_spill] sm:$0xff] %v8189_v0 }
 0x4d2   :  { %v1961_v1 = vpop.f32.mrf.mxu2  ;;  %2016 = vmatmul.f32.gmra.mxu3 %v1799_v14 }
 0x4d5   :  { %v8183_v8 = vpop.f32.mrf.mxu0 }
 0x4d8   :  { %1611 = vmatmul.f32.gmra.mxu0 %v1378_v26  ;;  %1676 = vmatmul.f32.gmra.mxu1 %v1347_v19  ;;  %v1351_v26 = vld [vmem:[#allocation6 + $0x498] sm:$0xff]  ;;  %v1805_v19 = vld [vmem:[#allocation6 + $0x6a0] sm:$0xff] }
 0x4da   :  { %v1964_v55 = vpop.f32.mrf.mxu2  ;;  %2019 = vmatmul.f32.gmra.mxu3 %v1801_v39  ;;  %v8193_v39 = vpop.f32.mrf.mxu1 }
 0x4db   :  { %11129 = vst [vmem:[#allocation117_spill] sm:$0xff] %v8193_v39  ;;  %v1388_v39 = vld [vmem:[#allocation6 + $0x5c0] sm:$0xff] }
 0x4dd   :  { %v8187_v41 = vpop.f32.mrf.mxu0 }
 0x4e0   :  { %1614 = vmatmul.f32.gmra.mxu0 %v1380_v38  ;;  %1679 = vmatmul.f32.gmra.mxu1 %v1349_v36  ;;  %v1353_v38 = vld [vmem:[#allocation6 + $0x4a8] sm:$0xff]  ;;  %v1807_v36 = vld [vmem:[#allocation6 + $0x6b0] sm:$0xff] }
 0x4e2   :  { %v1967_v46 = vpop.f32.mrf.mxu2  ;;  %2022 = vmatmul.f32.gmra.mxu3 %v1803_v35  ;;  %v8199_v18 = vpop.f32.mrf.mxu1 }
 0x4e3   :  { %11132 = vst [vmem:[#allocation120_spill] sm:$0xff] %v8199_v18 }
 0x4e5   :  { %v8191_v14 = vpop.f32.mrf.mxu0 }
 0x4e8   :  { %1617 = vmatmul.f32.gmra.mxu0 %v1382_v4  ;;  %1682 = vmatmul.f32.gmra.mxu1 %v1351_v26  ;;  %v1809_v4 = vld [vmem:[#allocation6 + $0x6c0] sm:$0xff] }
 0x4ea   :  { %v1970_v13 = vpop.f32.mrf.mxu2  ;;  %2025 = vmatmul.f32.gmra.mxu3 %v1805_v19 }
 0x4ed   :  { %v8195_v37 = vpop.f32.mrf.mxu0 }
 0x4ee   :  { %11130 = vst [vmem:[#allocation118_spill] sm:$0xff] %v8195_v37  ;;  %v1385_v37 = vld [vmem:[#allocation6 + $0x5a8] sm:$0xff] }
 0x4f0   :  { %1620 = vmatmul.f32.gmra.mxu0 %v1384_v43  ;;  %1685 = vmatmul.f32.gmra.mxu1 %v1353_v38  ;;  %v1357_v43 = vld [vmem:[#allocation6 + $0x4c8] sm:$0xff]  ;;  %v1811_v38 = vld [vmem:[#allocation6 + $0x6d0] sm:$0xff] }
 0x4f2   :  { %v1973_v35 = vpop.f32.mrf.mxu2  ;;  %2028 = vmatmul.f32.gmra.mxu3 %v1807_v36  ;;  %v8203_v36 = vpop.f32.mrf.mxu1 }
 0x4f3   :  { %11134 = vst [vmem:[#allocation122_spill] sm:$0xff] %v8203_v36  ;;  %v1373_v36 = vld [vmem:[#allocation6 + $0x548] sm:$0xff] }
 0x4f5   :  { %v8197_v0 = vpop.f32.mrf.mxu0 }
 0x4f6   :  { %11131 = vst [vmem:[#allocation119_spill] sm:$0xff] %v8197_v0  ;;  %v2502_v0 = vld [vmem:[#allocation10 + $0x628] sm:$0xff] }
 0x4f7   :  { %2739 = vmatpush.msrb.mxu3 %v2502_v0  ;;  %v2449_v0 = vld [vmem:[#allocation10 + $0x480] sm:$0xff] }
 0x4f8   :  { %1623 = vmatmul.f32.gmra.mxu0 %v1386_v48  ;;  %1688 = vmatmul.f32.gmra.mxu1 %v1355_v31  ;;  %v1390_v31 = vld [vmem:[#allocation6 + $0x5d0] sm:$0xff]  ;;  %v1359_v48 = vld [vmem:[#allocation6 + $0x4d8] sm:$0xff] }
 0x4fa   :  { %v1976_v26 = vpop.f32.mrf.mxu2  ;;  %2031 = vmatmul.f32.gmra.mxu3 %v1809_v4  ;;  %v1813_v4 = vld [vmem:[#allocation6 + $0x6e0] sm:$0xff] }
 0x4fb   :  { %2092 = vmatpush.msrb.mxu0 %v1976_v26  ;;  %v1786_v26 = vld [vmem:[#allocation6 + $0x608] sm:$0xff] }
 0x4fd   :  { %v8201_v19 = vpop.f32.mrf.mxu0  ;;  %2093 = vmatpush.msrb.mxu0 %v1973_v35  ;;  %v1817_v35 = vld [vmem:[#allocation6 + $0x700] sm:$0xff] }
 0x4fe   :  { %11133 = vst [vmem:[#allocation121_spill] sm:$0xff] %v8201_v19 }
 0x4ff   :  { %2094 = vmatpush.msrb.mxu0 %v1970_v13  ;;  %v8209_v13 = vpop.f32.mrf.mxu1 }
 0x500   :  { %1626 = vmatmul.f32.gmra.mxu0 %v1388_v39  ;;  %1691 = vmatmul.f32.gmra.mxu1 %v1357_v43  ;;  %11136 = vst [vmem:[#allocation124_spill] sm:$0xff] %v8209_v13  ;;  %v1815_v39 = vld [vmem:[#allocation6 + $0x6f0] sm:$0xff] }
 0x501   :  { %2095 = vmatpush.msrb.mxu0 %v1967_v46 }
 0x502   :  { %2034 = vmatmul.f32.gmra.mxu3 %v1811_v38  ;;  %v1819_v38 = vld [vmem:[#allocation6 + $0x710] sm:$0xff] }
 0x503   :  { %2096 = vmatpush.msrb.mxu0 %v1964_v55  ;;  %v1392_v55 = vld [vmem:[#allocation6 + $0x5e0] sm:$0xff] }
 0x505   :  { %v8205_v18 = vpop.f32.mrf.mxu0  ;;  %2097 = vmatpush.msrb.mxu0 %v1961_v1  ;;  %v1361_v1 = vld [vmem:[#allocation6 + $0x4e8] sm:$0xff] }
 0x506   :  { %11135 = vst [vmem:[#allocation123_spill] sm:$0xff] %v8205_v18  ;;  %v1381_v18 = vld [vmem:[#allocation6 + $0x588] sm:$0xff] }
 0x507   :  { %2098 = vmatpush.msrb.mxu0 %v8177_v52 }
 0x508   :  { %1629 = vmatmul.f32.gmra.mxu0 %v1390_v31  ;;  %1694 = vmatmul.f32.gmra.mxu1 %v1359_v48  ;;  %v1367_v31 = vld [vmem:[#allocation6 + $0x518] sm:$0xff] }
 0x509   :  { %2099 = vmatpush.msrb.mxu0 %v8171_v44  ;;  %v8218_v44 = vpop.f32.mrf.mxu1  ;;  %v1788_v48 = vld [vmem:[#allocation6 + $0x618] sm:$0xff] }
 0x50a   :  { %2037 = vmatmul.f32.gmra.mxu3 %v1813_v4  ;;  %11138 = vst [vmem:[#allocation126_spill] sm:$0xff] %v8218_v44  ;;  %v1821_v4 = vld [vmem:[#allocation6 + $0x720] sm:$0xff] }
 0x50b   :  { %2100 = vmatpush.msrb.mxu0 %v8165_v62  ;;  %v1394_v62 = vld [vmem:[#allocation6 + $0x5f0] sm:$0xff] }
 0x50d   :  { %v8212_v46 = vpop.f32.mrf.mxu0  ;;  %2101 = vmatpush.msrb.mxu0 %v8161_v51  ;;  %v1363_v51 = vld [vmem:[#allocation6 + $0x4f8] sm:$0xff] }
 0x50e   :  { %11137 = vst [vmem:[#allocation125_spill] sm:$0xff] %v8212_v46 }
 0x50f   :  { %2102 = vmatpush.msrb.mxu0 %v8155_v6 }
 0x510   :  { %1632 = vmatmul.f32.gmra.mxu0 %v1392_v55  ;;  %1697 = vmatmul.f32.gmra.mxu1 %v1361_v1 }
 0x511   :  { %2103 = vmatpush.msrb.mxu0 %v8149_v23 }
 0x512   :  { %2040 = vmatmul.f32.gmra.mxu3 %v1815_v39  ;;  %v1369_v39 = vld [vmem:[#allocation6 + $0x528] sm:$0xff] }
 0x513   :  { %2104 = vmatpush.msrb.mxu0 %v8140_v20  ;;  %v1365_v20 = vld [vmem:[#allocation6 + $0x508] sm:$0xff] }
 0x515   :  { %v8220_v52 = vpop.f32.mrf.mxu0  ;;  %2105 = vmatpush.msrb.mxu0 %v8126_v5 }
 0x516   :  { %11139 = vst [vmem:[#allocation127_spill] sm:$0xff] %v8220_v52  ;;  %v1379_v52 = vld [vmem:[#allocation6 + $0x578] sm:$0xff] }
 0x517   :  { %2106 = vmatpush.msrb.mxu0 %v8116_v10 }
 0x518   :  { %1635 = vmatmul.f32.gmra.mxu0 %v1394_v62  ;;  %1700 = vmatmul.f32.gmra.mxu1 %v1363_v51  ;;  %v1790_v62 = vld [vmem:[#allocation6 + $0x628] sm:$0xff] }
 0x519   :  { %2107 = vmatpush.msrb.mxu0 %v8111_v59 }
 0x51a   :  { %2043 = vmatmul.f32.gmra.mxu3 %v1817_v35  ;;  %v1823_v35 = vld [vmem:[#allocation6 + $0x730] sm:$0xff] }
 0x51d   :  { %v8225_v23 = vpop.f32.mrf.mxu0  ;;  %v8227_v6 = vpop.f32.mrf.mxu1 }
 0x51e   :  { %11140 = vst [vmem:[#allocation128_spill] sm:$0xff] %v8225_v23  ;;  %v8229_v43 = vpop.f32.mrf.mxu3  ;;  %v1377_v23 = vld [vmem:[#allocation6 + $0x568] sm:$0xff] }
 0x520   :  { %1703 = vmatmul.f32.gmra.mxu1 %v1365_v20  ;;  %2108 = vmatmul.f32.vlgmr.msrb.gmra.mxu0 %v1786_v26 }
 0x522   :  { %2046 = vmatmul.f32.gmra.mxu3 %v1819_v38  ;;  %v1371_v38 = vld [vmem:[#allocation6 + $0x538] sm:$0xff] }
 0x525   :  { %v8231_v5 = vpop.f32.mrf.mxu0  ;;  %v8233_v10 = vpop.f32.mrf.mxu1 }
 0x526   :  { %11141 = vst [vmem:[#allocation129_spill] sm:$0xff] %v8231_v5  ;;  %v8235_v59 = vpop.f32.mrf.mxu3  ;;  %v1375_v5 = vld [vmem:[#allocation6 + $0x558] sm:$0xff] }
 0x528   :  { %1706 = vmatmul.f32.gmra.mxu1 %v1367_v31  ;;  %2111 = vmatmul.f32.gmra.mxu0 %v1788_v48  ;;  %v1792_v31 = vld [vmem:[#allocation6 + $0x638] sm:$0xff] }
 0x52a   :  { %2049 = vmatmul.f32.gmra.mxu3 %v1821_v4  ;;  %v1825_v4 = vld [vmem:[#allocation6 + $0x740] sm:$0xff] }
 0x52d   :  { %v8237_v55 = vpop.f32.mrf.mxu0  ;;  %v8239_v1 = vpop.f32.mrf.mxu1 }
 0x52e   :  { %11142 = vst [vmem:[#allocation130_spill] sm:$0xff] %v8237_v55  ;;  %v8241_v51 = vpop.f32.mrf.mxu3 }
 0x530   :  { %1709 = vmatmul.f32.gmra.mxu1 %v1369_v39  ;;  %2114 = vmatmul.f32.gmra.mxu0 %v1790_v62  ;;  %v1794_v39 = vld [vmem:[#allocation6 + $0x648] sm:$0xff] }
 0x532   :  { %2052 = vmatmul.f32.gmra.mxu3 %v1823_v35  ;;  %v1827_v35 = vld [vmem:[#allocation6 + $0x750] sm:$0xff] }
 0x535   :  { %v8243_v20 = vpop.f32.mrf.mxu0  ;;  %v8245_v26 = vpop.f32.mrf.mxu1 }
 0x536   :  { %11143 = vst [vmem:[#allocation131_spill] sm:$0xff] %v8243_v20  ;;  %v8247_v48 = vpop.f32.mrf.mxu3 }
 0x538   :  { %1712 = vmatmul.f32.gmra.mxu1 %v1371_v38  ;;  %2117 = vmatmul.f32.gmra.mxu0 %v1792_v31  ;;  %v1796_v38 = vld [vmem:[#allocation6 + $0x658] sm:$0xff] }
 0x53a   :  { %2055 = vmatmul.f32.gmra.mxu3 %v1825_v4  ;;  %v1829_v4 = vld [vmem:[#allocation6 + $0x760] sm:$0xff] }
 0x53d   :  { %v8249_v44 = vpop.f32.mrf.mxu0  ;;  %v8251_v13 = vpop.f32.mrf.mxu1 }
 0x53e   :  { %11144 = vst [vmem:[#allocation132_spill] sm:$0xff] %v8249_v44  ;;  %v8253_v62 = vpop.f32.mrf.mxu3 }
 0x540   :  { %1715 = vmatmul.f32.gmra.mxu1 %v1373_v36  ;;  %2120 = vmatmul.f32.gmra.mxu0 %v1794_v39  ;;  %v1798_v36 = vld [vmem:[#allocation6 + $0x668] sm:$0xff] }
 0x542   :  { %2058 = vmatmul.f32.gmra.mxu3 %v1827_v35  ;;  %v1831_v35 = vld [vmem:[#allocation6 + $0x770] sm:$0xff] }
 0x545   :  { %v8255_v20 = vpop.f32.mrf.mxu0  ;;  %v8257_v55 = vpop.f32.mrf.mxu1 }
 0x546   :  { %11145 = vst [vmem:[#allocation133_spill] sm:$0xff] %v8255_v20  ;;  %v8259_v31 = vpop.f32.mrf.mxu3 }
 0x548   :  { %1718 = vmatmul.f32.gmra.mxu1 %v1375_v5  ;;  %2123 = vmatmul.f32.gmra.mxu0 %v1796_v38  ;;  %v1800_v5 = vld [vmem:[#allocation6 + $0x678] sm:$0xff] }
 0x54a   :  { %2061 = vmatmul.f32.gmra.mxu3 %v1829_v4  ;;  %v1833_v4 = vld [vmem:[#allocation6 + $0x780] sm:$0xff] }
 0x54d   :  { %v8261_v44 = vpop.f32.mrf.mxu0  ;;  %v8263_v22 = vpop.f32.mrf.mxu1 }
 0x54e   :  { %11146 = vst [vmem:[#allocation134_spill] sm:$0xff] %v8261_v44  ;;  %v8265_v39 = vpop.f32.mrf.mxu3 }
 0x550   :  { %1721 = vmatmul.f32.gmra.mxu1 %v1377_v23  ;;  %2126 = vmatmul.f32.gmra.mxu0 %v1798_v36  ;;  %v1802_v23 = vld [vmem:[#allocation6 + $0x688] sm:$0xff] }
 0x552   :  { %2064 = vmatmul.f32.gmra.mxu3 %v1831_v35  ;;  %v1835_v35 = vld [vmem:[#allocation6 + $0x790] sm:$0xff] }
 0x555   :  { %v8267_v20 = vpop.f32.mrf.mxu0  ;;  %v8269_v53 = vpop.f32.mrf.mxu1 }
 0x556   :  { %11147 = vst [vmem:[#allocation135_spill] sm:$0xff] %v8267_v20  ;;  %v8271_v38 = vpop.f32.mrf.mxu3 }
 0x558   :  { %1724 = vmatmul.f32.gmra.mxu1 %v1379_v52  ;;  %2129 = vmatmul.f32.gmra.mxu0 %v1800_v5  ;;  %v1804_v52 = vld [vmem:[#allocation6 + $0x698] sm:$0xff] }
 0x55a   :  { %2067 = vmatmul.f32.gmra.mxu3 %v1833_v4  ;;  %v1837_v4 = vld [vmem:[#allocation6 + $0x7a0] sm:$0xff] }
 0x55d   :  { %v8273_v44 = vpop.f32.mrf.mxu0  ;;  %v8275_v46 = vpop.f32.mrf.mxu1 }
 0x55e   :  { %11148 = vst [vmem:[#allocation136_spill] sm:$0xff] %v8273_v44  ;;  %v8277_v36 = vpop.f32.mrf.mxu3  ;;  %v2500_v44 = vld [vmem:[#allocation10 + $0x618] sm:$0xff] }
 0x55f   :  { %2513 = vmatpush.msrb.mxu1 %v2500_v44 }
 0x560   :  { %1727 = vmatmul.f32.gmra.mxu1 %v1381_v18  ;;  %2132 = vmatmul.f32.gmra.mxu0 %v1802_v23  ;;  %v2488_v18 = vld [vmem:[#allocation10 + $0x5b8] sm:$0xff]  ;;  %v2489_v23 = vld [vmem:[#allocation10 + $0x5c0] sm:$0xff] }
 0x561   :  { %2514 = vmatpush.msrb.mxu1 %v2487_v34  ;;  %2627 = vmatpush.msrb.mxu2 %v2488_v18  ;;  %v2448_v34 = vld [vmem:[#allocation10 + $0x478] sm:$0xff]  ;;  %v2450_v18 = vld [vmem:[#allocation10 + $0x488] sm:$0xff] }
 0x562   :  { %2070 = vmatmul.f32.gmra.mxu3 %v1835_v35  ;;  %v2474_v35 = vld [vmem:[#allocation10 + $0x548] sm:$0xff] }
 0x563   :  { %2740 = vmatpush.msrb.mxu3 %v2489_v23  ;;  %2515 = vmatpush.msrb.mxu1 %v2474_v35  ;;  %v2436_v23 = vld [vmem:[#allocation10 + $0x418] sm:$0xff]  ;;  %v2437_v35 = vld [vmem:[#allocation10 + $0x420] sm:$0xff] }
 0x565   :  { %v8279_v20 = vpop.f32.mrf.mxu0  ;;  %v8281_v19 = vpop.f32.mrf.mxu1  ;;  %2741 = vmatpush.msrb.mxu3 %v2476_v58 }
 0x566   :  { %11149 = vst [vmem:[#allocation137_spill] sm:$0xff] %v8279_v20  ;;  %v8283_v5 = vpop.f32.mrf.mxu3  ;;  %v2475_v20 = vld [vmem:[#allocation10 + $0x550] sm:$0xff] }
 0x567   :  { %2628 = vmatpush.msrb.mxu2 %v2475_v20  ;;  %v2422_v20 = vld [vmem:[#allocation10 + $0x3a8] sm:$0xff] }
 0x568   :  { %1730 = vmatmul.f32.gmra.mxu1 %v1383_v61  ;;  %2135 = vmatmul.f32.gmra.mxu0 %v1804_v52  ;;  %v1806_v61 = vld [vmem:[#allocation6 + $0x6a8] sm:$0xff] }
 0x569   :  { %v2461_v52 = vld [vmem:[#allocation10 + $0x4e0] sm:$0xff]  ;;  %2629 = vmatpush.msrb.mxu2 %v2462_v30 }
 0x56a   :  { %2073 = vmatmul.f32.gmra.mxu3 %v1837_v4  ;;  %v2463_v4 = vld [vmem:[#allocation10 + $0x4f0] sm:$0xff]  ;;  %2516 = vmatpush.msrb.mxu1 %v2461_v52 }
 0x56b   :  { %2742 = vmatpush.msrb.mxu3 %v2463_v4  ;;  %2630 = vmatpush.msrb.mxu2 %v2449_v0  ;;  %v2410_v4 = vld [vmem:[#allocation10 + $0x348] sm:$0xff]  ;;  %v2396_v0 = vld [vmem:[#allocation10 + $0x2d8] sm:$0xff] }
 0x56c   :  { %2517 = vmatpush.msrb.mxu1 %v2448_v34  ;;  %v1841_v34 = vld [vmem:[#allocation6 + $0x7c0] sm:$0xff] }
 0x56d   :  { %v8285_v45 = vpop.f32.mrf.mxu0  ;;  %v8287_v54 = vpop.f32.mrf.mxu1  ;;  %2743 = vmatpush.msrb.mxu3 %v2450_v18  ;;  %2631 = vmatpush.msrb.mxu2 %v2436_v23  ;;  %v2397_v18 = vld [vmem:[#allocation10 + $0x2e0] sm:$0xff]  ;;  %v2384_v23 = vld [vmem:[#allocation10 + $0x278] sm:$0xff] }
 0x56e   :  { %11150 = vst [vmem:[#allocation138_spill] sm:$0xff] %v8285_v45  ;;  %v8289_v44 = vpop.f32.mrf.mxu3  ;;  %v2435_v45 = vld [vmem:[#allocation10 + $0x410] sm:$0xff] }
 0x56f   :  { %11151 = vst [vmem:[#allocation139_spill] sm:$0xff] %v8287_v54  ;;  %2518 = vmatpush.msrb.mxu1 %v2435_v45  ;;  %v2424_v54 = vld [vmem:[#allocation10 + $0x3b8] sm:$0xff]  ;;  %2744 = vmatpush.msrb.mxu3 %v2437_v35  ;;  %v2411_v45 = vld [vmem:[#allocation10 + $0x350] sm:$0xff]  ;;  %v2385_v35 = vld [vmem:[#allocation10 + $0x280] sm:$0xff] }
 0x570   :  { %11152 = vst [vmem:[#allocation140_spill] sm:$0xff] %v8289_v44  ;;  %1733 = vmatmul.f32.gmra.mxu1 %v1385_v37  ;;  %2138 = vmatmul.f32.gmra.mxu0 %v1806_v61  ;;  %v2423_v44 = vld [vmem:[#allocation10 + $0x3b0] sm:$0xff] }
 0x571   :  { %v1387_v37 = vld [vmem:[#allocation6 + $0x5b8] sm:$0xff]  ;;  %2519 = vmatpush.msrb.mxu1 %v2422_v20  ;;  %2632 = vmatpush.msrb.mxu2 %v2423_v44  ;;  %v2370_v20 = vld [vmem:[#allocation10 + $0x208] sm:$0xff] }
 0x572   :  { %2076 = vmatmul.f32.gmra.mxu3 %v1839_v3  ;;  %v1808_v61 = vld [vmem:[#allocation6 + $0x6b8] sm:$0xff]  ;;  %v2409_v3 = vld [vmem:[#allocation10 + $0x340] sm:$0xff] }
 0x573   :  { %2745 = vmatpush.msrb.mxu3 %v2424_v54  ;;  %2520 = vmatpush.msrb.mxu1 %v2409_v3  ;;  %v1389_v54 = vld [vmem:[#allocation6 + $0x5c8] sm:$0xff]  ;;  %v2371_v3 = vld [vmem:[#allocation10 + $0x210] sm:$0xff] }
 0x574   :  { %2633 = vmatpush.msrb.mxu2 %v2410_v4  ;;  %v2372_v4 = vld [vmem:[#allocation10 + $0x218] sm:$0xff] }
 0x575   :  { %v8291_v58 = vpop.f32.mrf.mxu0  ;;  %v8293_v52 = vpop.f32.mrf.mxu1  ;;  %2746 = vmatpush.msrb.mxu3 %v2411_v45  ;;  %2521 = vmatpush.msrb.mxu1 %v2396_v0  ;;  %v2357_v45 = vld [vmem:[#allocation10 + $0x1a0] sm:$0xff]  ;;  %v2358_v0 = vld [vmem:[#allocation10 + $0x1a8] sm:$0xff] }
 0x576   :  { %11153 = vst [vmem:[#allocation141_spill] sm:$0xff] %v8291_v58  ;;  %v8295_v30 = vpop.f32.mrf.mxu3  ;;  %v2398_v58 = vld [vmem:[#allocation10 + $0x2e8] sm:$0xff]  ;;  %2634 = vmatpush.msrb.mxu2 %v2397_v18  ;;  %v2359_v18 = vld [vmem:[#allocation10 + $0x1b0] sm:$0xff] }
 0x577   :  { %11154 = vst [vmem:[#allocation142_spill] sm:$0xff] %v8293_v52  ;;  %v2383_v52 = vld [vmem:[#allocation10 + $0x270] sm:$0xff]  ;;  %2747 = vmatpush.msrb.mxu3 %v2398_v58  ;;  %v2345_v58 = vld [vmem:[#allocation10 + $0x140] sm:$0xff] }
 0x578   :  { %11155 = vst [vmem:[#allocation143_spill] sm:$0xff] %v8295_v30  ;;  %1736 = vmatmul.f32.gmra.mxu1 %v1387_v37  ;;  %2141 = vmatmul.f32.gmra.mxu0 %v1808_v61  ;;  %v1810_v37 = vld [vmem:[#allocation6 + $0x6c8] sm:$0xff] }
 0x579   :  { %2522 = vmatpush.msrb.mxu1 %v2383_v52  ;;  %2635 = vmatpush.msrb.mxu2 %v2384_v23  ;;  %v2346_v52 = vld [vmem:[#allocation10 + $0x148] sm:$0xff]  ;;  %v2331_v23 = vld [vmem:[#allocation10 + $0xd0] sm:$0xff] }
 0x57a   :  { %2079 = vmatmul.f32.gmra.mxu3 %v1841_v34  ;;  %v1843_v34 = vld [vmem:[#allocation6 + $0x7d0] sm:$0xff] }
 0x57b   :  { %2748 = vmatpush.msrb.mxu3 %v2385_v35  ;;  %2523 = vmatpush.msrb.mxu1 %v2370_v20 }
 0x57c   :  { %2636 = vmatpush.msrb.mxu2 %v2371_v3 }
 0x57d   :  { %v8297_v30 = vpop.f32.mrf.mxu0  ;;  %v8299_v44 = vpop.f32.mrf.mxu1  ;;  %2749 = vmatpush.msrb.mxu3 %v2372_v4  ;;  %2524 = vmatpush.msrb.mxu1 %v2357_v45  ;;  %v2318_v4 = vld [vmem:[#allocation10 + $0x68] sm:$0xff]  ;;  %v1845_v45 = vld [vmem:[#allocation6 + $0x7e0] sm:$0xff] }
 0x57e   :  { %11156 = vst [vmem:[#allocation144_spill] sm:$0xff] %v8297_v30  ;;  %v8301_v61 = vpop.f32.mrf.mxu3  ;;  %v2344_v30 = vld [vmem:[#allocation10 + $0x138] sm:$0xff]  ;;  %2637 = vmatpush.msrb.mxu2 %v2358_v0  ;;  %v2305_v0 = vld [vmem:[#allocation10] sm:$0xff] }
 0x57f   :  { %11157 = vst [vmem:[#allocation145_spill] sm:$0xff] %v8299_v44  ;;  %2750 = vmatpush.msrb.mxu3 %v2359_v18  ;;  %2525 = vmatpush.msrb.mxu1 %v2344_v30  ;;  %v2333_v44 = vld [vmem:[#allocation10 + $0xe0] sm:$0xff]  ;;  %v2320_v30 = vld [vmem:[#allocation10 + $0x78] sm:$0xff]  ;;  %v2306_v18 = vld [vmem:[#allocation10 + $0x8] sm:$0xff] }
 0x580   :  { %11158 = vst [vmem:[#allocation146_spill] sm:$0xff] %v8301_v61  ;;  %1739 = vmatmul.f32.gmra.mxu1 %v1389_v54  ;;  %2144 = vmatmul.f32.gmra.mxu0 %v1810_v37  ;;  %v2332_v61 = vld [vmem:[#allocation10 + $0xd8] sm:$0xff] }
 0x581   :  { %v1391_v54 = vld [vmem:[#allocation6 + $0x5d8] sm:$0xff]  ;;  %2638 = vmatpush.msrb.mxu2 %v2345_v58  ;;  %2751 = vmatpush.msrb.mxu3 %v2346_v52 }
 0x582   :  { %2082 = vmatmul.f32.gmra.mxu3 %v1843_v34  ;;  %v1812_v37 = vld [vmem:[#allocation6 + $0x6d8] sm:$0xff]  ;;  %2526 = vmatpush.msrb.mxu1 %v2331_v23  ;;  %v1393_v23 = vld [vmem:[#allocation6 + $0x5e8] sm:$0xff] }
 0x583   :  { %v2319_v34 = vld [vmem:[#allocation10 + $0x70] sm:$0xff]  ;;  %2639 = vmatpush.msrb.mxu2 %v2332_v61  ;;  %2752 = vmatpush.msrb.mxu3 %v2333_v44 }
 0x584   :  { %2527 = vmatpush.msrb.mxu1 %v2318_v4  ;;  %v1847_v61 = vld [vmem:[#allocation6 + $0x7f0] sm:$0xff]  ;;  %v1395_v4 = vld [vmem:[#allocation6 + $0x5f8] sm:$0xff] }
 0x585   :  { %v8303_v35 = vpop.f32.mrf.mxu0  ;;  %v8305_v20 = vpop.f32.mrf.mxu1  ;;  %2640 = vmatpush.msrb.mxu2 %v2319_v34  ;;  %2753 = vmatpush.msrb.mxu3 %v2320_v30  ;;  %v1816_v34 = vld [vmem:[#allocation6 + $0x6f8] sm:$0xff]  ;;  %v1657_v30 = vadd.f32 %v8227_v6, %v8145_v33 }
 0x586   :  { %11159 = vst [vmem:[#allocation147_spill] sm:$0xff] %v8303_v35  ;;  %v8307_v3 = vpop.f32.mrf.mxu3  ;;  %v2307_v35 = vld [vmem:[#allocation10 + $0x10] sm:$0xff]  ;;  %2528 = vmatpush.msrb.mxu1 %v2305_v0 }
 0x587   :  { %11160 = vst [vmem:[#allocation148_spill] sm:$0xff] %v8307_v3  ;;  %2641 = vmatpush.msrb.mxu2 %v2306_v18  ;;  %v1814_v3 = vld [vmem:[#allocation6 + $0x6e8] sm:$0xff]  ;;  %2754 = vmatpush.msrb.mxu3 %v2307_v35 }
 0x588   :  { %1742 = vmatmul.f32.gmra.mxu1 %v1391_v54  ;;  %2147 = vmatmul.f32.gmra.mxu0 %v1812_v37  ;;  %v1818_v18 = vld [vmem:[#allocation6 + $0x708] sm:$0xff] }
 0x58a   :  { %2085 = vmatmul.f32.gmra.mxu3 %v1845_v45 }
 0x58d   :  { %v8309_v58 = vpop.f32.mrf.mxu0  ;;  %v8311_v52 = vpop.f32.mrf.mxu1 }
 0x58e   :  { %11161 = vst [vmem:[#allocation149_spill] sm:$0xff] %v8309_v58  ;;  %v8313_v44 = vpop.f32.mrf.mxu3 }
 0x590   :  { %1745 = vmatmul.f32.gmra.mxu1 %v1393_v23  ;;  %2150 = vmatmul.f32.gmra.mxu0 %v1814_v3  ;;  %v1752_v3 = vadd.f32 %v1657_v30, %v7829_v50 }
 0x592   :  { %2088 = vmatmul.f32.gmra.mxu3 %v1847_v61  ;;  %v8327_v61 = vld [vmem:[#allocation9] ss:$0 sm:$0xff] }
 0x595   :  { %v8315_v54 = vpop.f32.mrf.mxu0  ;;  %v8317_v37 = vpop.f32.mrf.mxu1 }
 0x596   :  { %11162 = vst [vmem:[#allocation150_spill] sm:$0xff] %v8315_v54  ;;  %v8319_v45 = vpop.f32.mrf.mxu3 }
 0x597   :  { %11163 = vst [vmem:[#allocation151_spill] sm:$0xff] %v8319_v45  ;;  %v1820_v45 = vld [vmem:[#allocation6 + $0x718] sm:$0xff] }
 0x598   :  { %1748 = vmatmul.f32.gmra.mxu1 %v1395_v4  ;;  %2153 = vmatmul.f32.gmra.mxu0 %v1816_v34  ;;  %v1660_v4 = vadd.f32 %v8233_v10, %v8151_v60  ;;  %v1663_v10 = vadd.f32 %v8239_v1, %v8157_v27  ;;  %v1666_v1 = vadd.f32 %v8245_v26, %v8163_v9 }
 0x599   :  { %v1669_v26 = vadd.f32 %v8251_v13, %v8169_v29  ;;  %v1672_v13 = vadd.f32 %v8257_v55, %v8175_v56  ;;  %v1675_v55 = vadd.f32 %v8263_v22, %v8179_v32  ;;  %v1678_v32 = vadd.f32 %v8269_v53, %v8183_v8 }
 0x59a   :  { %v1753_v50 = vadd.f32 %v1660_v4, %v7835_v63  ;;  %v1681_v8 = vadd.f32 %v8275_v46, %v8187_v41  ;;  %v1684_v46 = vadd.f32 %v8281_v19, %v8191_v14 }
 0x59d   :  { %v8323_v35 = vpop.f32.mrf.mxu1  ;;  %v2109_v0 = vpop.f32.mrf.mxu0 }
 0x59e   :  { %11164 = vst [vmem:[#allocation152_spill] sm:$0xff] %v8323_v35  ;;  %v2110_v23 = vadd.f32 %v2109_v0, %v8229_v43  ;;  %v8329_v54 = vpop.f32.mrf.mxu3 }
 0x5a0   :  { %v2205_v58 = vadd.f32 %v2110_v23, %v1752_v3  ;;  %2156 = vmatmul.f32.gmra.mxu0 %v1818_v18  ;;  %v1754_v18 = vadd.f32 %v1663_v10, %v7841_v21 }
 0x5a2   :  { %v2241_v34 = vadd.f32 %v8327_v61, %v2205_v58 }
 0x5a4   :  { %v8334_v33 = vmax.f32 %v2241_v34, 0.0  ;;  %v1824_v34 = vld [vmem:[#allocation6 + $0x738] sm:$0xff] }
 0x5a5   :  { %v8336_v6 = vpop.f32.mrf.mxu1  ;;  %v2112_v35 = vpop.f32.mrf.mxu0 }
 0x5a6   :  { %v2113_v43 = vadd.f32 %v2112_v35, %v8235_v59  ;;  %2529 = vmatmul.f32.vlgmr.msrb.gmra.mxu1 %v8334_v33  ;;  %2642 = vmatmul.f32.vlgmr.msrb.gmra.mxu2 %v8334_v33  ;;  %v8342_v30 = vpop.f32.mrf.mxu3  ;;  %v1822_v35 = vld [vmem:[#allocation6 + $0x728] sm:$0xff] }
 0x5a7   :  { %2755 = vmatmul.f32.vlgmr.msrb.gmra.mxu3 %v8334_v33 }
 0x5a8   :  { %v2206_v60 = vadd.f32 %v2113_v43, %v1753_v50  ;;  %2159 = vmatmul.f32.gmra.mxu0 %v1820_v45  ;;  %v1755_v50 = vadd.f32 %v1666_v1, %v7847_v47 }
 0x5aa   :  { %v2242_v58 = vadd.f32 %v8327_v61, %v2206_v60 }
 0x5ac   :  { %v8348_v0 = vmax.f32 %v2242_v58, 0.0 }
 0x5ad   :  { %v8350_v63 = vpop.f32.mrf.mxu1  ;;  %v2115_v59 = vpop.f32.mrf.mxu0 }
 0x5ae   :  { %v2116_v3 = vadd.f32 %v2115_v59, %v8241_v51  ;;  %2532 = vmatmul.f32.gmra.mxu1 %v8348_v0  ;;  %2645 = vmatmul.f32.gmra.mxu2 %v8348_v0  ;;  %v8356_v45 = vpop.f32.mrf.mxu3  ;;  %v1826_v59 = vld [vmem:[#allocation6 + $0x748] sm:$0xff] }
 0x5af   :  { %2758 = vmatmul.f32.gmra.mxu3 %v8348_v0 }
 0x5b0   :  { %v2207_v27 = vadd.f32 %v2116_v3, %v1754_v18  ;;  %2162 = vmatmul.f32.gmra.mxu0 %v1822_v35  ;;  %v1756_v35 = vadd.f32 %v1669_v26, %v7853_v17  ;;  %v1830_v26 = vld [vmem:[#allocation6 + $0x768] sm:$0xff] }
 0x5b2   :  { %v2243_v23 = vadd.f32 %v8327_v61, %v2207_v27 }
 0x5b4   :  { %v8362_v4 = vmax.f32 %v2243_v23, 0.0  ;;  %v1828_v23 = vld [vmem:[#allocation6 + $0x758] sm:$0xff] }
 0x5b5   :  { %v8364_v21 = vpop.f32.mrf.mxu1  ;;  %v2118_v51 = vpop.f32.mrf.mxu0 }
 0x5b6   :  { %v2119_v43 = vadd.f32 %v2118_v51, %v8247_v48  ;;  %2535 = vmatmul.f32.gmra.mxu1 %v8362_v4  ;;  %2648 = vmatmul.f32.gmra.mxu2 %v8362_v4  ;;  %v8370_v60 = vpop.f32.mrf.mxu3  ;;  %v1757_v51 = vadd.f32 %v1672_v13, %v7859_v11  ;;  %v1832_v13 = vld [vmem:[#allocation6 + $0x778] sm:$0xff] }
 0x5b7   :  { %2761 = vmatmul.f32.gmra.mxu3 %v8362_v4 }
 0x5b8   :  { %v2208_v9 = vadd.f32 %v2119_v43, %v1755_v50  ;;  %2165 = vmatmul.f32.gmra.mxu0 %v1824_v34 }
 0x5ba   :  { %v2244_v10 = vadd.f32 %v8327_v61, %v2208_v9 }
 0x5bc   :  { %v8376_v58 = vmax.f32 %v2244_v10, 0.0  ;;  %v1758_v10 = vadd.f32 %v1675_v55, %v7865_v2  ;;  %v1034_v2 = vadd.f32 %v7949_v16, %v7811_v49  ;;  %v1834_v55 = vld [vmem:[#allocation6 + $0x788] sm:$0xff] }
 0x5bd   :  { %v8378_v47 = vpop.f32.mrf.mxu1  ;;  %v2121_v48 = vpop.f32.mrf.mxu0 }
 0x5be   :  { %v2122_v18 = vadd.f32 %v2121_v48, %v8253_v62  ;;  %2538 = vmatmul.f32.gmra.mxu1 %v8376_v58  ;;  %2651 = vmatmul.f32.gmra.mxu2 %v8376_v58  ;;  %v8384_v3 = vpop.f32.mrf.mxu3  ;;  %v1147_v49 = vadd.f32 %v8051_v12, %v1034_v2 }
 0x5bf   :  { %2764 = vmatmul.f32.gmra.mxu3 %v8376_v58 }
 0x5c0   :  { %v2209_v29 = vadd.f32 %v2122_v18, %v1756_v35  ;;  %2168 = vmatmul.f32.gmra.mxu0 %v1826_v59 }
 0x5c2   :  { %v2245_v27 = vadd.f32 %v8327_v61, %v2209_v29 }
 0x5c4   :  { %v8390_v1 = vmax.f32 %v2245_v27, 0.0  ;;  %v1759_v27 = vadd.f32 %v1678_v32, %v7871_v42  ;;  %v1260_v42 = vadd.f32 %v7875_v7, %v1147_v49  ;;  %v1836_v32 = vld [vmem:[#allocation6 + $0x798] sm:$0xff] }
 0x5c5   :  { %v8392_v17 = vpop.f32.mrf.mxu1  ;;  %v2124_v62 = vpop.f32.mrf.mxu0 }
 0x5c6   :  { %v2125_v34 = vadd.f32 %v2124_v62, %v8259_v31  ;;  %2541 = vmatmul.f32.gmra.mxu1 %v8390_v1  ;;  %2654 = vmatmul.f32.gmra.mxu2 %v8390_v1  ;;  %v8398_v50 = vpop.f32.mrf.mxu3 }
 0x5c7   :  { %2767 = vmatmul.f32.gmra.mxu3 %v8390_v1 }
 0x5c8   :  { %v2210_v56 = vadd.f32 %v2125_v34, %v1757_v51  ;;  %2171 = vmatmul.f32.gmra.mxu0 %v1828_v23 }
 0x5ca   :  { %v2246_v43 = vadd.f32 %v8327_v61, %v2210_v56 }
 0x5cc   :  { %v8404_v9 = vmax.f32 %v2246_v43, 0.0  ;;  %v1760_v43 = vadd.f32 %v1681_v8, %v1260_v42  ;;  %v11168_v8 = vld [vmem:[#allocation56_spill] sm:$0xff]  ;;  %v11169_v42 = vld [vmem:[#allocation41_spill] sm:$0xff] }
 0x5cd   :  { %v8406_v11 = vpop.f32.mrf.mxu1  ;;  %v2127_v31 = vpop.f32.mrf.mxu0 }
 0x5ce   :  { %v2128_v48 = vadd.f32 %v2127_v31, %v8265_v39  ;;  %2544 = vmatmul.f32.gmra.mxu1 %v8404_v9  ;;  %2657 = vmatmul.f32.gmra.mxu2 %v8404_v9  ;;  %v8412_v59 = vpop.f32.mrf.mxu3 }
 0x5cf   :  { %2770 = vmatmul.f32.gmra.mxu3 %v8404_v9 }
 0x5d0   :  { %v2211_v22 = vadd.f32 %v2128_v48, %v1758_v10  ;;  %2174 = vmatmul.f32.gmra.mxu0 %v1830_v26  ;;  %v1040_v10 = vadd.f32 %v7966_v28, %v7815_v25  ;;  %v2464_v25 = vld [vmem:[#allocation10 + $0x4f8] sm:$0xff] }
 0x5d2   :  { %v2247_v35 = vadd.f32 %v8327_v61, %v2211_v22 }
 0x5d4   :  { %v8420_v18 = vmax.f32 %v2247_v35, 0.0  ;;  %v2477_v35 = vld [vmem:[#allocation10 + $0x560] sm:$0xff] }
 0x5d5   :  { %v8422_v39 = vpop.f32.mrf.mxu1  ;;  %v2130_v29 = vpop.f32.mrf.mxu0 }
 0x5d6   :  { %v2131_v62 = vadd.f32 %v2130_v29, %v8271_v38  ;;  %2547 = vmatmul.f32.gmra.mxu1 %v8420_v18  ;;  %2660 = vmatmul.f32.gmra.mxu2 %v8420_v18  ;;  %v8428_v53 = vpop.f32.mrf.mxu3  ;;  %v1037_v38 = vadd.f32 %v7958_v24, %v7813_v57  ;;  %v2503_v24 = vld [vmem:[#allocation10 + $0x630] sm:$0xff] }
 0x5d7   :  { %2773 = vmatmul.f32.gmra.mxu3 %v8420_v18  ;;  %2852 = vmatpush.msra.mxu0 %v2503_v24 }
 0x5d8   :  { %v2212_v16 = vadd.f32 %v2131_v62, %v1759_v27  ;;  %2177 = vmatmul.f32.gmra.mxu0 %v1832_v13  ;;  %v1150_v7 = vadd.f32 %v8063_v40, %v1037_v38  ;;  %v2451_v13 = vld [vmem:[#allocation10 + $0x490] sm:$0xff]  ;;  %v11166_v27 = vld [vmem:[#allocation118_spill] sm:$0xff] }
 0x5d9   :  { %v11167_v62 = vld [vmem:[#allocation139_spill] sm:$0xff]  ;;  %v11170_v38 = vld [vmem:[#allocation78_spill] sm:$0xff] }
 0x5da   :  { %v2248_v23 = vadd.f32 %v8327_v61, %v2212_v16  ;;  %v1263_v26 = vadd.f32 %v7880_v15, %v1150_v7  ;;  %v11165_v15 = vld [vmem:[#allocation91_spill] sm:$0xff]  ;;  %v1687_v49 = vadd.f32 %v11167_v62, %v11166_v27  ;;  %v2438_v16 = vld [vmem:[#allocation10 + $0x428] sm:$0xff]  ;;  %v11177_v62 = vld [vmem:[#allocation37_spill] sm:$0xff] }
 0x5db   :  { %v1153_v28 = vadd.f32 %v11165_v15, %v1040_v10  ;;  %v1838_v7 = vld [vmem:[#allocation6 + $0x7a8] sm:$0xff] }
 0x5dc   :  { %v8438_v51 = vmax.f32 %v2248_v23, 0.0  ;;  %v1761_v2 = vadd.f32 %v1684_v46, %v1263_v26  ;;  %v11171_v46 = vld [vmem:[#allocation140_spill] sm:$0xff]  ;;  %v11172_v10 = vld [vmem:[#allocation93_spill] sm:$0xff]  ;;  %v11176_v27 = vld [vmem:[#allocation42_spill] sm:$0xff] }
 0x5dd   :  { %v8440_v34 = vpop.f32.mrf.mxu1  ;;  %v2133_v56 = vpop.f32.mrf.mxu0  ;;  %v1266_v23 = vadd.f32 %v11168_v8, %v1153_v28  ;;  %v2412_v26 = vld [vmem:[#allocation10 + $0x358] sm:$0xff]  ;;  %v2386_v28 = vld [vmem:[#allocation10 + $0x288] sm:$0xff] }
 0x5de   :  { %v2134_v12 = vadd.f32 %v2133_v56, %v8277_v36  ;;  %2550 = vmatmul.f32.gmra.mxu1 %v8438_v51  ;;  %2663 = vmatmul.f32.gmra.mxu2 %v8438_v51  ;;  %v8445_v41 = vpop.f32.mrf.mxu3  ;;  %v2490_v36 = vld [vmem:[#allocation10 + $0x5c8] sm:$0xff]  ;;  %v1043_v56 = vadd.f32 %v11170_v38, %v11169_v42  ;;  %v2373_v42 = vld [vmem:[#allocation10 + $0x220] sm:$0xff] }
 0x5df   :  { %2776 = vmatmul.f32.gmra.mxu3 %v8438_v51  ;;  %2853 = vmatpush.msra.mxu0 %v2490_v36  ;;  %v1762_v24 = vadd.f32 %v1687_v49, %v1266_v23  ;;  %v1046_v49 = vadd.f32 %v11177_v62, %v11176_v27  ;;  %v1840_v23 = vld [vmem:[#allocation6 + $0x7b8] sm:$0xff] }
 0x5e0   :  { %v2213_v57 = vadd.f32 %v2134_v12, %v1760_v43  ;;  %2180 = vmatmul.f32.gmra.mxu0 %v1834_v55 }
 0x5e1   :  { %2854 = vmatpush.msra.mxu0 %v2477_v35  ;;  %v2399_v35 = vld [vmem:[#allocation10 + $0x2f0] sm:$0xff] }
 0x5e2   :  { %v2249_v31 = vadd.f32 %v8327_v61, %v2213_v57  ;;  %v2425_v57 = vld [vmem:[#allocation10 + $0x3c0] sm:$0xff] }
 0x5e3   :  { %2855 = vmatpush.msra.mxu0 %v2464_v25 }
 0x5e4   :  { %v8455_v48 = vmax.f32 %v2249_v31, 0.0 }
 0x5e5   :  { %v8457_v22 = vpop.f32.mrf.mxu1  ;;  %v2136_v40 = vpop.f32.mrf.mxu0  ;;  %2856 = vmatpush.msra.mxu0 %v2451_v13 }
 0x5e6   :  { %v2137_v14 = vadd.f32 %v2136_v40, %v8283_v5  ;;  %2553 = vmatmul.f32.gmra.mxu1 %v8455_v48  ;;  %2666 = vmatmul.f32.gmra.mxu2 %v8455_v48  ;;  %v8462_v19 = vpop.f32.mrf.mxu3  ;;  %v1156_v40 = vadd.f32 %v11172_v10, %v1043_v56  ;;  %v11178_v56 = vld [vmem:[#allocation143_spill] sm:$0xff]  ;;  %v11180_v10 = vld [vmem:[#allocation121_spill] sm:$0xff] }
 0x5e7   :  { %2779 = vmatmul.f32.gmra.mxu3 %v8455_v48  ;;  %2857 = vmatpush.msra.mxu0 %v2438_v16 }
 0x5e8   :  { %v2214_v29 = vadd.f32 %v2137_v14, %v1761_v2  ;;  %2183 = vmatmul.f32.gmra.mxu0 %v1836_v32  ;;  %v11173_v2 = vld [vmem:[#allocation119_spill] sm:$0xff]  ;;  %v11174_v14 = vld [vmem:[#allocation142_spill] sm:$0xff] }
 0x5e9   :  { %2858 = vmatpush.msra.mxu0 %v2425_v57  ;;  %v1690_v25 = vadd.f32 %v11174_v14, %v11173_v2  ;;  %v11179_v57 = vld [vmem:[#allocation95_spill] sm:$0xff]  ;;  %v2334_v2 = vld [vmem:[#allocation10 + $0xe8] sm:$0xff]  ;;  %v11182_v14 = vld [vmem:[#allocation60_spill] sm:$0xff] }
 0x5ea   :  { %v2250_v5 = vadd.f32 %v8327_v61, %v2214_v29  ;;  %v11175_v29 = vld [vmem:[#allocation58_spill] sm:$0xff] }
 0x5eb   :  { %2859 = vmatpush.msra.mxu0 %v2412_v26  ;;  %v1269_v13 = vadd.f32 %v11175_v29, %v1156_v40  ;;  %v2347_v26 = vld [vmem:[#allocation10 + $0x150] sm:$0xff]  ;;  %v11181_v40 = vld [vmem:[#allocation145_spill] sm:$0xff] }
 0x5ec   :  { %v8472_v55 = vmax.f32 %v2250_v5, 0.0 }
 0x5ed   :  { %v8474_v43 = vpop.f32.mrf.mxu1  ;;  %v2139_v12 = vpop.f32.mrf.mxu0  ;;  %2860 = vmatpush.msra.mxu0 %v2399_v35  ;;  %v1763_v38 = vadd.f32 %v1690_v25, %v1269_v13 }
 0x5ee   :  { %v2140_v31 = vadd.f32 %v2139_v12, %v11171_v46  ;;  %2556 = vmatmul.f32.gmra.mxu1 %v8472_v55  ;;  %2669 = vmatmul.f32.gmra.mxu2 %v8472_v55  ;;  %v8479_v36 = vpop.f32.mrf.mxu3 }
 0x5ef   :  { %2782 = vmatmul.f32.gmra.mxu3 %v8472_v55  ;;  %2861 = vmatpush.msra.mxu0 %v2386_v28  ;;  %v11184_v28 = vld [vmem:[#allocation38_spill] sm:$0xff] }
 0x5f0   :  { %v2215_v32 = vadd.f32 %v2140_v31, %v1762_v24  ;;  %2186 = vmatmul.f32.gmra.mxu0 %v1838_v7  ;;  %v2360_v7 = vld [vmem:[#allocation10 + $0x1b8] sm:$0xff]  ;;  %v1159_v24 = vadd.f32 %v11179_v57, %v1046_v49  ;;  %v1842_v49 = vld [vmem:[#allocation6 + $0x7c8] sm:$0xff] }
 0x5f1   :  { %2862 = vmatpush.msra.mxu0 %v2373_v42  ;;  %v11185_v42 = vld [vmem:[#allocation146_spill] sm:$0xff] }
 0x5f2   :  { %v2251_v15 = vadd.f32 %v8327_v61, %v2215_v32  ;;  %v1693_v32 = vadd.f32 %v11181_v40, %v11180_v10  ;;  %v1272_v25 = vadd.f32 %v11182_v14, %v1159_v24  ;;  %v11187_v24 = vld [vmem:[#allocation123_spill] sm:$0xff]  ;;  %v11188_v40 = vld [vmem:[#allocation62_spill] sm:$0xff] }
 0x5f3   :  { %2863 = vmatpush.msra.mxu0 %v2360_v7 }
 0x5f4   :  { %v8489_v5 = vmax.f32 %v2251_v15, 0.0  ;;  %v11183_v15 = vld [vmem:[#allocation43_spill] sm:$0xff] }
 0x5f5   :  { %v8491_v16 = vpop.f32.mrf.mxu1  ;;  %v2142_v8 = vpop.f32.mrf.mxu0  ;;  %2864 = vmatpush.msra.mxu0 %v2347_v26  ;;  %v1049_v29 = vadd.f32 %v11184_v28, %v11183_v15  ;;  %v1844_v28 = vld [vmem:[#allocation6 + $0x7d8] sm:$0xff] }
 0x5f6   :  { %v2143_v12 = vadd.f32 %v2142_v8, %v11178_v56  ;;  %2559 = vmatmul.f32.gmra.mxu1 %v8489_v5  ;;  %2672 = vmatmul.f32.gmra.mxu2 %v8489_v5  ;;  %v8498_v31 = vpop.f32.mrf.mxu3  ;;  %v2321_v8 = vld [vmem:[#allocation10 + $0x80] sm:$0xff]  ;;  %v2308_v56 = vld [vmem:[#allocation10 + $0x18] sm:$0xff] }
 0x5f7   :  { %2785 = vmatmul.f32.gmra.mxu3 %v8489_v5  ;;  %2865 = vmatpush.msra.mxu0 %v2334_v2  ;;  %v11190_v2 = vld [vmem:[#allocation81_spill] sm:$0xff] }
 0x5f8   :  { %v2216_v46 = vadd.f32 %v2143_v12, %v1763_v38  ;;  %2189 = vmatmul.f32.gmra.mxu0 %v1840_v23  ;;  %v1764_v23 = vadd.f32 %v1693_v32, %v1272_v25  ;;  %v11186_v12 = vld [vmem:[#allocation97_spill] sm:$0xff] }
 0x5f9   :  { %2866 = vmatpush.msra.mxu0 %v2321_v8  ;;  %v1162_v7 = vadd.f32 %v11186_v12, %v1049_v29  ;;  %v11192_v8 = vld [vmem:[#allocation99_spill] sm:$0xff] }
 0x5fa   :  { %v2252_v35 = vadd.f32 %v8327_v61, %v2216_v46  ;;  %v1696_v46 = vadd.f32 %v8305_v20, %v11187_v24  ;;  %v11195_v24 = vld [vmem:[#allocation45_spill] sm:$0xff] }
 0x5fb   :  { %2867 = vmatpush.msra.mxu0 %v2308_v56  ;;  %v1275_v32 = vadd.f32 %v11188_v40, %v1162_v7  ;;  %v11194_v7 = vld [vmem:[#allocation64_spill] sm:$0xff] }
 0x5fc   :  { %v8506_v13 = vmax.f32 %v2252_v35, 0.0  ;;  %v11189_v35 = vld [vmem:[#allocation44_spill] sm:$0xff] }
 0x5fd   :  { %v8508_v27 = vpop.f32.mrf.mxu1  ;;  %v2145_v62 = vpop.f32.mrf.mxu0  ;;  %v1052_v14 = vadd.f32 %v11190_v2, %v11189_v35  ;;  %v1765_v29 = vadd.f32 %v1696_v46, %v1275_v32  ;;  %v11196_v46 = vld [vmem:[#allocation83_spill] sm:$0xff]  ;;  %v1846_v2 = vld [vmem:[#allocation6 + $0x7e8] sm:$0xff] }
 0x5fe   :  { %v2146_v38 = vadd.f32 %v2145_v62, %v11185_v42  ;;  %2562 = vmatmul.f32.gmra.mxu1 %v8506_v13  ;;  %2675 = vmatmul.f32.gmra.mxu2 %v8506_v13  ;;  %v8518_v10 = vpop.f32.mrf.mxu3  ;;  %v11191_v62 = vld [vmem:[#allocation148_spill] sm:$0xff] }
 0x5ff   :  { %2788 = vmatmul.f32.gmra.mxu3 %v8506_v13 }
 0x600   :  { %v2217_v57 = vadd.f32 %v2146_v38, %v1764_v23  ;;  %2192 = vmatmul.f32.gmra.mxu0 %v1842_v49  ;;  %v1165_v23 = vadd.f32 %v11192_v8, %v1052_v14  ;;  %v11193_v38 = vld [vmem:[#allocation125_spill] sm:$0xff] }
 0x601   :  { %v1699_v56 = vadd.f32 %v8311_v52, %v11193_v38  ;;  %v11197_v52 = vld [vmem:[#allocation101_spill] sm:$0xff] }
 0x602   :  { %v2253_v26 = vadd.f32 %v8327_v61, %v2217_v57  ;;  %v1278_v57 = vadd.f32 %v11194_v7, %v1165_v23 }
 0x604   :  { %v8523_v25 = vmax.f32 %v2253_v26, 0.0  ;;  %v1055_v26 = vadd.f32 %v11196_v46, %v11195_v24  ;;  %v1848_v24 = vld [vmem:[#allocation6 + $0x7f8] sm:$0xff] }
 0x605   :  { %v2148_v15 = vpop.f32.mrf.mxu0  ;;  %v8528_v20 = vpop.f32.mrf.mxu1 }
 0x606   :  { %v2149_v49 = vadd.f32 %v2148_v15, %v11191_v62  ;;  %2565 = vmatmul.f32.gmra.mxu1 %v8523_v25  ;;  %2678 = vmatmul.f32.gmra.mxu2 %v8523_v25  ;;  %v8540_v32 = vpop.f32.mrf.mxu3  ;;  %v1766_v15 = vadd.f32 %v1699_v56, %v1278_v57  ;;  %v11201_v56 = vld [vmem:[#allocation40_spill] sm:$0xff] }
 0x607   :  { %2791 = vmatmul.f32.gmra.mxu3 %v8523_v25 }
 0x608   :  { %v2218_v42 = vadd.f32 %v2149_v49, %v1765_v29  ;;  %2195 = vmatmul.f32.gmra.mxu0 %v1844_v28  ;;  %v1168_v28 = vadd.f32 %v11197_v52, %v1055_v26  ;;  %v11198_v49 = vld [vmem:[#allocation127_spill] sm:$0xff]  ;;  %v11205_v52 = vld [vmem:[#allocation128_spill] sm:$0xff] }
 0x609   :  { %v1702_v8 = vadd.f32 %v8317_v37, %v11198_v49  ;;  %v11203_v26 = vld [vmem:[#allocation151_spill] sm:$0xff] }
 0x60a   :  { %v2254_v12 = vadd.f32 %v8327_v61, %v2218_v42  ;;  %v11199_v42 = vld [vmem:[#allocation66_spill] sm:$0xff]  ;;  %v11204_v37 = vld [vmem:[#allocation103_spill] sm:$0xff] }
 0x60b   :  { %v1281_v38 = vadd.f32 %v11199_v42, %v1168_v28  ;;  %v11206_v28 = vld [vmem:[#allocation152_spill] sm:$0xff] }
 0x60c   :  { %v8538_v40 = vmax.f32 %v2254_v12, 0.0 }
 0x60d   :  { %v2151_v35 = vpop.f32.mrf.mxu0  ;;  %v8547_v62 = vpop.f32.mrf.mxu1  ;;  %v1767_v46 = vadd.f32 %v1702_v8, %v1281_v38  ;;  %v11208_v38 = vld [vmem:[#allocation47_spill] sm:$0xff] }
 0x60e   :  { %v2152_v14 = vadd.f32 %v2151_v35, %v8313_v44  ;;  %2568 = vmatmul.f32.gmra.mxu1 %v8538_v40  ;;  %2681 = vmatmul.f32.gmra.mxu2 %v8538_v40  ;;  %v11200_v44 = vld [vmem:[#allocation46_spill] sm:$0xff] }
 0x60f   :  { %2794 = vmatmul.f32.gmra.mxu3 %v8538_v40  ;;  %v1058_v12 = vadd.f32 %v11201_v56, %v11200_v44  ;;  %v11209_v44 = vld [vmem:[#allocation85_spill] sm:$0xff] }
 0x610   :  { %v2219_v29 = vadd.f32 %v2152_v14, %v1766_v15  ;;  %2198 = vmatmul.f32.gmra.mxu0 %v1846_v2  ;;  %v8560_v2 = vpop.f32.mrf.mxu3  ;;  %v1061_v56 = vadd.f32 %v11209_v44, %v11208_v38 }
 0x611   :  { %v1171_v15 = vadd.f32 %v11204_v37, %v1058_v12 }
 0x612   :  { %v2255_v23 = vadd.f32 %v8327_v61, %v2219_v29  ;;  %v1705_v29 = vadd.f32 %v11206_v28, %v11205_v52 }
 0x614   :  { %v8555_v7 = vmax.f32 %v2255_v23, 0.0  ;;  %v11207_v23 = vld [vmem:[#allocation68_spill] sm:$0xff] }
 0x615   :  { %v2154_v57 = vpop.f32.mrf.mxu0  ;;  %v8567_v8 = vpop.f32.mrf.mxu1  ;;  %v1284_v42 = vadd.f32 %v11207_v23, %v1171_v15  ;;  %v11211_v15 = vld [vmem:[#allocation129_spill] sm:$0xff]  ;;  %v11214_v23 = vld [vmem:[#allocation86_spill] sm:$0xff] }
 0x616   :  { %11202 = vst [vmem:[#allocation91_spill] sm:$0xff] %v8555_v7  ;;  %v2155_v35 = vadd.f32 %v2154_v57, %v11203_v26  ;;  %2571 = vmatmul.f32.gmra.mxu1 %v8555_v7  ;;  %2684 = vmatmul.f32.gmra.mxu2 %v8555_v7 }
 0x617   :  { %2797 = vmatmul.f32.gmra.mxu3 %v8555_v7  ;;  %v1768_v7 = vadd.f32 %v1705_v29, %v1284_v42 }
 0x618   :  { %v2220_v14 = vadd.f32 %v2155_v35, %v1767_v46  ;;  %2201 = vmatmul.f32.gmra.mxu0 %v1848_v24  ;;  %v11210_v24 = vld [vmem:[#allocation105_spill] sm:$0xff]  ;;  %v8580_v37 = vpop.f32.mrf.mxu3 }
 0x619   :  { %v1174_v46 = vadd.f32 %v11210_v24, %v1061_v56 }
 0x61a   :  { %v2256_v49 = vadd.f32 %v8327_v61, %v2220_v14  ;;  %v1708_v14 = vadd.f32 %v8336_v6, %v11211_v15  ;;  %v11215_v6 = vld [vmem:[#allocation107_spill] sm:$0xff] }
 0x61c   :  { %v8572_v57 = vmax.f32 %v2256_v49, 0.0  ;;  %v11213_v49 = vld [vmem:[#allocation48_spill] sm:$0xff] }
 0x61d   :  { %v2157_v26 = vpop.f32.mrf.mxu0  ;;  %v1064_v42 = vadd.f32 %v11214_v23, %v11213_v49  ;;  %v11220_v49 = vld [vmem:[#allocation87_spill] sm:$0xff] }
 0x61e   :  { %v2158_v12 = vadd.f32 %v2157_v26, %v8329_v54  ;;  %2574 = vmatmul.f32.gmra.mxu1 %v8572_v57  ;;  %2687 = vmatmul.f32.gmra.mxu2 %v8572_v57  ;;  %v11212_v54 = vld [vmem:[#allocation69_spill] sm:$0xff] }
 0x61f   :  { %2800 = vmatmul.f32.gmra.mxu3 %v8572_v57  ;;  %v1287_v29 = vadd.f32 %v11212_v54, %v1174_v46  ;;  %v1177_v26 = vadd.f32 %v11215_v6, %v1064_v42  ;;  %v11216_v46 = vld [vmem:[#allocation130_spill] sm:$0xff] }
 0x620   :  { %v2221_v35 = vadd.f32 %v2158_v12, %v1768_v7  ;;  %2868 = vmatmul.f32.vlgmr.msra.gmra.mxu0 %v8334_v33 }
 0x621   :  { %v1769_v7 = vadd.f32 %v1708_v14, %v1287_v29  ;;  %v11219_v29 = vld [vmem:[#allocation49_spill] sm:$0xff] }
 0x622   :  { %v2257_v52 = vadd.f32 %v8327_v61, %v2221_v35  ;;  %v1711_v35 = vadd.f32 %v8350_v63, %v11216_v46  ;;  %v1067_v23 = vadd.f32 %v11220_v49, %v11219_v29  ;;  %v11221_v63 = vld [vmem:[#allocation109_spill] sm:$0xff]  ;;  %v11222_v46 = vld [vmem:[#allocation131_spill] sm:$0xff]  ;;  %v11226_v49 = vld [vmem:[#allocation50_spill] sm:$0xff] }
 0x623   :  { %v8585_v28 = vpop.f32.mrf.mxu1 }
 0x624   :  { %v8590_v38 = vmax.f32 %v2257_v52, 0.0  ;;  %v11218_v52 = vld [vmem:[#allocation70_spill] sm:$0xff]  ;;  %v1180_v6 = vadd.f32 %v11221_v63, %v1067_v23 }
 0x625   :  { %v2160_v44 = vpop.f32.mrf.mxu0  ;;  %v1290_v54 = vadd.f32 %v11218_v52, %v1177_v26 }
 0x626   :  { %v2161_v56 = vadd.f32 %v2160_v44, %v8342_v30  ;;  %2577 = vmatmul.f32.gmra.mxu1 %v8590_v38  ;;  %2690 = vmatmul.f32.gmra.mxu2 %v8590_v38 }
 0x627   :  { %2803 = vmatmul.f32.gmra.mxu3 %v8590_v38 }
 0x628   :  { %v2222_v12 = vadd.f32 %v2161_v56, %v1769_v7  ;;  %2871 = vmatmul.f32.gmra.mxu0 %v8348_v0  ;;  %v1770_v7 = vadd.f32 %v1711_v35, %v1290_v54  ;;  %v11225_v54 = vld [vmem:[#allocation71_spill] sm:$0xff] }
 0x629   :  { %v8598_v24 = vpop.f32.mrf.mxu2  ;;  %v1293_v29 = vadd.f32 %v11225_v54, %v1180_v6  ;;  %v11229_v54 = vld [vmem:[#allocation132_spill] sm:$0xff] }
 0x62a   :  { %v2258_v15 = vadd.f32 %v8327_v61, %v2222_v12  ;;  %v8603_v14 = vpop.f32.mrf.mxu3 }
 0x62b   :  { %11217 = vst [vmem:[#allocation118_spill] sm:$0xff] %v8603_v14  ;;  %v8605_v30 = vpop.f32.mrf.mxu1 }
 0x62c   :  { %v8610_v42 = vmax.f32 %v2258_v15, 0.0  ;;  %v1714_v15 = vadd.f32 %v8364_v21, %v11222_v46  ;;  %v11228_v21 = vld [vmem:[#allocation110_spill] sm:$0xff] }
 0x62d   :  { %v2163_v44 = vpop.f32.mrf.mxu0 }
 0x62e   :  { %v2164_v56 = vadd.f32 %v2163_v44, %v8356_v45  ;;  %2580 = vmatmul.f32.gmra.mxu1 %v8610_v42  ;;  %2693 = vmatmul.f32.gmra.mxu2 %v8610_v42  ;;  %v11227_v44 = vld [vmem:[#allocation88_spill] sm:$0xff] }
 0x62f   :  { %2806 = vmatmul.f32.gmra.mxu3 %v8610_v42  ;;  %v1070_v14 = vadd.f32 %v11227_v44, %v11226_v49  ;;  %v11232_v49 = vld [vmem:[#allocation72_spill] sm:$0xff] }
 0x630   :  { %v2223_v12 = vadd.f32 %v2164_v56, %v1770_v7  ;;  %2874 = vmatmul.f32.gmra.mxu0 %v8362_v4  ;;  %v1771_v56 = vadd.f32 %v1714_v15, %v1293_v29 }
 0x631   :  { %v8618_v26 = vpop.f32.mrf.mxu2 }
 0x632   :  { %v2259_v35 = vadd.f32 %v8327_v61, %v2223_v12  ;;  %v8623_v52 = vpop.f32.mrf.mxu3  ;;  %v1183_v12 = vadd.f32 %v11228_v21, %v1070_v14 }
 0x633   :  { %11223 = vst [vmem:[#allocation139_spill] sm:$0xff] %v8623_v52  ;;  %v8625_v45 = vpop.f32.mrf.mxu1  ;;  %v11234_v52 = vld [vmem:[#allocation89_spill] sm:$0xff] }
 0x634   :  { %11224 = vst [vmem:[#allocation56_spill] sm:$0xff] %v8625_v45  ;;  %v8630_v23 = vmax.f32 %v2259_v35, 0.0  ;;  %v1717_v35 = vadd.f32 %v8378_v47, %v11229_v54  ;;  %v1296_v44 = vadd.f32 %v11232_v49, %v1183_v12  ;;  %v11235_v47 = vld [vmem:[#allocation111_spill] sm:$0xff] }
 0x635   :  { %v2166_v7 = vpop.f32.mrf.mxu0 }
 0x636   :  { %v2167_v63 = vadd.f32 %v2166_v7, %v8370_v60  ;;  %2583 = vmatmul.f32.gmra.mxu1 %v8630_v23  ;;  %2696 = vmatmul.f32.gmra.mxu2 %v8630_v23  ;;  %v11233_v7 = vld [vmem:[#allocation51_spill] sm:$0xff] }
 0x637   :  { %2809 = vmatmul.f32.gmra.mxu3 %v8630_v23  ;;  %v1073_v45 = vadd.f32 %v11234_v52, %v11233_v7  ;;  %v11236_v52 = vld [vmem:[#allocation133_spill] sm:$0xff] }
 0x638   :  { %v2224_v46 = vadd.f32 %v2167_v63, %v1771_v56  ;;  %2877 = vmatmul.f32.gmra.mxu0 %v8376_v58  ;;  %v1772_v63 = vadd.f32 %v1717_v35, %v1296_v44  ;;  %v11239_v44 = vld [vmem:[#allocation73_spill] sm:$0xff] }
 0x639   :  { %v8638_v6 = vpop.f32.mrf.mxu2 }
 0x63a   :  { %v2260_v15 = vadd.f32 %v8327_v61, %v2224_v46  ;;  %v8643_v29 = vpop.f32.mrf.mxu3  ;;  %v1186_v46 = vadd.f32 %v11235_v47, %v1073_v45 }
 0x63b   :  { %11230 = vst [vmem:[#allocation41_spill] sm:$0xff] %v8643_v29  ;;  %v8645_v60 = vpop.f32.mrf.mxu1  ;;  %v11241_v29 = vld [vmem:[#allocation90_spill] sm:$0xff] }
 0x63c   :  { %11231 = vst [vmem:[#allocation78_spill] sm:$0xff] %v8645_v60  ;;  %v8650_v14 = vmax.f32 %v2260_v15, 0.0  ;;  %v1720_v15 = vadd.f32 %v8392_v17, %v11236_v52  ;;  %v1299_v7 = vadd.f32 %v11239_v44, %v1186_v46  ;;  %v11242_v17 = vld [vmem:[#allocation112_spill] sm:$0xff] }
 0x63d   :  { %v2169_v56 = vpop.f32.mrf.mxu0 }
 0x63e   :  { %v2170_v21 = vadd.f32 %v2169_v56, %v8384_v3  ;;  %2586 = vmatmul.f32.gmra.mxu1 %v8650_v14  ;;  %2699 = vmatmul.f32.gmra.mxu2 %v8650_v14  ;;  %v11240_v56 = vld [vmem:[#allocation52_spill] sm:$0xff] }
 0x63f   :  { %2812 = vmatmul.f32.gmra.mxu3 %v8650_v14  ;;  %v1076_v60 = vadd.f32 %v11241_v29, %v11240_v56  ;;  %v11243_v29 = vld [vmem:[#allocation134_spill] sm:$0xff] }
 0x640   :  { %v2225_v54 = vadd.f32 %v2170_v21, %v1772_v63  ;;  %2880 = vmatmul.f32.gmra.mxu0 %v8390_v1  ;;  %v1773_v21 = vadd.f32 %v1720_v15, %v1299_v7  ;;  %v11246_v7 = vld [vmem:[#allocation74_spill] sm:$0xff] }
 0x641   :  { %v8658_v12 = vpop.f32.mrf.mxu2 }
 0x642   :  { %v2261_v35 = vadd.f32 %v8327_v61, %v2225_v54  ;;  %v8663_v49 = vpop.f32.mrf.mxu3  ;;  %v1189_v54 = vadd.f32 %v11242_v17, %v1076_v60 }
 0x643   :  { %11237 = vst [vmem:[#allocation140_spill] sm:$0xff] %v8663_v49  ;;  %v8665_v3 = vpop.f32.mrf.mxu1  ;;  %v11248_v49 = vld [vmem:[#allocation92_spill] sm:$0xff] }
 0x644   :  { %11238 = vst [vmem:[#allocation93_spill] sm:$0xff] %v8665_v3  ;;  %v8670_v45 = vmax.f32 %v2261_v35, 0.0  ;;  %v1723_v35 = vadd.f32 %v8406_v11, %v11243_v29  ;;  %v1302_v56 = vadd.f32 %v11246_v7, %v1189_v54  ;;  %v11249_v11 = vld [vmem:[#allocation113_spill] sm:$0xff] }
 0x645   :  { %v2172_v63 = vpop.f32.mrf.mxu0 }
 0x646   :  { %v2173_v47 = vadd.f32 %v2172_v63, %v8398_v50  ;;  %2589 = vmatmul.f32.gmra.mxu1 %v8670_v45  ;;  %2702 = vmatmul.f32.gmra.mxu2 %v8670_v45  ;;  %v11247_v63 = vld [vmem:[#allocation53_spill] sm:$0xff] }
 0x647   :  { %2815 = vmatmul.f32.gmra.mxu3 %v8670_v45  ;;  %v1079_v3 = vadd.f32 %v11248_v49, %v11247_v63  ;;  %v11250_v49 = vld [vmem:[#allocation135_spill] sm:$0xff] }
 0x648   :  { %v2226_v52 = vadd.f32 %v2173_v47, %v1773_v21  ;;  %2883 = vmatmul.f32.gmra.mxu0 %v8404_v9  ;;  %v1774_v47 = vadd.f32 %v1723_v35, %v1302_v56  ;;  %v11253_v56 = vld [vmem:[#allocation75_spill] sm:$0xff] }
 0x649   :  { %v8678_v46 = vpop.f32.mrf.mxu2 }
 0x64a   :  { %v2262_v15 = vadd.f32 %v8327_v61, %v2226_v52  ;;  %v8683_v44 = vpop.f32.mrf.mxu3  ;;  %v1192_v52 = vadd.f32 %v11249_v11, %v1079_v3 }
 0x64b   :  { %11244 = vst [vmem:[#allocation119_spill] sm:$0xff] %v8683_v44  ;;  %v8685_v50 = vpop.f32.mrf.mxu1  ;;  %v11255_v44 = vld [vmem:[#allocation94_spill] sm:$0xff] }
 0x64c   :  { %11245 = vst [vmem:[#allocation142_spill] sm:$0xff] %v8685_v50  ;;  %v8690_v60 = vmax.f32 %v2262_v15, 0.0  ;;  %v1726_v15 = vadd.f32 %v8422_v39, %v11250_v49  ;;  %v1305_v63 = vadd.f32 %v11253_v56, %v1192_v52  ;;  %v11256_v39 = vld [vmem:[#allocation114_spill] sm:$0xff] }
 0x64d   :  { %v2175_v21 = vpop.f32.mrf.mxu0 }
 0x64e   :  { %v2176_v17 = vadd.f32 %v2175_v21, %v8412_v59  ;;  %2592 = vmatmul.f32.gmra.mxu1 %v8690_v60  ;;  %2705 = vmatmul.f32.gmra.mxu2 %v8690_v60  ;;  %v11254_v21 = vld [vmem:[#allocation54_spill] sm:$0xff] }
 0x64f   :  { %2818 = vmatmul.f32.gmra.mxu3 %v8690_v60  ;;  %v1082_v50 = vadd.f32 %v11255_v44, %v11254_v21  ;;  %v11258_v44 = vld [vmem:[#allocation136_spill] sm:$0xff] }
 0x650   :  { %v2227_v29 = vadd.f32 %v2176_v17, %v1774_v47  ;;  %2886 = vmatmul.f32.gmra.mxu0 %v8420_v18  ;;  %v1775_v17 = vadd.f32 %v1726_v15, %v1305_v63  ;;  %v11261_v63 = vld [vmem:[#allocation76_spill] sm:$0xff] }
 0x651   :  { %v8698_v54 = vpop.f32.mrf.mxu2 }
 0x652   :  { %v2263_v35 = vadd.f32 %v8327_v61, %v2227_v29  ;;  %v8703_v7 = vpop.f32.mrf.mxu3  ;;  %v1195_v29 = vadd.f32 %v11256_v39, %v1082_v50 }
 0x653   :  { %11251 = vst [vmem:[#allocation58_spill] sm:$0xff] %v8703_v7  ;;  %v8705_v59 = vpop.f32.mrf.mxu1  ;;  %v11263_v7 = vld [vmem:[#allocation96_spill] sm:$0xff] }
 0x654   :  { %11252 = vst [vmem:[#allocation42_spill] sm:$0xff] %v8705_v59  ;;  %v8710_v3 = vmax.f32 %v2263_v35, 0.0  ;;  %v1729_v35 = vadd.f32 %v8440_v34, %v11258_v44  ;;  %v1308_v21 = vadd.f32 %v11261_v63, %v1195_v29  ;;  %v11264_v34 = vld [vmem:[#allocation115_spill] sm:$0xff] }
 0x655   :  { %v2178_v47 = vpop.f32.mrf.mxu0 }
 0x656   :  { %v2179_v11 = vadd.f32 %v2178_v47, %v8428_v53  ;;  %2595 = vmatmul.f32.gmra.mxu1 %v8710_v3  ;;  %2708 = vmatmul.f32.gmra.mxu2 %v8710_v3  ;;  %v11262_v47 = vld [vmem:[#allocation55_spill] sm:$0xff] }
 0x657   :  { %2821 = vmatmul.f32.gmra.mxu3 %v8710_v3  ;;  %v1085_v59 = vadd.f32 %v11263_v7, %v11262_v47  ;;  %v11266_v7 = vld [vmem:[#allocation137_spill] sm:$0xff] }
 0x658   :  { %v2228_v49 = vadd.f32 %v2179_v11, %v1775_v17  ;;  %2889 = vmatmul.f32.gmra.mxu0 %v8438_v51  ;;  %v1776_v11 = vadd.f32 %v1729_v35, %v1308_v21  ;;  %v11269_v21 = vld [vmem:[#allocation77_spill] sm:$0xff] }
 0x659   :  { %v8718_v52 = vpop.f32.mrf.mxu2 }
 0x65a   :  { %11257 = vst [vmem:[#allocation37_spill] sm:$0xff] %v8718_v52  ;;  %v2264_v15 = vadd.f32 %v8327_v61, %v2228_v49  ;;  %v8723_v56 = vpop.f32.mrf.mxu3  ;;  %v1198_v49 = vadd.f32 %v11264_v34, %v1085_v59 }
 0x65b   :  { %11259 = vst [vmem:[#allocation143_spill] sm:$0xff] %v8723_v56  ;;  %v8725_v53 = vpop.f32.mrf.mxu1  ;;  %v11271_v56 = vld [vmem:[#allocation98_spill] sm:$0xff] }
 0x65c   :  { %11260 = vst [vmem:[#allocation95_spill] sm:$0xff] %v8725_v53  ;;  %v8730_v50 = vmax.f32 %v2264_v15, 0.0  ;;  %v1732_v15 = vadd.f32 %v8457_v22, %v11266_v7  ;;  %v1311_v47 = vadd.f32 %v11269_v21, %v1198_v49  ;;  %v2504_v22 = vld [vmem:[#allocation10 + $0x638] sm:$0xff]  ;;  %v2506_v7 = vld [vmem:[#allocation10 + $0x648] sm:$0xff] }
 0x65d   :  { %v2181_v17 = vpop.f32.mrf.mxu0  ;;  %2965 = vmatpush.msra.mxu1 %v2504_v22  ;;  %3191 = vmatpush.msra.mxu3 %v2506_v7  ;;  %v11276_v22 = vld [vmem:[#allocation36_spill] sm:$0xff]  ;;  %v11277_v7 = vld [vmem:[#allocation59_spill] sm:$0xff] }
 0x65e   :  { %v2182_v39 = vadd.f32 %v2181_v17, %v8445_v41  ;;  %2598 = vmatmul.f32.gmra.mxu1 %v8730_v50  ;;  %2711 = vmatmul.f32.gmra.mxu2 %v8730_v50  ;;  %v11270_v17 = vld [vmem:[#allocation57_spill] sm:$0xff] }
 0x65f   :  { %2824 = vmatmul.f32.gmra.mxu3 %v8730_v50  ;;  %v1088_v53 = vadd.f32 %v11271_v56, %v11270_v17 }
 0x660   :  { %v2229_v44 = vadd.f32 %v2182_v39, %v1776_v11  ;;  %2892 = vmatmul.f32.gmra.mxu0 %v8455_v48  ;;  %v1777_v39 = vadd.f32 %v1732_v15, %v1311_v47  ;;  %v2492_v15 = vld [vmem:[#allocation10 + $0x5d8] sm:$0xff]  ;;  %v11274_v47 = vld [vmem:[#allocation138_spill] sm:$0xff] }
 0x661   :  { %v8738_v29 = vpop.f32.mrf.mxu2  ;;  %v1735_v17 = vadd.f32 %v8474_v43, %v11274_v47 }
 0x662   :  { %11265 = vst [vmem:[#allocation121_spill] sm:$0xff] %v8738_v29  ;;  %v2265_v35 = vadd.f32 %v8327_v61, %v2229_v44  ;;  %v8743_v63 = vpop.f32.mrf.mxu3  ;;  %v2505_v44 = vld [vmem:[#allocation10 + $0x640] sm:$0xff] }
 0x663   :  { %11267 = vst [vmem:[#allocation145_spill] sm:$0xff] %v8743_v63  ;;  %v8745_v41 = vpop.f32.mrf.mxu1  ;;  %v11272_v63 = vld [vmem:[#allocation116_spill] sm:$0xff]  ;;  %3078 = vmatpush.msra.mxu2 %v2505_v44 }
 0x664   :  { %11268 = vst [vmem:[#allocation60_spill] sm:$0xff] %v8745_v41  ;;  %v8750_v59 = vmax.f32 %v2265_v35, 0.0  ;;  %v1201_v49 = vadd.f32 %v11272_v63, %v1088_v53  ;;  %v2493_v35 = vld [vmem:[#allocation10 + $0x5e0] sm:$0xff]  ;;  %v2478_v63 = vld [vmem:[#allocation10 + $0x568] sm:$0xff] }
 0x665   :  { %v2184_v11 = vpop.f32.mrf.mxu0  ;;  %3079 = vmatpush.msra.mxu2 %v2492_v15  ;;  %3192 = vmatpush.msra.mxu3 %v2493_v35  ;;  %v2467_v35 = vld [vmem:[#allocation10 + $0x510] sm:$0xff] }
 0x666   :  { %v2185_v34 = vadd.f32 %v2184_v11, %v8462_v19  ;;  %2601 = vmatmul.f32.gmra.mxu1 %v8750_v59  ;;  %2714 = vmatmul.f32.gmra.mxu2 %v8750_v59  ;;  %v2491_v19 = vld [vmem:[#allocation10 + $0x5d0] sm:$0xff]  ;;  %v1314_v44 = vadd.f32 %v11276_v22, %v1201_v49  ;;  %v2452_v49 = vld [vmem:[#allocation10 + $0x498] sm:$0xff] }
 0x667   :  { %2827 = vmatmul.f32.gmra.mxu3 %v8750_v59  ;;  %2966 = vmatpush.msra.mxu1 %v2491_v19  ;;  %v2466_v19 = vld [vmem:[#allocation10 + $0x508] sm:$0xff] }
 0x668   :  { %v2230_v21 = vadd.f32 %v2185_v34, %v1777_v39  ;;  %2895 = vmatmul.f32.gmra.mxu0 %v8472_v55  ;;  %v2479_v39 = vld [vmem:[#allocation10 + $0x570] sm:$0xff]  ;;  %v2480_v34 = vld [vmem:[#allocation10 + $0x578] sm:$0xff]  ;;  %v1778_v47 = vadd.f32 %v1735_v17, %v1314_v44  ;;  %v11281_v44 = vld [vmem:[#allocation141_spill] sm:$0xff] }
 0x669   :  { %v8758_v56 = vpop.f32.mrf.mxu2  ;;  %2967 = vmatpush.msra.mxu1 %v2478_v63  ;;  %3080 = vmatpush.msra.mxu2 %v2479_v39  ;;  %v2454_v39 = vld [vmem:[#allocation10 + $0x4a8] sm:$0xff] }
 0x66a   :  { %11273 = vst [vmem:[#allocation43_spill] sm:$0xff] %v8758_v56  ;;  %v2266_v11 = vadd.f32 %v8327_v61, %v2230_v21  ;;  %v8763_v41 = vpop.f32.mrf.mxu3  ;;  %v11278_v56 = vld [vmem:[#allocation100_spill] sm:$0xff]  ;;  %3193 = vmatpush.msra.mxu3 %v2480_v34  ;;  %v2465_v21 = vld [vmem:[#allocation10 + $0x500] sm:$0xff] }
 0x66b   :  { %11275 = vst [vmem:[#allocation38_spill] sm:$0xff] %v8763_v41  ;;  %v8765_v53 = vpop.f32.mrf.mxu1  ;;  %v1091_v29 = vadd.f32 %v11278_v56, %v11277_v7  ;;  %2968 = vmatpush.msra.mxu1 %v2465_v21  ;;  %v2453_v56 = vld [vmem:[#allocation10 + $0x4a0] sm:$0xff]  ;;  %3081 = vmatpush.msra.mxu2 %v2466_v19  ;;  %v2440_v34 = vld [vmem:[#allocation10 + $0x438] sm:$0xff]  ;;  %v1738_v7 = vadd.f32 %v8491_v16, %v11281_v44  ;;  %v2426_v19 = vld [vmem:[#allocation10 + $0x3c8] sm:$0xff] }
 0x66c   :  { %v8770_v52 = vmax.f32 %v2266_v11, 0.0  ;;  %v11279_v11 = vld [vmem:[#allocation117_spill] sm:$0xff]  ;;  %3194 = vmatpush.msra.mxu3 %v2467_v35  ;;  %v2427_v16 = vld [vmem:[#allocation10 + $0x3d0] sm:$0xff] }
 0x66d   :  { %v2187_v43 = vpop.f32.mrf.mxu0  ;;  %v1204_v63 = vadd.f32 %v11279_v11, %v1091_v29  ;;  %2969 = vmatpush.msra.mxu1 %v2452_v49  ;;  %3082 = vmatpush.msra.mxu2 %v2453_v56  ;;  %v2441_v29 = vld [vmem:[#allocation10 + $0x440] sm:$0xff]  ;;  %v11285_v49 = vld [vmem:[#allocation102_spill] sm:$0xff] }
 0x66e   :  { %v2188_v15 = vadd.f32 %v2187_v43, %v8479_v36  ;;  %2604 = vmatmul.f32.gmra.mxu1 %v8770_v52  ;;  %2717 = vmatmul.f32.gmra.mxu2 %v8770_v52  ;;  %v2439_v36 = vld [vmem:[#allocation10 + $0x430] sm:$0xff]  ;;  %v11284_v35 = vld [vmem:[#allocation61_spill] sm:$0xff] }
 0x66f   :  { %2830 = vmatmul.f32.gmra.mxu3 %v8770_v52  ;;  %2970 = vmatpush.msra.mxu1 %v2439_v36  ;;  %v1094_v41 = vadd.f32 %v11285_v49, %v11284_v35  ;;  %v2415_v36 = vld [vmem:[#allocation10 + $0x370] sm:$0xff]  ;;  %v8802_v49 = vld [vmem:[#allocation9] ss:$0 sm:$0xff] }
 0x670   :  { %v2231_v22 = vadd.f32 %v2188_v15, %v1778_v47  ;;  %2898 = vmatmul.f32.gmra.mxu0 %v8489_v5  ;;  %3195 = vmatpush.msra.mxu3 %v2454_v39  ;;  %v11283_v15 = vld [vmem:[#allocation79_spill] sm:$0xff]  ;;  %v2413_v39 = vld [vmem:[#allocation10 + $0x360] sm:$0xff] }
 0x671   :  { %v8778_v17 = vpop.f32.mrf.mxu2  ;;  %v1317_v11 = vadd.f32 %v11283_v15, %v1204_v63  ;;  %3083 = vmatpush.msra.mxu2 %v2440_v34  ;;  %2971 = vmatpush.msra.mxu1 %v2426_v19  ;;  %v2414_v63 = vld [vmem:[#allocation10 + $0x368] sm:$0xff] }
 0x672   :  { %11280 = vst [vmem:[#allocation146_spill] sm:$0xff] %v8778_v17  ;;  %v2267_v43 = vadd.f32 %v8327_v61, %v2231_v22  ;;  %v8783_v21 = vpop.f32.mrf.mxu3  ;;  %3196 = vmatpush.msra.mxu3 %v2441_v29  ;;  %v2428_v61 = vld [vmem:[#allocation10 + $0x3d8] sm:$0xff] }
 0x673   :  { %11282 = vst [vmem:[#allocation97_spill] sm:$0xff] %v8783_v21  ;;  %v8785_v47 = vpop.f32.mrf.mxu1  ;;  %v1779_v56 = vadd.f32 %v1738_v7, %v1317_v11  ;;  %3084 = vmatpush.msra.mxu2 %v2427_v16  ;;  %v2400_v29 = vld [vmem:[#allocation10 + $0x2f8] sm:$0xff]  ;;  %v2401_v7 = vld [vmem:[#allocation10 + $0x300] sm:$0xff]  ;;  %2972 = vmatpush.msra.mxu1 %v2413_v39 }
 0x674   :  { %v8790_v17 = vmax.f32 %v2267_v43, 0.0  ;;  %v11286_v43 = vld [vmem:[#allocation120_spill] sm:$0xff]  ;;  %3197 = vmatpush.msra.mxu3 %v2428_v61 }
 0x675   :  { %v2190_v44 = vpop.f32.mrf.mxu0  ;;  %v1207_v34 = vadd.f32 %v11286_v43, %v1094_v41  ;;  %3085 = vmatpush.msra.mxu2 %v2414_v63  ;;  %v11288_v11 = vld [vmem:[#allocation144_spill] sm:$0xff]  ;;  %v2387_v41 = vld [vmem:[#allocation10 + $0x290] sm:$0xff]  ;;  %2973 = vmatpush.msra.mxu1 %v2400_v29 }
 0x676   :  { %v2191_v22 = vadd.f32 %v2190_v44, %v8498_v31  ;;  %2607 = vmatmul.f32.gmra.mxu1 %v8790_v17  ;;  %2720 = vmatmul.f32.gmra.mxu2 %v8790_v17  ;;  %v2402_v31 = vld [vmem:[#allocation10 + $0x308] sm:$0xff]  ;;  %v1741_v35 = vadd.f32 %v8508_v27, %v11288_v11  ;;  %v11291_v63 = vld [vmem:[#allocation63_spill] sm:$0xff]  ;;  %v11292_v43 = vld [vmem:[#allocation104_spill] sm:$0xff] }
 0x677   :  { %2833 = vmatmul.f32.gmra.mxu3 %v8790_v17  ;;  %3086 = vmatpush.msra.mxu2 %v2401_v7  ;;  %v1097_v21 = vadd.f32 %v11292_v43, %v11291_v63  ;;  %v2374_v27 = vld [vmem:[#allocation10 + $0x228] sm:$0xff]  ;;  %v2375_v29 = vld [vmem:[#allocation10 + $0x230] sm:$0xff]  ;;  %v2376_v7 = vld [vmem:[#allocation10 + $0x238] sm:$0xff] }
 0x678   :  { %v2232_v15 = vadd.f32 %v2191_v22, %v1779_v56  ;;  %2901 = vmatmul.f32.gmra.mxu0 %v8506_v13  ;;  %3198 = vmatpush.msra.mxu3 %v2415_v36  ;;  %v2388_v56 = vld [vmem:[#allocation10 + $0x298] sm:$0xff] }
 0x679   :  { %v8798_v19 = vpop.f32.mrf.mxu2  ;;  %v11290_v22 = vld [vmem:[#allocation80_spill] sm:$0xff]  ;;  %2974 = vmatpush.msra.mxu1 %v2387_v41  ;;  %3087 = vmatpush.msra.mxu2 %v2388_v56  ;;  %v2362_v41 = vld [vmem:[#allocation10 + $0x1c8] sm:$0xff] }
 0x67a   :  { %11287 = vst [vmem:[#allocation123_spill] sm:$0xff] %v8798_v19  ;;  %v2268_v16 = vadd.f32 %v8802_v49, %v2232_v15  ;;  %v8805_v44 = vpop.f32.mrf.mxu3  ;;  %v1320_v39 = vadd.f32 %v11290_v22, %v1207_v34  ;;  %3199 = vmatpush.msra.mxu3 %v2402_v31  ;;  %v2389_v15 = vld [vmem:[#allocation10 + $0x2a0] sm:$0xff] }
 0x67b   :  { %11289 = vst [vmem:[#allocation62_spill] sm:$0xff] %v8805_v44  ;;  %v8807_v61 = vpop.f32.mrf.mxu1  ;;  %v2361_v34 = vld [vmem:[#allocation10 + $0x1c0] sm:$0xff]  ;;  %2975 = vmatpush.msra.mxu1 %v2374_v27  ;;  %3088 = vmatpush.msra.mxu2 %v2375_v29  ;;  %v11299_v29 = vld [vmem:[#allocation106_spill] sm:$0xff] }
 0x67c   :  { %v8812_v19 = vmax.f32 %v2268_v16, 0.0  ;;  %v1780_v36 = vadd.f32 %v1741_v35, %v1320_v39  ;;  %v11293_v16 = vld [vmem:[#allocation122_spill] sm:$0xff]  ;;  %3200 = vmatpush.msra.mxu3 %v2389_v15  ;;  %v2348_v35 = vld [vmem:[#allocation10 + $0x158] sm:$0xff]  ;;  %v11295_v39 = vld [vmem:[#allocation147_spill] sm:$0xff] }
 0x67d   :  { %v2193_v11 = vpop.f32.mrf.mxu0  ;;  %v1210_v31 = vadd.f32 %v11293_v16, %v1097_v21  ;;  %2976 = vmatpush.msra.mxu1 %v2361_v34  ;;  %v1744_v63 = vadd.f32 %v8528_v20, %v11295_v39  ;;  %v2349_v21 = vld [vmem:[#allocation10 + $0x160] sm:$0xff]  ;;  %3089 = vmatpush.msra.mxu2 %v2362_v41  ;;  %v11297_v15 = vld [vmem:[#allocation39_spill] sm:$0xff]  ;;  %v2336_v20 = vld [vmem:[#allocation10 + $0xf8] sm:$0xff] }
 0x67e   :  { %v2194_v44 = vadd.f32 %v2193_v11, %v8518_v10  ;;  %2610 = vmatmul.f32.gmra.mxu1 %v8812_v19  ;;  %2723 = vmatmul.f32.gmra.mxu2 %v8812_v19  ;;  %v2363_v10 = vld [vmem:[#allocation10 + $0x1d0] sm:$0xff]  ;;  %v11298_v16 = vld [vmem:[#allocation65_spill] sm:$0xff]  ;;  %v2322_v41 = vld [vmem:[#allocation10 + $0x88] sm:$0xff] }
 0x67f   :  { %2836 = vmatmul.f32.gmra.mxu3 %v8812_v19  ;;  %2977 = vmatpush.msra.mxu1 %v2348_v35  ;;  %v1100_v34 = vadd.f32 %v11299_v29, %v11298_v16  ;;  %v2337_v35 = vld [vmem:[#allocation10 + $0x100] sm:$0xff] }
 0x680   :  { %v2233_v22 = vadd.f32 %v2194_v44, %v1780_v36  ;;  %2904 = vmatmul.f32.gmra.mxu0 %v8523_v25  ;;  %3201 = vmatpush.msra.mxu3 %v2376_v7  ;;  %v2335_v44 = vld [vmem:[#allocation10 + $0xf0] sm:$0xff]  ;;  %v1323_v36 = vadd.f32 %v11297_v15, %v1210_v31 }
 0x681   :  { %v8820_v56 = vpop.f32.mrf.mxu2  ;;  %3090 = vmatpush.msra.mxu2 %v2349_v21  ;;  %2978 = vmatpush.msra.mxu1 %v2335_v44  ;;  %v2323_v31 = vld [vmem:[#allocation10 + $0x90] sm:$0xff]  ;;  %v2309_v21 = vld [vmem:[#allocation10 + $0x20] sm:$0xff] }
 0x682   :  { %11294 = vst [vmem:[#allocation44_spill] sm:$0xff] %v8820_v56  ;;  %v2269_v43 = vadd.f32 %v8802_v49, %v2233_v22  ;;  %v8825_v27 = vpop.f32.mrf.mxu3  ;;  %3202 = vmatpush.msra.mxu3 %v2363_v10  ;;  %v2350_v22 = vld [vmem:[#allocation10 + $0x168] sm:$0xff]  ;;  %v1781_v7 = vadd.f32 %v1744_v63, %v1323_v36  ;;  %v11302_v36 = vld [vmem:[#allocation149_spill] sm:$0xff] }
 0x683   :  { %11296 = vst [vmem:[#allocation81_spill] sm:$0xff] %v8825_v27  ;;  %v8827_v11 = vpop.f32.mrf.mxu1  ;;  %3091 = vmatpush.msra.mxu2 %v2336_v20  ;;  %v2310_v63 = vld [vmem:[#allocation10 + $0x28] sm:$0xff]  ;;  %2979 = vmatpush.msra.mxu1 %v2322_v41  ;;  %v1747_v16 = vadd.f32 %v8547_v62, %v11302_v36 }
 0x684   :  { %v8832_v56 = vmax.f32 %v2269_v43, 0.0  ;;  %v11300_v43 = vld [vmem:[#allocation124_spill] sm:$0xff]  ;;  %3203 = vmatpush.msra.mxu3 %v2350_v22  ;;  %v11305_v22 = vld [vmem:[#allocation67_spill] sm:$0xff] }
 0x685   :  { %v2196_v39 = vpop.f32.mrf.mxu0  ;;  %v1213_v10 = vadd.f32 %v11300_v43, %v1100_v34  ;;  %3092 = vmatpush.msra.mxu2 %v2323_v31  ;;  %2980 = vmatpush.msra.mxu1 %v2309_v21 }
 0x686   :  { %v2197_v27 = vadd.f32 %v2196_v39, %v8540_v32  ;;  %2613 = vmatmul.f32.gmra.mxu1 %v8832_v56  ;;  %2726 = vmatmul.f32.gmra.mxu2 %v8832_v56  ;;  %v2324_v32 = vld [vmem:[#allocation10 + $0x98] sm:$0xff] }
 0x687   :  { %2839 = vmatmul.f32.gmra.mxu3 %v8832_v56  ;;  %3093 = vmatpush.msra.mxu2 %v2310_v63  ;;  %v11308_v63 = vld [vmem:[#allocation91_spill] sm:$0xff] }
 0x688   :  { %v2234_v15 = vadd.f32 %v2197_v27, %v1781_v7  ;;  %2907 = vmatmul.f32.gmra.mxu0 %v8538_v40  ;;  %3204 = vmatpush.msra.mxu3 %v2337_v35  ;;  %v11304_v27 = vld [vmem:[#allocation82_spill] sm:$0xff]  ;;  %v11306_v7 = vld [vmem:[#allocation108_spill] sm:$0xff] }
 0x689   :  { %v8840_v44 = vpop.f32.mrf.mxu2  ;;  %v1326_v39 = vadd.f32 %v11304_v27, %v1213_v10  ;;  %v1103_v43 = vadd.f32 %v11306_v7, %v11305_v22  ;;  %v11307_v35 = vld [vmem:[#allocation126_spill] sm:$0xff] }
 0x68a   :  { %11301 = vst [vmem:[#allocation148_spill] sm:$0xff] %v8840_v44  ;;  %v2270_v29 = vadd.f32 %v8802_v49, %v2234_v15  ;;  %v8845_v20 = vpop.f32.mrf.mxu3  ;;  %3205 = vmatpush.msra.mxu3 %v2324_v32  ;;  %v2311_v44 = vld [vmem:[#allocation10 + $0x30] sm:$0xff]  ;;  %v11309_v32 = vld [vmem:[#allocation150_spill] sm:$0xff] }
 0x68b   :  { %11303 = vst [vmem:[#allocation99_spill] sm:$0xff] %v8845_v20  ;;  %v8847_v34 = vpop.f32.mrf.mxu1  ;;  %v1782_v62 = vadd.f32 %v1747_v16, %v1326_v39  ;;  %v1216_v21 = vadd.f32 %v11307_v35, %v1103_v43  ;;  %v11311_v39 = vld [vmem:[#allocation84_spill] sm:$0xff] }
 0x68c   :  { %v8852_v41 = vmax.f32 %v2270_v29, 0.0  ;;  %3206 = vmatpush.msra.mxu3 %v2311_v44  ;;  %v1750_v29 = vadd.f32 %v8567_v8, %v11309_v32 }
 0x68d   :  { %v2199_v31 = vpop.f32.mrf.mxu0  ;;  %v1329_v22 = vadd.f32 %v11311_v39, %v1216_v21 }
 0x68e   :  { %v2200_v15 = vadd.f32 %v2199_v31, %v8560_v2  ;;  %2616 = vmatmul.f32.gmra.mxu1 %v8852_v41  ;;  %2729 = vmatmul.f32.gmra.mxu2 %v8852_v41 }
 0x68f   :  { %2842 = vmatmul.f32.gmra.mxu3 %v8852_v41  ;;  %v1783_v31 = vadd.f32 %v1750_v29, %v1329_v22 }
 0x690   :  { %v2235_v10 = vadd.f32 %v2200_v15, %v1782_v62  ;;  %2910 = vmatmul.f32.gmra.mxu0 %v11308_v63 }
 0x691   :  { %v8860_v36 = vpop.f32.mrf.mxu2 }
 0x692   :  { %v2271_v16 = vadd.f32 %v8802_v49, %v2235_v10  ;;  %v8865_v2 = vpop.f32.mrf.mxu3 }
 0x693   :  { %11310 = vst [vmem:[#allocation125_spill] sm:$0xff] %v8865_v2  ;;  %v8867_v27 = vpop.f32.mrf.mxu1 }
 0x694   :  { %v8870_v7 = vmax.f32 %v2271_v16, 0.0 }
 0x695   :  { %v2202_v43 = vpop.f32.mrf.mxu0 }
 0x696   :  { %v2203_v62 = vadd.f32 %v2202_v43, %v8580_v37  ;;  %2619 = vmatmul.f32.gmra.mxu1 %v8870_v7  ;;  %2732 = vmatmul.f32.gmra.mxu2 %v8870_v7 }
 0x697   :  { %2845 = vmatmul.f32.gmra.mxu3 %v8870_v7 }
 0x698   :  { %v2236_v8 = vadd.f32 %v2203_v62, %v1783_v31  ;;  %2913 = vmatmul.f32.gmra.mxu0 %v8572_v57 }
 0x699   :  { %v8877_v44 = vpop.f32.mrf.mxu2 }
 0x69a   :  { %v2272_v15 = vadd.f32 %v8802_v49, %v2236_v8  ;;  %v8880_v35 = vpop.f32.mrf.mxu3 }
 0x69b   :  { %11312 = vst [vmem:[#allocation64_spill] sm:$0xff] %v8880_v35  ;;  %v8882_v21 = vpop.f32.mrf.mxu1 }
 0x69c   :  { %v8884_v10 = vmax.f32 %v2272_v15, 0.0 }
 0x69d   :  { %v8886_v37 = vpop.f32.mrf.mxu0 }
 0x69e   :  { %11313 = vst [vmem:[#allocation45_spill] sm:$0xff] %v8886_v37  ;;  %2622 = vmatmul.f32.gmra.mxu1 %v8884_v10  ;;  %2735 = vmatmul.f32.gmra.mxu2 %v8884_v10 }
 0x69f   :  { %2848 = vmatmul.f32.gmra.mxu3 %v8884_v10 }
 0x6a0   :  { %2916 = vmatmul.f32.gmra.mxu0 %v8590_v38 }
 0x6a1   :  { %v8892_v32 = vpop.f32.mrf.mxu2 }
 0x6a2   :  { %v8894_v29 = vpop.f32.mrf.mxu3 }
 0x6a3   :  { %11314 = vst [vmem:[#allocation83_spill] sm:$0xff] %v8894_v29  ;;  %v8896_v49 = vpop.f32.mrf.mxu1 }
 0x6a4   :  { %11315 = vst [vmem:[#allocation101_spill] sm:$0xff] %v8896_v49 }
 0x6a5   :  { %v8898_v16 = vpop.f32.mrf.mxu0 }
 0x6a6   :  { %11316 = vst [vmem:[#allocation127_spill] sm:$0xff] %v8898_v16  ;;  %2981 = vmatmul.f32.vlgmr.msra.gmra.mxu1 %v8334_v33  ;;  %3094 = vmatmul.f32.vlgmr.msra.gmra.mxu2 %v8334_v33 }
 0x6a7   :  { %3207 = vmatmul.f32.vlgmr.msra.gmra.mxu3 %v8334_v33 }
 0x6a8   :  { %2919 = vmatmul.f32.gmra.mxu0 %v8610_v42 }
 0x6a9   :  { %v8904_v39 = vpop.f32.mrf.mxu2 }
 0x6aa   :  { %11317 = vst [vmem:[#allocation66_spill] sm:$0xff] %v8904_v39  ;;  %v8906_v22 = vpop.f32.mrf.mxu3 }
 0x6ab   :  { %11318 = vst [vmem:[#allocation46_spill] sm:$0xff] %v8906_v22  ;;  %v8908_v43 = vpop.f32.mrf.mxu1 }
 0x6ac   :  { %11319 = vst [vmem:[#allocation40_spill] sm:$0xff] %v8908_v43  ;;  %v2484_v43 = vld [vmem:[#allocation10 + $0x598] sm:$0xff] }
 0x6ad   :  { %v8910_v31 = vpop.f32.mrf.mxu0 }
 0x6ae   :  { %11320 = vst [vmem:[#allocation151_spill] sm:$0xff] %v8910_v31  ;;  %2984 = vmatmul.f32.gmra.mxu1 %v8348_v0  ;;  %3097 = vmatmul.f32.gmra.mxu2 %v8348_v0 }
 0x6af   :  { %3210 = vmatmul.f32.gmra.mxu3 %v8348_v0 }
 0x6b0   :  { %2922 = vmatmul.f32.gmra.mxu0 %v8630_v23 }
 0x6b1   :  { %v8916_v62 = vpop.f32.mrf.mxu2 }
 0x6b2   :  { %11321 = vst [vmem:[#allocation103_spill] sm:$0xff] %v8916_v62  ;;  %v8918_v8 = vpop.f32.mrf.mxu3  ;;  %v2483_v62 = vld [vmem:[#allocation10 + $0x590] sm:$0xff] }
 0x6b3   :  { %11322 = vst [vmem:[#allocation128_spill] sm:$0xff] %v8918_v8  ;;  %v8920_v15 = vpop.f32.mrf.mxu1 }
 0x6b4   :  { %11323 = vst [vmem:[#allocation152_spill] sm:$0xff] %v8920_v15  ;;  %v2482_v15 = vld [vmem:[#allocation10 + $0x588] sm:$0xff] }
 0x6b5   :  { %v8922_v16 = vpop.f32.mrf.mxu0 }
 0x6b6   :  { %11324 = vst [vmem:[#allocation68_spill] sm:$0xff] %v8922_v16  ;;  %2987 = vmatmul.f32.gmra.mxu1 %v8362_v4  ;;  %3100 = vmatmul.f32.gmra.mxu2 %v8362_v4 }
 0x6b7   :  { %3213 = vmatmul.f32.gmra.mxu3 %v8362_v4 }
 0x6b8   :  { %2925 = vmatmul.f32.gmra.mxu0 %v8650_v14 }
 0x6b9   :  { %v8928_v31 = vpop.f32.mrf.mxu2 }
 0x6ba   :  { %11325 = vst [vmem:[#allocation47_spill] sm:$0xff] %v8928_v31  ;;  %v8930_v37 = vpop.f32.mrf.mxu3  ;;  %v2429_v31 = vld [vmem:[#allocation10 + $0x3e0] sm:$0xff] }
 0x6bb   :  { %11326 = vst [vmem:[#allocation85_spill] sm:$0xff] %v8930_v37  ;;  %v8932_v22 = vpop.f32.mrf.mxu1 }
 0x6bc   :  { %11327 = vst [vmem:[#allocation105_spill] sm:$0xff] %v8932_v22  ;;  %v2468_v22 = vld [vmem:[#allocation10 + $0x518] sm:$0xff] }
 0x6bd   :  { %v8934_v29 = vpop.f32.mrf.mxu0 }
 0x6be   :  { %11328 = vst [vmem:[#allocation129_spill] sm:$0xff] %v8934_v29  ;;  %2990 = vmatmul.f32.gmra.mxu1 %v8376_v58  ;;  %3103 = vmatmul.f32.gmra.mxu2 %v8376_v58 }
 0x6bf   :  { %3216 = vmatmul.f32.gmra.mxu3 %v8376_v58 }
 0x6c0   :  { %2928 = vmatmul.f32.gmra.mxu0 %v8670_v45 }
 0x6c1   :  { %v8940_v16 = vpop.f32.mrf.mxu2 }
 0x6c2   :  { %11329 = vst [vmem:[#allocation69_spill] sm:$0xff] %v8940_v16  ;;  %v8942_v8 = vpop.f32.mrf.mxu3 }
 0x6c3   :  { %11330 = vst [vmem:[#allocation48_spill] sm:$0xff] %v8942_v8  ;;  %v8944_v35 = vpop.f32.mrf.mxu1 }
 0x6c4   :  { %11331 = vst [vmem:[#allocation86_spill] sm:$0xff] %v8944_v35 }
 0x6c5   :  { %v8946_v2 = vpop.f32.mrf.mxu0 }
 0x6c6   :  { %11332 = vst [vmem:[#allocation107_spill] sm:$0xff] %v8946_v2  ;;  %2993 = vmatmul.f32.gmra.mxu1 %v8390_v1  ;;  %3106 = vmatmul.f32.gmra.mxu2 %v8390_v1 }
 0x6c7   :  { %3219 = vmatmul.f32.gmra.mxu3 %v8390_v1 }
 0x6c8   :  { %2931 = vmatmul.f32.gmra.mxu0 %v8690_v60 }
 0x6c9   :  { %v8952_v29 = vpop.f32.mrf.mxu2 }
 0x6ca   :  { %11333 = vst [vmem:[#allocation130_spill] sm:$0xff] %v8952_v29  ;;  %v8954_v37 = vpop.f32.mrf.mxu3 }
 0x6cb   :  { %11334 = vst [vmem:[#allocation70_spill] sm:$0xff] %v8954_v37  ;;  %v8956_v20 = vpop.f32.mrf.mxu1 }
 0x6cc   :  { %11335 = vst [vmem:[#allocation49_spill] sm:$0xff] %v8956_v20 }
 0x6cd   :  { %v8958_v16 = vpop.f32.mrf.mxu0 }
 0x6ce   :  { %11336 = vst [vmem:[#allocation87_spill] sm:$0xff] %v8958_v16  ;;  %2996 = vmatmul.f32.gmra.mxu1 %v8404_v9  ;;  %3109 = vmatmul.f32.gmra.mxu2 %v8404_v9 }
 0x6cf   :  { %3222 = vmatmul.f32.gmra.mxu3 %v8404_v9 }
 0x6d0   :  { %2934 = vmatmul.f32.gmra.mxu0 %v8710_v3 }
 0x6d1   :  { %v8964_v2 = vpop.f32.mrf.mxu2 }
 0x6d2   :  { %11337 = vst [vmem:[#allocation109_spill] sm:$0xff] %v8964_v2  ;;  %v8966_v8 = vpop.f32.mrf.mxu3 }
 0x6d3   :  { %11338 = vst [vmem:[#allocation131_spill] sm:$0xff] %v8966_v8  ;;  %v8968_v35 = vpop.f32.mrf.mxu1  ;;  %v2507_v8 = vld [vmem:[#allocation10 + $0x650] sm:$0xff] }
 0x6d4   :  { %11339 = vst [vmem:[#allocation71_spill] sm:$0xff] %v8968_v35  ;;  %3304 = vmatpush.msrb.mxu0 %v2507_v8  ;;  %v2455_v8 = vld [vmem:[#allocation10 + $0x4b0] sm:$0xff] }
 0x6d5   :  { %v8970_v29 = vpop.f32.mrf.mxu0 }
 0x6d6   :  { %11340 = vst [vmem:[#allocation50_spill] sm:$0xff] %v8970_v29  ;;  %2999 = vmatmul.f32.gmra.mxu1 %v8420_v18  ;;  %3112 = vmatmul.f32.gmra.mxu2 %v8420_v18 }
 0x6d7   :  { %3225 = vmatmul.f32.gmra.mxu3 %v8420_v18 }
 0x6d8   :  { %2937 = vmatmul.f32.gmra.mxu0 %v8730_v50 }
 0x6d9   :  { %v8976_v16 = vpop.f32.mrf.mxu2 }
 0x6da   :  { %11341 = vst [vmem:[#allocation88_spill] sm:$0xff] %v8976_v16  ;;  %v8978_v37 = vpop.f32.mrf.mxu3 }
 0x6db   :  { %11342 = vst [vmem:[#allocation110_spill] sm:$0xff] %v8978_v37  ;;  %v8980_v20 = vpop.f32.mrf.mxu1  ;;  %v2494_v37 = vld [vmem:[#allocation10 + $0x5e8] sm:$0xff] }
 0x6dc   :  { %11343 = vst [vmem:[#allocation132_spill] sm:$0xff] %v8980_v20  ;;  %3305 = vmatpush.msrb.mxu0 %v2494_v37 }
 0x6dd   :  { %v8982_v2 = vpop.f32.mrf.mxu0 }
 0x6de   :  { %11344 = vst [vmem:[#allocation72_spill] sm:$0xff] %v8982_v2  ;;  %3002 = vmatmul.f32.gmra.mxu1 %v8438_v51  ;;  %3115 = vmatmul.f32.gmra.mxu2 %v8438_v51  ;;  %v2481_v2 = vld [vmem:[#allocation10 + $0x580] sm:$0xff] }
 0x6df   :  { %3228 = vmatmul.f32.gmra.mxu3 %v8438_v51  ;;  %3306 = vmatpush.msrb.mxu0 %v2481_v2  ;;  %v2416_v2 = vld [vmem:[#allocation10 + $0x378] sm:$0xff] }
 0x6e0   :  { %2940 = vmatmul.f32.gmra.mxu0 %v8750_v59 }
 0x6e1   :  { %v8988_v29 = vpop.f32.mrf.mxu2  ;;  %3307 = vmatpush.msrb.mxu0 %v2468_v22 }
 0x6e2   :  { %11345 = vst [vmem:[#allocation51_spill] sm:$0xff] %v8988_v29  ;;  %v8990_v35 = vpop.f32.mrf.mxu3 }
 0x6e3   :  { %11346 = vst [vmem:[#allocation89_spill] sm:$0xff] %v8990_v35  ;;  %v8992_v16 = vpop.f32.mrf.mxu1  ;;  %3308 = vmatpush.msrb.mxu0 %v2455_v8 }
 0x6e4   :  { %11347 = vst [vmem:[#allocation111_spill] sm:$0xff] %v8992_v16 }
 0x6e5   :  { %v8994_v20 = vpop.f32.mrf.mxu0 }
 0x6e6   :  { %11348 = vst [vmem:[#allocation133_spill] sm:$0xff] %v8994_v20  ;;  %3005 = vmatmul.f32.gmra.mxu1 %v8455_v48  ;;  %3118 = vmatmul.f32.gmra.mxu2 %v8455_v48  ;;  %v2442_v20 = vld [vmem:[#allocation10 + $0x448] sm:$0xff] }
 0x6e7   :  { %3231 = vmatmul.f32.gmra.mxu3 %v8455_v48  ;;  %3309 = vmatpush.msrb.mxu0 %v2442_v20  ;;  %v2390_v20 = vld [vmem:[#allocation10 + $0x2a8] sm:$0xff] }
 0x6e8   :  { %2943 = vmatmul.f32.gmra.mxu0 %v8770_v52 }
 0x6e9   :  { %v9000_v29 = vpop.f32.mrf.mxu2  ;;  %3310 = vmatpush.msrb.mxu0 %v2429_v31  ;;  %v2364_v31 = vld [vmem:[#allocation10 + $0x1d8] sm:$0xff] }
 0x6ea   :  { %11349 = vst [vmem:[#allocation73_spill] sm:$0xff] %v9000_v29  ;;  %v9002_v35 = vpop.f32.mrf.mxu3  ;;  %v2377_v29 = vld [vmem:[#allocation10 + $0x240] sm:$0xff] }
 0x6eb   :  { %11350 = vst [vmem:[#allocation52_spill] sm:$0xff] %v9002_v35  ;;  %v9004_v37 = vpop.f32.mrf.mxu1  ;;  %3311 = vmatpush.msrb.mxu0 %v2416_v2  ;;  %v2403_v35 = vld [vmem:[#allocation10 + $0x310] sm:$0xff] }
 0x6ec   :  { %11351 = vst [vmem:[#allocation90_spill] sm:$0xff] %v9004_v37 }
 0x6ed   :  { %v9006_v16 = vpop.f32.mrf.mxu0  ;;  %3312 = vmatpush.msrb.mxu0 %v2403_v35 }
 0x6ee   :  { %11352 = vst [vmem:[#allocation112_spill] sm:$0xff] %v9006_v16  ;;  %3008 = vmatmul.f32.gmra.mxu1 %v8472_v55  ;;  %3121 = vmatmul.f32.gmra.mxu2 %v8472_v55 }
 0x6ef   :  { %3234 = vmatmul.f32.gmra.mxu3 %v8472_v55  ;;  %3313 = vmatpush.msrb.mxu0 %v2390_v20  ;;  %v2338_v20 = vld [vmem:[#allocation10 + $0x108] sm:$0xff] }
 0x6f0   :  { %2946 = vmatmul.f32.gmra.mxu0 %v8790_v17 }
 0x6f1   :  { %v9012_v22 = vpop.f32.mrf.mxu2  ;;  %3314 = vmatpush.msrb.mxu0 %v2377_v29  ;;  %v2312_v29 = vld [vmem:[#allocation10 + $0x38] sm:$0xff] }
 0x6f2   :  { %11353 = vst [vmem:[#allocation134_spill] sm:$0xff] %v9012_v22  ;;  %v9014_v8 = vpop.f32.mrf.mxu3  ;;  %v2325_v22 = vld [vmem:[#allocation10 + $0xa0] sm:$0xff] }
 0x6f3   :  { %11354 = vst [vmem:[#allocation74_spill] sm:$0xff] %v9014_v8  ;;  %v9016_v37 = vpop.f32.mrf.mxu1  ;;  %3315 = vmatpush.msrb.mxu0 %v2364_v31  ;;  %v2351_v8 = vld [vmem:[#allocation10 + $0x170] sm:$0xff] }
 0x6f4   :  { %11355 = vst [vmem:[#allocation53_spill] sm:$0xff] %v9016_v37 }
 0x6f5   :  { %v9018_v16 = vpop.f32.mrf.mxu0  ;;  %3316 = vmatpush.msrb.mxu0 %v2351_v8 }
 0x6f6   :  { %11356 = vst [vmem:[#allocation92_spill] sm:$0xff] %v9018_v16  ;;  %3011 = vmatmul.f32.gmra.mxu1 %v8489_v5  ;;  %3124 = vmatmul.f32.gmra.mxu2 %v8489_v5 }
 0x6f7   :  { %3237 = vmatmul.f32.gmra.mxu3 %v8489_v5  ;;  %3317 = vmatpush.msrb.mxu0 %v2338_v20 }
 0x6f8   :  { %2949 = vmatmul.f32.gmra.mxu0 %v8812_v19 }
 0x6f9   :  { %v9024_v2 = vpop.f32.mrf.mxu2  ;;  %3318 = vmatpush.msrb.mxu0 %v2325_v22 }
 0x6fa   :  { %11357 = vst [vmem:[#allocation113_spill] sm:$0xff] %v9024_v2  ;;  %v9026_v35 = vpop.f32.mrf.mxu3 }
 0x6fb   :  { %11358 = vst [vmem:[#allocation135_spill] sm:$0xff] %v9026_v35  ;;  %v9028_v37 = vpop.f32.mrf.mxu1  ;;  %3319 = vmatpush.msrb.mxu0 %v2312_v29 }
 0x6fc   :  { %11359 = vst [vmem:[#allocation75_spill] sm:$0xff] %v9028_v37 }
 0x6fd   :  { %v9030_v16 = vpop.f32.mrf.mxu0 }
 0x6fe   :  { %11360 = vst [vmem:[#allocation54_spill] sm:$0xff] %v9030_v16  ;;  %3014 = vmatmul.f32.gmra.mxu1 %v8506_v13  ;;  %3127 = vmatmul.f32.gmra.mxu2 %v8506_v13 }
 0x6ff   :  { %3240 = vmatmul.f32.gmra.mxu3 %v8506_v13 }
 0x700   :  { %2952 = vmatmul.f32.gmra.mxu0 %v8832_v56 }
 0x701   :  { %v9036_v31 = vpop.f32.mrf.mxu2 }
 0x702   :  { %11361 = vst [vmem:[#allocation94_spill] sm:$0xff] %v9036_v31  ;;  %v9038_v35 = vpop.f32.mrf.mxu3 }
 0x703   :  { %11362 = vst [vmem:[#allocation114_spill] sm:$0xff] %v9038_v35  ;;  %v9040_v8 = vpop.f32.mrf.mxu1 }
 0x704   :  { %11363 = vst [vmem:[#allocation136_spill] sm:$0xff] %v9040_v8 }
 0x705   :  { %v9042_v16 = vpop.f32.mrf.mxu0 }
 0x706   :  { %11364 = vst [vmem:[#allocation76_spill] sm:$0xff] %v9042_v16  ;;  %3017 = vmatmul.f32.gmra.mxu1 %v8523_v25  ;;  %3130 = vmatmul.f32.gmra.mxu2 %v8523_v25 }
 0x707   :  { %3243 = vmatmul.f32.gmra.mxu3 %v8523_v25 }
 0x708   :  { %2955 = vmatmul.f32.gmra.mxu0 %v8852_v41 }
 0x709   :  { %v9048_v22 = vpop.f32.mrf.mxu2 }
 0x70a   :  { %11365 = vst [vmem:[#allocation55_spill] sm:$0xff] %v9048_v22  ;;  %v9050_v20 = vpop.f32.mrf.mxu3 }
 0x70b   :  { %11366 = vst [vmem:[#allocation96_spill] sm:$0xff] %v9050_v20  ;;  %v9052_v31 = vpop.f32.mrf.mxu1 }
 0x70c   :  { %11367 = vst [vmem:[#allocation115_spill] sm:$0xff] %v9052_v31 }
 0x70d   :  { %v9054_v29 = vpop.f32.mrf.mxu0 }
 0x70e   :  { %11368 = vst [vmem:[#allocation137_spill] sm:$0xff] %v9054_v29  ;;  %3020 = vmatmul.f32.gmra.mxu1 %v8538_v40  ;;  %3133 = vmatmul.f32.gmra.mxu2 %v8538_v40 }
 0x70f   :  { %3246 = vmatmul.f32.gmra.mxu3 %v8538_v40 }
 0x710   :  { %2958 = vmatmul.f32.gmra.mxu0 %v8870_v7 }
 0x711   :  { %v9060_v16 = vpop.f32.mrf.mxu2 }
 0x712   :  { %11369 = vst [vmem:[#allocation77_spill] sm:$0xff] %v9060_v16  ;;  %v9062_v35 = vpop.f32.mrf.mxu3 }
 0x713   :  { %11370 = vst [vmem:[#allocation57_spill] sm:$0xff] %v9062_v35  ;;  %v9064_v8 = vpop.f32.mrf.mxu1 }
 0x714   :  { %11371 = vst [vmem:[#allocation98_spill] sm:$0xff] %v9064_v8 }
 0x715   :  { %v9066_v22 = vpop.f32.mrf.mxu0 }
 0x716   :  { %11372 = vst [vmem:[#allocation116_spill] sm:$0xff] %v9066_v22  ;;  %3023 = vmatmul.f32.gmra.mxu1 %v11308_v63  ;;  %3136 = vmatmul.f32.gmra.mxu2 %v11308_v63 }
 0x717   :  { %3249 = vmatmul.f32.gmra.mxu3 %v11308_v63 }
 0x718   :  { %2961 = vmatmul.f32.gmra.mxu0 %v8884_v10 }
 0x719   :  { %v9072_v29 = vpop.f32.mrf.mxu2 }
 0x71a   :  { %11373 = vst [vmem:[#allocation138_spill] sm:$0xff] %v9072_v29  ;;  %v9074_v20 = vpop.f32.mrf.mxu3 }
 0x71b   :  { %11374 = vst [vmem:[#allocation36_spill] sm:$0xff] %v9074_v20  ;;  %v9076_v31 = vpop.f32.mrf.mxu1 }
 0x71c   :  { %11375 = vst [vmem:[#allocation59_spill] sm:$0xff] %v9076_v31 }
 0x71d   :  { %v9078_v16 = vpop.f32.mrf.mxu0 }
 0x71e   :  { %11376 = vst [vmem:[#allocation100_spill] sm:$0xff] %v9078_v16  ;;  %3026 = vmatmul.f32.gmra.mxu1 %v8572_v57  ;;  %3139 = vmatmul.f32.gmra.mxu2 %v8572_v57 }
 0x71f   :  { %3252 = vmatmul.f32.gmra.mxu3 %v8572_v57 }
 0x720   :  { %3320 = vmatmul.f32.vlgmr.msrb.gmra.mxu0 %v8334_v33 }
 0x721   :  { %v9084_v22 = vpop.f32.mrf.mxu2 }
 0x722   :  { %11377 = vst [vmem:[#allocation117_spill] sm:$0xff] %v9084_v22  ;;  %v9086_v35 = vpop.f32.mrf.mxu3 }
 0x723   :  { %11378 = vst [vmem:[#allocation141_spill] sm:$0xff] %v9086_v35  ;;  %v9088_v8 = vpop.f32.mrf.mxu1 }
 0x724   :  { %11379 = vst [vmem:[#allocation79_spill] sm:$0xff] %v9088_v8 }
 0x725   :  { %v9090_v29 = vpop.f32.mrf.mxu0 }
 0x726   :  { %11380 = vst [vmem:[#allocation61_spill] sm:$0xff] %v9090_v29  ;;  %3029 = vmatmul.f32.gmra.mxu1 %v8590_v38  ;;  %3142 = vmatmul.f32.gmra.mxu2 %v8590_v38 }
 0x727   :  { %3255 = vmatmul.f32.gmra.mxu3 %v8590_v38 }
 0x728   :  { %3323 = vmatmul.f32.gmra.mxu0 %v8348_v0 }
 0x729   :  { %v9096_v16 = vpop.f32.mrf.mxu2 }
 0x72a   :  { %11381 = vst [vmem:[#allocation102_spill] sm:$0xff] %v9096_v16  ;;  %v9098_v20 = vpop.f32.mrf.mxu3 }
 0x72b   :  { %11382 = vst [vmem:[#allocation120_spill] sm:$0xff] %v9098_v20  ;;  %v9100_v31 = vpop.f32.mrf.mxu1 }
 0x72c   :  { %11383 = vst [vmem:[#allocation144_spill] sm:$0xff] %v9100_v31 }
 0x72d   :  { %v9102_v22 = vpop.f32.mrf.mxu0 }
 0x72e   :  { %11384 = vst [vmem:[#allocation80_spill] sm:$0xff] %v9102_v22  ;;  %3032 = vmatmul.f32.gmra.mxu1 %v8610_v42  ;;  %3145 = vmatmul.f32.gmra.mxu2 %v8610_v42 }
 0x72f   :  { %3258 = vmatmul.f32.gmra.mxu3 %v8610_v42 }
 0x730   :  { %3326 = vmatmul.f32.gmra.mxu0 %v8362_v4 }
 0x731   :  { %v9108_v29 = vpop.f32.mrf.mxu2 }
 0x732   :  { %11385 = vst [vmem:[#allocation63_spill] sm:$0xff] %v9108_v29  ;;  %v9110_v35 = vpop.f32.mrf.mxu3 }
 0x733   :  { %11386 = vst [vmem:[#allocation104_spill] sm:$0xff] %v9110_v35  ;;  %v9112_v8 = vpop.f32.mrf.mxu1 }
 0x734   :  { %11387 = vst [vmem:[#allocation122_spill] sm:$0xff] %v9112_v8 }
 0x735   :  { %v9114_v16 = vpop.f32.mrf.mxu0 }
 0x736   :  { %11388 = vst [vmem:[#allocation147_spill] sm:$0xff] %v9114_v16  ;;  %3035 = vmatmul.f32.gmra.mxu1 %v8630_v23  ;;  %3148 = vmatmul.f32.gmra.mxu2 %v8630_v23 }
 0x737   :  { %3261 = vmatmul.f32.gmra.mxu3 %v8630_v23 }
 0x738   :  { %3329 = vmatmul.f32.gmra.mxu0 %v8376_v58 }
 0x739   :  { %v9120_v22 = vpop.f32.mrf.mxu2 }
 0x73a   :  { %11389 = vst [vmem:[#allocation39_spill] sm:$0xff] %v9120_v22  ;;  %v9122_v20 = vpop.f32.mrf.mxu3 }
 0x73b   :  { %11390 = vst [vmem:[#allocation65_spill] sm:$0xff] %v9122_v20  ;;  %v9124_v31 = vpop.f32.mrf.mxu1 }
 0x73c   :  { %11391 = vst [vmem:[#allocation106_spill] sm:$0xff] %v9124_v31 }
 0x73d   :  { %v9126_v29 = vpop.f32.mrf.mxu0 }
 0x73e   :  { %11392 = vst [vmem:[#allocation124_spill] sm:$0xff] %v9126_v29  ;;  %3038 = vmatmul.f32.gmra.mxu1 %v8650_v14  ;;  %3151 = vmatmul.f32.gmra.mxu2 %v8650_v14 }
 0x73f   :  { %3264 = vmatmul.f32.gmra.mxu3 %v8650_v14 }
 0x740   :  { %3332 = vmatmul.f32.gmra.mxu0 %v8390_v1 }
 0x741   :  { %v9132_v16 = vpop.f32.mrf.mxu2 }
 0x742   :  { %11393 = vst [vmem:[#allocation149_spill] sm:$0xff] %v9132_v16  ;;  %v9134_v35 = vpop.f32.mrf.mxu3 }
 0x743   :  { %11394 = vst [vmem:[#allocation82_spill] sm:$0xff] %v9134_v35  ;;  %v9136_v8 = vpop.f32.mrf.mxu1 }
 0x744   :  { %11395 = vst [vmem:[#allocation67_spill] sm:$0xff] %v9136_v8 }
 0x745   :  { %v9138_v22 = vpop.f32.mrf.mxu0 }
 0x746   :  { %11396 = vst [vmem:[#allocation108_spill] sm:$0xff] %v9138_v22  ;;  %3041 = vmatmul.f32.gmra.mxu1 %v8670_v45  ;;  %3154 = vmatmul.f32.gmra.mxu2 %v8670_v45 }
 0x747   :  { %3267 = vmatmul.f32.gmra.mxu3 %v8670_v45 }
 0x748   :  { %3335 = vmatmul.f32.gmra.mxu0 %v8404_v9 }
 0x749   :  { %v9144_v29 = vpop.f32.mrf.mxu2 }
 0x74a   :  { %11397 = vst [vmem:[#allocation126_spill] sm:$0xff] %v9144_v29  ;;  %v9146_v20 = vpop.f32.mrf.mxu3 }
 0x74b   :  { %11398 = vst [vmem:[#allocation91_spill] sm:$0xff] %v9146_v20  ;;  %v9148_v31 = vpop.f32.mrf.mxu1 }
 0x74c   :  { %11399 = vst [vmem:[#allocation150_spill] sm:$0xff] %v9148_v31 }
 0x74d   :  { %v9150_v16 = vpop.f32.mrf.mxu0 }
 0x74e   :  { %11400 = vst [vmem:[#allocation84_spill] sm:$0xff] %v9150_v16  ;;  %3044 = vmatmul.f32.gmra.mxu1 %v8690_v60  ;;  %3157 = vmatmul.f32.gmra.mxu2 %v8690_v60 }
 0x74f   :  { %3270 = vmatmul.f32.gmra.mxu3 %v8690_v60 }
 0x750   :  { %3338 = vmatmul.f32.gmra.mxu0 %v8420_v18 }
 0x751   :  { %v9156_v22 = vpop.f32.mrf.mxu2 }
 0x752   :  { %11401 = vst [vmem:[#allocation153_spill] sm:$0xff] %v9156_v22  ;;  %v9158_v35 = vpop.f32.mrf.mxu3 }
 0x753   :  { %11402 = vst [vmem:[#allocation154_spill] sm:$0xff] %v9158_v35  ;;  %v9160_v8 = vpop.f32.mrf.mxu1 }
 0x754   :  { %11403 = vst [vmem:[#allocation155_spill] sm:$0xff] %v9160_v8 }
 0x755   :  { %v9162_v29 = vpop.f32.mrf.mxu0 }
 0x756   :  { %11404 = vst [vmem:[#allocation156_spill] sm:$0xff] %v9162_v29  ;;  %3047 = vmatmul.f32.gmra.mxu1 %v8710_v3  ;;  %3160 = vmatmul.f32.gmra.mxu2 %v8710_v3 }
 0x757   :  { %3273 = vmatmul.f32.gmra.mxu3 %v8710_v3 }
 0x758   :  { %3341 = vmatmul.f32.gmra.mxu0 %v8438_v51 }
 0x759   :  { %v9168_v16 = vpop.f32.mrf.mxu2 }
 0x75a   :  { %11405 = vst [vmem:[#allocation157_spill] sm:$0xff] %v9168_v16  ;;  %v9170_v20 = vpop.f32.mrf.mxu3 }
 0x75b   :  { %11406 = vst [vmem:[#allocation158_spill] sm:$0xff] %v9170_v20  ;;  %v9172_v31 = vpop.f32.mrf.mxu1  ;;  %v2509_v20 = vld [vmem:[#allocation10 + $0x660] sm:$0xff] }
 0x75c   :  { %11407 = vst [vmem:[#allocation159_spill] sm:$0xff] %v9172_v31  ;;  %v2510_v31 = vld [vmem:[#allocation10 + $0x668] sm:$0xff]  ;;  %3530 = vmatpush.msrb.mxu2 %v2509_v20 }
 0x75d   :  { %v9174_v22 = vpop.f32.mrf.mxu0  ;;  %3643 = vmatpush.msrb.mxu3 %v2510_v31  ;;  %v2470_v31 = vld [vmem:[#allocation10 + $0x528] sm:$0xff] }
 0x75e   :  { %11408 = vst [vmem:[#allocation160_spill] sm:$0xff] %v9174_v22  ;;  %3050 = vmatmul.f32.gmra.mxu1 %v8730_v50  ;;  %3163 = vmatmul.f32.gmra.mxu2 %v8730_v50  ;;  %v2508_v22 = vld [vmem:[#allocation10 + $0x658] sm:$0xff] }
 0x75f   :  { %3276 = vmatmul.f32.gmra.mxu3 %v8730_v50  ;;  %3417 = vmatpush.msrb.mxu1 %v2508_v22  ;;  %v2469_v22 = vld [vmem:[#allocation10 + $0x520] sm:$0xff] }
 0x760   :  { %3344 = vmatmul.f32.gmra.mxu0 %v8455_v48 }
 0x761   :  { %v9180_v29 = vpop.f32.mrf.mxu2 }
 0x762   :  { %11409 = vst [vmem:[#allocation161_spill] sm:$0xff] %v9180_v29  ;;  %v9182_v35 = vpop.f32.mrf.mxu3 }
 0x763   :  { %11410 = vst [vmem:[#allocation162_spill] sm:$0xff] %v9182_v35  ;;  %v9184_v8 = vpop.f32.mrf.mxu1  ;;  %v2495_v35 = vld [vmem:[#allocation10 + $0x5f0] sm:$0xff] }
 0x764   :  { %11411 = vst [vmem:[#allocation163_spill] sm:$0xff] %v9184_v8  ;;  %v2496_v8 = vld [vmem:[#allocation10 + $0x5f8] sm:$0xff]  ;;  %3418 = vmatpush.msrb.mxu1 %v2495_v35  ;;  %v2471_v35 = vld [vmem:[#allocation10 + $0x530] sm:$0xff] }
 0x765   :  { %v9186_v16 = vpop.f32.mrf.mxu0  ;;  %3531 = vmatpush.msrb.mxu2 %v2496_v8  ;;  %v2456_v8 = vld [vmem:[#allocation10 + $0x4b8] sm:$0xff] }
 0x766   :  { %11412 = vst [vmem:[#allocation164_spill] sm:$0xff] %v9186_v16  ;;  %3053 = vmatmul.f32.gmra.mxu1 %v8750_v59  ;;  %3166 = vmatmul.f32.gmra.mxu2 %v8750_v59  ;;  %v2497_v16 = vld [vmem:[#allocation10 + $0x600] sm:$0xff] }
 0x767   :  { %3279 = vmatmul.f32.gmra.mxu3 %v8750_v59  ;;  %3419 = vmatpush.msrb.mxu1 %v2482_v15  ;;  %v2458_v15 = vld [vmem:[#allocation10 + $0x4c8] sm:$0xff] }
 0x768   :  { %3347 = vmatmul.f32.gmra.mxu0 %v8472_v55  ;;  %3644 = vmatpush.msrb.mxu3 %v2497_v16  ;;  %v2457_v16 = vld [vmem:[#allocation10 + $0x4c0] sm:$0xff] }
 0x769   :  { %v9192_v37 = vpop.f32.mrf.mxu2  ;;  %3532 = vmatpush.msrb.mxu2 %v2483_v62  ;;  %3420 = vmatpush.msrb.mxu1 %v2469_v22  ;;  %v2444_v62 = vld [vmem:[#allocation10 + $0x458] sm:$0xff]  ;;  %v2430_v22 = vld [vmem:[#allocation10 + $0x3e8] sm:$0xff] }
 0x76a   :  { %11413 = vst [vmem:[#allocation165_spill] sm:$0xff] %v9192_v37  ;;  %v9194_v29 = vpop.f32.mrf.mxu3  ;;  %3645 = vmatpush.msrb.mxu3 %v2484_v43  ;;  %v2443_v43 = vld [vmem:[#allocation10 + $0x450] sm:$0xff] }
 0x76b   :  { %11414 = vst [vmem:[#allocation166_spill] sm:$0xff] %v9194_v29  ;;  %v9196_v2 = vpop.f32.mrf.mxu1  ;;  %3533 = vmatpush.msrb.mxu2 %v2470_v31  ;;  %3421 = vmatpush.msrb.mxu1 %v2456_v8  ;;  %v2445_v29 = vld [vmem:[#allocation10 + $0x460] sm:$0xff]  ;;  %v2431_v37 = vld [vmem:[#allocation10 + $0x3f0] sm:$0xff]  ;;  %v2432_v31 = vld [vmem:[#allocation10 + $0x3f8] sm:$0xff] }
 0x76c   :  { %11415 = vst [vmem:[#allocation167_spill] sm:$0xff] %v9196_v2  ;;  %3646 = vmatpush.msrb.mxu3 %v2471_v35  ;;  %v2417_v35 = vld [vmem:[#allocation10 + $0x380] sm:$0xff]  ;;  %v2418_v8 = vld [vmem:[#allocation10 + $0x388] sm:$0xff] }
 0x76d   :  { %v9198_v39 = vpop.f32.mrf.mxu0  ;;  %3534 = vmatpush.msrb.mxu2 %v2457_v16  ;;  %3422 = vmatpush.msrb.mxu1 %v2443_v43  ;;  %v2419_v16 = vld [vmem:[#allocation10 + $0x390] sm:$0xff]  ;;  %v2405_v43 = vld [vmem:[#allocation10 + $0x320] sm:$0xff] }
 0x76e   :  { %11416 = vst [vmem:[#allocation168_spill] sm:$0xff] %v9198_v39  ;;  %3056 = vmatmul.f32.gmra.mxu1 %v8770_v52  ;;  %3169 = vmatmul.f32.gmra.mxu2 %v8770_v52 }
 0x76f   :  { %3282 = vmatmul.f32.gmra.mxu3 %v8770_v52  ;;  %3535 = vmatpush.msrb.mxu2 %v2444_v62 }
 0x770   :  { %3350 = vmatmul.f32.gmra.mxu0 %v8489_v5  ;;  %3647 = vmatpush.msrb.mxu3 %v2458_v15  ;;  %v2404_v15 = vld [vmem:[#allocation10 + $0x318] sm:$0xff] }
 0x771   :  { %v9204_v20 = vpop.f32.mrf.mxu2  ;;  %3423 = vmatpush.msrb.mxu1 %v2430_v22  ;;  %3536 = vmatpush.msrb.mxu2 %v2431_v37  ;;  %v2378_v37 = vld [vmem:[#allocation10 + $0x248] sm:$0xff] }
 0x772   :  { %11417 = vst [vmem:[#allocation169_spill] sm:$0xff] %v9204_v20  ;;  %v9206_v39 = vpop.f32.mrf.mxu3  ;;  %3648 = vmatpush.msrb.mxu3 %v2445_v29  ;;  %v2406_v29 = vld [vmem:[#allocation10 + $0x328] sm:$0xff] }
 0x773   :  { %11418 = vst [vmem:[#allocation170_spill] sm:$0xff] %v9206_v39  ;;  %v9208_v2 = vpop.f32.mrf.mxu1  ;;  %3424 = vmatpush.msrb.mxu1 %v2417_v35  ;;  %3537 = vmatpush.msrb.mxu2 %v2418_v8  ;;  %v2392_v39 = vld [vmem:[#allocation10 + $0x2b8] sm:$0xff]  ;;  %v2379_v35 = vld [vmem:[#allocation10 + $0x250] sm:$0xff]  ;;  %v2365_v8 = vld [vmem:[#allocation10 + $0x1e0] sm:$0xff] }
 0x774   :  { %11419 = vst [vmem:[#allocation171_spill] sm:$0xff] %v9208_v2  ;;  %3649 = vmatpush.msrb.mxu3 %v2432_v31  ;;  %v2393_v31 = vld [vmem:[#allocation10 + $0x2c0] sm:$0xff] }
 0x775   :  { %v9210_v49 = vpop.f32.mrf.mxu0  ;;  %3425 = vmatpush.msrb.mxu1 %v2404_v15  ;;  %3538 = vmatpush.msrb.mxu2 %v2405_v43  ;;  %v2366_v15 = vld [vmem:[#allocation10 + $0x1e8] sm:$0xff]  ;;  %v2352_v43 = vld [vmem:[#allocation10 + $0x178] sm:$0xff] }
 0x776   :  { %11420 = vst [vmem:[#allocation172_spill] sm:$0xff] %v9210_v49  ;;  %3059 = vmatmul.f32.gmra.mxu1 %v8790_v17  ;;  %3172 = vmatmul.f32.gmra.mxu2 %v8790_v17  ;;  %v2391_v49 = vld [vmem:[#allocation10 + $0x2b0] sm:$0xff] }
 0x777   :  { %3285 = vmatmul.f32.gmra.mxu3 %v8790_v17  ;;  %3426 = vmatpush.msrb.mxu1 %v2391_v49  ;;  %v2367_v49 = vld [vmem:[#allocation10 + $0x1f0] sm:$0xff] }
 0x778   :  { %3353 = vmatmul.f32.gmra.mxu0 %v8506_v13  ;;  %3650 = vmatpush.msrb.mxu3 %v2419_v16  ;;  %v2380_v16 = vld [vmem:[#allocation10 + $0x258] sm:$0xff] }
 0x779   :  { %v9216_v62 = vpop.f32.mrf.mxu2  ;;  %3539 = vmatpush.msrb.mxu2 %v2392_v39  ;;  %3427 = vmatpush.msrb.mxu1 %v2378_v37  ;;  %v2340_v37 = vld [vmem:[#allocation10 + $0x118] sm:$0xff] }
 0x77a   :  { %11421 = vst [vmem:[#allocation173_spill] sm:$0xff] %v9216_v62  ;;  %v9218_v22 = vpop.f32.mrf.mxu3  ;;  %3651 = vmatpush.msrb.mxu3 %v2406_v29 }
 0x77b   :  { %11422 = vst [vmem:[#allocation174_spill] sm:$0xff] %v9218_v22  ;;  %v9220_v2 = vpop.f32.mrf.mxu1  ;;  %3540 = vmatpush.msrb.mxu2 %v2379_v35  ;;  %3428 = vmatpush.msrb.mxu1 %v2365_v8  ;;  %v2339_v22 = vld [vmem:[#allocation10 + $0x110] sm:$0xff]  ;;  %v2326_v35 = vld [vmem:[#allocation10 + $0xa8] sm:$0xff] }
 0x77c   :  { %11423 = vst [vmem:[#allocation175_spill] sm:$0xff] %v9220_v2  ;;  %3652 = vmatpush.msrb.mxu3 %v2393_v31  ;;  %v2354_v31 = vld [vmem:[#allocation10 + $0x188] sm:$0xff]  ;;  %v2327_v8 = vld [vmem:[#allocation10 + $0xb0] sm:$0xff] }
 0x77d   :  { %v9222_v20 = vpop.f32.mrf.mxu0  ;;  %3541 = vmatpush.msrb.mxu2 %v2366_v15  ;;  %3429 = vmatpush.msrb.mxu1 %v2352_v43  ;;  %v2313_v15 = vld [vmem:[#allocation10 + $0x40] sm:$0xff]  ;;  %v2314_v43 = vld [vmem:[#allocation10 + $0x48] sm:$0xff] }
 0x77e   :  { %11424 = vst [vmem:[#allocation176_spill] sm:$0xff] %v9222_v20  ;;  %3062 = vmatmul.f32.gmra.mxu1 %v8812_v19  ;;  %3175 = vmatmul.f32.gmra.mxu2 %v8812_v19  ;;  %v2353_v20 = vld [vmem:[#allocation10 + $0x180] sm:$0xff] }
 0x77f   :  { %3288 = vmatmul.f32.gmra.mxu3 %v8812_v19  ;;  %3542 = vmatpush.msrb.mxu2 %v2353_v20  ;;  %v2328_v20 = vld [vmem:[#allocation10 + $0xb8] sm:$0xff] }
 0x780   :  { %3356 = vmatmul.f32.gmra.mxu0 %v8523_v25  ;;  %3653 = vmatpush.msrb.mxu3 %v2380_v16  ;;  %v2341_v16 = vld [vmem:[#allocation10 + $0x120] sm:$0xff] }
 0x781   :  { %v9228_v29 = vpop.f32.mrf.mxu2  ;;  %3430 = vmatpush.msrb.mxu1 %v2339_v22  ;;  %3543 = vmatpush.msrb.mxu2 %v2340_v37 }
 0x782   :  { %11425 = vst [vmem:[#allocation177_spill] sm:$0xff] %v9228_v29  ;;  %v9230_v39 = vpop.f32.mrf.mxu3  ;;  %3654 = vmatpush.msrb.mxu3 %v2367_v49 }
 0x783   :  { %11426 = vst [vmem:[#allocation178_spill] sm:$0xff] %v9230_v39  ;;  %v9232_v2 = vpop.f32.mrf.mxu1  ;;  %3431 = vmatpush.msrb.mxu1 %v2326_v35  ;;  %3544 = vmatpush.msrb.mxu2 %v2327_v8  ;;  %v2315_v39 = vld [vmem:[#allocation10 + $0x50] sm:$0xff] }
 0x784   :  { %11427 = vst [vmem:[#allocation179_spill] sm:$0xff] %v9232_v2  ;;  %3655 = vmatpush.msrb.mxu3 %v2354_v31 }
 0x785   :  { %v9234_v62 = vpop.f32.mrf.mxu0  ;;  %3432 = vmatpush.msrb.mxu1 %v2313_v15  ;;  %3545 = vmatpush.msrb.mxu2 %v2314_v43 }
 0x786   :  { %11428 = vst [vmem:[#allocation180_spill] sm:$0xff] %v9234_v62  ;;  %3065 = vmatmul.f32.gmra.mxu1 %v8832_v56  ;;  %3178 = vmatmul.f32.gmra.mxu2 %v8832_v56 }
 0x787   :  { %3291 = vmatmul.f32.gmra.mxu3 %v8832_v56 }
 0x788   :  { %3359 = vmatmul.f32.gmra.mxu0 %v8538_v40  ;;  %3656 = vmatpush.msrb.mxu3 %v2341_v16 }
 0x789   :  { %v9240_v49 = vpop.f32.mrf.mxu2 }
 0x78a   :  { %11429 = vst [vmem:[#allocation181_spill] sm:$0xff] %v9240_v49  ;;  %v9242_v22 = vpop.f32.mrf.mxu3  ;;  %3657 = vmatpush.msrb.mxu3 %v2328_v20  ;;  %v4843_v49 = vld [vmem:[#allocation13 + $0xe8] sm:$0xff] }
 0x78b   :  { %11430 = vst [vmem:[#allocation182_spill] sm:$0xff] %v9242_v22  ;;  %v9244_v62 = vpop.f32.mrf.mxu1 }
 0x78c   :  { %11431 = vst [vmem:[#allocation183_spill] sm:$0xff] %v9244_v62  ;;  %3658 = vmatpush.msrb.mxu3 %v2315_v39  ;;  %v4827_v62 = vld [vmem:[#allocation13 + $0x68] sm:$0xff] }
 0x78d   :  { %v9246_v37 = vpop.f32.mrf.mxu0 }
 0x78e   :  { %11432 = vst [vmem:[#allocation184_spill] sm:$0xff] %v9246_v37  ;;  %3068 = vmatmul.f32.gmra.mxu1 %v8852_v41  ;;  %3181 = vmatmul.f32.gmra.mxu2 %v8852_v41 }
 0x78f   :  { %3294 = vmatmul.f32.gmra.mxu3 %v8852_v41 }
 0x790   :  { %3362 = vmatmul.f32.gmra.mxu0 %v11308_v63 }
 0x791   :  { %v9252_v31 = vpop.f32.mrf.mxu2 }
 0x792   :  { %11433 = vst [vmem:[#allocation185_spill] sm:$0xff] %v9252_v31  ;;  %v9254_v35 = vpop.f32.mrf.mxu3  ;;  %v2486_v31 = vld [vmem:[#allocation10 + $0x5a8] sm:$0xff] }
 0x793   :  { %11434 = vst [vmem:[#allocation186_spill] sm:$0xff] %v9254_v35  ;;  %v9256_v8 = vpop.f32.mrf.mxu1 }
 0x794   :  { %11435 = vst [vmem:[#allocation187_spill] sm:$0xff] %v9256_v8  ;;  %v2433_v8 = vld [vmem:[#allocation10 + $0x400] sm:$0xff] }
 0x795   :  { %v9258_v16 = vpop.f32.mrf.mxu0 }
 0x796   :  { %11436 = vst [vmem:[#allocation188_spill] sm:$0xff] %v9258_v16  ;;  %3071 = vmatmul.f32.gmra.mxu1 %v8870_v7  ;;  %3184 = vmatmul.f32.gmra.mxu2 %v8870_v7 }
 0x797   :  { %3297 = vmatmul.f32.gmra.mxu3 %v8870_v7 }
 0x798   :  { %3365 = vmatmul.f32.gmra.mxu0 %v8572_v57 }
 0x799   :  { %v9264_v15 = vpop.f32.mrf.mxu2 }
 0x79a   :  { %11437 = vst [vmem:[#allocation189_spill] sm:$0xff] %v9264_v15  ;;  %v9266_v43 = vpop.f32.mrf.mxu3  ;;  %v2472_v15 = vld [vmem:[#allocation10 + $0x538] sm:$0xff] }
 0x79b   :  { %11438 = vst [vmem:[#allocation190_spill] sm:$0xff] %v9266_v43  ;;  %v9268_v39 = vpop.f32.mrf.mxu1 }
 0x79c   :  { %11439 = vst [vmem:[#allocation191_spill] sm:$0xff] %v9268_v39 }
 0x79d   :  { %v9270_v20 = vpop.f32.mrf.mxu0 }
 0x79e   :  { %11440 = vst [vmem:[#allocation192_spill] sm:$0xff] %v9270_v20  ;;  %3074 = vmatmul.f32.gmra.mxu1 %v8884_v10  ;;  %3187 = vmatmul.f32.gmra.mxu2 %v8884_v10 }
 0x79f   :  { %3300 = vmatmul.f32.gmra.mxu3 %v8884_v10 }
 0x7a0   :  { %3368 = vmatmul.f32.gmra.mxu0 %v8590_v38 }
 0x7a1   :  { %v9276_v16 = vpop.f32.mrf.mxu2 }
 0x7a2   :  { %11441 = vst [vmem:[#allocation193_spill] sm:$0xff] %v9276_v16  ;;  %v9278_v37 = vpop.f32.mrf.mxu3 }
 0x7a3   :  { %11442 = vst [vmem:[#allocation194_spill] sm:$0xff] %v9278_v37  ;;  %v9280_v35 = vpop.f32.mrf.mxu1 }
 0x7a4   :  { %11443 = vst [vmem:[#allocation195_spill] sm:$0xff] %v9280_v35 }
 0x7a5   :  { %v9282_v22 = vpop.f32.mrf.mxu0 }
 0x7a6   :  { %11444 = vst [vmem:[#allocation196_spill] sm:$0xff] %v9282_v22  ;;  %3433 = vmatmul.f32.vlgmr.msrb.gmra.mxu1 %v8334_v33  ;;  %3546 = vmatmul.f32.vlgmr.msrb.gmra.mxu2 %v8334_v33 }
 0x7a7   :  { %3659 = vmatmul.f32.vlgmr.msrb.gmra.mxu3 %v8334_v33 }
 0x7a8   :  { %3371 = vmatmul.f32.gmra.mxu0 %v8610_v42 }
 0x7a9   :  { %v9288_v20 = vpop.f32.mrf.mxu2 }
 0x7aa   :  { %11445 = vst [vmem:[#allocation197_spill] sm:$0xff] %v9288_v20  ;;  %v9290_v43 = vpop.f32.mrf.mxu3 }
 0x7ab   :  { %11446 = vst [vmem:[#allocation198_spill] sm:$0xff] %v9290_v43  ;;  %v9292_v39 = vpop.f32.mrf.mxu1 }
 0x7ac   :  { %11447 = vst [vmem:[#allocation199_spill] sm:$0xff] %v9292_v39 }
 0x7ad   :  { %v9294_v16 = vpop.f32.mrf.mxu0 }
 0x7ae   :  { %11448 = vst [vmem:[#allocation200_spill] sm:$0xff] %v9294_v16  ;;  %3436 = vmatmul.f32.gmra.mxu1 %v8348_v0  ;;  %3549 = vmatmul.f32.gmra.mxu2 %v8348_v0 }
 0x7af   :  { %3662 = vmatmul.f32.gmra.mxu3 %v8348_v0 }
 0x7b0   :  { %3374 = vmatmul.f32.gmra.mxu0 %v8630_v23 }
 0x7b1   :  { %v9300_v22 = vpop.f32.mrf.mxu2 }
 0x7b2   :  { %11449 = vst [vmem:[#allocation201_spill] sm:$0xff] %v9300_v22  ;;  %v9302_v37 = vpop.f32.mrf.mxu3 }
 0x7b3   :  { %11450 = vst [vmem:[#allocation202_spill] sm:$0xff] %v9302_v37  ;;  %v9304_v35 = vpop.f32.mrf.mxu1 }
 0x7b4   :  { %11451 = vst [vmem:[#allocation203_spill] sm:$0xff] %v9304_v35 }
 0x7b5   :  { %v9306_v20 = vpop.f32.mrf.mxu0 }
 0x7b6   :  { %11452 = vst [vmem:[#allocation204_spill] sm:$0xff] %v9306_v20  ;;  %3439 = vmatmul.f32.gmra.mxu1 %v8362_v4  ;;  %3552 = vmatmul.f32.gmra.mxu2 %v8362_v4 }
 0x7b7   :  { %3665 = vmatmul.f32.gmra.mxu3 %v8362_v4 }
 0x7b8   :  { %3377 = vmatmul.f32.gmra.mxu0 %v8650_v14 }
 0x7b9   :  { %v9312_v16 = vpop.f32.mrf.mxu2 }
 0x7ba   :  { %11453 = vst [vmem:[#allocation205_spill] sm:$0xff] %v9312_v16  ;;  %v9314_v43 = vpop.f32.mrf.mxu3 }
 0x7bb   :  { %11454 = vst [vmem:[#allocation206_spill] sm:$0xff] %v9314_v43  ;;  %v9316_v39 = vpop.f32.mrf.mxu1 }
 0x7bc   :  { %11455 = vst [vmem:[#allocation207_spill] sm:$0xff] %v9316_v39 }
 0x7bd   :  { %v9318_v22 = vpop.f32.mrf.mxu0 }
 0x7be   :  { %11456 = vst [vmem:[#allocation208_spill] sm:$0xff] %v9318_v22  ;;  %3442 = vmatmul.f32.gmra.mxu1 %v8376_v58  ;;  %3555 = vmatmul.f32.gmra.mxu2 %v8376_v58 }
 0x7bf   :  { %3668 = vmatmul.f32.gmra.mxu3 %v8376_v58 }
 0x7c0   :  { %3380 = vmatmul.f32.gmra.mxu0 %v8670_v45 }
 0x7c1   :  { %v9324_v20 = vpop.f32.mrf.mxu2 }
 0x7c2   :  { %11457 = vst [vmem:[#allocation209_spill] sm:$0xff] %v9324_v20  ;;  %v9326_v37 = vpop.f32.mrf.mxu3 }
 0x7c3   :  { %11458 = vst [vmem:[#allocation210_spill] sm:$0xff] %v9326_v37  ;;  %v9328_v35 = vpop.f32.mrf.mxu1 }
 0x7c4   :  { %11459 = vst [vmem:[#allocation211_spill] sm:$0xff] %v9328_v35 }
 0x7c5   :  { %v9330_v16 = vpop.f32.mrf.mxu0 }
 0x7c6   :  { %11460 = vst [vmem:[#allocation212_spill] sm:$0xff] %v9330_v16  ;;  %3445 = vmatmul.f32.gmra.mxu1 %v8390_v1  ;;  %3558 = vmatmul.f32.gmra.mxu2 %v8390_v1 }
 0x7c7   :  { %3671 = vmatmul.f32.gmra.mxu3 %v8390_v1 }
 0x7c8   :  { %3383 = vmatmul.f32.gmra.mxu0 %v8690_v60 }
 0x7c9   :  { %v9336_v22 = vpop.f32.mrf.mxu2 }
 0x7ca   :  { %11461 = vst [vmem:[#allocation213_spill] sm:$0xff] %v9336_v22  ;;  %v9338_v43 = vpop.f32.mrf.mxu3 }
 0x7cb   :  { %11462 = vst [vmem:[#allocation214_spill] sm:$0xff] %v9338_v43  ;;  %v9340_v39 = vpop.f32.mrf.mxu1 }
 0x7cc   :  { %11463 = vst [vmem:[#allocation215_spill] sm:$0xff] %v9340_v39 }
 0x7cd   :  { %v9342_v20 = vpop.f32.mrf.mxu0 }
 0x7ce   :  { %11464 = vst [vmem:[#allocation216_spill] sm:$0xff] %v9342_v20  ;;  %3448 = vmatmul.f32.gmra.mxu1 %v8404_v9  ;;  %3561 = vmatmul.f32.gmra.mxu2 %v8404_v9 }
 0x7cf   :  { %3674 = vmatmul.f32.gmra.mxu3 %v8404_v9 }
 0x7d0   :  { %3386 = vmatmul.f32.gmra.mxu0 %v8710_v3 }
 0x7d1   :  { %v9348_v16 = vpop.f32.mrf.mxu2 }
 0x7d2   :  { %11465 = vst [vmem:[#allocation217_spill] sm:$0xff] %v9348_v16  ;;  %v9350_v37 = vpop.f32.mrf.mxu3 }
 0x7d3   :  { %11466 = vst [vmem:[#allocation218_spill] sm:$0xff] %v9350_v37  ;;  %v9352_v35 = vpop.f32.mrf.mxu1  ;;  %v2511_v37 = vld [vmem:[#allocation10 + $0x670] sm:$0xff] }
 0x7d4   :  { %11467 = vst [vmem:[#allocation219_spill] sm:$0xff] %v9352_v35  ;;  %3756 = vmatpush.msra.mxu0 %v2511_v37  ;;  %v2459_v37 = vld [vmem:[#allocation10 + $0x4d0] sm:$0xff] }
 0x7d5   :  { %v9354_v22 = vpop.f32.mrf.mxu0 }
 0x7d6   :  { %11468 = vst [vmem:[#allocation220_spill] sm:$0xff] %v9354_v22  ;;  %3451 = vmatmul.f32.gmra.mxu1 %v8420_v18  ;;  %3564 = vmatmul.f32.gmra.mxu2 %v8420_v18 }
 0x7d7   :  { %3677 = vmatmul.f32.gmra.mxu3 %v8420_v18 }
 0x7d8   :  { %3389 = vmatmul.f32.gmra.mxu0 %v8730_v50 }
 0x7d9   :  { %v9360_v20 = vpop.f32.mrf.mxu2 }
 0x7da   :  { %11469 = vst [vmem:[#allocation221_spill] sm:$0xff] %v9360_v20  ;;  %v9362_v43 = vpop.f32.mrf.mxu3 }
 0x7db   :  { %11470 = vst [vmem:[#allocation222_spill] sm:$0xff] %v9362_v43  ;;  %v9364_v39 = vpop.f32.mrf.mxu1  ;;  %v2498_v43 = vld [vmem:[#allocation10 + $0x608] sm:$0xff] }
 0x7dc   :  { %11471 = vst [vmem:[#allocation223_spill] sm:$0xff] %v9364_v39  ;;  %3757 = vmatpush.msra.mxu0 %v2498_v43 }
 0x7dd   :  { %v9366_v16 = vpop.f32.mrf.mxu0 }
 0x7de   :  { %11472 = vst [vmem:[#allocation224_spill] sm:$0xff] %v9366_v16  ;;  %3454 = vmatmul.f32.gmra.mxu1 %v8438_v51  ;;  %3567 = vmatmul.f32.gmra.mxu2 %v8438_v51  ;;  %v2485_v16 = vld [vmem:[#allocation10 + $0x5a0] sm:$0xff] }
 0x7df   :  { %3680 = vmatmul.f32.gmra.mxu3 %v8438_v51  ;;  %3758 = vmatpush.msra.mxu0 %v2485_v16  ;;  %v2420_v16 = vld [vmem:[#allocation10 + $0x398] sm:$0xff] }
 0x7e0   :  { %3392 = vmatmul.f32.gmra.mxu0 %v8750_v59 }
 0x7e1   :  { %v9372_v22 = vpop.f32.mrf.mxu2  ;;  %3759 = vmatpush.msra.mxu0 %v2472_v15 }
 0x7e2   :  { %11473 = vst [vmem:[#allocation225_spill] sm:$0xff] %v9372_v22  ;;  %v9374_v35 = vpop.f32.mrf.mxu3 }
 0x7e3   :  { %11474 = vst [vmem:[#allocation226_spill] sm:$0xff] %v9374_v35  ;;  %v9376_v20 = vpop.f32.mrf.mxu1  ;;  %3760 = vmatpush.msra.mxu0 %v2459_v37 }
 0x7e4   :  { %11475 = vst [vmem:[#allocation227_spill] sm:$0xff] %v9376_v20 }
 0x7e5   :  { %v9378_v39 = vpop.f32.mrf.mxu0 }
 0x7e6   :  { %11476 = vst [vmem:[#allocation228_spill] sm:$0xff] %v9378_v39  ;;  %3457 = vmatmul.f32.gmra.mxu1 %v8455_v48  ;;  %3570 = vmatmul.f32.gmra.mxu2 %v8455_v48  ;;  %v2446_v39 = vld [vmem:[#allocation10 + $0x468] sm:$0xff] }
 0x7e7   :  { %3683 = vmatmul.f32.gmra.mxu3 %v8455_v48  ;;  %3761 = vmatpush.msra.mxu0 %v2446_v39  ;;  %v2394_v39 = vld [vmem:[#allocation10 + $0x2c8] sm:$0xff] }
 0x7e8   :  { %3395 = vmatmul.f32.gmra.mxu0 %v8770_v52 }
 0x7e9   :  { %v9384_v22 = vpop.f32.mrf.mxu2  ;;  %3762 = vmatpush.msra.mxu0 %v2433_v8  ;;  %v2368_v8 = vld [vmem:[#allocation10 + $0x1f8] sm:$0xff] }
 0x7ea   :  { %11477 = vst [vmem:[#allocation229_spill] sm:$0xff] %v9384_v22  ;;  %v9386_v35 = vpop.f32.mrf.mxu3  ;;  %v2381_v22 = vld [vmem:[#allocation10 + $0x260] sm:$0xff] }
 0x7eb   :  { %11478 = vst [vmem:[#allocation230_spill] sm:$0xff] %v9386_v35  ;;  %v9388_v43 = vpop.f32.mrf.mxu1  ;;  %3763 = vmatpush.msra.mxu0 %v2420_v16  ;;  %v2407_v35 = vld [vmem:[#allocation10 + $0x330] sm:$0xff] }
 0x7ec   :  { %11479 = vst [vmem:[#allocation231_spill] sm:$0xff] %v9388_v43 }
 0x7ed   :  { %v9390_v20 = vpop.f32.mrf.mxu0  ;;  %3764 = vmatpush.msra.mxu0 %v2407_v35 }
 0x7ee   :  { %11480 = vst [vmem:[#allocation232_spill] sm:$0xff] %v9390_v20  ;;  %3460 = vmatmul.f32.gmra.mxu1 %v8472_v55  ;;  %3573 = vmatmul.f32.gmra.mxu2 %v8472_v55 }
 0x7ef   :  { %3686 = vmatmul.f32.gmra.mxu3 %v8472_v55  ;;  %3765 = vmatpush.msra.mxu0 %v2394_v39  ;;  %v2342_v39 = vld [vmem:[#allocation10 + $0x128] sm:$0xff] }
 0x7f0   :  { %3398 = vmatmul.f32.gmra.mxu0 %v8790_v17 }
 0x7f1   :  { %v9396_v15 = vpop.f32.mrf.mxu2  ;;  %3766 = vmatpush.msra.mxu0 %v2381_v22  ;;  %v2316_v22 = vld [vmem:[#allocation10 + $0x58] sm:$0xff] }
 0x7f2   :  { %11481 = vst [vmem:[#allocation233_spill] sm:$0xff] %v9396_v15  ;;  %v9398_v37 = vpop.f32.mrf.mxu3  ;;  %v2329_v15 = vld [vmem:[#allocation10 + $0xc0] sm:$0xff] }
 0x7f3   :  { %11482 = vst [vmem:[#allocation234_spill] sm:$0xff] %v9398_v37  ;;  %v9400_v43 = vpop.f32.mrf.mxu1  ;;  %3767 = vmatpush.msra.mxu0 %v2368_v8  ;;  %v2355_v37 = vld [vmem:[#allocation10 + $0x190] sm:$0xff] }
 0x7f4   :  { %11483 = vst [vmem:[#allocation235_spill] sm:$0xff] %v9400_v43 }
 0x7f5   :  { %v9402_v20 = vpop.f32.mrf.mxu0  ;;  %3768 = vmatpush.msra.mxu0 %v2355_v37 }
 0x7f6   :  { %11484 = vst [vmem:[#allocation236_spill] sm:$0xff] %v9402_v20  ;;  %3463 = vmatmul.f32.gmra.mxu1 %v8489_v5  ;;  %3576 = vmatmul.f32.gmra.mxu2 %v8489_v5 }
 0x7f7   :  { %3689 = vmatmul.f32.gmra.mxu3 %v8489_v5  ;;  %3769 = vmatpush.msra.mxu0 %v2342_v39 }
 0x7f8   :  { %3401 = vmatmul.f32.gmra.mxu0 %v8812_v19 }
 0x7f9   :  { %v9408_v16 = vpop.f32.mrf.mxu2  ;;  %3770 = vmatpush.msra.mxu0 %v2329_v15 }
 0x7fa   :  { %11485 = vst [vmem:[#allocation237_spill] sm:$0xff] %v9408_v16  ;;  %v9410_v35 = vpop.f32.mrf.mxu3 }
 0x7fb   :  { %11486 = vst [vmem:[#allocation238_spill] sm:$0xff] %v9410_v35  ;;  %v9412_v43 = vpop.f32.mrf.mxu1  ;;  %3771 = vmatpush.msra.mxu0 %v2316_v22 }
 0x7fc   :  { %11487 = vst [vmem:[#allocation239_spill] sm:$0xff] %v9412_v43 }
 0x7fd   :  { %v9414_v20 = vpop.f32.mrf.mxu0 }
 0x7fe   :  { %11488 = vst [vmem:[#allocation240_spill] sm:$0xff] %v9414_v20  ;;  %3466 = vmatmul.f32.gmra.mxu1 %v8506_v13  ;;  %3579 = vmatmul.f32.gmra.mxu2 %v8506_v13 }
 0x7ff   :  { %3692 = vmatmul.f32.gmra.mxu3 %v8506_v13 }
 0x800   :  { %3404 = vmatmul.f32.gmra.mxu0 %v8832_v56 }
 0x801   :  { %v9420_v8 = vpop.f32.mrf.mxu2 }
 0x802   :  { %11489 = vst [vmem:[#allocation241_spill] sm:$0xff] %v9420_v8  ;;  %v9422_v35 = vpop.f32.mrf.mxu3 }
 0x803   :  { %11490 = vst [vmem:[#allocation242_spill] sm:$0xff] %v9422_v35  ;;  %v9424_v37 = vpop.f32.mrf.mxu1 }
 0x804   :  { %11491 = vst [vmem:[#allocation243_spill] sm:$0xff] %v9424_v37 }
 0x805   :  { %v9426_v20 = vpop.f32.mrf.mxu0 }
 0x806   :  { %11492 = vst [vmem:[#allocation244_spill] sm:$0xff] %v9426_v20  ;;  %3469 = vmatmul.f32.gmra.mxu1 %v8523_v25  ;;  %3582 = vmatmul.f32.gmra.mxu2 %v8523_v25 }
 0x807   :  { %3695 = vmatmul.f32.gmra.mxu3 %v8523_v25 }
 0x808   :  { %3407 = vmatmul.f32.gmra.mxu0 %v8852_v41 }
 0x809   :  { %v9432_v15 = vpop.f32.mrf.mxu2 }
 0x80a   :  { %11493 = vst [vmem:[#allocation245_spill] sm:$0xff] %v9432_v15  ;;  %v9434_v39 = vpop.f32.mrf.mxu3 }
 0x80b   :  { %11494 = vst [vmem:[#allocation246_spill] sm:$0xff] %v9434_v39  ;;  %v9436_v8 = vpop.f32.mrf.mxu1 }
 0x80c   :  { %11495 = vst [vmem:[#allocation247_spill] sm:$0xff] %v9436_v8 }
 0x80d   :  { %v9438_v22 = vpop.f32.mrf.mxu0 }
 0x80e   :  { %11496 = vst [vmem:[#allocation248_spill] sm:$0xff] %v9438_v22  ;;  %3472 = vmatmul.f32.gmra.mxu1 %v8538_v40  ;;  %3585 = vmatmul.f32.gmra.mxu2 %v8538_v40 }
 0x80f   :  { %3698 = vmatmul.f32.gmra.mxu3 %v8538_v40 }
 0x810   :  { %3410 = vmatmul.f32.gmra.mxu0 %v8870_v7 }
 0x811   :  { %v9444_v20 = vpop.f32.mrf.mxu2 }
 0x812   :  { %11497 = vst [vmem:[#allocation249_spill] sm:$0xff] %v9444_v20  ;;  %v9446_v35 = vpop.f32.mrf.mxu3 }
 0x813   :  { %11498 = vst [vmem:[#allocation250_spill] sm:$0xff] %v9446_v35  ;;  %v9448_v37 = vpop.f32.mrf.mxu1 }
 0x814   :  { %11499 = vst [vmem:[#allocation251_spill] sm:$0xff] %v9448_v37 }
 0x815   :  { %v9450_v15 = vpop.f32.mrf.mxu0 }
 0x816   :  { %11500 = vst [vmem:[#allocation252_spill] sm:$0xff] %v9450_v15  ;;  %3475 = vmatmul.f32.gmra.mxu1 %v11308_v63  ;;  %3588 = vmatmul.f32.gmra.mxu2 %v11308_v63 }
 0x817   :  { %3701 = vmatmul.f32.gmra.mxu3 %v11308_v63 }
 0x818   :  { %3413 = vmatmul.f32.gmra.mxu0 %v8884_v10 }
 0x819   :  { %v9456_v22 = vpop.f32.mrf.mxu2 }
 0x81a   :  { %11501 = vst [vmem:[#allocation253_spill] sm:$0xff] %v9456_v22  ;;  %v9458_v39 = vpop.f32.mrf.mxu3 }
 0x81b   :  { %11502 = vst [vmem:[#allocation254_spill] sm:$0xff] %v9458_v39  ;;  %v9460_v8 = vpop.f32.mrf.mxu1 }
 0x81c   :  { %11503 = vst [vmem:[#allocation255_spill] sm:$0xff] %v9460_v8 }
 0x81d   :  { %v9462_v20 = vpop.f32.mrf.mxu0 }
 0x81e   :  { %11504 = vst [vmem:[#allocation256_spill] sm:$0xff] %v9462_v20  ;;  %3478 = vmatmul.f32.gmra.mxu1 %v8572_v57  ;;  %3591 = vmatmul.f32.gmra.mxu2 %v8572_v57 }
 0x81f   :  { %3704 = vmatmul.f32.gmra.mxu3 %v8572_v57 }
 0x820   :  { %3772 = vmatmul.f32.vlgmr.msra.gmra.mxu0 %v8334_v33 }
 0x821   :  { %v9468_v15 = vpop.f32.mrf.mxu2 }
 0x822   :  { %11505 = vst [vmem:[#allocation257_spill] sm:$0xff] %v9468_v15  ;;  %v9470_v35 = vpop.f32.mrf.mxu3 }
 0x823   :  { %11506 = vst [vmem:[#allocation258_spill] sm:$0xff] %v9470_v35  ;;  %v9472_v37 = vpop.f32.mrf.mxu1 }
 0x824   :  { %11507 = vst [vmem:[#allocation259_spill] sm:$0xff] %v9472_v37 }
 0x825   :  { %v9474_v22 = vpop.f32.mrf.mxu0 }
 0x826   :  { %11508 = vst [vmem:[#allocation260_spill] sm:$0xff] %v9474_v22  ;;  %3481 = vmatmul.f32.gmra.mxu1 %v8590_v38  ;;  %3594 = vmatmul.f32.gmra.mxu2 %v8590_v38 }
 0x827   :  { %3707 = vmatmul.f32.gmra.mxu3 %v8590_v38 }
 0x828   :  { %3775 = vmatmul.f32.gmra.mxu0 %v8348_v0 }
 0x829   :  { %v9480_v20 = vpop.f32.mrf.mxu2 }
 0x82a   :  { %11509 = vst [vmem:[#allocation261_spill] sm:$0xff] %v9480_v20  ;;  %v9482_v39 = vpop.f32.mrf.mxu3 }
 0x82b   :  { %11510 = vst [vmem:[#allocation262_spill] sm:$0xff] %v9482_v39  ;;  %v9484_v8 = vpop.f32.mrf.mxu1 }
 0x82c   :  { %11511 = vst [vmem:[#allocation263_spill] sm:$0xff] %v9484_v8 }
 0x82d   :  { %v9486_v15 = vpop.f32.mrf.mxu0 }
 0x82e   :  { %11512 = vst [vmem:[#allocation264_spill] sm:$0xff] %v9486_v15  ;;  %3484 = vmatmul.f32.gmra.mxu1 %v8610_v42  ;;  %3597 = vmatmul.f32.gmra.mxu2 %v8610_v42 }
 0x82f   :  { %3710 = vmatmul.f32.gmra.mxu3 %v8610_v42 }
 0x830   :  { %3778 = vmatmul.f32.gmra.mxu0 %v8362_v4 }
 0x831   :  { %v9492_v22 = vpop.f32.mrf.mxu2 }
 0x832   :  { %11513 = vst [vmem:[#allocation265_spill] sm:$0xff] %v9492_v22  ;;  %v9494_v35 = vpop.f32.mrf.mxu3 }
 0x833   :  { %11514 = vst [vmem:[#allocation266_spill] sm:$0xff] %v9494_v35  ;;  %v9496_v37 = vpop.f32.mrf.mxu1 }
 0x834   :  { %11515 = vst [vmem:[#allocation267_spill] sm:$0xff] %v9496_v37 }
 0x835   :  { %v9498_v20 = vpop.f32.mrf.mxu0 }
 0x836   :  { %11516 = vst [vmem:[#allocation268_spill] sm:$0xff] %v9498_v20  ;;  %3487 = vmatmul.f32.gmra.mxu1 %v8630_v23  ;;  %3600 = vmatmul.f32.gmra.mxu2 %v8630_v23 }
 0x837   :  { %3713 = vmatmul.f32.gmra.mxu3 %v8630_v23 }
 0x838   :  { %3781 = vmatmul.f32.gmra.mxu0 %v8376_v58 }
 0x839   :  { %v9504_v15 = vpop.f32.mrf.mxu2 }
 0x83a   :  { %11517 = vst [vmem:[#allocation269_spill] sm:$0xff] %v9504_v15  ;;  %v9506_v39 = vpop.f32.mrf.mxu3 }
 0x83b   :  { %11518 = vst [vmem:[#allocation270_spill] sm:$0xff] %v9506_v39  ;;  %v9508_v8 = vpop.f32.mrf.mxu1 }
 0x83c   :  { %11519 = vst [vmem:[#allocation271_spill] sm:$0xff] %v9508_v8 }
 0x83d   :  { %v9510_v22 = vpop.f32.mrf.mxu0 }
 0x83e   :  { %11520 = vst [vmem:[#allocation272_spill] sm:$0xff] %v9510_v22  ;;  %3490 = vmatmul.f32.gmra.mxu1 %v8650_v14  ;;  %3603 = vmatmul.f32.gmra.mxu2 %v8650_v14 }
 0x83f   :  { %3716 = vmatmul.f32.gmra.mxu3 %v8650_v14 }
 0x840   :  { %3784 = vmatmul.f32.gmra.mxu0 %v8390_v1 }
 0x841   :  { %v9516_v20 = vpop.f32.mrf.mxu2 }
 0x842   :  { %11521 = vst [vmem:[#allocation273_spill] sm:$0xff] %v9516_v20  ;;  %v9518_v35 = vpop.f32.mrf.mxu3 }
 0x843   :  { %11522 = vst [vmem:[#allocation274_spill] sm:$0xff] %v9518_v35  ;;  %v9520_v37 = vpop.f32.mrf.mxu1 }
 0x844   :  { %11523 = vst [vmem:[#allocation275_spill] sm:$0xff] %v9520_v37 }
 0x845   :  { %v9522_v15 = vpop.f32.mrf.mxu0 }
 0x846   :  { %11524 = vst [vmem:[#allocation276_spill] sm:$0xff] %v9522_v15  ;;  %3493 = vmatmul.f32.gmra.mxu1 %v8670_v45  ;;  %3606 = vmatmul.f32.gmra.mxu2 %v8670_v45 }
 0x847   :  { %3719 = vmatmul.f32.gmra.mxu3 %v8670_v45 }
 0x848   :  { %3787 = vmatmul.f32.gmra.mxu0 %v8404_v9 }
 0x849   :  { %v9528_v22 = vpop.f32.mrf.mxu2 }
 0x84a   :  { %11525 = vst [vmem:[#allocation277_spill] sm:$0xff] %v9528_v22  ;;  %v9530_v39 = vpop.f32.mrf.mxu3 }
 0x84b   :  { %11526 = vst [vmem:[#allocation278_spill] sm:$0xff] %v9530_v39  ;;  %v9532_v8 = vpop.f32.mrf.mxu1 }
 0x84c   :  { %11527 = vst [vmem:[#allocation279_spill] sm:$0xff] %v9532_v8 }
 0x84d   :  { %v9534_v20 = vpop.f32.mrf.mxu0 }
 0x84e   :  { %11528 = vst [vmem:[#allocation280_spill] sm:$0xff] %v9534_v20  ;;  %3496 = vmatmul.f32.gmra.mxu1 %v8690_v60  ;;  %3609 = vmatmul.f32.gmra.mxu2 %v8690_v60 }
 0x84f   :  { %3722 = vmatmul.f32.gmra.mxu3 %v8690_v60 }
 0x850   :  { %3790 = vmatmul.f32.gmra.mxu0 %v8420_v18 }
 0x851   :  { %v9540_v15 = vpop.f32.mrf.mxu2 }
 0x852   :  { %11529 = vst [vmem:[#allocation281_spill] sm:$0xff] %v9540_v15  ;;  %v9542_v35 = vpop.f32.mrf.mxu3 }
 0x853   :  { %11530 = vst [vmem:[#allocation282_spill] sm:$0xff] %v9542_v35  ;;  %v9544_v37 = vpop.f32.mrf.mxu1 }
 0x854   :  { %11531 = vst [vmem:[#allocation283_spill] sm:$0xff] %v9544_v37 }
 0x855   :  { %v9546_v22 = vpop.f32.mrf.mxu0 }
 0x856   :  { %11532 = vst [vmem:[#allocation284_spill] sm:$0xff] %v9546_v22  ;;  %3499 = vmatmul.f32.gmra.mxu1 %v8710_v3  ;;  %3612 = vmatmul.f32.gmra.mxu2 %v8710_v3 }
 0x857   :  { %3725 = vmatmul.f32.gmra.mxu3 %v8710_v3 }
 0x858   :  { %3793 = vmatmul.f32.gmra.mxu0 %v8438_v51 }
 0x859   :  { %v9552_v20 = vpop.f32.mrf.mxu2 }
 0x85a   :  { %11533 = vst [vmem:[#allocation285_spill] sm:$0xff] %v9552_v20  ;;  %v9554_v39 = vpop.f32.mrf.mxu3 }
 0x85b   :  { %11534 = vst [vmem:[#allocation286_spill] sm:$0xff] %v9554_v39  ;;  %v9556_v8 = vpop.f32.mrf.mxu1  ;;  %v4829_v39 = vld [vmem:[#allocation13 + $0x78] sm:$0xff] }
 0x85c   :  { %11535 = vst [vmem:[#allocation287_spill] sm:$0xff] %v9556_v8  ;;  %v4845_v8 = vld [vmem:[#allocation13 + $0xf8] sm:$0xff]  ;;  %5022 = vmatpush.msra.mxu2 %v4829_v39 }
 0x85d   :  { %v9558_v15 = vpop.f32.mrf.mxu0  ;;  %5135 = vmatpush.msra.mxu3 %v4845_v8  ;;  %v4826_v8 = vld [vmem:[#allocation13 + $0x60] sm:$0xff] }
 0x85e   :  { %11536 = vst [vmem:[#allocation288_spill] sm:$0xff] %v9558_v15  ;;  %3502 = vmatmul.f32.gmra.mxu1 %v8730_v50  ;;  %3615 = vmatmul.f32.gmra.mxu2 %v8730_v50  ;;  %v2512_v15 = vld [vmem:[#allocation10 + $0x678] sm:$0xff] }
 0x85f   :  { %3728 = vmatmul.f32.gmra.mxu3 %v8730_v50  ;;  %3869 = vmatpush.msra.mxu1 %v2512_v15  ;;  %v2473_v15 = vld [vmem:[#allocation10 + $0x540] sm:$0xff] }
 0x860   :  { %3796 = vmatmul.f32.gmra.mxu0 %v8455_v48 }
 0x861   :  { %v9564_v22 = vpop.f32.mrf.mxu2 }
 0x862   :  { %11537 = vst [vmem:[#allocation289_spill] sm:$0xff] %v9564_v22  ;;  %v9566_v35 = vpop.f32.mrf.mxu3 }
 0x863   :  { %11538 = vst [vmem:[#allocation290_spill] sm:$0xff] %v9566_v35  ;;  %v9568_v37 = vpop.f32.mrf.mxu1  ;;  %v2499_v35 = vld [vmem:[#allocation10 + $0x610] sm:$0xff] }
 0x864   :  { %11539 = vst [vmem:[#allocation291_spill] sm:$0xff] %v9568_v37  ;;  %v4828_v37 = vld [vmem:[#allocation13 + $0x70] sm:$0xff]  ;;  %3870 = vmatpush.msra.mxu1 %v2499_v35  ;;  %v4842_v35 = vld [vmem:[#allocation13 + $0xe0] sm:$0xff] }
 0x865   :  { %v9570_v20 = vpop.f32.mrf.mxu0  ;;  %5023 = vmatpush.msra.mxu2 %v4828_v37  ;;  %v2460_v37 = vld [vmem:[#allocation10 + $0x4d8] sm:$0xff] }
 0x866   :  { %11540 = vst [vmem:[#allocation292_spill] sm:$0xff] %v9570_v20  ;;  %3505 = vmatmul.f32.gmra.mxu1 %v8750_v59  ;;  %3618 = vmatmul.f32.gmra.mxu2 %v8750_v59  ;;  %v4844_v20 = vld [vmem:[#allocation13 + $0xf0] sm:$0xff] }
 0x867   :  { %3731 = vmatmul.f32.gmra.mxu3 %v8750_v59  ;;  %3871 = vmatpush.msra.mxu1 %v2486_v31  ;;  %v4841_v31 = vld [vmem:[#allocation13 + $0xd8] sm:$0xff] }
 0x868   :  { %3799 = vmatmul.f32.gmra.mxu0 %v8472_v55  ;;  %5136 = vmatpush.msra.mxu3 %v4844_v20  ;;  %v4825_v20 = vld [vmem:[#allocation13 + $0x58] sm:$0xff] }
 0x869   :  { %v9576_v43 = vpop.f32.mrf.mxu2  ;;  %5024 = vmatpush.msra.mxu2 %v4827_v62  ;;  %3872 = vmatpush.msra.mxu1 %v2473_v15  ;;  %v2447_v62 = vld [vmem:[#allocation10 + $0x470] sm:$0xff]  ;;  %v2434_v15 = vld [vmem:[#allocation10 + $0x408] sm:$0xff] }
 0x86a   :  { %11541 = vst [vmem:[#allocation293_spill] sm:$0xff] %v9576_v43  ;;  %v9578_v22 = vpop.f32.mrf.mxu3  ;;  %5137 = vmatpush.msra.mxu3 %v4843_v49  ;;  %v4824_v49 = vld [vmem:[#allocation13 + $0x50] sm:$0xff]  ;;  %v4823_v43 = vld [vmem:[#allocation13 + $0x48] sm:$0xff] }
 0x86b   :  { %11542 = vst [vmem:[#allocation294_spill] sm:$0xff] %v9578_v22  ;;  %v9580_v16 = vpop.f32.mrf.mxu1  ;;  %5025 = vmatpush.msra.mxu2 %v4826_v8  ;;  %3873 = vmatpush.msra.mxu1 %v2460_v37  ;;  %v4840_v22 = vld [vmem:[#allocation13 + $0xd0] sm:$0xff]  ;;  %v4839_v8 = vld [vmem:[#allocation13 + $0xc8] sm:$0xff]  ;;  %v4822_v37 = vld [vmem:[#allocation13 + $0x40] sm:$0xff] }
 0x86c   :  { %11543 = vst [vmem:[#allocation295_spill] sm:$0xff] %v9580_v16  ;;  %5138 = vmatpush.msra.mxu3 %v4842_v35  ;;  %v2421_v35 = vld [vmem:[#allocation10 + $0x3a0] sm:$0xff] }
 0x86d   :  { %v9582_v2 = vpop.f32.mrf.mxu0  ;;  %5026 = vmatpush.msra.mxu2 %v4825_v20  ;;  %3874 = vmatpush.msra.mxu1 %v2447_v62  ;;  %v4838_v20 = vld [vmem:[#allocation13 + $0xc0] sm:$0xff]  ;;  %v4821_v62 = vld [vmem:[#allocation13 + $0x38] sm:$0xff] }
 0x86e   :  { %11544 = vst [vmem:[#allocation296_spill] sm:$0xff] %v9582_v2  ;;  %3508 = vmatmul.f32.gmra.mxu1 %v8770_v52  ;;  %3621 = vmatmul.f32.gmra.mxu2 %v8770_v52 }
 0x86f   :  { %3734 = vmatmul.f32.gmra.mxu3 %v8770_v52  ;;  %5027 = vmatpush.msra.mxu2 %v4824_v49 }
 0x870   :  { %3802 = vmatmul.f32.gmra.mxu0 %v8489_v5  ;;  %5139 = vmatpush.msra.mxu3 %v4841_v31  ;;  %v2408_v31 = vld [vmem:[#allocation10 + $0x338] sm:$0xff] }
 0x871   :  { %v9588_v39 = vpop.f32.mrf.mxu2  ;;  %3875 = vmatpush.msra.mxu1 %v2434_v15  ;;  %5028 = vmatpush.msra.mxu2 %v4823_v43  ;;  %v2382_v43 = vld [vmem:[#allocation10 + $0x268] sm:$0xff] }
 0x872   :  { %11545 = vst [vmem:[#allocation297_spill] sm:$0xff] %v9588_v39  ;;  %v9590_v2 = vpop.f32.mrf.mxu3  ;;  %5140 = vmatpush.msra.mxu3 %v4840_v22  ;;  %v4837_v22 = vld [vmem:[#allocation13 + $0xb8] sm:$0xff] }
 0x873   :  { %11546 = vst [vmem:[#allocation298_spill] sm:$0xff] %v9590_v2  ;;  %v9592_v16 = vpop.f32.mrf.mxu1  ;;  %3876 = vmatpush.msra.mxu1 %v2421_v35  ;;  %5029 = vmatpush.msra.mxu2 %v4822_v37  ;;  %v4820_v2 = vld [vmem:[#allocation13 + $0x30] sm:$0xff]  ;;  %v4819_v35 = vld [vmem:[#allocation13 + $0x28] sm:$0xff]  ;;  %v2369_v37 = vld [vmem:[#allocation10 + $0x200] sm:$0xff] }
 0x874   :  { %11547 = vst [vmem:[#allocation299_spill] sm:$0xff] %v9592_v16  ;;  %5141 = vmatpush.msra.mxu3 %v4839_v8  ;;  %v4836_v8 = vld [vmem:[#allocation13 + $0xb0] sm:$0xff] }
 0x875   :  { %v9594_v29 = vpop.f32.mrf.mxu0  ;;  %3877 = vmatpush.msra.mxu1 %v2408_v31  ;;  %5030 = vmatpush.msra.mxu2 %v4821_v62  ;;  %v4818_v31 = vld [vmem:[#allocation13 + $0x20] sm:$0xff]  ;;  %v2356_v62 = vld [vmem:[#allocation10 + $0x198] sm:$0xff] }
 0x876   :  { %11548 = vst [vmem:[#allocation300_spill] sm:$0xff] %v9594_v29  ;;  %3511 = vmatmul.f32.gmra.mxu1 %v8790_v17  ;;  %3624 = vmatmul.f32.gmra.mxu2 %v8790_v17  ;;  %v2395_v29 = vld [vmem:[#allocation10 + $0x2d0] sm:$0xff] }
 0x877   :  { %3737 = vmatmul.f32.gmra.mxu3 %v8790_v17  ;;  %3878 = vmatpush.msra.mxu1 %v2395_v29 }
 0x878   :  { %3805 = vmatmul.f32.gmra.mxu0 %v8506_v13  ;;  %5142 = vmatpush.msra.mxu3 %v4838_v20  ;;  %v4835_v20 = vld [vmem:[#allocation13 + $0xa8] sm:$0xff] }
 0x879   :  { %v9600_v49 = vpop.f32.mrf.mxu2  ;;  %5031 = vmatpush.msra.mxu2 %v4820_v2  ;;  %3879 = vmatpush.msra.mxu1 %v2382_v43  ;;  %v4834_v2 = vld [vmem:[#allocation13 + $0xa0] sm:$0xff]  ;;  %v4816_v43 = vld [vmem:[#allocation13 + $0x10] sm:$0xff] }
 0x87a   :  { %11549 = vst [vmem:[#allocation301_spill] sm:$0xff] %v9600_v49  ;;  %v9602_v15 = vpop.f32.mrf.mxu3  ;;  %5143 = vmatpush.msra.mxu3 %v4837_v22 }
 0x87b   :  { %11550 = vst [vmem:[#allocation302_spill] sm:$0xff] %v9602_v15  ;;  %v9604_v16 = vpop.f32.mrf.mxu1  ;;  %5032 = vmatpush.msra.mxu2 %v4819_v35  ;;  %3880 = vmatpush.msra.mxu1 %v2369_v37  ;;  %v2343_v15 = vld [vmem:[#allocation10 + $0x130] sm:$0xff]  ;;  %v2330_v35 = vld [vmem:[#allocation10 + $0xc8] sm:$0xff] }
 0x87c   :  { %11551 = vst [vmem:[#allocation303_spill] sm:$0xff] %v9604_v16  ;;  %5144 = vmatpush.msra.mxu3 %v4836_v8  ;;  %v4833_v8 = vld [vmem:[#allocation13 + $0x98] sm:$0xff]  ;;  %v4815_v37 = vld [vmem:[#allocation13 + $0x8] sm:$0xff] }
 0x87d   :  { %v9606_v39 = vpop.f32.mrf.mxu0  ;;  %5033 = vmatpush.msra.mxu2 %v4818_v31  ;;  %3881 = vmatpush.msra.mxu1 %v2356_v62  ;;  %v2317_v31 = vld [vmem:[#allocation10 + $0x60] sm:$0xff] }
 0x87e   :  { %11552 = vst [vmem:[#allocation304_spill] sm:$0xff] %v9606_v39  ;;  %3514 = vmatmul.f32.gmra.mxu1 %v8812_v19  ;;  %3627 = vmatmul.f32.gmra.mxu2 %v8812_v19  ;;  %v4817_v39 = vld [vmem:[#allocation13 + $0x18] sm:$0xff]  ;;  %v4814_v62 = vld [vmem:[#allocation13] sm:$0xff] }
 0x87f   :  { %3740 = vmatmul.f32.gmra.mxu3 %v8812_v19  ;;  %5034 = vmatpush.msra.mxu2 %v4817_v39  ;;  %v4831_v39 = vld [vmem:[#allocation13 + $0x88] sm:$0xff] }
 0x880   :  { %3808 = vmatmul.f32.gmra.mxu0 %v8523_v25  ;;  %5145 = vmatpush.msra.mxu3 %v4835_v20  ;;  %v4832_v20 = vld [vmem:[#allocation13 + $0x90] sm:$0xff] }
 0x881   :  { %v9612_v22 = vpop.f32.mrf.mxu2  ;;  %3882 = vmatpush.msra.mxu1 %v2343_v15  ;;  %5035 = vmatpush.msra.mxu2 %v4816_v43 }
 0x882   :  { %11553 = vst [vmem:[#allocation305_spill] sm:$0xff] %v9612_v22  ;;  %v9614_v29 = vpop.f32.mrf.mxu3  ;;  %5146 = vmatpush.msra.mxu3 %v4834_v2 }
 0x883   :  { %11554 = vst [vmem:[#allocation306_spill] sm:$0xff] %v9614_v29  ;;  %v9616_v16 = vpop.f32.mrf.mxu1  ;;  %3883 = vmatpush.msra.mxu1 %v2330_v35  ;;  %5036 = vmatpush.msra.mxu2 %v4815_v37  ;;  %v4830_v29 = vld [vmem:[#allocation13 + $0x80] sm:$0xff] }
 0x884   :  { %11555 = vst [vmem:[#allocation307_spill] sm:$0xff] %v9616_v16  ;;  %5147 = vmatpush.msra.mxu3 %v4833_v8 }
 0x885   :  { %v9618_v49 = vpop.f32.mrf.mxu0  ;;  %3884 = vmatpush.msra.mxu1 %v2317_v31  ;;  %5037 = vmatpush.msra.mxu2 %v4814_v62 }
 0x886   :  { %11556 = vst [vmem:[#allocation308_spill] sm:$0xff] %v9618_v49  ;;  %3517 = vmatmul.f32.gmra.mxu1 %v8832_v56  ;;  %3630 = vmatmul.f32.gmra.mxu2 %v8832_v56 }
 0x887   :  { %3743 = vmatmul.f32.gmra.mxu3 %v8832_v56 }
 0x888   :  { %3811 = vmatmul.f32.gmra.mxu0 %v8538_v40  ;;  %5148 = vmatpush.msra.mxu3 %v4832_v20 }
 0x889   :  { %v9624_v2 = vpop.f32.mrf.mxu2 }
 0x88a   :  { %11557 = vst [vmem:[#allocation309_spill] sm:$0xff] %v9624_v2  ;;  %v9626_v15 = vpop.f32.mrf.mxu3  ;;  %5149 = vmatpush.msra.mxu3 %v4831_v39 }
 0x88b   :  { %11558 = vst [vmem:[#allocation310_spill] sm:$0xff] %v9626_v15  ;;  %v9628_v49 = vpop.f32.mrf.mxu1 }
 0x88c   :  { %11559 = vst [vmem:[#allocation311_spill] sm:$0xff] %v9628_v49  ;;  %5150 = vmatpush.msra.mxu3 %v4830_v29 }
 0x88d   :  { %v9630_v43 = vpop.f32.mrf.mxu0 }
 0x88e   :  { %11560 = vst [vmem:[#allocation312_spill] sm:$0xff] %v9630_v43  ;;  %3520 = vmatmul.f32.gmra.mxu1 %v8852_v41  ;;  %3633 = vmatmul.f32.gmra.mxu2 %v8852_v41 }
 0x88f   :  { %3746 = vmatmul.f32.gmra.mxu3 %v8852_v41 }
 0x890   :  { %3814 = vmatmul.f32.gmra.mxu0 %v11308_v63 }
 0x891   :  { %v9636_v8 = vpop.f32.mrf.mxu2 }
 0x892   :  { %11561 = vst [vmem:[#allocation313_spill] sm:$0xff] %v9636_v8  ;;  %v9638_v35 = vpop.f32.mrf.mxu3 }
 0x893   :  { %11562 = vst [vmem:[#allocation314_spill] sm:$0xff] %v9638_v35  ;;  %v9640_v37 = vpop.f32.mrf.mxu1  ;;  %v3983_v35 = vld [vmem:[#allocation12 + $0x8] sm:$0xff] }
 0x894   :  { %11563 = vst [vmem:[#allocation315_spill] sm:$0xff] %v9640_v37  ;;  %v3995_v37 = vld [vmem:[#allocation12 + $0x68] sm:$0xff] }
 0x895   :  { %v9642_v20 = vpop.f32.mrf.mxu0 }
 0x896   :  { %11564 = vst [vmem:[#allocation316_spill] sm:$0xff] %v9642_v20  ;;  %3523 = vmatmul.f32.gmra.mxu1 %v8870_v7  ;;  %3636 = vmatmul.f32.gmra.mxu2 %v8870_v7  ;;  %v3982_v20 = vld [vmem:[#allocation12] sm:$0xff] }
 0x897   :  { %3749 = vmatmul.f32.gmra.mxu3 %v8870_v7 }
 0x898   :  { %3817 = vmatmul.f32.gmra.mxu0 %v8572_v57 }
 0x899   :  { %v9648_v31 = vpop.f32.mrf.mxu2 }
 0x89a   :  { %11565 = vst [vmem:[#allocation317_spill] sm:$0xff] %v9648_v31  ;;  %v9650_v62 = vpop.f32.mrf.mxu3 }
 0x89b   :  { %11566 = vst [vmem:[#allocation318_spill] sm:$0xff] %v9650_v62  ;;  %v9652_v29 = vpop.f32.mrf.mxu1  ;;  %v4398_v62 = vmul.f32 %v3982_v20, %v8585_v28  ;;  %v4411_v28 = vmul.f32 %v3995_v37, %v8605_v30 }
 0x89c   :  { %11567 = vst [vmem:[#allocation319_spill] sm:$0xff] %v9652_v29 }
 0x89d   :  { %v9654_v39 = vpop.f32.mrf.mxu0 }
 0x89e   :  { %11568 = vst [vmem:[#allocation320_spill] sm:$0xff] %v9654_v39  ;;  %3526 = vmatmul.f32.gmra.mxu1 %v8884_v10  ;;  %3639 = vmatmul.f32.gmra.mxu2 %v8884_v10  ;;  %v4399_v39 = vmul.f32 %v3983_v35, %v8598_v24 }
 0x89f   :  { %3752 = vmatmul.f32.gmra.mxu3 %v8884_v10 }
 0x8a0   :  { %3820 = vmatmul.f32.gmra.mxu0 %v8590_v38 }
 0x8a1   :  { %v9660_v43 = vpop.f32.mrf.mxu2 }
 0x8a2   :  { %11569 = vst [vmem:[#allocation321_spill] sm:$0xff] %v9660_v43  ;;  %v9662_v15 = vpop.f32.mrf.mxu3  ;;  %v3996_v43 = vld [vmem:[#allocation12 + $0x70] sm:$0xff] }
 0x8a3   :  { %11570 = vst [vmem:[#allocation322_spill] sm:$0xff] %v9662_v15  ;;  %v9664_v31 = vpop.f32.mrf.mxu1  ;;  %v4412_v24 = vmul.f32 %v3996_v43, %v8618_v26 }
 0x8a4   :  { %11571 = vst [vmem:[#allocation323_spill] sm:$0xff] %v9664_v31 }
 0x8a5   :  { %v9668_v29 = vpop.f32.mrf.mxu0 }
 0x8a6   :  { %11572 = vst [vmem:[#allocation324_spill] sm:$0xff] %v9668_v29  ;;  %3885 = vmatmul.f32.vlgmr.msra.gmra.mxu1 %v8334_v33  ;;  %5038 = vmatmul.f32.vlgmr.msra.gmra.mxu2 %v4398_v62  ;;  %v4008_v33 = vld [vmem:[#allocation12 + $0xd0] sm:$0xff]  ;;  %v4009_v62 = vld [vmem:[#allocation12 + $0xd8] sm:$0xff] }
 0x8a7   :  { %5151 = vmatmul.f32.vlgmr.msra.gmra.mxu3 %v4399_v39  ;;  %v4425_v26 = vmul.f32 %v4009_v62, %v8638_v6 }
 0x8a8   :  { %3823 = vmatmul.f32.gmra.mxu0 %v8610_v42 }
 0x8a9   :  { %v9672_v8 = vpop.f32.mrf.mxu2 }
 0x8aa   :  { %11573 = vst [vmem:[#allocation325_spill] sm:$0xff] %v9672_v8  ;;  %v9674_v49 = vpop.f32.mrf.mxu3 }
 0x8ab   :  { %11574 = vst [vmem:[#allocation326_spill] sm:$0xff] %v9674_v49  ;;  %v9676_v15 = vpop.f32.mrf.mxu1  ;;  %v11580_v49 = vld [vmem:[#allocation56_spill] sm:$0xff] }
 0x8ac   :  { %11575 = vst [vmem:[#allocation327_spill] sm:$0xff] %v9676_v15  ;;  %v4424_v30 = vmul.f32 %v4008_v33, %v11580_v49  ;;  %v4155_v15 = vld [vmem:[#allocation12 + $0x568] sm:$0xff] }
 0x8ad   :  { %v9680_v35 = vpop.f32.mrf.mxu0 }
 0x8ae   :  { %11576 = vst [vmem:[#allocation328_spill] sm:$0xff] %v9680_v35  ;;  %3888 = vmatmul.f32.gmra.mxu1 %v8348_v0  ;;  %5041 = vmatmul.f32.gmra.mxu2 %v4411_v28  ;;  %v4021_v0 = vld [vmem:[#allocation12 + $0x138] sm:$0xff]  ;;  %v4022_v28 = vld [vmem:[#allocation12 + $0x140] sm:$0xff] }
 0x8af   :  { %5154 = vmatmul.f32.gmra.mxu3 %v4412_v24  ;;  %v4438_v6 = vmul.f32 %v4022_v28, %v8658_v12 }
 0x8b0   :  { %3826 = vmatmul.f32.gmra.mxu0 %v8630_v23 }
 0x8b1   :  { %v9684_v20 = vpop.f32.mrf.mxu2 }
 0x8b2   :  { %11577 = vst [vmem:[#allocation329_spill] sm:$0xff] %v9684_v20  ;;  %v9686_v39 = vpop.f32.mrf.mxu3 }
 0x8b3   :  { %11578 = vst [vmem:[#allocation330_spill] sm:$0xff] %v9686_v39  ;;  %v9688_v29 = vpop.f32.mrf.mxu1  ;;  %v11585_v39 = vld [vmem:[#allocation78_spill] sm:$0xff] }
 0x8b4   :  { %11579 = vst [vmem:[#allocation331_spill] sm:$0xff] %v9688_v29  ;;  %v4437_v49 = vmul.f32 %v4021_v0, %v11585_v39  ;;  %v11789_v29 = vld [vmem:[#allocation96_spill] sm:$0xff] }
 0x8b5   :  { %v9692_v43 = vpop.f32.mrf.mxu0 }
 0x8b6   :  { %11581 = vst [vmem:[#allocation56_spill] sm:$0xff] %v9692_v43  ;;  %3891 = vmatmul.f32.gmra.mxu1 %v8362_v4  ;;  %5044 = vmatmul.f32.gmra.mxu2 %v4424_v30  ;;  %v4034_v4 = vld [vmem:[#allocation12 + $0x1a0] sm:$0xff]  ;;  %v4035_v30 = vld [vmem:[#allocation12 + $0x1a8] sm:$0xff] }
 0x8b7   :  { %5157 = vmatmul.f32.gmra.mxu3 %v4425_v26  ;;  %v4451_v12 = vmul.f32 %v4035_v30, %v8678_v46 }
 0x8b8   :  { %3829 = vmatmul.f32.gmra.mxu0 %v8650_v14 }
 0x8b9   :  { %v9696_v37 = vpop.f32.mrf.mxu2 }
 0x8ba   :  { %11582 = vst [vmem:[#allocation332_spill] sm:$0xff] %v9696_v37  ;;  %v9698_v24 = vpop.f32.mrf.mxu3 }
 0x8bb   :  { %11583 = vst [vmem:[#allocation333_spill] sm:$0xff] %v9698_v24  ;;  %v9700_v35 = vpop.f32.mrf.mxu1  ;;  %v11590_v24 = vld [vmem:[#allocation93_spill] sm:$0xff] }
 0x8bc   :  { %11584 = vst [vmem:[#allocation334_spill] sm:$0xff] %v9700_v35  ;;  %v4450_v39 = vmul.f32 %v4034_v4, %v11590_v24  ;;  %v11783_v35 = vld [vmem:[#allocation114_spill] sm:$0xff] }
 0x8bd   :  { %v9704_v33 = vpop.f32.mrf.mxu0 }
 0x8be   :  { %11586 = vst [vmem:[#allocation78_spill] sm:$0xff] %v9704_v33  ;;  %3894 = vmatmul.f32.gmra.mxu1 %v8376_v58  ;;  %5047 = vmatmul.f32.gmra.mxu2 %v4437_v49  ;;  %v4047_v58 = vld [vmem:[#allocation12 + $0x208] sm:$0xff]  ;;  %v4048_v49 = vld [vmem:[#allocation12 + $0x210] sm:$0xff] }
 0x8bf   :  { %5160 = vmatmul.f32.gmra.mxu3 %v4438_v6  ;;  %v4464_v46 = vmul.f32 %v4048_v49, %v8698_v54 }
 0x8c0   :  { %3832 = vmatmul.f32.gmra.mxu0 %v8670_v45 }
 0x8c1   :  { %v9708_v62 = vpop.f32.mrf.mxu2 }
 0x8c2   :  { %11587 = vst [vmem:[#allocation335_spill] sm:$0xff] %v9708_v62  ;;  %v9710_v26 = vpop.f32.mrf.mxu3 }
 0x8c3   :  { %11588 = vst [vmem:[#allocation336_spill] sm:$0xff] %v9710_v26  ;;  %v9712_v43 = vpop.f32.mrf.mxu1  ;;  %v11595_v26 = vld [vmem:[#allocation142_spill] sm:$0xff] }
 0x8c4   :  { %11589 = vst [vmem:[#allocation337_spill] sm:$0xff] %v9712_v43  ;;  %v4463_v24 = vmul.f32 %v4047_v58, %v11595_v26  ;;  %v11601_v58 = vld [vmem:[#allocation37_spill] sm:$0xff]  ;;  %v11778_v43 = vld [vmem:[#allocation135_spill] sm:$0xff] }
 0x8c5   :  { %v9716_v0 = vpop.f32.mrf.mxu0 }
 0x8c6   :  { %11591 = vst [vmem:[#allocation93_spill] sm:$0xff] %v9716_v0  ;;  %3897 = vmatmul.f32.gmra.mxu1 %v8390_v1  ;;  %5050 = vmatmul.f32.gmra.mxu2 %v4450_v39  ;;  %v4060_v1 = vld [vmem:[#allocation12 + $0x270] sm:$0xff]  ;;  %v4061_v39 = vld [vmem:[#allocation12 + $0x278] sm:$0xff] }
 0x8c7   :  { %5163 = vmatmul.f32.gmra.mxu3 %v4451_v12  ;;  %v4477_v54 = vmul.f32 %v4061_v39, %v11601_v58 }
 0x8c8   :  { %3835 = vmatmul.f32.gmra.mxu0 %v8690_v60 }
 0x8c9   :  { %v9720_v28 = vpop.f32.mrf.mxu2 }
 0x8ca   :  { %11592 = vst [vmem:[#allocation338_spill] sm:$0xff] %v9720_v28  ;;  %v9722_v6 = vpop.f32.mrf.mxu3 }
 0x8cb   :  { %11593 = vst [vmem:[#allocation339_spill] sm:$0xff] %v9722_v6  ;;  %v9724_v33 = vpop.f32.mrf.mxu1  ;;  %v11600_v6 = vld [vmem:[#allocation42_spill] sm:$0xff] }
 0x8cc   :  { %11594 = vst [vmem:[#allocation340_spill] sm:$0xff] %v9724_v33  ;;  %v4476_v26 = vmul.f32 %v4060_v1, %v11600_v6  ;;  %v11607_v1 = vld [vmem:[#allocation121_spill] sm:$0xff]  ;;  %v11773_v33 = vld [vmem:[#allocation74_spill] sm:$0xff] }
 0x8cd   :  { %v9728_v4 = vpop.f32.mrf.mxu0 }
 0x8ce   :  { %11596 = vst [vmem:[#allocation142_spill] sm:$0xff] %v9728_v4  ;;  %3900 = vmatmul.f32.gmra.mxu1 %v8404_v9  ;;  %5053 = vmatmul.f32.gmra.mxu2 %v4463_v24  ;;  %v4073_v9 = vld [vmem:[#allocation12 + $0x2d8] sm:$0xff] }
 0x8cf   :  { %5166 = vmatmul.f32.gmra.mxu3 %v4464_v46  ;;  %v4074_v46 = vld [vmem:[#allocation12 + $0x2e0] sm:$0xff] }
 0x8d0   :  { %3838 = vmatmul.f32.gmra.mxu0 %v8710_v3  ;;  %v4490_v39 = vmul.f32 %v4074_v46, %v11607_v1  ;;  %v11613_v1 = vld [vmem:[#allocation43_spill] sm:$0xff] }
 0x8d1   :  { %v9732_v30 = vpop.f32.mrf.mxu2 }
 0x8d2   :  { %11597 = vst [vmem:[#allocation341_spill] sm:$0xff] %v9732_v30  ;;  %v9734_v12 = vpop.f32.mrf.mxu3  ;;  %v4091_v30 = vld [vmem:[#allocation12 + $0x368] sm:$0xff] }
 0x8d3   :  { %11598 = vst [vmem:[#allocation342_spill] sm:$0xff] %v9734_v12  ;;  %v9736_v0 = vpop.f32.mrf.mxu1 }
 0x8d4   :  { %11599 = vst [vmem:[#allocation343_spill] sm:$0xff] %v9736_v0  ;;  %v11606_v0 = vld [vmem:[#allocation95_spill] sm:$0xff] }
 0x8d5   :  { %v9740_v49 = vpop.f32.mrf.mxu0  ;;  %v4489_v6 = vmul.f32 %v4073_v9, %v11606_v0  ;;  %v4860_v0 = vld [vmem:[#allocation13 + $0x170] sm:$0xff]  ;;  %v11612_v9 = vld [vmem:[#allocation60_spill] sm:$0xff] }
 0x8d6   :  { %11602 = vst [vmem:[#allocation42_spill] sm:$0xff] %v9740_v49  ;;  %3903 = vmatmul.f32.gmra.mxu1 %v8420_v18  ;;  %5056 = vmatmul.f32.gmra.mxu2 %v4476_v26  ;;  %v4086_v18 = vld [vmem:[#allocation12 + $0x340] sm:$0xff]  ;;  %v4087_v49 = vld [vmem:[#allocation12 + $0x348] sm:$0xff] }
 0x8d7   :  { %5169 = vmatmul.f32.gmra.mxu3 %v4477_v54  ;;  %v4861_v54 = vld [vmem:[#allocation13 + $0x178] sm:$0xff]  ;;  %v4502_v46 = vmul.f32 %v4086_v18, %v11612_v9  ;;  %v4100_v18 = vld [vmem:[#allocation12 + $0x3b0] sm:$0xff] }
 0x8d8   :  { %3841 = vmatmul.f32.gmra.mxu0 %v8730_v50  ;;  %v4856_v9 = vld [vmem:[#allocation13 + $0x150] sm:$0xff] }
 0x8d9   :  { %v9744_v24 = vpop.f32.mrf.mxu2  ;;  %5248 = vmatpush.msrb.mxu0 %v4861_v54  ;;  %v4099_v54 = vld [vmem:[#allocation12 + $0x3a8] sm:$0xff] }
 0x8da   :  { %11603 = vst [vmem:[#allocation37_spill] sm:$0xff] %v9744_v24  ;;  %v9746_v4 = vpop.f32.mrf.mxu3 }
 0x8db   :  { %11604 = vst [vmem:[#allocation344_spill] sm:$0xff] %v9746_v4  ;;  %v9748_v12 = vpop.f32.mrf.mxu1  ;;  %5249 = vmatpush.msrb.mxu0 %v4860_v0 }
 0x8dc   :  { %11605 = vst [vmem:[#allocation345_spill] sm:$0xff] %v9748_v12 }
 0x8dd   :  { %v9752_v58 = vpop.f32.mrf.mxu0 }
 0x8de   :  { %11608 = vst [vmem:[#allocation95_spill] sm:$0xff] %v9752_v58  ;;  %3906 = vmatmul.f32.gmra.mxu1 %v8438_v51  ;;  %5059 = vmatmul.f32.gmra.mxu2 %v4489_v6  ;;  %v4503_v51 = vmul.f32 %v4087_v49, %v11613_v1  ;;  %v4858_v58 = vld [vmem:[#allocation13 + $0x160] sm:$0xff] }
 0x8df   :  { %5172 = vmatmul.f32.gmra.mxu3 %v4490_v39  ;;  %v4859_v39 = vld [vmem:[#allocation13 + $0x168] sm:$0xff] }
 0x8e0   :  { %3844 = vmatmul.f32.gmra.mxu0 %v8750_v59 }
 0x8e1   :  { %v9756_v26 = vpop.f32.mrf.mxu2  ;;  %5250 = vmatpush.msrb.mxu0 %v4859_v39  ;;  %v4855_v39 = vld [vmem:[#allocation13 + $0x148] sm:$0xff] }
 0x8e2   :  { %11609 = vst [vmem:[#allocation121_spill] sm:$0xff] %v9756_v26  ;;  %v9758_v4 = vpop.f32.mrf.mxu3 }
 0x8e3   :  { %11610 = vst [vmem:[#allocation346_spill] sm:$0xff] %v9758_v4  ;;  %v9760_v12 = vpop.f32.mrf.mxu1  ;;  %5251 = vmatpush.msrb.mxu0 %v4858_v58  ;;  %v4854_v58 = vld [vmem:[#allocation13 + $0x140] sm:$0xff] }
 0x8e4   :  { %11611 = vst [vmem:[#allocation347_spill] sm:$0xff] %v9760_v12  ;;  %v4857_v12 = vld [vmem:[#allocation13 + $0x158] sm:$0xff] }
 0x8e5   :  { %v9764_v6 = vpop.f32.mrf.mxu0  ;;  %5252 = vmatpush.msrb.mxu0 %v4857_v12  ;;  %v4853_v12 = vld [vmem:[#allocation13 + $0x138] sm:$0xff] }
 0x8e6   :  { %11614 = vst [vmem:[#allocation60_spill] sm:$0xff] %v9764_v6  ;;  %3909 = vmatmul.f32.gmra.mxu1 %v8455_v48  ;;  %5062 = vmatmul.f32.gmra.mxu2 %v4502_v46  ;;  %v4515_v48 = vmul.f32 %v4099_v54, %v8765_v53  ;;  %v11618_v46 = vld [vmem:[#allocation146_spill] sm:$0xff]  ;;  %v4112_v6 = vld [vmem:[#allocation12 + $0x410] sm:$0xff]  ;;  %v4113_v53 = vld [vmem:[#allocation12 + $0x418] sm:$0xff] }
 0x8e7   :  { %5175 = vmatmul.f32.gmra.mxu3 %v4503_v51  ;;  %v4516_v1 = vmul.f32 %v4100_v18, %v11618_v46  ;;  %5253 = vmatpush.msrb.mxu0 %v4856_v9  ;;  %v4852_v9 = vld [vmem:[#allocation13 + $0x130] sm:$0xff] }
 0x8e8   :  { %3847 = vmatmul.f32.gmra.mxu0 %v8770_v52 }
 0x8e9   :  { %v9768_v4 = vpop.f32.mrf.mxu2  ;;  %5254 = vmatpush.msrb.mxu0 %v4855_v39  ;;  %v4851_v39 = vld [vmem:[#allocation13 + $0x128] sm:$0xff] }
 0x8ea   :  { %11615 = vst [vmem:[#allocation43_spill] sm:$0xff] %v9768_v4  ;;  %v9770_v0 = vpop.f32.mrf.mxu3 }
 0x8eb   :  { %11616 = vst [vmem:[#allocation348_spill] sm:$0xff] %v9770_v0  ;;  %v9772_v49 = vpop.f32.mrf.mxu1  ;;  %5255 = vmatpush.msrb.mxu0 %v4854_v58  ;;  %v4850_v58 = vld [vmem:[#allocation13 + $0x120] sm:$0xff] }
 0x8ec   :  { %11617 = vst [vmem:[#allocation349_spill] sm:$0xff] %v9772_v49 }
 0x8ed   :  { %v9776_v51 = vpop.f32.mrf.mxu0  ;;  %5256 = vmatpush.msrb.mxu0 %v4853_v12  ;;  %v4849_v12 = vld [vmem:[#allocation13 + $0x118] sm:$0xff] }
 0x8ee   :  { %11619 = vst [vmem:[#allocation146_spill] sm:$0xff] %v9776_v51  ;;  %3912 = vmatmul.f32.gmra.mxu1 %v8472_v55  ;;  %5065 = vmatmul.f32.gmra.mxu2 %v4515_v48  ;;  %v4528_v55 = vmul.f32 %v4112_v6, %v8785_v47  ;;  %v11623_v48 = vld [vmem:[#allocation123_spill] sm:$0xff]  ;;  %v4125_v51 = vld [vmem:[#allocation12 + $0x478] sm:$0xff]  ;;  %v4126_v47 = vld [vmem:[#allocation12 + $0x480] sm:$0xff] }
 0x8ef   :  { %5178 = vmatmul.f32.gmra.mxu3 %v4516_v1  ;;  %v4529_v46 = vmul.f32 %v4113_v53, %v11623_v48  ;;  %5257 = vmatpush.msrb.mxu0 %v4852_v9  ;;  %v4848_v9 = vld [vmem:[#allocation13 + $0x110] sm:$0xff] }
 0x8f0   :  { %3850 = vmatmul.f32.gmra.mxu0 %v8790_v17 }
 0x8f1   :  { %v9780_v0 = vpop.f32.mrf.mxu2  ;;  %5258 = vmatpush.msrb.mxu0 %v4851_v39  ;;  %v4847_v39 = vld [vmem:[#allocation13 + $0x108] sm:$0xff] }
 0x8f2   :  { %11620 = vst [vmem:[#allocation350_spill] sm:$0xff] %v9780_v0  ;;  %v9782_v54 = vpop.f32.mrf.mxu3 }
 0x8f3   :  { %11621 = vst [vmem:[#allocation351_spill] sm:$0xff] %v9782_v54  ;;  %v9784_v18 = vpop.f32.mrf.mxu1  ;;  %5259 = vmatpush.msrb.mxu0 %v4850_v58  ;;  %v4846_v58 = vld [vmem:[#allocation13 + $0x100] sm:$0xff] }
 0x8f4   :  { %11622 = vst [vmem:[#allocation352_spill] sm:$0xff] %v9784_v18 }
 0x8f5   :  { %v9788_v1 = vpop.f32.mrf.mxu0  ;;  %5260 = vmatpush.msrb.mxu0 %v4849_v12  ;;  %v4139_v12 = vld [vmem:[#allocation12 + $0x4e8] sm:$0xff] }
 0x8f6   :  { %11624 = vst [vmem:[#allocation123_spill] sm:$0xff] %v9788_v1  ;;  %3915 = vmatmul.f32.gmra.mxu1 %v8489_v5  ;;  %5068 = vmatmul.f32.gmra.mxu2 %v4528_v55  ;;  %v4541_v5 = vmul.f32 %v4125_v51, %v8807_v61  ;;  %v11628_v55 = vld [vmem:[#allocation44_spill] sm:$0xff]  ;;  %v4138_v1 = vld [vmem:[#allocation12 + $0x4e0] sm:$0xff] }
 0x8f7   :  { %5181 = vmatmul.f32.gmra.mxu3 %v4529_v46  ;;  %v4542_v48 = vmul.f32 %v4126_v47, %v11628_v55  ;;  %5261 = vmatpush.msrb.mxu0 %v4848_v9  ;;  %v4554_v47 = vmul.f32 %v4138_v1, %v8827_v11  ;;  %v11633_v9 = vld [vmem:[#allocation148_spill] sm:$0xff] }
 0x8f8   :  { %3853 = vmatmul.f32.gmra.mxu0 %v8812_v19  ;;  %v4555_v55 = vmul.f32 %v4139_v12, %v11633_v9  ;;  %v4165_v9 = vld [vmem:[#allocation12 + $0x5b8] sm:$0xff] }
 0x8f9   :  { %v9792_v54 = vpop.f32.mrf.mxu2  ;;  %5262 = vmatpush.msrb.mxu0 %v4847_v39  ;;  %v4152_v39 = vld [vmem:[#allocation12 + $0x550] sm:$0xff] }
 0x8fa   :  { %11625 = vst [vmem:[#allocation353_spill] sm:$0xff] %v9792_v54  ;;  %v9794_v6 = vpop.f32.mrf.mxu3  ;;  %v4568_v1 = vmul.f32 %v4152_v39, %v8860_v36  ;;  %v4581_v36 = vmul.f32 %v4165_v9, %v8877_v44 }
 0x8fb   :  { %11626 = vst [vmem:[#allocation354_spill] sm:$0xff] %v9794_v6  ;;  %v9796_v53 = vpop.f32.mrf.mxu1  ;;  %5263 = vmatpush.msrb.mxu0 %v4846_v58 }
 0x8fc   :  { %11627 = vst [vmem:[#allocation355_spill] sm:$0xff] %v9796_v53 }
 0x8fd   :  { %v9800_v46 = vpop.f32.mrf.mxu0 }
 0x8fe   :  { %11629 = vst [vmem:[#allocation44_spill] sm:$0xff] %v9800_v46  ;;  %3918 = vmatmul.f32.gmra.mxu1 %v8506_v13  ;;  %5071 = vmatmul.f32.gmra.mxu2 %v4541_v5  ;;  %v4151_v5 = vld [vmem:[#allocation12 + $0x548] sm:$0xff] }
 0x8ff   :  { %5184 = vmatmul.f32.gmra.mxu3 %v4542_v48  ;;  %v4567_v11 = vmul.f32 %v4151_v5, %v8847_v34 }
 0x900   :  { %3856 = vmatmul.f32.gmra.mxu0 %v8832_v56 }
 0x901   :  { %v9804_v6 = vpop.f32.mrf.mxu2 }
 0x902   :  { %11630 = vst [vmem:[#allocation356_spill] sm:$0xff] %v9804_v6  ;;  %v9806_v61 = vpop.f32.mrf.mxu3 }
 0x903   :  { %11631 = vst [vmem:[#allocation357_spill] sm:$0xff] %v9806_v61  ;;  %v9808_v51 = vpop.f32.mrf.mxu1 }
 0x904   :  { %11632 = vst [vmem:[#allocation358_spill] sm:$0xff] %v9808_v51 }
 0x905   :  { %v9812_v13 = vpop.f32.mrf.mxu0 }
 0x906   :  { %11634 = vst [vmem:[#allocation148_spill] sm:$0xff] %v9812_v13  ;;  %3921 = vmatmul.f32.gmra.mxu1 %v8523_v25  ;;  %5074 = vmatmul.f32.gmra.mxu2 %v4554_v47  ;;  %v4164_v25 = vld [vmem:[#allocation12 + $0x5b0] sm:$0xff] }
 0x907   :  { %5187 = vmatmul.f32.gmra.mxu3 %v4555_v55  ;;  %v4580_v34 = vmul.f32 %v4164_v25, %v8867_v27 }
 0x908   :  { %3859 = vmatmul.f32.gmra.mxu0 %v8852_v41 }
 0x909   :  { %v9816_v48 = vpop.f32.mrf.mxu2 }
 0x90a   :  { %11635 = vst [vmem:[#allocation359_spill] sm:$0xff] %v9816_v48  ;;  %v9818_v58 = vpop.f32.mrf.mxu3 }
 0x90b   :  { %11636 = vst [vmem:[#allocation360_spill] sm:$0xff] %v9818_v58  ;;  %v9820_v46 = vpop.f32.mrf.mxu1  ;;  %v3997_v58 = vld [vmem:[#allocation12 + $0x78] sm:$0xff] }
 0x90c   :  { %11637 = vst [vmem:[#allocation361_spill] sm:$0xff] %v9820_v46 }
 0x90d   :  { %v9824_v12 = vpop.f32.mrf.mxu0 }
 0x90e   :  { %11638 = vst [vmem:[#allocation362_spill] sm:$0xff] %v9824_v12  ;;  %3924 = vmatmul.f32.gmra.mxu1 %v8538_v40  ;;  %5077 = vmatmul.f32.gmra.mxu2 %v4567_v11  ;;  %v4177_v40 = vld [vmem:[#allocation12 + $0x618] sm:$0xff]  ;;  %v4178_v11 = vld [vmem:[#allocation12 + $0x620] sm:$0xff]  ;;  %v3984_v12 = vld [vmem:[#allocation12 + $0x10] sm:$0xff] }
 0x90f   :  { %5190 = vmatmul.f32.gmra.mxu3 %v4568_v1  ;;  %v4593_v27 = vmul.f32 %v4177_v40, %v8882_v21  ;;  %v4594_v44 = vmul.f32 %v4178_v11, %v8892_v32  ;;  %v11651_v21 = vld [vmem:[#allocation101_spill] sm:$0xff]  ;;  %v11652_v40 = vld [vmem:[#allocation66_spill] sm:$0xff] }
 0x910   :  { %3862 = vmatmul.f32.gmra.mxu0 %v8870_v7 }
 0x911   :  { %v9828_v47 = vpop.f32.mrf.mxu2 }
 0x912   :  { %11639 = vst [vmem:[#allocation363_spill] sm:$0xff] %v9828_v47  ;;  %v9830_v55 = vpop.f32.mrf.mxu3 }
 0x913   :  { %11640 = vst [vmem:[#allocation364_spill] sm:$0xff] %v9830_v55  ;;  %v9832_v13 = vpop.f32.mrf.mxu1 }
 0x914   :  { %11641 = vst [vmem:[#allocation365_spill] sm:$0xff] %v9832_v13 }
 0x915   :  { %v9836_v5 = vpop.f32.mrf.mxu0 }
 0x916   :  { %11642 = vst [vmem:[#allocation366_spill] sm:$0xff] %v9836_v5  ;;  %3927 = vmatmul.f32.gmra.mxu1 %v11308_v63  ;;  %5080 = vmatmul.f32.gmra.mxu2 %v4580_v34  ;;  %v11647_v63 = vld [vmem:[#allocation118_spill] sm:$0xff]  ;;  %v4190_v34 = vld [vmem:[#allocation12 + $0x680] sm:$0xff] }
 0x917   :  { %5193 = vmatmul.f32.gmra.mxu3 %v4581_v36  ;;  %v4400_v9 = vmul.f32 %v3984_v12, %v11647_v63  ;;  %v4191_v5 = vld [vmem:[#allocation12 + $0x688] sm:$0xff]  ;;  %v4606_v32 = vmul.f32 %v4190_v34, %v11651_v21  ;;  %v11654_v12 = vld [vmem:[#allocation139_spill] sm:$0xff]  ;;  %v11656_v34 = vld [vmem:[#allocation40_spill] sm:$0xff] }
 0x918   :  { %3865 = vmatmul.f32.gmra.mxu0 %v8884_v10  ;;  %v4607_v11 = vmul.f32 %v4191_v5, %v11652_v40  ;;  %v4204_v63 = vld [vmem:[#allocation12 + $0x6f0] sm:$0xff] }
 0x919   :  { %v9840_v39 = vpop.f32.mrf.mxu2  ;;  %v11657_v21 = vld [vmem:[#allocation103_spill] sm:$0xff] }
 0x91a   :  { %11643 = vst [vmem:[#allocation367_spill] sm:$0xff] %v9840_v39  ;;  %v9842_v1 = vpop.f32.mrf.mxu3  ;;  %v4620_v40 = vmul.f32 %v4204_v63, %v11657_v21  ;;  %v11704_v39 = vld [vmem:[#allocation81_spill] sm:$0xff] }
 0x91b   :  { %11644 = vst [vmem:[#allocation368_spill] sm:$0xff] %v9842_v1  ;;  %v9844_v55 = vpop.f32.mrf.mxu1 }
 0x91c   :  { %11645 = vst [vmem:[#allocation369_spill] sm:$0xff] %v9844_v55  ;;  %v4890_v55 = vld [vmem:[#allocation13 + $0x260] sm:$0xff] }
 0x91d   :  { %v9848_v25 = vpop.f32.mrf.mxu0 }
 0x91e   :  { %11646 = vst [vmem:[#allocation370_spill] sm:$0xff] %v9848_v25  ;;  %3930 = vmatmul.f32.gmra.mxu1 %v8572_v57  ;;  %5083 = vmatmul.f32.gmra.mxu2 %v4593_v27  ;;  %v4413_v57 = vmul.f32 %v3997_v58, %v11654_v12  ;;  %v4203_v27 = vld [vmem:[#allocation12 + $0x6e8] sm:$0xff]  ;;  %v11659_v58 = vld [vmem:[#allocation41_spill] sm:$0xff]  ;;  %v4217_v12 = vld [vmem:[#allocation12 + $0x758] sm:$0xff] }
 0x91f   :  { %5196 = vmatmul.f32.gmra.mxu3 %v4594_v44  ;;  %v4619_v5 = vmul.f32 %v4203_v27, %v11656_v34  ;;  %v11661_v27 = vld [vmem:[#allocation152_spill] sm:$0xff]  ;;  %v11662_v34 = vld [vmem:[#allocation47_spill] sm:$0xff] }
 0x920   :  { %5264 = vmatmul.f32.vlgmr.msrb.gmra.mxu0 %v4400_v9  ;;  %v4633_v21 = vmul.f32 %v4217_v12, %v11662_v34 }
 0x921   :  { %v9852_v36 = vpop.f32.mrf.mxu2 }
 0x922   :  { %11648 = vst [vmem:[#allocation118_spill] sm:$0xff] %v9852_v36  ;;  %v9854_v1 = vpop.f32.mrf.mxu3 }
 0x923   :  { %11649 = vst [vmem:[#allocation371_spill] sm:$0xff] %v9854_v1  ;;  %v9856_v61 = vpop.f32.mrf.mxu1  ;;  %v4010_v1 = vld [vmem:[#allocation12 + $0xe0] sm:$0xff] }
 0x924   :  { %11650 = vst [vmem:[#allocation372_spill] sm:$0xff] %v9856_v61 }
 0x925   :  { %v9860_v25 = vpop.f32.mrf.mxu0 }
 0x926   :  { %11653 = vst [vmem:[#allocation101_spill] sm:$0xff] %v9860_v25  ;;  %3933 = vmatmul.f32.gmra.mxu1 %v8590_v38  ;;  %5086 = vmatmul.f32.gmra.mxu2 %v4606_v32  ;;  %v4426_v38 = vmul.f32 %v4010_v1, %v11659_v58  ;;  %v4216_v32 = vld [vmem:[#allocation12 + $0x750] sm:$0xff]  ;;  %v11664_v1 = vld [vmem:[#allocation140_spill] sm:$0xff]  ;;  %v4230_v58 = vld [vmem:[#allocation12 + $0x7c0] sm:$0xff] }
 0x927   :  { %5199 = vmatmul.f32.gmra.mxu3 %v4607_v11  ;;  %v4632_v63 = vmul.f32 %v4216_v32, %v11661_v27  ;;  %v11666_v32 = vld [vmem:[#allocation105_spill] sm:$0xff] }
 0x928   :  { %5267 = vmatmul.f32.gmra.mxu0 %v4413_v57  ;;  %v11667_v27 = vld [vmem:[#allocation69_spill] sm:$0xff] }
 0x929   :  { %v5039_v44 = vpop.f32.mrf.mxu2  ;;  %v4646_v34 = vmul.f32 %v4230_v58, %v11667_v27 }
 0x92a   :  { %v5152_v9 = vpop.f32.mrf.mxu3 }
 0x92b   :  { %v9864_v36 = vadd.f32 %v5152_v9, %v5039_v44  ;;  %v9866_v61 = vpop.f32.mrf.mxu1  ;;  %v4023_v44 = vld [vmem:[#allocation12 + $0x148] sm:$0xff] }
 0x92c   :  { %11655 = vst [vmem:[#allocation66_spill] sm:$0xff] %v9866_v61 }
 0x92d   :  { %v9870_v25 = vpop.f32.mrf.mxu0 }
 0x92e   :  { %11658 = vst [vmem:[#allocation139_spill] sm:$0xff] %v9870_v25  ;;  %3936 = vmatmul.f32.gmra.mxu1 %v8610_v42  ;;  %5089 = vmatmul.f32.gmra.mxu2 %v4619_v5  ;;  %v4439_v42 = vmul.f32 %v4023_v44, %v11664_v1  ;;  %v4229_v5 = vld [vmem:[#allocation12 + $0x7b8] sm:$0xff]  ;;  %v11669_v44 = vld [vmem:[#allocation119_spill] sm:$0xff]  ;;  %v4243_v1 = vld [vmem:[#allocation12 + $0x828] sm:$0xff] }
 0x92f   :  { %5202 = vmatmul.f32.gmra.mxu3 %v4620_v40  ;;  %v4645_v12 = vmul.f32 %v4229_v5, %v11666_v32  ;;  %v11671_v5 = vld [vmem:[#allocation86_spill] sm:$0xff] }
 0x930   :  { %5270 = vmatmul.f32.gmra.mxu0 %v4426_v38  ;;  %v11672_v32 = vld [vmem:[#allocation130_spill] sm:$0xff] }
 0x931   :  { %v5042_v11 = vpop.f32.mrf.mxu2  ;;  %v4659_v27 = vmul.f32 %v4243_v1, %v11672_v32 }
 0x932   :  { %v5155_v57 = vpop.f32.mrf.mxu3 }
 0x933   :  { %v9874_v9 = vadd.f32 %v5155_v57, %v5042_v11  ;;  %v9876_v61 = vpop.f32.mrf.mxu1  ;;  %v4036_v11 = vld [vmem:[#allocation12 + $0x1b0] sm:$0xff] }
 0x934   :  { %11660 = vst [vmem:[#allocation40_spill] sm:$0xff] %v9876_v61 }
 0x935   :  { %v9880_v25 = vpop.f32.mrf.mxu0 }
 0x936   :  { %11663 = vst [vmem:[#allocation103_spill] sm:$0xff] %v9880_v25  ;;  %3939 = vmatmul.f32.gmra.mxu1 %v8630_v23  ;;  %5092 = vmatmul.f32.gmra.mxu2 %v4632_v63  ;;  %v4452_v23 = vmul.f32 %v4036_v11, %v11669_v44  ;;  %v4242_v63 = vld [vmem:[#allocation12 + $0x820] sm:$0xff]  ;;  %v11674_v11 = vld [vmem:[#allocation58_spill] sm:$0xff]  ;;  %v4256_v44 = vld [vmem:[#allocation12 + $0x890] sm:$0xff] }
 0x937   :  { %5205 = vmatmul.f32.gmra.mxu3 %v4633_v21  ;;  %v4658_v58 = vmul.f32 %v4242_v63, %v11671_v5  ;;  %v11676_v63 = vld [vmem:[#allocation49_spill] sm:$0xff] }
 0x938   :  { %5273 = vmatmul.f32.gmra.mxu0 %v4439_v42  ;;  %v11677_v5 = vld [vmem:[#allocation109_spill] sm:$0xff] }
 0x939   :  { %v5045_v40 = vpop.f32.mrf.mxu2  ;;  %v4672_v32 = vmul.f32 %v4256_v44, %v11677_v5 }
 0x93a   :  { %v5158_v38 = vpop.f32.mrf.mxu3 }
 0x93b   :  { %v9884_v57 = vadd.f32 %v5158_v38, %v5045_v40  ;;  %v9886_v61 = vpop.f32.mrf.mxu1  ;;  %v4049_v40 = vld [vmem:[#allocation12 + $0x218] sm:$0xff] }
 0x93c   :  { %11665 = vst [vmem:[#allocation41_spill] sm:$0xff] %v9886_v61 }
 0x93d   :  { %v9890_v25 = vpop.f32.mrf.mxu0 }
 0x93e   :  { %11668 = vst [vmem:[#allocation152_spill] sm:$0xff] %v9890_v25  ;;  %3942 = vmatmul.f32.gmra.mxu1 %v8650_v14  ;;  %5095 = vmatmul.f32.gmra.mxu2 %v4645_v12  ;;  %v4465_v14 = vmul.f32 %v4049_v40, %v11674_v11  ;;  %v4255_v12 = vld [vmem:[#allocation12 + $0x888] sm:$0xff]  ;;  %v11679_v40 = vld [vmem:[#allocation143_spill] sm:$0xff]  ;;  %v4269_v11 = vld [vmem:[#allocation12 + $0x8f8] sm:$0xff] }
 0x93f   :  { %5208 = vmatmul.f32.gmra.mxu3 %v4646_v34  ;;  %v4671_v1 = vmul.f32 %v4255_v12, %v11676_v63  ;;  %v11681_v12 = vld [vmem:[#allocation71_spill] sm:$0xff]  ;;  %v11682_v63 = vld [vmem:[#allocation88_spill] sm:$0xff] }
 0x940   :  { %5276 = vmatmul.f32.gmra.mxu0 %v4452_v23  ;;  %v4685_v5 = vmul.f32 %v4269_v11, %v11682_v63 }
 0x941   :  { %v5048_v21 = vpop.f32.mrf.mxu2 }
 0x942   :  { %v5161_v42 = vpop.f32.mrf.mxu3 }
 0x943   :  { %v9894_v38 = vadd.f32 %v5161_v42, %v5048_v21  ;;  %v9896_v61 = vpop.f32.mrf.mxu1  ;;  %v4062_v21 = vld [vmem:[#allocation12 + $0x280] sm:$0xff] }
 0x944   :  { %11670 = vst [vmem:[#allocation47_spill] sm:$0xff] %v9896_v61 }
 0x945   :  { %v9900_v25 = vpop.f32.mrf.mxu0 }
 0x946   :  { %11673 = vst [vmem:[#allocation140_spill] sm:$0xff] %v9900_v25  ;;  %3945 = vmatmul.f32.gmra.mxu1 %v8670_v45  ;;  %5098 = vmatmul.f32.gmra.mxu2 %v4658_v58  ;;  %v4478_v45 = vmul.f32 %v4062_v21, %v11679_v40  ;;  %v4268_v58 = vld [vmem:[#allocation12 + $0x8f0] sm:$0xff]  ;;  %v11684_v21 = vld [vmem:[#allocation145_spill] sm:$0xff] }
 0x947   :  { %5211 = vmatmul.f32.gmra.mxu3 %v4659_v27  ;;  %v4684_v44 = vmul.f32 %v4268_v58, %v11681_v12  ;;  %v4282_v40 = vld [vmem:[#allocation12 + $0x960] sm:$0xff]  ;;  %v11686_v58 = vld [vmem:[#allocation132_spill] sm:$0xff]  ;;  %v11687_v12 = vld [vmem:[#allocation51_spill] sm:$0xff] }
 0x948   :  { %5279 = vmatmul.f32.gmra.mxu0 %v4465_v14  ;;  %v4698_v63 = vmul.f32 %v4282_v40, %v11687_v12 }
 0x949   :  { %v5051_v34 = vpop.f32.mrf.mxu2 }
 0x94a   :  { %v5164_v23 = vpop.f32.mrf.mxu3 }
 0x94b   :  { %v9904_v42 = vadd.f32 %v5164_v23, %v5051_v34  ;;  %v9906_v61 = vpop.f32.mrf.mxu1  ;;  %v4075_v34 = vld [vmem:[#allocation12 + $0x2e8] sm:$0xff] }
 0x94c   :  { %11675 = vst [vmem:[#allocation105_spill] sm:$0xff] %v9906_v61 }
 0x94d   :  { %v9910_v25 = vpop.f32.mrf.mxu0 }
 0x94e   :  { %11678 = vst [vmem:[#allocation69_spill] sm:$0xff] %v9910_v25  ;;  %3948 = vmatmul.f32.gmra.mxu1 %v8690_v60  ;;  %5101 = vmatmul.f32.gmra.mxu2 %v4671_v1  ;;  %v4491_v60 = vmul.f32 %v4075_v34, %v11684_v21  ;;  %v4281_v1 = vld [vmem:[#allocation12 + $0x958] sm:$0xff]  ;;  %v11689_v34 = vld [vmem:[#allocation38_spill] sm:$0xff] }
 0x94f   :  { %5214 = vmatmul.f32.gmra.mxu3 %v4672_v32  ;;  %v4697_v11 = vmul.f32 %v4281_v1, %v11686_v58  ;;  %v4295_v21 = vld [vmem:[#allocation12 + $0x9c8] sm:$0xff]  ;;  %v11691_v1 = vld [vmem:[#allocation111_spill] sm:$0xff]  ;;  %v11692_v58 = vld [vmem:[#allocation73_spill] sm:$0xff] }
 0x950   :  { %5282 = vmatmul.f32.gmra.mxu0 %v4478_v45  ;;  %v4711_v12 = vmul.f32 %v4295_v21, %v11692_v58  ;;  %v4908_v21 = vld [vmem:[#allocation13 + $0x2f0] sm:$0xff] }
 0x951   :  { %v5054_v27 = vpop.f32.mrf.mxu2 }
 0x952   :  { %v5167_v14 = vpop.f32.mrf.mxu3 }
 0x953   :  { %v9914_v23 = vadd.f32 %v5167_v14, %v5054_v27  ;;  %v9916_v61 = vpop.f32.mrf.mxu1  ;;  %v4088_v27 = vld [vmem:[#allocation12 + $0x350] sm:$0xff] }
 0x954   :  { %11680 = vst [vmem:[#allocation119_spill] sm:$0xff] %v9916_v61 }
 0x955   :  { %v9920_v25 = vpop.f32.mrf.mxu0 }
 0x956   :  { %11683 = vst [vmem:[#allocation86_spill] sm:$0xff] %v9920_v25  ;;  %3951 = vmatmul.f32.gmra.mxu1 %v8710_v3  ;;  %5104 = vmatmul.f32.gmra.mxu2 %v4684_v44  ;;  %v4504_v3 = vmul.f32 %v4088_v27, %v11689_v34  ;;  %v4294_v44 = vld [vmem:[#allocation12 + $0x9c0] sm:$0xff]  ;;  %v4909_v34 = vld [vmem:[#allocation13 + $0x2f8] sm:$0xff] }
 0x957   :  { %5217 = vmatmul.f32.gmra.mxu3 %v4685_v5  ;;  %v4710_v40 = vmul.f32 %v4294_v44, %v11691_v1  ;;  %v11694_v27 = vld [vmem:[#allocation97_spill] sm:$0xff]  ;;  %v4876_v44 = vld [vmem:[#allocation13 + $0x1f0] sm:$0xff] }
 0x958   :  { %5285 = vmatmul.f32.gmra.mxu0 %v4491_v60  ;;  %5587 = vmatpush.msrb.mxu3 %v4909_v34  ;;  %v4308_v1 = vld [vmem:[#allocation12 + $0xa30] sm:$0xff]  ;;  %v11697_v34 = vld [vmem:[#allocation134_spill] sm:$0xff] }
 0x959   :  { %v5057_v32 = vpop.f32.mrf.mxu2 }
 0x95a   :  { %v5170_v45 = vpop.f32.mrf.mxu3  ;;  %5588 = vmatpush.msrb.mxu3 %v4908_v21  ;;  %v4873_v21 = vld [vmem:[#allocation13 + $0x1d8] sm:$0xff] }
 0x95b   :  { %v9924_v14 = vadd.f32 %v5170_v45, %v5057_v32  ;;  %v9926_v61 = vpop.f32.mrf.mxu1  ;;  %v4101_v32 = vld [vmem:[#allocation12 + $0x3b8] sm:$0xff] }
 0x95c   :  { %11685 = vst [vmem:[#allocation130_spill] sm:$0xff] %v9926_v61 }
 0x95d   :  { %v9930_v25 = vpop.f32.mrf.mxu0 }
 0x95e   :  { %11688 = vst [vmem:[#allocation58_spill] sm:$0xff] %v9930_v25  ;;  %3954 = vmatmul.f32.gmra.mxu1 %v8730_v50  ;;  %5107 = vmatmul.f32.gmra.mxu2 %v4697_v11  ;;  %v4517_v50 = vmul.f32 %v4101_v32, %v11694_v27  ;;  %v4877_v11 = vld [vmem:[#allocation13 + $0x1f8] sm:$0xff]  ;;  %v4114_v32 = vld [vmem:[#allocation12 + $0x420] sm:$0xff] }
 0x95f   :  { %5220 = vmatmul.f32.gmra.mxu3 %v4698_v63  ;;  %v4893_v63 = vld [vmem:[#allocation13 + $0x278] sm:$0xff]  ;;  %5361 = vmatpush.msrb.mxu1 %v4877_v11 }
 0x960   :  { %5288 = vmatmul.f32.gmra.mxu0 %v4504_v3  ;;  %v4307_v3 = vld [vmem:[#allocation12 + $0xa28] sm:$0xff]  ;;  %5474 = vmatpush.msrb.mxu2 %v4893_v63 }
 0x961   :  { %v5060_v5 = vpop.f32.mrf.mxu2  ;;  %5362 = vmatpush.msrb.mxu1 %v4876_v44  ;;  %v4907_v63 = vld [vmem:[#allocation13 + $0x2e8] sm:$0xff]  ;;  %v4874_v44 = vld [vmem:[#allocation13 + $0x1e0] sm:$0xff] }
 0x962   :  { %v5173_v60 = vpop.f32.mrf.mxu3  ;;  %5589 = vmatpush.msrb.mxu3 %v4907_v63  ;;  %v4888_v63 = vld [vmem:[#allocation13 + $0x250] sm:$0xff] }
 0x963   :  { %v9934_v45 = vadd.f32 %v5173_v60, %v5060_v5  ;;  %v9936_v61 = vpop.f32.mrf.mxu1  ;;  %v4892_v60 = vld [vmem:[#allocation13 + $0x270] sm:$0xff] }
 0x964   :  { %11690 = vst [vmem:[#allocation49_spill] sm:$0xff] %v9936_v61  ;;  %5475 = vmatpush.msrb.mxu2 %v4892_v60  ;;  %v4906_v60 = vld [vmem:[#allocation13 + $0x2e0] sm:$0xff] }
 0x965   :  { %v9940_v25 = vpop.f32.mrf.mxu0  ;;  %5590 = vmatpush.msrb.mxu3 %v4906_v60  ;;  %v11702_v60 = vld [vmem:[#allocation113_spill] sm:$0xff] }
 0x966   :  { %11693 = vst [vmem:[#allocation109_spill] sm:$0xff] %v9940_v25  ;;  %3957 = vmatmul.f32.gmra.mxu1 %v8750_v59  ;;  %5110 = vmatmul.f32.gmra.mxu2 %v4710_v40  ;;  %v4875_v40 = vld [vmem:[#allocation13 + $0x1e8] sm:$0xff]  ;;  %v4724_v25 = vmul.f32 %v4308_v1, %v11697_v34  ;;  %v4320_v1 = vld [vmem:[#allocation12 + $0xa90] sm:$0xff]  ;;  %v4321_v34 = vld [vmem:[#allocation12 + $0xa98] sm:$0xff] }
 0x967   :  { %5223 = vmatmul.f32.gmra.mxu3 %v4711_v12  ;;  %v4891_v12 = vld [vmem:[#allocation13 + $0x268] sm:$0xff]  ;;  %5363 = vmatpush.msrb.mxu1 %v4875_v40  ;;  %v4905_v40 = vld [vmem:[#allocation13 + $0x2d8] sm:$0xff] }
 0x968   :  { %5291 = vmatmul.f32.gmra.mxu0 %v4517_v50  ;;  %v11696_v50 = vld [vmem:[#allocation90_spill] sm:$0xff]  ;;  %5476 = vmatpush.msrb.mxu2 %v4891_v12  ;;  %v4872_v12 = vld [vmem:[#allocation13 + $0x1d0] sm:$0xff] }
 0x969   :  { %v5063_v5 = vpop.f32.mrf.mxu2  ;;  %v4723_v11 = vmul.f32 %v4307_v3, %v11696_v50  ;;  %5364 = vmatpush.msrb.mxu1 %v4874_v44  ;;  %v4889_v3 = vld [vmem:[#allocation13 + $0x258] sm:$0xff]  ;;  %5591 = vmatpush.msrb.mxu3 %v4905_v40  ;;  %v4871_v44 = vld [vmem:[#allocation13 + $0x1c8] sm:$0xff]  ;;  %v4886_v40 = vld [vmem:[#allocation13 + $0x240] sm:$0xff] }
 0x96a   :  { %v5176_v58 = vpop.f32.mrf.mxu3  ;;  %5477 = vmatpush.msrb.mxu2 %v4890_v55  ;;  %v11701_v55 = vld [vmem:[#allocation53_spill] sm:$0xff] }
 0x96b   :  { %v9944_v27 = vadd.f32 %v5176_v58, %v5063_v5  ;;  %v9946_v59 = vpop.f32.mrf.mxu1  ;;  %v11699_v5 = vld [vmem:[#allocation62_spill] sm:$0xff]  ;;  %5365 = vmatpush.msrb.mxu1 %v4873_v21  ;;  %v4737_v21 = vmul.f32 %v4321_v34, %v11702_v60 }
 0x96c   :  { %11695 = vst [vmem:[#allocation143_spill] sm:$0xff] %v9946_v59  ;;  %v4530_v58 = vmul.f32 %v4114_v32, %v11699_v5  ;;  %5478 = vmatpush.msrb.mxu2 %v4889_v3  ;;  %v4904_v32 = vld [vmem:[#allocation13 + $0x2d0] sm:$0xff]  ;;  %v4736_v5 = vmul.f32 %v4320_v1, %v11701_v55  ;;  %v4903_v3 = vld [vmem:[#allocation13 + $0x2c8] sm:$0xff]  ;;  %v4869_v1 = vld [vmem:[#allocation13 + $0x1b8] sm:$0xff] }
 0x96d   :  { %v9950_v61 = vpop.f32.mrf.mxu0  ;;  %5366 = vmatpush.msrb.mxu1 %v4872_v12  ;;  %5592 = vmatpush.msrb.mxu3 %v4904_v32  ;;  %v4885_v12 = vld [vmem:[#allocation13 + $0x238] sm:$0xff] }
 0x96e   :  { %11698 = vst [vmem:[#allocation71_spill] sm:$0xff] %v9950_v61  ;;  %3960 = vmatmul.f32.gmra.mxu1 %v8770_v52  ;;  %5113 = vmatmul.f32.gmra.mxu2 %v4723_v11  ;;  %v4127_v52 = vld [vmem:[#allocation12 + $0x488] sm:$0xff]  ;;  %v4901_v32 = vld [vmem:[#allocation13 + $0x2b8] sm:$0xff] }
 0x96f   :  { %5226 = vmatmul.f32.gmra.mxu3 %v4724_v25  ;;  %5479 = vmatpush.msrb.mxu2 %v4888_v63  ;;  %v4543_v13 = vmul.f32 %v4127_v52, %v11704_v39  ;;  %v4333_v63 = vld [vmem:[#allocation12 + $0xaf8] sm:$0xff]  ;;  %v4868_v39 = vld [vmem:[#allocation13 + $0x1b0] sm:$0xff] }
 0x970   :  { %5294 = vmatmul.f32.gmra.mxu0 %v4530_v58  ;;  %v4887_v58 = vld [vmem:[#allocation13 + $0x248] sm:$0xff]  ;;  %5367 = vmatpush.msrb.mxu1 %v4871_v44  ;;  %v4334_v44 = vld [vmem:[#allocation12 + $0xb00] sm:$0xff]  ;;  %v4140_v52 = vld [vmem:[#allocation12 + $0x4f0] sm:$0xff] }
 0x971   :  { %v5066_v50 = vpop.f32.mrf.mxu2  ;;  %5480 = vmatpush.msrb.mxu2 %v4887_v58  ;;  %5593 = vmatpush.msrb.mxu3 %v4903_v3  ;;  %v11707_v3 = vld [vmem:[#allocation94_spill] sm:$0xff] }
 0x972   :  { %v5179_v61 = vpop.f32.mrf.mxu3 }
 0x973   :  { %v9954_v11 = vadd.f32 %v5179_v61, %v5066_v50  ;;  %v9956_v25 = vpop.f32.mrf.mxu1  ;;  %v4870_v61 = vld [vmem:[#allocation13 + $0x1c0] sm:$0xff]  ;;  %5481 = vmatpush.msrb.mxu2 %v4886_v40 }
 0x974   :  { %11700 = vst [vmem:[#allocation88_spill] sm:$0xff] %v9956_v25  ;;  %v4902_v50 = vld [vmem:[#allocation13 + $0x2c0] sm:$0xff]  ;;  %5368 = vmatpush.msrb.mxu1 %v4870_v61  ;;  %v4750_v61 = vmul.f32 %v4334_v44, %v11707_v3 }
 0x975   :  { %v9960_v59 = vpop.f32.mrf.mxu0  ;;  %5594 = vmatpush.msrb.mxu3 %v4902_v50  ;;  %5482 = vmatpush.msrb.mxu2 %v4885_v12  ;;  %v4900_v50 = vld [vmem:[#allocation13 + $0x2b0] sm:$0xff]  ;;  %v4882_v12 = vld [vmem:[#allocation13 + $0x220] sm:$0xff] }
 0x976   :  { %11703 = vst [vmem:[#allocation145_spill] sm:$0xff] %v9960_v59  ;;  %3963 = vmatmul.f32.gmra.mxu1 %v8790_v17  ;;  %5116 = vmatmul.f32.gmra.mxu2 %v4736_v5  ;;  %v4884_v17 = vld [vmem:[#allocation13 + $0x230] sm:$0xff] }
 0x977   :  { %5229 = vmatmul.f32.gmra.mxu3 %v4737_v21  ;;  %5369 = vmatpush.msrb.mxu1 %v4869_v1  ;;  %v4867_v21 = vld [vmem:[#allocation13 + $0x1a8] sm:$0xff]  ;;  %v11709_v59 = vld [vmem:[#allocation99_spill] sm:$0xff] }
 0x978   :  { %5297 = vmatmul.f32.gmra.mxu0 %v4543_v13  ;;  %v11706_v13 = vld [vmem:[#allocation75_spill] sm:$0xff]  ;;  %5595 = vmatpush.msrb.mxu3 %v4901_v32  ;;  %v4556_v25 = vmul.f32 %v4140_v52, %v11709_v59  ;;  %v4899_v1 = vld [vmem:[#allocation13 + $0x2a8] sm:$0xff]  ;;  %v4346_v32 = vld [vmem:[#allocation12 + $0xb60] sm:$0xff] }
 0x979   :  { %v5069_v34 = vpop.f32.mrf.mxu2  ;;  %v4749_v58 = vmul.f32 %v4333_v63, %v11706_v13  ;;  %5370 = vmatpush.msrb.mxu1 %v4868_v39  ;;  %5483 = vmatpush.msrb.mxu2 %v4884_v17  ;;  %v4865_v63 = vld [vmem:[#allocation13 + $0x198] sm:$0xff]  ;;  %v4898_v39 = vld [vmem:[#allocation13 + $0x2a0] sm:$0xff]  ;;  %v4347_v17 = vld [vmem:[#allocation12 + $0xb68] sm:$0xff] }
 0x97a   :  { %v5182_v55 = vpop.f32.mrf.mxu3  ;;  %5596 = vmatpush.msrb.mxu3 %v4900_v50  ;;  %v4881_v59 = vld [vmem:[#allocation13 + $0x218] sm:$0xff]  ;;  %v11712_v50 = vld [vmem:[#allocation55_spill] sm:$0xff] }
 0x97b   :  { %v9964_v5 = vadd.f32 %v5182_v55, %v5069_v34  ;;  %v9966_v60 = vpop.f32.mrf.mxu1  ;;  %v4883_v34 = vld [vmem:[#allocation13 + $0x228] sm:$0xff]  ;;  %v4866_v55 = vld [vmem:[#allocation13 + $0x1a0] sm:$0xff]  ;;  %5371 = vmatpush.msrb.mxu1 %v4867_v21  ;;  %v4153_v52 = vld [vmem:[#allocation12 + $0x558] sm:$0xff] }
 0x97c   :  { %11705 = vst [vmem:[#allocation132_spill] sm:$0xff] %v9966_v60  ;;  %5484 = vmatpush.msrb.mxu2 %v4883_v34  ;;  %5597 = vmatpush.msrb.mxu3 %v4899_v1  ;;  %v4763_v34 = vmul.f32 %v4347_v17, %v11712_v50  ;;  %v11714_v1 = vld [vmem:[#allocation125_spill] sm:$0xff] }
 0x97d   :  { %v9970_v40 = vpop.f32.mrf.mxu0  ;;  %5372 = vmatpush.msrb.mxu1 %v4866_v55  ;;  %v4569_v60 = vmul.f32 %v4153_v52, %v11714_v1  ;;  %v4166_v52 = vld [vmem:[#allocation12 + $0x5c0] sm:$0xff] }
 0x97e   :  { %11708 = vst [vmem:[#allocation51_spill] sm:$0xff] %v9970_v40  ;;  %3966 = vmatmul.f32.gmra.mxu1 %v8812_v19  ;;  %5119 = vmatmul.f32.gmra.mxu2 %v4749_v58  ;;  %v4864_v19 = vld [vmem:[#allocation13 + $0x190] sm:$0xff]  ;;  %v4897_v40 = vld [vmem:[#allocation13 + $0x298] sm:$0xff]  ;;  %v4894_v1 = vld [vmem:[#allocation13 + $0x280] sm:$0xff] }
 0x97f   :  { %5232 = vmatmul.f32.gmra.mxu3 %v4750_v61  ;;  %5485 = vmatpush.msrb.mxu2 %v4882_v12  ;;  %v4880_v61 = vld [vmem:[#allocation13 + $0x210] sm:$0xff] }
 0x980   :  { %5300 = vmatmul.f32.gmra.mxu0 %v4556_v25  ;;  %5373 = vmatpush.msrb.mxu1 %v4865_v63  ;;  %v11711_v25 = vld [vmem:[#allocation136_spill] sm:$0xff]  ;;  %v4896_v12 = vld [vmem:[#allocation13 + $0x290] sm:$0xff]  ;;  %v4862_v63 = vld [vmem:[#allocation13 + $0x180] sm:$0xff] }
 0x981   :  { %v5072_v44 = vpop.f32.mrf.mxu2  ;;  %v4762_v21 = vmul.f32 %v4346_v32, %v11711_v25  ;;  %5598 = vmatpush.msrb.mxu3 %v4898_v39  ;;  %5486 = vmatpush.msrb.mxu2 %v4881_v59  ;;  %v4878_v32 = vld [vmem:[#allocation13 + $0x200] sm:$0xff]  ;;  %v4359_v39 = vld [vmem:[#allocation12 + $0xbc8] sm:$0xff] }
 0x982   :  { %v5185_v13 = vpop.f32.mrf.mxu3  ;;  %5374 = vmatpush.msrb.mxu1 %v4864_v19  ;;  %v4895_v59 = vld [vmem:[#allocation13 + $0x288] sm:$0xff]  ;;  %v4360_v19 = vld [vmem:[#allocation12 + $0xbd0] sm:$0xff] }
 0x983   :  { %v9974_v58 = vadd.f32 %v5185_v13, %v5072_v44  ;;  %v9976_v3 = vpop.f32.mrf.mxu1  ;;  %v4863_v44 = vld [vmem:[#allocation13 + $0x188] sm:$0xff]  ;;  %5487 = vmatpush.msrb.mxu2 %v4880_v61  ;;  %5599 = vmatpush.msrb.mxu3 %v4897_v40  ;;  %v11716_v61 = vld [vmem:[#allocation115_spill] sm:$0xff]  ;;  %v11717_v40 = vld [vmem:[#allocation77_spill] sm:$0xff] }
 0x984   :  { %11710 = vst [vmem:[#allocation38_spill] sm:$0xff] %v9976_v3  ;;  %v4879_v13 = vld [vmem:[#allocation13 + $0x208] sm:$0xff]  ;;  %5375 = vmatpush.msrb.mxu1 %v4863_v44  ;;  %v4776_v50 = vmul.f32 %v4360_v19, %v11717_v40  ;;  %v11719_v44 = vld [vmem:[#allocation64_spill] sm:$0xff] }
 0x985   :  { %v9980_v55 = vpop.f32.mrf.mxu0  ;;  %5488 = vmatpush.msrb.mxu2 %v4879_v13  ;;  %5600 = vmatpush.msrb.mxu3 %v4896_v12  ;;  %v4582_v13 = vmul.f32 %v4166_v52, %v11719_v44  ;;  %v4372_v12 = vld [vmem:[#allocation12 + $0xc30] sm:$0xff]  ;;  %v11721_v19 = vld [vmem:[#allocation98_spill] sm:$0xff]  ;;  %v4386_v44 = vld [vmem:[#allocation12 + $0xca0] sm:$0xff] }
 0x986   :  { %11713 = vst [vmem:[#allocation111_spill] sm:$0xff] %v9980_v55  ;;  %3969 = vmatmul.f32.gmra.mxu1 %v8832_v56  ;;  %5122 = vmatmul.f32.gmra.mxu2 %v4762_v21  ;;  %v11722_v40 = vld [vmem:[#allocation138_spill] sm:$0xff] }
 0x987   :  { %5235 = vmatmul.f32.gmra.mxu3 %v4763_v34  ;;  %5376 = vmatpush.msrb.mxu1 %v4862_v63  ;;  %v4373_v63 = vld [vmem:[#allocation12 + $0xc38] sm:$0xff] }
 0x988   :  { %5303 = vmatmul.f32.gmra.mxu0 %v4569_v60  ;;  %5489 = vmatpush.msrb.mxu2 %v4878_v32  ;;  %v4775_v60 = vmul.f32 %v4359_v39, %v11716_v61  ;;  %v4788_v61 = vmul.f32 %v4372_v12, %v11721_v19  ;;  %v11726_v12 = vld [vmem:[#allocation59_spill] sm:$0xff]  ;;  %v11727_v19 = vld [vmem:[#allocation117_spill] sm:$0xff] }
 0x989   :  { %v5075_v17 = vpop.f32.mrf.mxu2  ;;  %5601 = vmatpush.msrb.mxu3 %v4895_v59 }
 0x98a   :  { %v5188_v25 = vpop.f32.mrf.mxu3 }
 0x98b   :  { %v9984_v56 = vadd.f32 %v5188_v25, %v5075_v17  ;;  %v9986_v21 = vpop.f32.mrf.mxu1  ;;  %5602 = vmatpush.msrb.mxu3 %v4894_v1  ;;  %v4179_v25 = vld [vmem:[#allocation12 + $0x628] sm:$0xff] }
 0x98c   :  { %11715 = vst [vmem:[#allocation73_spill] sm:$0xff] %v9986_v21  ;;  %v3999_v21 = vld [vmem:[#allocation12 + $0x88] sm:$0xff] }
 0x98d   :  { %v9990_v34 = vpop.f32.mrf.mxu0 }
 0x98e   :  { %11718 = vst [vmem:[#allocation97_spill] sm:$0xff] %v9990_v34  ;;  %3972 = vmatmul.f32.gmra.mxu1 %v8852_v41  ;;  %5125 = vmatmul.f32.gmra.mxu2 %v4775_v60  ;;  %v4789_v34 = vmul.f32 %v4373_v63, %v11722_v40  ;;  %v11724_v41 = vld [vmem:[#allocation83_spill] sm:$0xff]  ;;  %v4802_v40 = vmul.f32 %v4386_v44, %v11727_v19  ;;  %v11730_v44 = vld [vmem:[#allocation45_spill] sm:$0xff] }
 0x98f   :  { %5238 = vmatmul.f32.gmra.mxu3 %v4776_v50  ;;  %v4595_v60 = vmul.f32 %v4179_v25, %v11724_v41  ;;  %v4385_v50 = vld [vmem:[#allocation12 + $0xc98] sm:$0xff]  ;;  %v11728_v25 = vld [vmem:[#allocation46_spill] sm:$0xff]  ;;  %v11731_v19 = vld [vmem:[#allocation79_spill] sm:$0xff] }
 0x990   :  { %5306 = vmatmul.f32.gmra.mxu0 %v4582_v13  ;;  %v4801_v63 = vmul.f32 %v4385_v50, %v11726_v12 }
 0x991   :  { %v5078_v17 = vpop.f32.mrf.mxu2 }
 0x992   :  { %v5191_v32 = vpop.f32.mrf.mxu3 }
 0x993   :  { %v9994_v39 = vadd.f32 %v5191_v32, %v5078_v17  ;;  %v9996_v59 = vpop.f32.mrf.mxu1  ;;  %v4192_v17 = vld [vmem:[#allocation12 + $0x690] sm:$0xff] }
 0x994   :  { %11720 = vst [vmem:[#allocation90_spill] sm:$0xff] %v9996_v59 }
 0x995   :  { %v10000_v52 = vpop.f32.mrf.mxu0 }
 0x996   :  { %11723 = vst [vmem:[#allocation134_spill] sm:$0xff] %v10000_v52  ;;  %3975 = vmatmul.f32.gmra.mxu1 %v8870_v7  ;;  %5128 = vmatmul.f32.gmra.mxu2 %v4788_v61  ;;  %v4608_v7 = vmul.f32 %v4192_v17, %v11728_v25  ;;  %v3986_v61 = vld [vmem:[#allocation12 + $0x20] sm:$0xff]  ;;  %v11732_v17 = vld [vmem:[#allocation102_spill] sm:$0xff] }
 0x997   :  { %5241 = vmatmul.f32.gmra.mxu3 %v4789_v34  ;;  %v3985_v34 = vld [vmem:[#allocation12 + $0x18] sm:$0xff]  ;;  %v4402_v59 = vmul.f32 %v3986_v61, %v11731_v19  ;;  %v11735_v61 = vld [vmem:[#allocation127_spill] sm:$0xff] }
 0x998   :  { %5309 = vmatmul.f32.gmra.mxu0 %v4595_v60  ;;  %v3987_v60 = vld [vmem:[#allocation12 + $0x28] sm:$0xff]  ;;  %v4401_v12 = vmul.f32 %v3985_v34, %v11730_v44  ;;  %v11736_v44 = vld [vmem:[#allocation144_spill] sm:$0xff] }
 0x999   :  { %v5081_v1 = vpop.f32.mrf.mxu2  ;;  %v4403_v25 = vmul.f32 %v3987_v60, %v11732_v17  ;;  %v4415_v19 = vmul.f32 %v3999_v21, %v11736_v44  ;;  %v11737_v17 = vld [vmem:[#allocation63_spill] sm:$0xff] }
 0x99a   :  { %v5194_v13 = vpop.f32.mrf.mxu3  ;;  %v11740_v21 = vld [vmem:[#allocation151_spill] sm:$0xff] }
 0x99b   :  { %v10004_v32 = vadd.f32 %v5194_v13, %v5081_v1  ;;  %v10006_v55 = vpop.f32.mrf.mxu1  ;;  %v4205_v13 = vld [vmem:[#allocation12 + $0x6f8] sm:$0xff] }
 0x99c   :  { %11725 = vst [vmem:[#allocation62_spill] sm:$0xff] %v10006_v55 }
 0x99d   :  { %v10010_v52 = vpop.f32.mrf.mxu0 }
 0x99e   :  { %3978 = vmatmul.f32.gmra.mxu1 %v8884_v10  ;;  %5131 = vmatmul.f32.gmra.mxu2 %v4801_v63  ;;  %v11733_v63 = vld [vmem:[#allocation128_spill] sm:$0xff] }
 0x99f   :  { %5244 = vmatmul.f32.gmra.mxu3 %v4802_v40  ;;  %v4621_v40 = vmul.f32 %v4205_v13, %v11733_v63  ;;  %v4011_v63 = vld [vmem:[#allocation12 + $0xe8] sm:$0xff] }
 0x9a0   :  { %5312 = vmatmul.f32.gmra.mxu0 %v4608_v7  ;;  %v3998_v7 = vld [vmem:[#allocation12 + $0x80] sm:$0xff] }
 0x9a1   :  { %v5084_v41 = vpop.f32.mrf.mxu2  ;;  %v4414_v60 = vmul.f32 %v3998_v7, %v11735_v61  ;;  %v11741_v61 = vld [vmem:[#allocation122_spill] sm:$0xff] }
 0x9a2   :  { %v5197_v1 = vpop.f32.mrf.mxu3 }
 0x9a3   :  { %v10014_v55 = vadd.f32 %v5197_v1, %v5084_v41  ;;  %v10016_v50 = vpop.f32.mrf.mxu1  ;;  %v4000_v1 = vld [vmem:[#allocation12 + $0x90] sm:$0xff] }
 0x9a4   :  { %11729 = vst [vmem:[#allocation53_spill] sm:$0xff] %v10016_v50  ;;  %v4218_v50 = vld [vmem:[#allocation12 + $0x760] sm:$0xff]  ;;  %v4416_v13 = vmul.f32 %v4000_v1, %v11737_v17  ;;  %v4427_v1 = vmul.f32 %v4011_v63, %v11740_v21  ;;  %v11742_v17 = vld [vmem:[#allocation39_spill] sm:$0xff]  ;;  %v11746_v21 = vld [vmem:[#allocation106_spill] sm:$0xff] }
 0x9a5   :  { %v10021_v10 = vpop.f32.mrf.mxu0 }
 0x9a6   :  { %5377 = vmatmul.f32.vlgmr.msrb.gmra.mxu1 %v4401_v12  ;;  %5490 = vmatmul.f32.vlgmr.msrb.gmra.mxu2 %v4402_v59  ;;  %v11738_v59 = vld [vmem:[#allocation85_spill] sm:$0xff] }
 0x9a7   :  { %5603 = vmatmul.f32.vlgmr.msrb.gmra.mxu3 %v4403_v25  ;;  %v4634_v25 = vmul.f32 %v4218_v50, %v11738_v59  ;;  %v4024_v59 = vld [vmem:[#allocation12 + $0x150] sm:$0xff] }
 0x9a8   :  { %5315 = vmatmul.f32.gmra.mxu0 %v4621_v40  ;;  %v4012_v40 = vld [vmem:[#allocation12 + $0xf0] sm:$0xff] }
 0x9a9   :  { %v5087_v41 = vpop.f32.mrf.mxu2  ;;  %v4428_v44 = vmul.f32 %v4012_v40, %v11741_v61  ;;  %v11745_v40 = vld [vmem:[#allocation68_spill] sm:$0xff] }
 0x9aa   :  { %v5200_v3 = vpop.f32.mrf.mxu3 }
 0x9ab   :  { %v10024_v47 = vadd.f32 %v5200_v3, %v5087_v41  ;;  %v10026_v34 = vpop.f32.mrf.mxu1  ;;  %v4013_v41 = vld [vmem:[#allocation12 + $0xf8] sm:$0xff] }
 0x9ac   :  { %11734 = vst [vmem:[#allocation113_spill] sm:$0xff] %v10026_v34  ;;  %v4231_v34 = vld [vmem:[#allocation12 + $0x7c8] sm:$0xff]  ;;  %v4429_v50 = vmul.f32 %v4013_v41, %v11742_v17  ;;  %v4440_v41 = vmul.f32 %v4024_v59, %v11745_v40  ;;  %v11747_v17 = vld [vmem:[#allocation149_spill] sm:$0xff]  ;;  %v11751_v40 = vld [vmem:[#allocation67_spill] sm:$0xff] }
 0x9ad   :  { %v10031_v12 = vpop.f32.mrf.mxu0 }
 0x9ae   :  { %5380 = vmatmul.f32.gmra.mxu1 %v4414_v60  ;;  %5493 = vmatmul.f32.gmra.mxu2 %v4415_v19  ;;  %v11743_v19 = vld [vmem:[#allocation48_spill] sm:$0xff] }
 0x9af   :  { %5606 = vmatmul.f32.gmra.mxu3 %v4416_v13  ;;  %v4647_v13 = vmul.f32 %v4231_v34, %v11743_v19  ;;  %v4037_v19 = vld [vmem:[#allocation12 + $0x1b8] sm:$0xff] }
 0x9b0   :  { %5318 = vmatmul.f32.gmra.mxu0 %v4634_v25  ;;  %v4025_v25 = vld [vmem:[#allocation12 + $0x158] sm:$0xff] }
 0x9b1   :  { %v5090_v3 = vpop.f32.mrf.mxu2  ;;  %v4441_v61 = vmul.f32 %v4025_v25, %v11746_v21  ;;  %v11750_v25 = vld [vmem:[#allocation129_spill] sm:$0xff] }
 0x9b2   :  { %v5203_v46 = vpop.f32.mrf.mxu3 }
 0x9b3   :  { %v10034_v48 = vadd.f32 %v5203_v46, %v5090_v3  ;;  %v10036_v7 = vpop.f32.mrf.mxu1  ;;  %v4026_v3 = vld [vmem:[#allocation12 + $0x160] sm:$0xff] }
 0x9b4   :  { %11739 = vst [vmem:[#allocation81_spill] sm:$0xff] %v10036_v7  ;;  %v4244_v7 = vld [vmem:[#allocation12 + $0x830] sm:$0xff]  ;;  %v4442_v34 = vmul.f32 %v4026_v3, %v11747_v17  ;;  %v4453_v3 = vmul.f32 %v4037_v19, %v11750_v25  ;;  %v11752_v17 = vld [vmem:[#allocation126_spill] sm:$0xff] }
 0x9b5   :  { %v10041_v60 = vpop.f32.mrf.mxu0  ;;  %v11756_v25 = vld [vmem:[#allocation150_spill] sm:$0xff] }
 0x9b6   :  { %5383 = vmatmul.f32.gmra.mxu1 %v4427_v1  ;;  %5496 = vmatmul.f32.gmra.mxu2 %v4428_v44  ;;  %v11748_v44 = vld [vmem:[#allocation70_spill] sm:$0xff] }
 0x9b7   :  { %5609 = vmatmul.f32.gmra.mxu3 %v4429_v50  ;;  %v4660_v50 = vmul.f32 %v4244_v7, %v11748_v44  ;;  %v4050_v44 = vld [vmem:[#allocation12 + $0x220] sm:$0xff] }
 0x9b8   :  { %5321 = vmatmul.f32.gmra.mxu0 %v4647_v13  ;;  %v4038_v13 = vld [vmem:[#allocation12 + $0x1c0] sm:$0xff] }
 0x9b9   :  { %v5093_v46 = vpop.f32.mrf.mxu2  ;;  %v4454_v21 = vmul.f32 %v4038_v13, %v11751_v40  ;;  %v11755_v13 = vld [vmem:[#allocation107_spill] sm:$0xff] }
 0x9ba   :  { %v5206_v51 = vpop.f32.mrf.mxu3 }
 0x9bb   :  { %v10044_v6 = vadd.f32 %v5206_v51, %v5093_v46  ;;  %v10046_v63 = vpop.f32.mrf.mxu1  ;;  %v4039_v46 = vld [vmem:[#allocation12 + $0x1c8] sm:$0xff] }
 0x9bc   :  { %11744 = vst [vmem:[#allocation75_spill] sm:$0xff] %v10046_v63  ;;  %v4257_v63 = vld [vmem:[#allocation12 + $0x898] sm:$0xff]  ;;  %v4455_v7 = vmul.f32 %v4039_v46, %v11752_v17  ;;  %v4466_v46 = vmul.f32 %v4050_v44, %v11755_v13  ;;  %v11757_v17 = vld [vmem:[#allocation153_spill] sm:$0xff]  ;;  %v11761_v13 = vld [vmem:[#allocation155_spill] sm:$0xff] }
 0x9bd   :  { %v10051_v1 = vpop.f32.mrf.mxu0 }
 0x9be   :  { %5386 = vmatmul.f32.gmra.mxu1 %v4440_v41  ;;  %5499 = vmatmul.f32.gmra.mxu2 %v4441_v61  ;;  %v11753_v61 = vld [vmem:[#allocation131_spill] sm:$0xff] }
 0x9bf   :  { %5612 = vmatmul.f32.gmra.mxu3 %v4442_v34  ;;  %v4673_v34 = vmul.f32 %v4257_v63, %v11753_v61  ;;  %v4063_v61 = vld [vmem:[#allocation12 + $0x288] sm:$0xff] }
 0x9c0   :  { %5324 = vmatmul.f32.gmra.mxu0 %v4660_v50  ;;  %v4051_v50 = vld [vmem:[#allocation12 + $0x228] sm:$0xff] }
 0x9c1   :  { %v5096_v51 = vpop.f32.mrf.mxu2  ;;  %v4467_v40 = vmul.f32 %v4051_v50, %v11756_v25  ;;  %v11760_v50 = vld [vmem:[#allocation87_spill] sm:$0xff] }
 0x9c2   :  { %v5209_v53 = vpop.f32.mrf.mxu3 }
 0x9c3   :  { %v10054_v54 = vadd.f32 %v5209_v53, %v5096_v51  ;;  %v10056_v59 = vpop.f32.mrf.mxu1  ;;  %v4052_v51 = vld [vmem:[#allocation12 + $0x230] sm:$0xff] }
 0x9c4   :  { %11749 = vst [vmem:[#allocation94_spill] sm:$0xff] %v10056_v59  ;;  %v4270_v59 = vld [vmem:[#allocation12 + $0x900] sm:$0xff]  ;;  %v4468_v63 = vmul.f32 %v4052_v51, %v11757_v17  ;;  %v4479_v51 = vmul.f32 %v4063_v61, %v11760_v50  ;;  %v11766_v50 = vld [vmem:[#allocation159_spill] sm:$0xff] }
 0x9c5   :  { %v10061_v41 = vpop.f32.mrf.mxu0  ;;  %v11762_v17 = vld [vmem:[#allocation157_spill] sm:$0xff] }
 0x9c6   :  { %5389 = vmatmul.f32.gmra.mxu1 %v4453_v3  ;;  %5502 = vmatmul.f32.gmra.mxu2 %v4454_v21  ;;  %v11758_v21 = vld [vmem:[#allocation110_spill] sm:$0xff] }
 0x9c7   :  { %5615 = vmatmul.f32.gmra.mxu3 %v4455_v7  ;;  %v4686_v7 = vmul.f32 %v4270_v59, %v11758_v21  ;;  %v4076_v21 = vld [vmem:[#allocation12 + $0x2f0] sm:$0xff] }
 0x9c8   :  { %5327 = vmatmul.f32.gmra.mxu0 %v4673_v34  ;;  %v4064_v34 = vld [vmem:[#allocation12 + $0x290] sm:$0xff] }
 0x9c9   :  { %v5099_v53 = vpop.f32.mrf.mxu2  ;;  %v4480_v25 = vmul.f32 %v4064_v34, %v11761_v13  ;;  %v11765_v34 = vld [vmem:[#allocation50_spill] sm:$0xff] }
 0x9ca   :  { %v5212_v18 = vpop.f32.mrf.mxu3 }
 0x9cb   :  { %v10064_v0 = vadd.f32 %v5212_v18, %v5099_v53  ;;  %v10066_v19 = vpop.f32.mrf.mxu1  ;;  %v4065_v53 = vld [vmem:[#allocation12 + $0x298] sm:$0xff] }
 0x9cc   :  { %11754 = vst [vmem:[#allocation99_spill] sm:$0xff] %v10066_v19  ;;  %v4283_v19 = vld [vmem:[#allocation12 + $0x968] sm:$0xff]  ;;  %v4481_v59 = vmul.f32 %v4065_v53, %v11762_v17  ;;  %v4492_v53 = vmul.f32 %v4076_v21, %v11765_v34  ;;  %v11767_v17 = vld [vmem:[#allocation161_spill] sm:$0xff]  ;;  %v4309_v21 = vld [vmem:[#allocation12 + $0xa38] sm:$0xff] }
 0x9cd   :  { %v10071_v3 = vpop.f32.mrf.mxu0  ;;  %v4725_v28 = vmul.f32 %v4309_v21, %v11773_v33  ;;  %v4920_v33 = vld [vmem:[#allocation13 + $0x350] sm:$0xff]  ;;  %v11775_v21 = vld [vmem:[#allocation133_spill] sm:$0xff] }
 0x9ce   :  { %5392 = vmatmul.f32.gmra.mxu1 %v4466_v46  ;;  %5505 = vmatmul.f32.gmra.mxu2 %v4467_v40  ;;  %v11763_v40 = vld [vmem:[#allocation89_spill] sm:$0xff] }
 0x9cf   :  { %5618 = vmatmul.f32.gmra.mxu3 %v4468_v63  ;;  %v4699_v63 = vmul.f32 %v4283_v19, %v11763_v40  ;;  %v4089_v40 = vld [vmem:[#allocation12 + $0x358] sm:$0xff] }
 0x9d0   :  { %5330 = vmatmul.f32.gmra.mxu0 %v4686_v7  ;;  %v4077_v7 = vld [vmem:[#allocation12 + $0x2f8] sm:$0xff] }
 0x9d1   :  { %v5102_v18 = vpop.f32.mrf.mxu2  ;;  %v4493_v13 = vmul.f32 %v4077_v7, %v11766_v50  ;;  %v11770_v50 = vld [vmem:[#allocation72_spill] sm:$0xff] }
 0x9d2   :  { %v5215_v49 = vpop.f32.mrf.mxu3 }
 0x9d3   :  { %v10074_v4 = vadd.f32 %v5215_v49, %v5102_v18  ;;  %v10076_v44 = vpop.f32.mrf.mxu1  ;;  %v4078_v18 = vld [vmem:[#allocation12 + $0x300] sm:$0xff] }
 0x9d4   :  { %11759 = vst [vmem:[#allocation136_spill] sm:$0xff] %v10076_v44  ;;  %v4296_v44 = vld [vmem:[#allocation12 + $0x9d0] sm:$0xff]  ;;  %v4494_v19 = vmul.f32 %v4078_v18, %v11767_v17  ;;  %v4505_v17 = vmul.f32 %v4089_v40, %v11770_v50  ;;  %v4921_v40 = vld [vmem:[#allocation13 + $0x358] sm:$0xff]  ;;  %v4322_v50 = vld [vmem:[#allocation12 + $0xaa0] sm:$0xff] }
 0x9d5   :  { %v10081_v46 = vpop.f32.mrf.mxu0  ;;  %v4924_v18 = vld [vmem:[#allocation13 + $0x370] sm:$0xff]  ;;  %v4738_v62 = vmul.f32 %v4322_v50, %v11778_v43  ;;  %v11780_v50 = vld [vmem:[#allocation112_spill] sm:$0xff] }
 0x9d6   :  { %5395 = vmatmul.f32.gmra.mxu1 %v4479_v51  ;;  %5508 = vmatmul.f32.gmra.mxu2 %v4480_v25  ;;  %v11768_v25 = vld [vmem:[#allocation52_spill] sm:$0xff]  ;;  %v4916_v43 = vld [vmem:[#allocation13 + $0x330] sm:$0xff] }
 0x9d7   :  { %5621 = vmatmul.f32.gmra.mxu3 %v4481_v59  ;;  %v4712_v59 = vmul.f32 %v4296_v44, %v11768_v25  ;;  %v11771_v44 = vld [vmem:[#allocation163_spill] sm:$0xff] }
 0x9d8   :  { %5333 = vmatmul.f32.gmra.mxu0 %v4699_v63  ;;  %v4090_v63 = vld [vmem:[#allocation12 + $0x360] sm:$0xff] }
 0x9d9   :  { %v5105_v49 = vpop.f32.mrf.mxu2 }
 0x9da   :  { %v5218_v26 = vpop.f32.mrf.mxu3 }
 0x9db   :  { %v10084_v24 = vadd.f32 %v5218_v26, %v5105_v49  ;;  %v10086_v61 = vpop.f32.mrf.mxu1  ;;  %v4925_v49 = vld [vmem:[#allocation13 + $0x378] sm:$0xff] }
 0x9dc   :  { %11764 = vst [vmem:[#allocation55_spill] sm:$0xff] %v10086_v61  ;;  %5700 = vmatpush.msra.mxu0 %v4925_v49  ;;  %v4103_v49 = vld [vmem:[#allocation12 + $0x3c8] sm:$0xff] }
 0x9dd   :  { %v10091_v51 = vpop.f32.mrf.mxu0 }
 0x9de   :  { %5398 = vmatmul.f32.gmra.mxu1 %v4492_v53  ;;  %5511 = vmatmul.f32.gmra.mxu2 %v4493_v13  ;;  %v4506_v53 = vmul.f32 %v4090_v63, %v11771_v44  ;;  %v11772_v13 = vld [vmem:[#allocation165_spill] sm:$0xff]  ;;  %v4104_v63 = vld [vmem:[#allocation12 + $0x3d0] sm:$0xff] }
 0x9df   :  { %5624 = vmatmul.f32.gmra.mxu3 %v4494_v19  ;;  %5701 = vmatpush.msra.mxu0 %v4924_v18  ;;  %v4507_v19 = vmul.f32 %v4091_v30, %v11772_v13 }
 0x9e0   :  { %5336 = vmatmul.f32.gmra.mxu0 %v4712_v59  ;;  %v4923_v59 = vld [vmem:[#allocation13 + $0x368] sm:$0xff] }
 0x9e1   :  { %v5108_v26 = vpop.f32.mrf.mxu2  ;;  %5702 = vmatpush.msra.mxu0 %v4923_v59 }
 0x9e2   :  { %v5221_v61 = vpop.f32.mrf.mxu3 }
 0x9e3   :  { %v10094_v34 = vadd.f32 %v5221_v61, %v5108_v26  ;;  %v10096_v7 = vpop.f32.mrf.mxu1  ;;  %v4922_v61 = vld [vmem:[#allocation13 + $0x360] sm:$0xff] }
 0x9e4   :  { %11769 = vst [vmem:[#allocation125_spill] sm:$0xff] %v10096_v7  ;;  %v4102_v26 = vld [vmem:[#allocation12 + $0x3c0] sm:$0xff]  ;;  %5703 = vmatpush.msra.mxu0 %v4922_v61  ;;  %v4919_v61 = vld [vmem:[#allocation13 + $0x348] sm:$0xff] }
 0x9e5   :  { %v10101_v25 = vpop.f32.mrf.mxu0 }
 0x9e6   :  { %5401 = vmatmul.f32.gmra.mxu1 %v4505_v17  ;;  %5514 = vmatmul.f32.gmra.mxu2 %v4506_v53  ;;  %v4518_v17 = vmul.f32 %v4102_v26, %v11775_v21  ;;  %v11776_v53 = vld [vmem:[#allocation167_spill] sm:$0xff]  ;;  %v4917_v26 = vld [vmem:[#allocation13 + $0x338] sm:$0xff] }
 0x9e7   :  { %5627 = vmatmul.f32.gmra.mxu3 %v4507_v19  ;;  %5704 = vmatpush.msra.mxu0 %v4921_v40  ;;  %v4519_v13 = vmul.f32 %v4103_v49, %v11776_v53  ;;  %v11777_v19 = vld [vmem:[#allocation169_spill] sm:$0xff]  ;;  %v4115_v40 = vld [vmem:[#allocation12 + $0x428] sm:$0xff]  ;;  %v4117_v49 = vld [vmem:[#allocation12 + $0x438] sm:$0xff] }
 0x9e8   :  { %5339 = vmatmul.f32.gmra.mxu0 %v4725_v28  ;;  %v4520_v28 = vmul.f32 %v4104_v63, %v11777_v19  ;;  %v4335_v63 = vld [vmem:[#allocation12 + $0xb08] sm:$0xff] }
 0x9e9   :  { %v5111_v7 = vpop.f32.mrf.mxu2  ;;  %5705 = vmatpush.msra.mxu0 %v4920_v33  ;;  %v4751_v37 = vmul.f32 %v4335_v63, %v11783_v35  ;;  %v4912_v35 = vld [vmem:[#allocation13 + $0x310] sm:$0xff]  ;;  %v11786_v63 = vld [vmem:[#allocation92_spill] sm:$0xff] }
 0x9ea   :  { %v5224_v18 = vpop.f32.mrf.mxu3 }
 0x9eb   :  { %v10104_v30 = vadd.f32 %v5224_v18, %v5111_v7  ;;  %v10106_v44 = vpop.f32.mrf.mxu1  ;;  %5706 = vmatpush.msra.mxu0 %v4919_v61  ;;  %v4918_v7 = vld [vmem:[#allocation13 + $0x340] sm:$0xff]  ;;  %v4116_v18 = vld [vmem:[#allocation12 + $0x430] sm:$0xff] }
 0x9ec   :  { %11774 = vst [vmem:[#allocation115_spill] sm:$0xff] %v10106_v44 }
 0x9ed   :  { %v10111_v59 = vpop.f32.mrf.mxu0  ;;  %5707 = vmatpush.msra.mxu0 %v4918_v7  ;;  %v4915_v7 = vld [vmem:[#allocation13 + $0x328] sm:$0xff] }
 0x9ee   :  { %5404 = vmatmul.f32.gmra.mxu1 %v4518_v17  ;;  %5517 = vmatmul.f32.gmra.mxu2 %v4519_v13  ;;  %v4531_v17 = vmul.f32 %v4115_v40, %v11780_v50  ;;  %v11781_v13 = vld [vmem:[#allocation171_spill] sm:$0xff]  ;;  %v4913_v40 = vld [vmem:[#allocation13 + $0x318] sm:$0xff] }
 0x9ef   :  { %5630 = vmatmul.f32.gmra.mxu3 %v4520_v28  ;;  %5708 = vmatpush.msra.mxu0 %v4917_v26  ;;  %v4532_v19 = vmul.f32 %v4116_v18, %v11781_v13  ;;  %v11782_v28 = vld [vmem:[#allocation173_spill] sm:$0xff]  ;;  %v4128_v26 = vld [vmem:[#allocation12 + $0x490] sm:$0xff] }
 0x9f0   :  { %5342 = vmatmul.f32.gmra.mxu0 %v4738_v62  ;;  %v4533_v62 = vmul.f32 %v4117_v49, %v11782_v28  ;;  %v4130_v18 = vld [vmem:[#allocation12 + $0x4a0] sm:$0xff]  ;;  %v4348_v49 = vld [vmem:[#allocation12 + $0xb70] sm:$0xff] }
 0x9f1   :  { %v5114_v44 = vpop.f32.mrf.mxu2  ;;  %5709 = vmatpush.msra.mxu0 %v4916_v43  ;;  %v4764_v20 = vmul.f32 %v4348_v49, %v11789_v29  ;;  %v11793_v29 = vld [vmem:[#allocation179_spill] sm:$0xff] }
 0x9f2   :  { %v5227_v21 = vpop.f32.mrf.mxu3 }
 0x9f3   :  { %v10114_v53 = vadd.f32 %v5227_v21, %v5114_v44  ;;  %v10116_v33 = vpop.f32.mrf.mxu1  ;;  %5710 = vmatpush.msra.mxu0 %v4915_v7  ;;  %v4914_v44 = vld [vmem:[#allocation13 + $0x320] sm:$0xff]  ;;  %v4129_v21 = vld [vmem:[#allocation12 + $0x498] sm:$0xff] }
 0x9f4   :  { %11779 = vst [vmem:[#allocation77_spill] sm:$0xff] %v10116_v33 }
 0x9f5   :  { %v10121_v61 = vpop.f32.mrf.mxu0  ;;  %5711 = vmatpush.msra.mxu0 %v4914_v44  ;;  %v4911_v44 = vld [vmem:[#allocation13 + $0x308] sm:$0xff] }
 0x9f6   :  { %5407 = vmatmul.f32.gmra.mxu1 %v4531_v17  ;;  %5520 = vmatmul.f32.gmra.mxu2 %v4532_v19  ;;  %v4544_v17 = vmul.f32 %v4128_v26, %v11786_v63  ;;  %v11787_v19 = vld [vmem:[#allocation175_spill] sm:$0xff]  ;;  %v4143_v26 = vld [vmem:[#allocation12 + $0x508] sm:$0xff]  ;;  %v4361_v63 = vld [vmem:[#allocation12 + $0xbd8] sm:$0xff] }
 0x9f7   :  { %5633 = vmatmul.f32.gmra.mxu3 %v4533_v62  ;;  %5712 = vmatpush.msra.mxu0 %v4913_v40  ;;  %v4545_v28 = vmul.f32 %v4129_v21, %v11787_v19  ;;  %v11788_v62 = vld [vmem:[#allocation177_spill] sm:$0xff]  ;;  %v4141_v40 = vld [vmem:[#allocation12 + $0x4f8] sm:$0xff] }
 0x9f8   :  { %5345 = vmatmul.f32.gmra.mxu0 %v4751_v37  ;;  %v4546_v37 = vmul.f32 %v4130_v18, %v11788_v62 }
 0x9f9   :  { %v5117_v33 = vpop.f32.mrf.mxu2  ;;  %5713 = vmatpush.msra.mxu0 %v4912_v35  ;;  %v11792_v35 = vld [vmem:[#allocation54_spill] sm:$0xff] }
 0x9fa   :  { %v5230_v50 = vpop.f32.mrf.mxu3  ;;  %v4557_v62 = vmul.f32 %v4141_v40, %v11792_v35  ;;  %v11799_v35 = vld [vmem:[#allocation183_spill] sm:$0xff] }
 0x9fb   :  { %v10124_v13 = vadd.f32 %v5230_v50, %v5117_v33  ;;  %v10126_v43 = vpop.f32.mrf.mxu1  ;;  %5714 = vmatpush.msra.mxu0 %v4911_v44  ;;  %v4910_v33 = vld [vmem:[#allocation13 + $0x300] sm:$0xff] }
 0x9fc   :  { %11785 = vst [vmem:[#allocation98_spill] sm:$0xff] %v10126_v43  ;;  %v4142_v50 = vld [vmem:[#allocation12 + $0x500] sm:$0xff] }
 0x9fd   :  { %11784 = vst [vmem:[#allocation64_spill] sm:$0xff] %v10124_v13  ;;  %v10131_v7 = vpop.f32.mrf.mxu0  ;;  %5715 = vmatpush.msra.mxu0 %v4910_v33  ;;  %v4558_v49 = vmul.f32 %v4142_v50, %v11793_v29  ;;  %v4154_v33 = vld [vmem:[#allocation12 + $0x560] sm:$0xff]  ;;  %v11798_v50 = vld [vmem:[#allocation76_spill] sm:$0xff]  ;;  %v4571_v29 = vmul.f32 %v4155_v15, %v11799_v35  ;;  %v11820_v13 = vld [vmem:[#allocation199_spill] sm:$0xff] }
 0x9fe   :  { %5410 = vmatmul.f32.gmra.mxu1 %v4544_v17  ;;  %5523 = vmatmul.f32.gmra.mxu2 %v4545_v28  ;;  %v11794_v17 = vld [vmem:[#allocation181_spill] sm:$0xff] }
 0x9ff   :  { %5636 = vmatmul.f32.gmra.mxu3 %v4546_v37  ;;  %v4559_v28 = vmul.f32 %v4143_v26, %v11794_v17  ;;  %v4570_v26 = vmul.f32 %v4154_v33, %v11798_v50  ;;  %v11800_v17 = vld [vmem:[#allocation185_spill] sm:$0xff]  ;;  %v11805_v50 = vld [vmem:[#allocation187_spill] sm:$0xff] }
 0xa00   :  { %5348 = vmatmul.f32.gmra.mxu0 %v4764_v20  ;;  %v11795_v20 = vld [vmem:[#allocation57_spill] sm:$0xff] }
 0xa01   :  { %v5120_v43 = vpop.f32.mrf.mxu2  ;;  %v4777_v44 = vmul.f32 %v4361_v63, %v11795_v20  ;;  %v4167_v20 = vld [vmem:[#allocation12 + $0x5c8] sm:$0xff]  ;;  %v11804_v15 = vld [vmem:[#allocation137_spill] sm:$0xff] }
 0xa02   :  { %v5233_v21 = vpop.f32.mrf.mxu3 }
 0xa03   :  { %v10134_v18 = vadd.f32 %v5233_v21, %v5120_v43  ;;  %v10136_v19 = vpop.f32.mrf.mxu1  ;;  %v4156_v21 = vld [vmem:[#allocation12 + $0x570] sm:$0xff] }
 0xa04   :  { %11791 = vst [vmem:[#allocation83_spill] sm:$0xff] %v10136_v19  ;;  %v4374_v19 = vld [vmem:[#allocation12 + $0xc40] sm:$0xff]  ;;  %v4572_v63 = vmul.f32 %v4156_v21, %v11800_v17  ;;  %v4583_v21 = vmul.f32 %v4167_v20, %v11804_v15  ;;  %v11811_v15 = vld [vmem:[#allocation191_spill] sm:$0xff] }
 0xa05   :  { %11790 = vst [vmem:[#allocation138_spill] sm:$0xff] %v10134_v18  ;;  %v10141_v37 = vpop.f32.mrf.mxu0  ;;  %v11806_v17 = vld [vmem:[#allocation189_spill] sm:$0xff] }
 0xa06   :  { %5413 = vmatmul.f32.gmra.mxu1 %v4557_v62  ;;  %5526 = vmatmul.f32.gmra.mxu2 %v4558_v49  ;;  %v11801_v49 = vld [vmem:[#allocation36_spill] sm:$0xff] }
 0xa07   :  { %5639 = vmatmul.f32.gmra.mxu3 %v4559_v28  ;;  %v4790_v28 = vmul.f32 %v4374_v19, %v11801_v49  ;;  %v4180_v49 = vld [vmem:[#allocation12 + $0x630] sm:$0xff] }
 0xa08   :  { %5351 = vmatmul.f32.gmra.mxu0 %v4777_v44  ;;  %v4168_v44 = vld [vmem:[#allocation12 + $0x5d0] sm:$0xff] }
 0xa09   :  { %v5123_v43 = vpop.f32.mrf.mxu2  ;;  %v4584_v35 = vmul.f32 %v4168_v44, %v11805_v50  ;;  %v11810_v44 = vld [vmem:[#allocation116_spill] sm:$0xff] }
 0xa0a   :  { %v5236_v8 = vpop.f32.mrf.mxu3 }
 0xa0b   :  { %v10144_v31 = vadd.f32 %v5236_v8, %v5123_v43  ;;  %v10146_v40 = vpop.f32.mrf.mxu1  ;;  %v4169_v43 = vld [vmem:[#allocation12 + $0x5d8] sm:$0xff] }
 0xa0c   :  { %11797 = vst [vmem:[#allocation117_spill] sm:$0xff] %v10146_v40  ;;  %v4387_v40 = vld [vmem:[#allocation12 + $0xca8] sm:$0xff]  ;;  %v4585_v19 = vmul.f32 %v4169_v43, %v11806_v17  ;;  %v4596_v43 = vmul.f32 %v4180_v49, %v11810_v44  ;;  %v11812_v17 = vld [vmem:[#allocation193_spill] sm:$0xff] }
 0xa0d   :  { %11796 = vst [vmem:[#allocation59_spill] sm:$0xff] %v10144_v31  ;;  %v10151_v62 = vpop.f32.mrf.mxu0 }
 0xa0e   :  { %5416 = vmatmul.f32.gmra.mxu1 %v4570_v26  ;;  %5529 = vmatmul.f32.gmra.mxu2 %v4571_v29  ;;  %v11807_v29 = vld [vmem:[#allocation141_spill] sm:$0xff] }
 0xa0f   :  { %5642 = vmatmul.f32.gmra.mxu3 %v4572_v63  ;;  %v4803_v63 = vmul.f32 %v4387_v40, %v11807_v29  ;;  %v4193_v29 = vld [vmem:[#allocation12 + $0x698] sm:$0xff] }
 0xa10   :  { %5354 = vmatmul.f32.gmra.mxu0 %v4790_v28  ;;  %v4181_v28 = vld [vmem:[#allocation12 + $0x638] sm:$0xff] }
 0xa11   :  { %v5126_v8 = vpop.f32.mrf.mxu2  ;;  %v4597_v50 = vmul.f32 %v4181_v28, %v11811_v15  ;;  %v11815_v28 = vld [vmem:[#allocation100_spill] sm:$0xff] }
 0xa12   :  { %v5239_v31 = vpop.f32.mrf.mxu3  ;;  %v4609_v44 = vmul.f32 %v4193_v29, %v11815_v28  ;;  %v4208_v29 = vld [vmem:[#allocation12 + $0x710] sm:$0xff] }
 0xa13   :  { %v10154_v2 = vadd.f32 %v5239_v31, %v5126_v8  ;;  %v10156_v33 = vpop.f32.mrf.mxu1  ;;  %v4182_v8 = vld [vmem:[#allocation12 + $0x640] sm:$0xff] }
 0xa14   :  { %11803 = vst [vmem:[#allocation45_spill] sm:$0xff] %v10156_v33  ;;  %v3988_v33 = vld [vmem:[#allocation12 + $0x30] sm:$0xff]  ;;  %v4598_v40 = vmul.f32 %v4182_v8, %v11812_v17  ;;  %v11817_v17 = vld [vmem:[#allocation197_spill] sm:$0xff] }
 0xa15   :  { %11802 = vst [vmem:[#allocation46_spill] sm:$0xff] %v10154_v2  ;;  %v10161_v26 = vpop.f32.mrf.mxu0  ;;  %v11816_v8 = vld [vmem:[#allocation195_spill] sm:$0xff] }
 0xa16   :  { %5419 = vmatmul.f32.gmra.mxu1 %v4583_v21  ;;  %5532 = vmatmul.f32.gmra.mxu2 %v4584_v35  ;;  %v11813_v35 = vld [vmem:[#allocation120_spill] sm:$0xff] }
 0xa17   :  { %5645 = vmatmul.f32.gmra.mxu3 %v4585_v19  ;;  %v4404_v19 = vmul.f32 %v3988_v33, %v11813_v35 }
 0xa18   :  { %5357 = vmatmul.f32.gmra.mxu0 %v4803_v63  ;;  %v4194_v63 = vld [vmem:[#allocation12 + $0x6a0] sm:$0xff] }
 0xa19   :  { %v5129_v31 = vpop.f32.mrf.mxu2  ;;  %v4610_v15 = vmul.f32 %v4194_v63, %v11816_v8  ;;  %v4014_v8 = vld [vmem:[#allocation12 + $0x100] sm:$0xff] }
 0xa1a   :  { %v5242_v2 = vpop.f32.mrf.mxu3 }
 0xa1b   :  { %v10164_v16 = vadd.f32 %v5242_v2, %v5129_v31  ;;  %v10166_v20 = vpop.f32.mrf.mxu1  ;;  %v4195_v31 = vld [vmem:[#allocation12 + $0x6a8] sm:$0xff] }
 0xa1c   :  { %11809 = vst [vmem:[#allocation102_spill] sm:$0xff] %v10166_v20  ;;  %v4001_v20 = vld [vmem:[#allocation12 + $0x98] sm:$0xff]  ;;  %v4611_v22 = vmul.f32 %v4195_v31, %v11817_v17  ;;  %v11819_v17 = vld [vmem:[#allocation61_spill] sm:$0xff] }
 0xa1d   :  { %11808 = vst [vmem:[#allocation79_spill] sm:$0xff] %v10164_v16  ;;  %v10171_v21 = vpop.f32.mrf.mxu0 }
 0xa1e   :  { %5422 = vmatmul.f32.gmra.mxu1 %v4596_v43  ;;  %5535 = vmatmul.f32.gmra.mxu2 %v4597_v50  ;;  %v11818_v43 = vld [vmem:[#allocation104_spill] sm:$0xff] }
 0xa1f   :  { %5648 = vmatmul.f32.gmra.mxu3 %v4598_v40  ;;  %v4417_v50 = vmul.f32 %v4001_v20, %v11818_v43  ;;  %v5266_v40 = vadd.f32 %v10010_v52, %v9864_v36  ;;  %v11821_v36 = vld [vmem:[#allocation201_spill] sm:$0xff] }
 0xa20   :  { %5716 = vmatmul.f32.vlgmr.msra.gmra.mxu0 %v4404_v19  ;;  %v4207_v19 = vld [vmem:[#allocation12 + $0x708] sm:$0xff]  ;;  %v4624_v52 = vmul.f32 %v4208_v29, %v11821_v36  ;;  %v11824_v36 = vld [vmem:[#allocation203_spill] sm:$0xff] }
 0xa21   :  { %v5132_v2 = vpop.f32.mrf.mxu2  ;;  %v4623_v20 = vmul.f32 %v4207_v19, %v11820_v13  ;;  %v4221_v13 = vld [vmem:[#allocation12 + $0x778] sm:$0xff] }
 0xa22   :  { %v5245_v16 = vpop.f32.mrf.mxu3 }
 0xa23   :  { %v10174_v18 = vadd.f32 %v5245_v16, %v5132_v2  ;;  %v5378_v49 = vpop.f32.mrf.mxu1  ;;  %v4206_v16 = vld [vmem:[#allocation12 + $0x700] sm:$0xff] }
 0xa24   :  { %v5379_v35 = vadd.f32 %v5378_v49, %v5266_v40  ;;  %v4219_v40 = vld [vmem:[#allocation12 + $0x768] sm:$0xff] }
 0xa25   :  { %11814 = vst [vmem:[#allocation128_spill] sm:$0xff] %v10174_v18  ;;  %v10179_v33 = vpop.f32.mrf.mxu0  ;;  %v4622_v18 = vmul.f32 %v4206_v16, %v11819_v17 }
 0xa26   :  { %5425 = vmatmul.f32.gmra.mxu1 %v4609_v44  ;;  %5538 = vmatmul.f32.gmra.mxu2 %v4610_v15  ;;  %v5269_v15 = vadd.f32 %v10021_v10, %v9874_v9  ;;  %v11825_v9 = vld [vmem:[#allocation205_spill] sm:$0xff] }
 0xa27   :  { %5651 = vmatmul.f32.gmra.mxu3 %v4611_v22  ;;  %v11822_v22 = vld [vmem:[#allocation65_spill] sm:$0xff]  ;;  %v4637_v10 = vmul.f32 %v4221_v13, %v11825_v9  ;;  %v11828_v9 = vld [vmem:[#allocation207_spill] sm:$0xff] }
 0xa28   :  { %5719 = vmatmul.f32.gmra.mxu0 %v4417_v50  ;;  %v4430_v49 = vmul.f32 %v4014_v8, %v11822_v22 }
 0xa29   :  { %v5491_v2 = vpop.f32.mrf.mxu2 }
 0xa2a   :  { %v5492_v28 = vadd.f32 %v5491_v2, %v5379_v35  ;;  %v5604_v63 = vpop.f32.mrf.mxu3  ;;  %v4220_v35 = vld [vmem:[#allocation12 + $0x770] sm:$0xff] }
 0xa2b   :  { %v5381_v31 = vpop.f32.mrf.mxu1  ;;  %v4636_v8 = vmul.f32 %v4220_v35, %v11824_v36  ;;  %v4234_v35 = vld [vmem:[#allocation12 + $0x7e0] sm:$0xff] }
 0xa2c   :  { %v10186_v43 = vadd.f32 %v5604_v63, %v5492_v28  ;;  %v5382_v50 = vadd.f32 %v5381_v31, %v5269_v15  ;;  %v4027_v28 = vld [vmem:[#allocation12 + $0x168] sm:$0xff]  ;;  %v11823_v63 = vld [vmem:[#allocation80_spill] sm:$0xff]  ;;  %v4232_v15 = vld [vmem:[#allocation12 + $0x7d0] sm:$0xff] }
 0xa2d   :  { %v10189_v44 = vpop.f32.mrf.mxu0  ;;  %v4635_v17 = vmul.f32 %v4219_v40, %v11823_v63  ;;  %v11826_v31 = vld [vmem:[#allocation82_spill] sm:$0xff]  ;;  %v11827_v63 = vld [vmem:[#allocation147_spill] sm:$0xff] }
 0xa2e   :  { %5428 = vmatmul.f32.gmra.mxu1 %v4622_v18  ;;  %5541 = vmatmul.f32.gmra.mxu2 %v4623_v20  ;;  %v4443_v20 = vmul.f32 %v4027_v28, %v11826_v31  ;;  %v4648_v36 = vmul.f32 %v4232_v15, %v11827_v63  ;;  %v11831_v63 = vld [vmem:[#allocation124_spill] sm:$0xff] }
 0xa2f   :  { %5654 = vmatmul.f32.gmra.mxu3 %v4624_v52  ;;  %v5272_v52 = vadd.f32 %v10031_v12, %v9884_v57  ;;  %v11829_v57 = vld [vmem:[#allocation209_spill] sm:$0xff] }
 0xa30   :  { %5722 = vmatmul.f32.gmra.mxu0 %v4430_v49  ;;  %v4650_v12 = vmul.f32 %v4234_v35, %v11829_v57  ;;  %v11832_v57 = vld [vmem:[#allocation211_spill] sm:$0xff] }
 0xa31   :  { %v5494_v16 = vpop.f32.mrf.mxu2 }
 0xa32   :  { %v5495_v19 = vadd.f32 %v5494_v16, %v5382_v50  ;;  %v5607_v2 = vpop.f32.mrf.mxu3  ;;  %v4233_v50 = vld [vmem:[#allocation12 + $0x7d8] sm:$0xff] }
 0xa33   :  { %v5384_v29 = vpop.f32.mrf.mxu1  ;;  %v4649_v28 = vmul.f32 %v4233_v50, %v11828_v9  ;;  %v4247_v50 = vld [vmem:[#allocation12 + $0x848] sm:$0xff] }
 0xa34   :  { %v10196_v22 = vadd.f32 %v5607_v2, %v5495_v19  ;;  %v5385_v49 = vadd.f32 %v5384_v29, %v5272_v52  ;;  %v4040_v2 = vld [vmem:[#allocation12 + $0x1d0] sm:$0xff]  ;;  %v4245_v52 = vld [vmem:[#allocation12 + $0x838] sm:$0xff] }
 0xa35   :  { %v10199_v18 = vpop.f32.mrf.mxu0  ;;  %v11830_v29 = vld [vmem:[#allocation91_spill] sm:$0xff]  ;;  %v4661_v9 = vmul.f32 %v4245_v52, %v11831_v63  ;;  %v11835_v63 = vld [vmem:[#allocation108_spill] sm:$0xff] }
 0xa36   :  { %5431 = vmatmul.f32.gmra.mxu1 %v4635_v17  ;;  %5544 = vmatmul.f32.gmra.mxu2 %v4636_v8  ;;  %v4456_v8 = vmul.f32 %v4040_v2, %v11830_v29 }
 0xa37   :  { %5657 = vmatmul.f32.gmra.mxu3 %v4637_v10  ;;  %v5275_v10 = vadd.f32 %v10041_v60, %v9894_v38  ;;  %v11833_v38 = vld [vmem:[#allocation213_spill] sm:$0xff] }
 0xa38   :  { %5725 = vmatmul.f32.gmra.mxu0 %v4443_v20  ;;  %v4663_v60 = vmul.f32 %v4247_v50, %v11833_v38  ;;  %v11836_v38 = vld [vmem:[#allocation215_spill] sm:$0xff] }
 0xa39   :  { %v5497_v40 = vpop.f32.mrf.mxu2 }
 0xa3a   :  { %v5498_v16 = vadd.f32 %v5497_v40, %v5385_v49  ;;  %v5610_v19 = vpop.f32.mrf.mxu3  ;;  %v4246_v49 = vld [vmem:[#allocation12 + $0x840] sm:$0xff] }
 0xa3b   :  { %v5387_v13 = vpop.f32.mrf.mxu1  ;;  %v4662_v2 = vmul.f32 %v4246_v49, %v11832_v57  ;;  %v4260_v49 = vld [vmem:[#allocation12 + $0x8b0] sm:$0xff] }
 0xa3c   :  { %v10206_v31 = vadd.f32 %v5610_v19, %v5498_v16  ;;  %v5388_v20 = vadd.f32 %v5387_v13, %v5275_v10  ;;  %v4053_v19 = vld [vmem:[#allocation12 + $0x238] sm:$0xff]  ;;  %v11834_v13 = vld [vmem:[#allocation154_spill] sm:$0xff]  ;;  %v4258_v10 = vld [vmem:[#allocation12 + $0x8a0] sm:$0xff] }
 0xa3d   :  { %v10209_v17 = vpop.f32.mrf.mxu0  ;;  %v4674_v57 = vmul.f32 %v4258_v10, %v11835_v63  ;;  %v11839_v63 = vld [vmem:[#allocation84_spill] sm:$0xff] }
 0xa3e   :  { %5434 = vmatmul.f32.gmra.mxu1 %v4648_v36  ;;  %5547 = vmatmul.f32.gmra.mxu2 %v4649_v28  ;;  %v4469_v28 = vmul.f32 %v4053_v19, %v11834_v13 }
 0xa3f   :  { %5660 = vmatmul.f32.gmra.mxu3 %v4650_v12  ;;  %v5278_v12 = vadd.f32 %v10051_v1, %v9904_v42  ;;  %v11837_v42 = vld [vmem:[#allocation217_spill] sm:$0xff] }
 0xa40   :  { %5728 = vmatmul.f32.gmra.mxu0 %v4456_v8  ;;  %v4676_v1 = vmul.f32 %v4260_v49, %v11837_v42  ;;  %v11840_v42 = vld [vmem:[#allocation219_spill] sm:$0xff] }
 0xa41   :  { %v5500_v15 = vpop.f32.mrf.mxu2 }
 0xa42   :  { %v5501_v40 = vadd.f32 %v5500_v15, %v5388_v20  ;;  %v5613_v16 = vpop.f32.mrf.mxu3  ;;  %v4259_v20 = vld [vmem:[#allocation12 + $0x8a8] sm:$0xff] }
 0xa43   :  { %v5390_v35 = vpop.f32.mrf.mxu1  ;;  %v4675_v19 = vmul.f32 %v4259_v20, %v11836_v38  ;;  %v4273_v20 = vld [vmem:[#allocation12 + $0x918] sm:$0xff] }
 0xa44   :  { %v10216_v29 = vadd.f32 %v5613_v16, %v5501_v40  ;;  %v5391_v8 = vadd.f32 %v5390_v35, %v5278_v12  ;;  %v4066_v16 = vld [vmem:[#allocation12 + $0x2a0] sm:$0xff]  ;;  %v11838_v35 = vld [vmem:[#allocation158_spill] sm:$0xff] }
 0xa45   :  { %v10219_v36 = vpop.f32.mrf.mxu0  ;;  %v4271_v12 = vld [vmem:[#allocation12 + $0x908] sm:$0xff] }
 0xa46   :  { %5437 = vmatmul.f32.gmra.mxu1 %v4661_v9  ;;  %5550 = vmatmul.f32.gmra.mxu2 %v4662_v2  ;;  %v4482_v2 = vmul.f32 %v4066_v16, %v11838_v35  ;;  %v4687_v38 = vmul.f32 %v4271_v12, %v11839_v63  ;;  %v11843_v63 = vld [vmem:[#allocation156_spill] sm:$0xff] }
 0xa47   :  { %5663 = vmatmul.f32.gmra.mxu3 %v4663_v60  ;;  %v5281_v60 = vadd.f32 %v10061_v41, %v9914_v23  ;;  %v11841_v23 = vld [vmem:[#allocation221_spill] sm:$0xff] }
 0xa48   :  { %5731 = vmatmul.f32.gmra.mxu0 %v4469_v28  ;;  %v4689_v41 = vmul.f32 %v4273_v20, %v11841_v23  ;;  %v11844_v23 = vld [vmem:[#allocation223_spill] sm:$0xff] }
 0xa49   :  { %v5503_v52 = vpop.f32.mrf.mxu2 }
 0xa4a   :  { %v5504_v15 = vadd.f32 %v5503_v52, %v5391_v8  ;;  %v5616_v40 = vpop.f32.mrf.mxu3  ;;  %v4272_v8 = vld [vmem:[#allocation12 + $0x910] sm:$0xff] }
 0xa4b   :  { %v5393_v50 = vpop.f32.mrf.mxu1  ;;  %v4688_v16 = vmul.f32 %v4272_v8, %v11840_v42  ;;  %v4286_v8 = vld [vmem:[#allocation12 + $0x980] sm:$0xff] }
 0xa4c   :  { %v10226_v13 = vadd.f32 %v5616_v40, %v5504_v15  ;;  %v5394_v28 = vadd.f32 %v5393_v50, %v5281_v60  ;;  %v4079_v40 = vld [vmem:[#allocation12 + $0x308] sm:$0xff]  ;;  %v4284_v60 = vld [vmem:[#allocation12 + $0x970] sm:$0xff] }
 0xa4d   :  { %v10229_v9 = vpop.f32.mrf.mxu0  ;;  %v11842_v50 = vld [vmem:[#allocation162_spill] sm:$0xff]  ;;  %v4700_v42 = vmul.f32 %v4284_v60, %v11843_v63  ;;  %v11847_v63 = vld [vmem:[#allocation160_spill] sm:$0xff] }
 0xa4e   :  { %5440 = vmatmul.f32.gmra.mxu1 %v4674_v57  ;;  %5553 = vmatmul.f32.gmra.mxu2 %v4675_v19  ;;  %v4495_v19 = vmul.f32 %v4079_v40, %v11842_v50 }
 0xa4f   :  { %5666 = vmatmul.f32.gmra.mxu3 %v4676_v1  ;;  %v5284_v1 = vadd.f32 %v10071_v3, %v9924_v14  ;;  %v11845_v14 = vld [vmem:[#allocation225_spill] sm:$0xff] }
 0xa50   :  { %5734 = vmatmul.f32.gmra.mxu0 %v4482_v2  ;;  %v4702_v3 = vmul.f32 %v4286_v8, %v11845_v14  ;;  %v11848_v14 = vld [vmem:[#allocation227_spill] sm:$0xff] }
 0xa51   :  { %v5506_v10 = vpop.f32.mrf.mxu2 }
 0xa52   :  { %v5507_v52 = vadd.f32 %v5506_v10, %v5394_v28  ;;  %v5619_v15 = vpop.f32.mrf.mxu3  ;;  %v4285_v28 = vld [vmem:[#allocation12 + $0x978] sm:$0xff] }
 0xa53   :  { %v5396_v49 = vpop.f32.mrf.mxu1  ;;  %v4701_v40 = vmul.f32 %v4285_v28, %v11844_v23  ;;  %v4299_v28 = vld [vmem:[#allocation12 + $0x9e8] sm:$0xff] }
 0xa54   :  { %v10236_v35 = vadd.f32 %v5619_v15, %v5507_v52  ;;  %v5397_v2 = vadd.f32 %v5396_v49, %v5284_v1  ;;  %v4092_v15 = vld [vmem:[#allocation12 + $0x370] sm:$0xff]  ;;  %v11846_v49 = vld [vmem:[#allocation166_spill] sm:$0xff]  ;;  %v4297_v1 = vld [vmem:[#allocation12 + $0x9d8] sm:$0xff] }
 0xa55   :  { %v10239_v57 = vpop.f32.mrf.mxu0  ;;  %v4713_v23 = vmul.f32 %v4297_v1, %v11847_v63  ;;  %v4310_v1 = vld [vmem:[#allocation12 + $0xa40] sm:$0xff] }
 0xa56   :  { %5443 = vmatmul.f32.gmra.mxu1 %v4687_v38  ;;  %5556 = vmatmul.f32.gmra.mxu2 %v4688_v16  ;;  %v4508_v16 = vmul.f32 %v4092_v15, %v11846_v49  ;;  %v4118_v63 = vld [vmem:[#allocation12 + $0x440] sm:$0xff] }
 0xa57   :  { %5669 = vmatmul.f32.gmra.mxu3 %v4689_v41  ;;  %v5287_v41 = vadd.f32 %v10081_v46, %v9934_v45  ;;  %v11850_v45 = vld [vmem:[#allocation229_spill] sm:$0xff] }
 0xa58   :  { %5737 = vmatmul.f32.gmra.mxu0 %v4495_v19  ;;  %v4715_v46 = vmul.f32 %v4299_v28, %v11850_v45  ;;  %v4940_v28 = vld [vmem:[#allocation13 + $0x3f0] sm:$0xff]  ;;  %v4955_v45 = vld [vmem:[#allocation13 + $0x468] sm:$0xff] }
 0xa59   :  { %v5509_v12 = vpop.f32.mrf.mxu2 }
 0xa5a   :  { %v5510_v10 = vadd.f32 %v5509_v12, %v5397_v2  ;;  %v5622_v52 = vpop.f32.mrf.mxu3  ;;  %v4298_v2 = vld [vmem:[#allocation12 + $0x9e0] sm:$0xff] }
 0xa5b   :  { %v5399_v20 = vpop.f32.mrf.mxu1  ;;  %v4714_v15 = vmul.f32 %v4298_v2, %v11848_v14  ;;  %v4312_v14 = vld [vmem:[#allocation12 + $0xa50] sm:$0xff] }
 0xa5c   :  { %v10246_v50 = vadd.f32 %v5622_v52, %v5510_v10  ;;  %v5400_v19 = vadd.f32 %v5399_v20, %v5287_v41  ;;  %v4105_v52 = vld [vmem:[#allocation12 + $0x3d8] sm:$0xff]  ;;  %v11851_v20 = vld [vmem:[#allocation170_spill] sm:$0xff] }
 0xa5d   :  { %v10249_v38 = vpop.f32.mrf.mxu0  ;;  %v4957_v41 = vld [vmem:[#allocation13 + $0x478] sm:$0xff] }
 0xa5e   :  { %5446 = vmatmul.f32.gmra.mxu1 %v4700_v42  ;;  %5559 = vmatmul.f32.gmra.mxu2 %v4701_v40  ;;  %v4521_v40 = vmul.f32 %v4105_v52, %v11851_v20  ;;  %v4972_v52 = vld [vmem:[#allocation13 + $0x4f0] sm:$0xff] }
 0xa5f   :  { %5672 = vmatmul.f32.gmra.mxu3 %v4702_v3  ;;  %v5290_v3 = vadd.f32 %v10091_v51, %v9944_v27  ;;  %5926 = vmatpush.msra.mxu2 %v4957_v41  ;;  %v11855_v41 = vld [vmem:[#allocation233_spill] sm:$0xff] }
 0xa60   :  { %5740 = vmatmul.f32.gmra.mxu0 %v4508_v16  ;;  %v4941_v16 = vld [vmem:[#allocation13 + $0x3f8] sm:$0xff] }
 0xa61   :  { %v5512_v60 = vpop.f32.mrf.mxu2  ;;  %5813 = vmatpush.msra.mxu1 %v4941_v16 }
 0xa62   :  { %v5513_v12 = vadd.f32 %v5512_v60, %v5400_v19  ;;  %v5625_v10 = vpop.f32.mrf.mxu3  ;;  %v4973_v19 = vld [vmem:[#allocation13 + $0x4f8] sm:$0xff]  ;;  %v4311_v60 = vld [vmem:[#allocation12 + $0xa48] sm:$0xff] }
 0xa63   :  { %v5402_v8 = vpop.f32.mrf.mxu1  ;;  %6039 = vmatpush.msra.mxu3 %v4973_v19  ;;  %5814 = vmatpush.msra.mxu1 %v4940_v28  ;;  %v4728_v19 = vmul.f32 %v4312_v14, %v11855_v41  ;;  %v11856_v28 = vld [vmem:[#allocation174_spill] sm:$0xff] }
 0xa64   :  { %v10256_v49 = vadd.f32 %v5625_v10, %v5513_v12  ;;  %v5403_v2 = vadd.f32 %v5402_v8, %v5290_v3  ;;  %v4956_v10 = vld [vmem:[#allocation13 + $0x470] sm:$0xff]  ;;  %v11852_v8 = vld [vmem:[#allocation164_spill] sm:$0xff] }
 0xa65   :  { %v10259_v42 = vpop.f32.mrf.mxu0  ;;  %5927 = vmatpush.msra.mxu2 %v4956_v10  ;;  %6040 = vmatpush.msra.mxu3 %v4972_v52  ;;  %v4726_v20 = vmul.f32 %v4310_v1, %v11852_v8  ;;  %v4534_v10 = vmul.f32 %v4118_v63, %v11856_v28  ;;  %v5293_v52 = vadd.f32 %v10101_v25, %v9954_v11  ;;  %v4970_v1 = vld [vmem:[#allocation13 + $0x4e0] sm:$0xff]  ;;  %v4936_v63 = vld [vmem:[#allocation13 + $0x3d0] sm:$0xff] }
 0xa66   :  { %11849 = vst [vmem:[#allocation127_spill] sm:$0xff] %v10256_v49  ;;  %5449 = vmatmul.f32.gmra.mxu1 %v4713_v23  ;;  %5562 = vmatmul.f32.gmra.mxu2 %v4714_v15  ;;  %v4939_v15 = vld [vmem:[#allocation13 + $0x3e8] sm:$0xff]  ;;  %v4952_v8 = vld [vmem:[#allocation13 + $0x450] sm:$0xff] }
 0xa67   :  { %5675 = vmatmul.f32.gmra.mxu3 %v4715_v46  ;;  %v4971_v46 = vld [vmem:[#allocation13 + $0x4e8] sm:$0xff]  ;;  %5815 = vmatpush.msra.mxu1 %v4939_v15  ;;  %v4969_v15 = vld [vmem:[#allocation13 + $0x4d8] sm:$0xff] }
 0xa68   :  { %5743 = vmatmul.f32.gmra.mxu0 %v4521_v40  ;;  %v11853_v40 = vld [vmem:[#allocation231_spill] sm:$0xff]  ;;  %5928 = vmatpush.msra.mxu2 %v4955_v45 }
 0xa69   :  { %v5515_v12 = vpop.f32.mrf.mxu2  ;;  %v4727_v3 = vmul.f32 %v4311_v60, %v11853_v40  ;;  %6041 = vmatpush.msra.mxu3 %v4971_v46  ;;  %v4937_v60 = vld [vmem:[#allocation13 + $0x3d8] sm:$0xff]  ;;  %v4324_v45 = vld [vmem:[#allocation12 + $0xab0] sm:$0xff] }
 0xa6a   :  { %v5516_v27 = vadd.f32 %v5515_v12, %v5403_v2  ;;  %v5628_v51 = vpop.f32.mrf.mxu3  ;;  %v4938_v2 = vld [vmem:[#allocation13 + $0x3e0] sm:$0xff]  ;;  %v4325_v40 = vld [vmem:[#allocation12 + $0xab8] sm:$0xff] }
 0xa6b   :  { %v5405_v23 = vpop.f32.mrf.mxu1  ;;  %v4954_v12 = vld [vmem:[#allocation13 + $0x460] sm:$0xff]  ;;  %5816 = vmatpush.msra.mxu1 %v4938_v2  ;;  %6042 = vmatpush.msra.mxu3 %v4970_v1 }
 0xa6c   :  { %v10266_v16 = vadd.f32 %v5628_v51, %v5516_v27  ;;  %v4953_v27 = vld [vmem:[#allocation13 + $0x458] sm:$0xff]  ;;  %v4323_v51 = vld [vmem:[#allocation12 + $0xaa8] sm:$0xff]  ;;  %v5406_v14 = vadd.f32 %v5405_v23, %v5293_v52  ;;  %5929 = vmatpush.msra.mxu2 %v4954_v12  ;;  %v11858_v12 = vld [vmem:[#allocation235_spill] sm:$0xff] }
 0xa6d   :  { %v10269_v49 = vpop.f32.mrf.mxu0  ;;  %5817 = vmatpush.msra.mxu1 %v4937_v60  ;;  %6043 = vmatpush.msra.mxu3 %v4969_v15  ;;  %v11857_v23 = vld [vmem:[#allocation168_spill] sm:$0xff]  ;;  %v4740_v28 = vmul.f32 %v4324_v45, %v11858_v12  ;;  %v4951_v52 = vld [vmem:[#allocation13 + $0x448] sm:$0xff]  ;;  %v11859_v1 = vld [vmem:[#allocation237_spill] sm:$0xff]  ;;  %v5296_v15 = vadd.f32 %v10111_v59, %v9964_v5 }
 0xa6e   :  { %11854 = vst [vmem:[#allocation144_spill] sm:$0xff] %v10266_v16  ;;  %5452 = vmatmul.f32.gmra.mxu1 %v4726_v20  ;;  %5565 = vmatmul.f32.gmra.mxu2 %v4727_v3  ;;  %v4968_v20 = vld [vmem:[#allocation13 + $0x4d0] sm:$0xff]  ;;  %v4131_v3 = vld [vmem:[#allocation12 + $0x4a8] sm:$0xff]  ;;  %v4739_v2 = vmul.f32 %v4323_v51, %v11857_v23  ;;  %v4741_v60 = vmul.f32 %v4325_v40, %v11859_v1  ;;  %v4934_v51 = vld [vmem:[#allocation13 + $0x3c0] sm:$0xff] }
 0xa6f   :  { %5678 = vmatmul.f32.gmra.mxu3 %v4728_v19  ;;  %5930 = vmatpush.msra.mxu2 %v4953_v27  ;;  %v4935_v19 = vld [vmem:[#allocation13 + $0x3c8] sm:$0xff]  ;;  %v4950_v45 = vld [vmem:[#allocation13 + $0x440] sm:$0xff]  ;;  %v4933_v40 = vld [vmem:[#allocation13 + $0x3b8] sm:$0xff] }
 0xa70   :  { %5746 = vmatmul.f32.gmra.mxu0 %v4534_v10  ;;  %5818 = vmatpush.msra.mxu1 %v4936_v63  ;;  %v4967_v27 = vld [vmem:[#allocation13 + $0x4c8] sm:$0xff]  ;;  %v4966_v63 = vld [vmem:[#allocation13 + $0x4c0] sm:$0xff]  ;;  %v4948_v12 = vld [vmem:[#allocation13 + $0x430] sm:$0xff] }
 0xa71   :  { %v5518_v46 = vpop.f32.mrf.mxu2  ;;  %5931 = vmatpush.msra.mxu2 %v4952_v8  ;;  %6044 = vmatpush.msra.mxu3 %v4968_v20  ;;  %v4337_v20 = vld [vmem:[#allocation12 + $0xb18] sm:$0xff]  ;;  %v4338_v23 = vld [vmem:[#allocation12 + $0xb20] sm:$0xff] }
 0xa72   :  { %v5519_v11 = vadd.f32 %v5518_v46, %v5406_v14  ;;  %v5631_v25 = vpop.f32.mrf.mxu3  ;;  %5819 = vmatpush.msra.mxu1 %v4935_v19  ;;  %v11860_v14 = vld [vmem:[#allocation178_spill] sm:$0xff] }
 0xa73   :  { %v5408_v41 = vpop.f32.mrf.mxu1  ;;  %v4547_v46 = vmul.f32 %v4131_v3, %v11860_v14  ;;  %5932 = vmatpush.msra.mxu2 %v4951_v52  ;;  %6045 = vmatpush.msra.mxu3 %v4967_v27  ;;  %v4965_v3 = vld [vmem:[#allocation13 + $0x4b8] sm:$0xff] }
 0xa74   :  { %v10276_v10 = vadd.f32 %v5631_v25, %v5519_v11  ;;  %v5409_v8 = vadd.f32 %v5408_v41, %v5296_v15  ;;  %v4949_v11 = vld [vmem:[#allocation13 + $0x438] sm:$0xff]  ;;  %v4336_v25 = vld [vmem:[#allocation12 + $0xb10] sm:$0xff]  ;;  %5820 = vmatpush.msra.mxu1 %v4934_v51  ;;  %v11863_v15 = vld [vmem:[#allocation241_spill] sm:$0xff] }
 0xa75   :  { %v10279_v16 = vpop.f32.mrf.mxu0  ;;  %5933 = vmatpush.msra.mxu2 %v4950_v45  ;;  %6046 = vmatpush.msra.mxu3 %v4966_v63  ;;  %v11861_v41 = vld [vmem:[#allocation172_spill] sm:$0xff]  ;;  %v4754_v51 = vmul.f32 %v4338_v23, %v11863_v15  ;;  %v4964_v63 = vld [vmem:[#allocation13 + $0x4b0] sm:$0xff]  ;;  %v4946_v23 = vld [vmem:[#allocation13 + $0x420] sm:$0xff] }
 0xa76   :  { %5455 = vmatmul.f32.gmra.mxu1 %v4739_v2  ;;  %5568 = vmatmul.f32.gmra.mxu2 %v4740_v28  ;;  %v4932_v2 = vld [vmem:[#allocation13 + $0x3b0] sm:$0xff]  ;;  %v4752_v1 = vmul.f32 %v4336_v25, %v11861_v41  ;;  %v4930_v25 = vld [vmem:[#allocation13 + $0x3a0] sm:$0xff]  ;;  %v4351_v41 = vld [vmem:[#allocation12 + $0xb88] sm:$0xff] }
 0xa77   :  { %5681 = vmatmul.f32.gmra.mxu3 %v4741_v60  ;;  %v4144_v28 = vld [vmem:[#allocation12 + $0x510] sm:$0xff]  ;;  %5821 = vmatpush.msra.mxu1 %v4933_v40  ;;  %v5299_v40 = vadd.f32 %v10121_v61, %v9974_v58 }
 0xa78   :  { %5749 = vmatmul.f32.gmra.mxu0 %v4547_v46  ;;  %5934 = vmatpush.msra.mxu2 %v4949_v11  ;;  %v11862_v60 = vld [vmem:[#allocation239_spill] sm:$0xff]  ;;  %v4931_v46 = vld [vmem:[#allocation13 + $0x3a8] sm:$0xff] }
 0xa79   :  { %v5521_v19 = vpop.f32.mrf.mxu2  ;;  %v4753_v27 = vmul.f32 %v4337_v20, %v11862_v60  ;;  %6047 = vmatpush.msra.mxu3 %v4965_v3  ;;  %5822 = vmatpush.msra.mxu1 %v4932_v2  ;;  %v4947_v11 = vld [vmem:[#allocation13 + $0x428] sm:$0xff]  ;;  %v4350_v2 = vld [vmem:[#allocation12 + $0xb80] sm:$0xff]  ;;  %v4928_v60 = vld [vmem:[#allocation13 + $0x390] sm:$0xff] }
 0xa7a   :  { %v5522_v5 = vadd.f32 %v5521_v19, %v5409_v8  ;;  %v5634_v59 = vpop.f32.mrf.mxu3  ;;  %5935 = vmatpush.msra.mxu2 %v4948_v12  ;;  %v11864_v8 = vld [vmem:[#allocation182_spill] sm:$0xff] }
 0xa7b   :  { %v5411_v52 = vpop.f32.mrf.mxu1  ;;  %v4560_v19 = vmul.f32 %v4144_v28, %v11864_v8  ;;  %5823 = vmatpush.msra.mxu1 %v4931_v46  ;;  %v4963_v20 = vld [vmem:[#allocation13 + $0x4a8] sm:$0xff]  ;;  %6048 = vmatpush.msra.mxu3 %v4964_v63  ;;  %v4962_v28 = vld [vmem:[#allocation13 + $0x4a0] sm:$0xff] }
 0xa7c   :  { %v10286_v14 = vadd.f32 %v5634_v59, %v5522_v5  ;;  %v5412_v3 = vadd.f32 %v5411_v52, %v5299_v40  ;;  %v4929_v5 = vld [vmem:[#allocation13 + $0x398] sm:$0xff]  ;;  %5936 = vmatpush.msra.mxu2 %v4947_v11  ;;  %v11867_v40 = vld [vmem:[#allocation245_spill] sm:$0xff] }
 0xa7d   :  { %v10289_v45 = vpop.f32.mrf.mxu0  ;;  %v4349_v59 = vld [vmem:[#allocation12 + $0xb78] sm:$0xff]  ;;  %5824 = vmatpush.msra.mxu1 %v4930_v25  ;;  %6049 = vmatpush.msra.mxu3 %v4963_v20  ;;  %v4767_v11 = vmul.f32 %v4351_v41, %v11867_v40  ;;  %v4926_v41 = vld [vmem:[#allocation13 + $0x380] sm:$0xff] }
 0xa7e   :  { %5458 = vmatmul.f32.gmra.mxu1 %v4752_v1  ;;  %5571 = vmatmul.f32.gmra.mxu2 %v4753_v27  ;;  %v4945_v1 = vld [vmem:[#allocation13 + $0x418] sm:$0xff] }
 0xa7f   :  { %5684 = vmatmul.f32.gmra.mxu3 %v4754_v51  ;;  %v4157_v27 = vld [vmem:[#allocation12 + $0x578] sm:$0xff]  ;;  %5937 = vmatpush.msra.mxu2 %v4946_v23  ;;  %v11866_v51 = vld [vmem:[#allocation243_spill] sm:$0xff]  ;;  %v5302_v23 = vadd.f32 %v10131_v7, %v9984_v56 }
 0xa80   :  { %5752 = vmatmul.f32.gmra.mxu0 %v4560_v19  ;;  %5825 = vmatpush.msra.mxu1 %v4929_v5  ;;  %v11865_v52 = vld [vmem:[#allocation176_spill] sm:$0xff]  ;;  %v4766_v63 = vmul.f32 %v4350_v2, %v11866_v51  ;;  %v4944_v19 = vld [vmem:[#allocation13 + $0x410] sm:$0xff]  ;;  %v4927_v5 = vld [vmem:[#allocation13 + $0x388] sm:$0xff] }
 0xa81   :  { %v5524_v12 = vpop.f32.mrf.mxu2  ;;  %v4765_v15 = vmul.f32 %v4349_v59, %v11865_v52  ;;  %6050 = vmatpush.msra.mxu3 %v4962_v28  ;;  %5938 = vmatpush.msra.mxu2 %v4945_v1  ;;  %v4961_v20 = vld [vmem:[#allocation13 + $0x498] sm:$0xff]  ;;  %v4943_v59 = vld [vmem:[#allocation13 + $0x408] sm:$0xff]  ;;  %v4960_v2 = vld [vmem:[#allocation13 + $0x490] sm:$0xff] }
 0xa82   :  { %v5525_v58 = vadd.f32 %v5524_v12, %v5412_v3  ;;  %v5637_v61 = vpop.f32.mrf.mxu3  ;;  %5826 = vmatpush.msra.mxu1 %v4928_v60  ;;  %v11868_v3 = vld [vmem:[#allocation186_spill] sm:$0xff]  ;;  %v4364_v52 = vld [vmem:[#allocation12 + $0xbf0] sm:$0xff] }
 0xa83   :  { %v5414_v46 = vpop.f32.mrf.mxu1  ;;  %v4573_v12 = vmul.f32 %v4157_v27, %v11868_v3  ;;  %5939 = vmatpush.msra.mxu2 %v4944_v19  ;;  %6051 = vmatpush.msra.mxu3 %v4961_v20  ;;  %v4363_v1 = vld [vmem:[#allocation12 + $0xbe8] sm:$0xff]  ;;  %v11870_v19 = vld [vmem:[#allocation247_spill] sm:$0xff]  ;;  %v11871_v20 = vld [vmem:[#allocation249_spill] sm:$0xff] }
 0xa84   :  { %v10296_v8 = vadd.f32 %v5637_v61, %v5525_v58  ;;  %v5415_v28 = vadd.f32 %v5414_v46, %v5302_v23  ;;  %v4942_v58 = vld [vmem:[#allocation13 + $0x400] sm:$0xff]  ;;  %5827 = vmatpush.msra.mxu1 %v4927_v5  ;;  %v4959_v27 = vld [vmem:[#allocation13 + $0x488] sm:$0xff]  ;;  %v4779_v40 = vmul.f32 %v4363_v1, %v11870_v19  ;;  %v4780_v3 = vmul.f32 %v4364_v52, %v11871_v20  ;;  %v4377_v1 = vld [vmem:[#allocation12 + $0xc58] sm:$0xff] }
 0xa85   :  { %v10299_v25 = vpop.f32.mrf.mxu0  ;;  %v4362_v61 = vld [vmem:[#allocation12 + $0xbe0] sm:$0xff]  ;;  %5940 = vmatpush.msra.mxu2 %v4943_v59  ;;  %6052 = vmatpush.msra.mxu3 %v4960_v2  ;;  %v11872_v5 = vld [vmem:[#allocation190_spill] sm:$0xff]  ;;  %v5305_v2 = vadd.f32 %v10141_v37, %v9994_v39 }
 0xa86   :  { %5461 = vmatmul.f32.gmra.mxu1 %v4765_v15  ;;  %5574 = vmatmul.f32.gmra.mxu2 %v4766_v63  ;;  %v4170_v15 = vld [vmem:[#allocation12 + $0x5e0] sm:$0xff]  ;;  %v11869_v63 = vld [vmem:[#allocation180_spill] sm:$0xff]  ;;  %v4183_v52 = vld [vmem:[#allocation12 + $0x648] sm:$0xff] }
 0xa87   :  { %5687 = vmatmul.f32.gmra.mxu3 %v4767_v11  ;;  %5828 = vmatpush.msra.mxu1 %v4926_v41  ;;  %v4778_v46 = vmul.f32 %v4362_v61, %v11869_v63  ;;  %v4958_v23 = vld [vmem:[#allocation13 + $0x480] sm:$0xff]  ;;  %v4586_v59 = vmul.f32 %v4170_v15, %v11872_v5  ;;  %v4375_v41 = vld [vmem:[#allocation12 + $0xc48] sm:$0xff]  ;;  %v11874_v15 = vld [vmem:[#allocation251_spill] sm:$0xff] }
 0xa88   :  { %5755 = vmatmul.f32.gmra.mxu0 %v4573_v12  ;;  %5941 = vmatpush.msra.mxu2 %v4942_v58  ;;  %v4376_v58 = vld [vmem:[#allocation12 + $0xc50] sm:$0xff]  ;;  %v11875_v39 = vld [vmem:[#allocation253_spill] sm:$0xff] }
 0xa89   :  { %v5527_v60 = vpop.f32.mrf.mxu2  ;;  %6053 = vmatpush.msra.mxu3 %v4959_v27  ;;  %v4792_v19 = vmul.f32 %v4376_v58, %v11874_v15  ;;  %v4793_v37 = vmul.f32 %v4377_v1, %v11875_v39  ;;  %v4388_v5 = vld [vmem:[#allocation12 + $0xcb0] sm:$0xff]  ;;  %v5311_v39 = vadd.f32 %v10161_v26, %v10014_v55  ;;  %v11883_v55 = vld [vmem:[#allocation261_spill] sm:$0xff] }
 0xa8a   :  { %v5528_v56 = vadd.f32 %v5527_v60, %v5415_v28  ;;  %v5640_v7 = vpop.f32.mrf.mxu3 }
 0xa8b   :  { %v5417_v51 = vpop.f32.mrf.mxu1  ;;  %6054 = vmatpush.msra.mxu3 %v4958_v23 }
 0xa8c   :  { %v10306_v11 = vadd.f32 %v5640_v7, %v5528_v56  ;;  %v5418_v28 = vadd.f32 %v5417_v51, %v5305_v2  ;;  %v11873_v7 = vld [vmem:[#allocation184_spill] sm:$0xff]  ;;  %v11876_v51 = vld [vmem:[#allocation194_spill] sm:$0xff] }
 0xa8d   :  { %v10309_v12 = vpop.f32.mrf.mxu0  ;;  %v4791_v63 = vmul.f32 %v4375_v41, %v11873_v7  ;;  %v11878_v7 = vld [vmem:[#allocation255_spill] sm:$0xff] }
 0xa8e   :  { %5464 = vmatmul.f32.gmra.mxu1 %v4778_v46  ;;  %5577 = vmatmul.f32.gmra.mxu2 %v4779_v40  ;;  %v4599_v40 = vmul.f32 %v4183_v52, %v11876_v51  ;;  %v3989_v51 = vld [vmem:[#allocation12 + $0x38] sm:$0xff] }
 0xa8f   :  { %5690 = vmatmul.f32.gmra.mxu3 %v4780_v3  ;;  %v5308_v3 = vadd.f32 %v10151_v62, %v10004_v32  ;;  %v11879_v32 = vld [vmem:[#allocation257_spill] sm:$0xff] }
 0xa90   :  { %5758 = vmatmul.f32.gmra.mxu0 %v4586_v59  ;;  %v4389_v59 = vld [vmem:[#allocation12 + $0xcb8] sm:$0xff] }
 0xa91   :  { %v5530_v61 = vpop.f32.mrf.mxu2  ;;  %v4805_v52 = vmul.f32 %v4389_v59, %v11878_v7 }
 0xa92   :  { %v5531_v60 = vadd.f32 %v5530_v61, %v5418_v28  ;;  %v5643_v27 = vpop.f32.mrf.mxu3  ;;  %v4390_v28 = vld [vmem:[#allocation12 + $0xcc0] sm:$0xff]  ;;  %v4196_v61 = vld [vmem:[#allocation12 + $0x6b0] sm:$0xff] }
 0xa93   :  { %v5420_v56 = vpop.f32.mrf.mxu1  ;;  %v4806_v62 = vmul.f32 %v4390_v28, %v11879_v32  ;;  %v5314_v32 = vadd.f32 %v10171_v21, %v10024_v47  ;;  %v11887_v47 = vld [vmem:[#allocation265_spill] sm:$0xff] }
 0xa94   :  { %v10316_v20 = vadd.f32 %v5643_v27, %v5531_v60  ;;  %v5421_v23 = vadd.f32 %v5420_v56, %v5308_v3  ;;  %v11877_v60 = vld [vmem:[#allocation188_spill] sm:$0xff]  ;;  %v11880_v56 = vld [vmem:[#allocation198_spill] sm:$0xff] }
 0xa95   :  { %v10319_v46 = vpop.f32.mrf.mxu0  ;;  %v4804_v27 = vmul.f32 %v4388_v5, %v11877_v60  ;;  %v11882_v60 = vld [vmem:[#allocation259_spill] sm:$0xff] }
 0xa96   :  { %5467 = vmatmul.f32.gmra.mxu1 %v4791_v63  ;;  %5580 = vmatmul.f32.gmra.mxu2 %v4792_v19  ;;  %v4612_v19 = vmul.f32 %v4196_v61, %v11880_v56  ;;  %v4002_v56 = vld [vmem:[#allocation12 + $0xa0] sm:$0xff] }
 0xa97   :  { %5693 = vmatmul.f32.gmra.mxu3 %v4793_v37 }
 0xa98   :  { %5761 = vmatmul.f32.gmra.mxu0 %v4599_v40  ;;  %v3990_v40 = vld [vmem:[#allocation12 + $0x40] sm:$0xff] }
 0xa99   :  { %v5533_v2 = vpop.f32.mrf.mxu2  ;;  %v4406_v61 = vmul.f32 %v3990_v40, %v11882_v60 }
 0xa9a   :  { %v5534_v41 = vadd.f32 %v5533_v2, %v5421_v23  ;;  %v5646_v58 = vpop.f32.mrf.mxu3  ;;  %v3991_v23 = vld [vmem:[#allocation12 + $0x48] sm:$0xff]  ;;  %v4209_v2 = vld [vmem:[#allocation12 + $0x718] sm:$0xff] }
 0xa9b   :  { %v5423_v1 = vpop.f32.mrf.mxu1  ;;  %v4407_v26 = vmul.f32 %v3991_v23, %v11883_v55  ;;  %v5317_v55 = vadd.f32 %v10179_v33, %v10034_v48  ;;  %v11891_v48 = vld [vmem:[#allocation269_spill] sm:$0xff] }
 0xa9c   :  { %v10326_v15 = vadd.f32 %v5646_v58, %v5534_v41  ;;  %v5424_v37 = vadd.f32 %v5423_v1, %v5311_v39  ;;  %v11881_v41 = vld [vmem:[#allocation192_spill] sm:$0xff]  ;;  %v11884_v1 = vld [vmem:[#allocation202_spill] sm:$0xff] }
 0xa9d   :  { %v10329_v63 = vpop.f32.mrf.mxu0  ;;  %v4405_v58 = vmul.f32 %v3989_v51, %v11881_v41  ;;  %v11886_v41 = vld [vmem:[#allocation263_spill] sm:$0xff] }
 0xa9e   :  { %5470 = vmatmul.f32.gmra.mxu1 %v4804_v27  ;;  %5583 = vmatmul.f32.gmra.mxu2 %v4805_v52  ;;  %v4625_v52 = vmul.f32 %v4209_v2, %v11884_v1  ;;  %v4015_v1 = vld [vmem:[#allocation12 + $0x108] sm:$0xff] }
 0xa9f   :  { %5696 = vmatmul.f32.gmra.mxu3 %v4806_v62 }
 0xaa0   :  { %5764 = vmatmul.f32.gmra.mxu0 %v4612_v19  ;;  %v4003_v19 = vld [vmem:[#allocation12 + $0xa8] sm:$0xff] }
 0xaa1   :  { %v5536_v3 = vpop.f32.mrf.mxu2  ;;  %v4419_v2 = vmul.f32 %v4003_v19, %v11886_v41 }
 0xaa2   :  { %v5537_v5 = vadd.f32 %v5536_v3, %v5424_v37  ;;  %v5649_v59 = vpop.f32.mrf.mxu3  ;;  %v4004_v37 = vld [vmem:[#allocation12 + $0xb0] sm:$0xff]  ;;  %v4222_v3 = vld [vmem:[#allocation12 + $0x780] sm:$0xff] }
 0xaa3   :  { %v5426_v28 = vpop.f32.mrf.mxu1  ;;  %v4420_v21 = vmul.f32 %v4004_v37, %v11887_v47  ;;  %v5320_v47 = vadd.f32 %v10189_v44, %v10044_v6  ;;  %v11895_v6 = vld [vmem:[#allocation273_spill] sm:$0xff] }
 0xaa4   :  { %v10336_v7 = vadd.f32 %v5649_v59, %v5537_v5  ;;  %v5427_v62 = vadd.f32 %v5426_v28, %v5314_v32  ;;  %v11885_v5 = vld [vmem:[#allocation196_spill] sm:$0xff]  ;;  %v11888_v28 = vld [vmem:[#allocation206_spill] sm:$0xff] }
 0xaa5   :  { %v10339_v27 = vpop.f32.mrf.mxu0  ;;  %v4418_v59 = vmul.f32 %v4002_v56, %v11885_v5  ;;  %v11890_v5 = vld [vmem:[#allocation267_spill] sm:$0xff] }
 0xaa6   :  { %5829 = vmatmul.f32.vlgmr.msra.gmra.mxu1 %v4405_v58  ;;  %5942 = vmatmul.f32.vlgmr.msra.gmra.mxu2 %v4406_v61  ;;  %v4638_v61 = vmul.f32 %v4222_v3, %v11888_v28  ;;  %v4028_v28 = vld [vmem:[#allocation12 + $0x170] sm:$0xff] }
 0xaa7   :  { %6055 = vmatmul.f32.vlgmr.msra.gmra.mxu3 %v4407_v26 }
 0xaa8   :  { %5767 = vmatmul.f32.gmra.mxu0 %v4625_v52  ;;  %v4016_v52 = vld [vmem:[#allocation12 + $0x110] sm:$0xff] }
 0xaa9   :  { %v5539_v39 = vpop.f32.mrf.mxu2  ;;  %v4432_v3 = vmul.f32 %v4016_v52, %v11890_v5 }
 0xaaa   :  { %v5540_v51 = vadd.f32 %v5539_v39, %v5427_v62  ;;  %v5652_v40 = vpop.f32.mrf.mxu3  ;;  %v4017_v62 = vld [vmem:[#allocation12 + $0x118] sm:$0xff]  ;;  %v4235_v39 = vld [vmem:[#allocation12 + $0x7e8] sm:$0xff] }
 0xaab   :  { %v5429_v23 = vpop.f32.mrf.mxu1  ;;  %v4433_v33 = vmul.f32 %v4017_v62, %v11891_v48  ;;  %v5323_v48 = vadd.f32 %v10199_v18, %v10054_v54  ;;  %v11899_v54 = vld [vmem:[#allocation277_spill] sm:$0xff] }
 0xaac   :  { %v10346_v60 = vadd.f32 %v5652_v40, %v5540_v51  ;;  %v5430_v26 = vadd.f32 %v5429_v23, %v5317_v55  ;;  %v11889_v51 = vld [vmem:[#allocation200_spill] sm:$0xff]  ;;  %v11892_v23 = vld [vmem:[#allocation210_spill] sm:$0xff] }
 0xaad   :  { %v10349_v58 = vpop.f32.mrf.mxu0  ;;  %v4431_v40 = vmul.f32 %v4015_v1, %v11889_v51  ;;  %v11894_v51 = vld [vmem:[#allocation271_spill] sm:$0xff] }
 0xaae   :  { %5832 = vmatmul.f32.gmra.mxu1 %v4418_v59  ;;  %5945 = vmatmul.f32.gmra.mxu2 %v4419_v2  ;;  %v4651_v2 = vmul.f32 %v4235_v39, %v11892_v23  ;;  %v4041_v23 = vld [vmem:[#allocation12 + $0x1d8] sm:$0xff] }
 0xaaf   :  { %6058 = vmatmul.f32.gmra.mxu3 %v4420_v21 }
 0xab0   :  { %5770 = vmatmul.f32.gmra.mxu0 %v4638_v61  ;;  %v4029_v61 = vld [vmem:[#allocation12 + $0x178] sm:$0xff] }
 0xab1   :  { %v5542_v32 = vpop.f32.mrf.mxu2  ;;  %v4445_v39 = vmul.f32 %v4029_v61, %v11894_v51 }
 0xab2   :  { %v5543_v56 = vadd.f32 %v5542_v32, %v5430_v26  ;;  %v5655_v19 = vpop.f32.mrf.mxu3  ;;  %v4030_v26 = vld [vmem:[#allocation12 + $0x180] sm:$0xff]  ;;  %v4248_v32 = vld [vmem:[#allocation12 + $0x850] sm:$0xff] }
 0xab3   :  { %v5432_v37 = vpop.f32.mrf.mxu1  ;;  %v4446_v44 = vmul.f32 %v4030_v26, %v11895_v6  ;;  %v5326_v6 = vadd.f32 %v10209_v17, %v10064_v0  ;;  %v11903_v0 = vld [vmem:[#allocation281_spill] sm:$0xff] }
 0xab4   :  { %v10356_v41 = vadd.f32 %v5655_v19, %v5543_v56  ;;  %v5433_v21 = vadd.f32 %v5432_v37, %v5320_v47  ;;  %v11893_v56 = vld [vmem:[#allocation204_spill] sm:$0xff]  ;;  %v11896_v37 = vld [vmem:[#allocation214_spill] sm:$0xff] }
 0xab5   :  { %v10359_v59 = vpop.f32.mrf.mxu0  ;;  %v4444_v19 = vmul.f32 %v4028_v28, %v11893_v56  ;;  %v11898_v56 = vld [vmem:[#allocation275_spill] sm:$0xff] }
 0xab6   :  { %5835 = vmatmul.f32.gmra.mxu1 %v4431_v40  ;;  %5948 = vmatmul.f32.gmra.mxu2 %v4432_v3  ;;  %v4664_v3 = vmul.f32 %v4248_v32, %v11896_v37  ;;  %v4054_v37 = vld [vmem:[#allocation12 + $0x240] sm:$0xff] }
 0xab7   :  { %6061 = vmatmul.f32.gmra.mxu3 %v4433_v33 }
 0xab8   :  { %5773 = vmatmul.f32.gmra.mxu0 %v4651_v2  ;;  %v4042_v2 = vld [vmem:[#allocation12 + $0x1e0] sm:$0xff] }
 0xab9   :  { %v5545_v55 = vpop.f32.mrf.mxu2  ;;  %v4458_v32 = vmul.f32 %v4042_v2, %v11898_v56 }
 0xaba   :  { %v5546_v1 = vadd.f32 %v5545_v55, %v5433_v21  ;;  %v5658_v52 = vpop.f32.mrf.mxu3  ;;  %v4043_v21 = vld [vmem:[#allocation12 + $0x1e8] sm:$0xff]  ;;  %v4261_v55 = vld [vmem:[#allocation12 + $0x8b8] sm:$0xff] }
 0xabb   :  { %v5435_v62 = vpop.f32.mrf.mxu1  ;;  %v4459_v18 = vmul.f32 %v4043_v21, %v11899_v54  ;;  %v5329_v54 = vadd.f32 %v10219_v36, %v10074_v4  ;;  %v11907_v4 = vld [vmem:[#allocation285_spill] sm:$0xff] }
 0xabc   :  { %v10366_v5 = vadd.f32 %v5658_v52, %v5546_v1  ;;  %v5436_v33 = vadd.f32 %v5435_v62, %v5323_v48  ;;  %v11897_v1 = vld [vmem:[#allocation208_spill] sm:$0xff]  ;;  %v11900_v62 = vld [vmem:[#allocation218_spill] sm:$0xff] }
 0xabd   :  { %v10369_v40 = vpop.f32.mrf.mxu0  ;;  %v4457_v52 = vmul.f32 %v4041_v23, %v11897_v1  ;;  %v11902_v1 = vld [vmem:[#allocation279_spill] sm:$0xff] }
 0xabe   :  { %5838 = vmatmul.f32.gmra.mxu1 %v4444_v19  ;;  %5951 = vmatmul.f32.gmra.mxu2 %v4445_v39  ;;  %v4677_v39 = vmul.f32 %v4261_v55, %v11900_v62  ;;  %v4067_v62 = vld [vmem:[#allocation12 + $0x2a8] sm:$0xff] }
 0xabf   :  { %6064 = vmatmul.f32.gmra.mxu3 %v4446_v44 }
 0xac0   :  { %5776 = vmatmul.f32.gmra.mxu0 %v4664_v3  ;;  %v4055_v3 = vld [vmem:[#allocation12 + $0x248] sm:$0xff] }
 0xac1   :  { %v5548_v47 = vpop.f32.mrf.mxu2  ;;  %v4471_v55 = vmul.f32 %v4055_v3, %v11902_v1 }
 0xac2   :  { %v5549_v28 = vadd.f32 %v5548_v47, %v5436_v33  ;;  %v5661_v61 = vpop.f32.mrf.mxu3  ;;  %v4056_v33 = vld [vmem:[#allocation12 + $0x250] sm:$0xff]  ;;  %v4274_v47 = vld [vmem:[#allocation12 + $0x920] sm:$0xff] }
 0xac3   :  { %v5438_v26 = vpop.f32.mrf.mxu1  ;;  %v4472_v17 = vmul.f32 %v4056_v33, %v11903_v0  ;;  %v5332_v0 = vadd.f32 %v10229_v9, %v10084_v24  ;;  %v11911_v24 = vld [vmem:[#allocation289_spill] sm:$0xff] }
 0xac4   :  { %v10376_v51 = vadd.f32 %v5661_v61, %v5549_v28  ;;  %v5439_v44 = vadd.f32 %v5438_v26, %v5326_v6  ;;  %v11901_v28 = vld [vmem:[#allocation212_spill] sm:$0xff]  ;;  %v11904_v26 = vld [vmem:[#allocation222_spill] sm:$0xff] }
 0xac5   :  { %v10379_v19 = vpop.f32.mrf.mxu0  ;;  %v4470_v61 = vmul.f32 %v4054_v37, %v11901_v28  ;;  %v11906_v28 = vld [vmem:[#allocation283_spill] sm:$0xff] }
 0xac6   :  { %5841 = vmatmul.f32.gmra.mxu1 %v4457_v52  ;;  %5954 = vmatmul.f32.gmra.mxu2 %v4458_v32  ;;  %v4690_v32 = vmul.f32 %v4274_v47, %v11904_v26  ;;  %v4080_v26 = vld [vmem:[#allocation12 + $0x310] sm:$0xff] }
 0xac7   :  { %6067 = vmatmul.f32.gmra.mxu3 %v4459_v18 }
 0xac8   :  { %5779 = vmatmul.f32.gmra.mxu0 %v4677_v39  ;;  %v4068_v39 = vld [vmem:[#allocation12 + $0x2b0] sm:$0xff] }
 0xac9   :  { %v5551_v48 = vpop.f32.mrf.mxu2  ;;  %v4484_v47 = vmul.f32 %v4068_v39, %v11906_v28 }
 0xaca   :  { %v5552_v23 = vadd.f32 %v5551_v48, %v5439_v44  ;;  %v5664_v2 = vpop.f32.mrf.mxu3  ;;  %v4069_v44 = vld [vmem:[#allocation12 + $0x2b8] sm:$0xff]  ;;  %v4287_v48 = vld [vmem:[#allocation12 + $0x988] sm:$0xff] }
 0xacb   :  { %v5441_v21 = vpop.f32.mrf.mxu1  ;;  %v4485_v36 = vmul.f32 %v4069_v44, %v11907_v4  ;;  %v5335_v4 = vadd.f32 %v10239_v57, %v10094_v34 }
 0xacc   :  { %v10386_v56 = vadd.f32 %v5664_v2, %v5552_v23  ;;  %v5442_v18 = vadd.f32 %v5441_v21, %v5329_v54  ;;  %v11905_v23 = vld [vmem:[#allocation216_spill] sm:$0xff]  ;;  %v11908_v21 = vld [vmem:[#allocation226_spill] sm:$0xff] }
 0xacd   :  { %v10389_v52 = vpop.f32.mrf.mxu0  ;;  %v4483_v2 = vmul.f32 %v4067_v62, %v11905_v23  ;;  %v11910_v23 = vld [vmem:[#allocation287_spill] sm:$0xff] }
 0xace   :  { %5844 = vmatmul.f32.gmra.mxu1 %v4470_v61  ;;  %5957 = vmatmul.f32.gmra.mxu2 %v4471_v55  ;;  %v4703_v55 = vmul.f32 %v4287_v48, %v11908_v21  ;;  %v4093_v21 = vld [vmem:[#allocation12 + $0x378] sm:$0xff] }
 0xacf   :  { %6070 = vmatmul.f32.gmra.mxu3 %v4472_v17 }
 0xad0   :  { %5782 = vmatmul.f32.gmra.mxu0 %v4690_v32  ;;  %v4081_v32 = vld [vmem:[#allocation12 + $0x318] sm:$0xff] }
 0xad1   :  { %v5554_v6 = vpop.f32.mrf.mxu2  ;;  %v4497_v48 = vmul.f32 %v4081_v32, %v11910_v23  ;;  %v11914_v23 = vld [vmem:[#allocation291_spill] sm:$0xff] }
 0xad2   :  { %v5555_v37 = vadd.f32 %v5554_v6, %v5442_v18  ;;  %v5667_v3 = vpop.f32.mrf.mxu3  ;;  %v4082_v18 = vld [vmem:[#allocation12 + $0x320] sm:$0xff]  ;;  %v4300_v6 = vld [vmem:[#allocation12 + $0x9f0] sm:$0xff] }
 0xad3   :  { %v5444_v33 = vpop.f32.mrf.mxu1  ;;  %v4498_v9 = vmul.f32 %v4082_v18, %v11911_v24  ;;  %v4313_v18 = vld [vmem:[#allocation12 + $0xa58] sm:$0xff]  ;;  %v4987_v24 = vld [vmem:[#allocation13 + $0x568] sm:$0xff] }
 0xad4   :  { %v10396_v1 = vadd.f32 %v5667_v3, %v5555_v37  ;;  %v5445_v17 = vadd.f32 %v5444_v33, %v5332_v0  ;;  %v11909_v37 = vld [vmem:[#allocation220_spill] sm:$0xff]  ;;  %v11912_v33 = vld [vmem:[#allocation230_spill] sm:$0xff] }
 0xad5   :  { %v10399_v61 = vpop.f32.mrf.mxu0  ;;  %v4496_v3 = vmul.f32 %v4080_v26, %v11909_v37  ;;  %v4095_v26 = vld [vmem:[#allocation12 + $0x388] sm:$0xff] }
 0xad6   :  { %5847 = vmatmul.f32.gmra.mxu1 %v4483_v2  ;;  %5960 = vmatmul.f32.gmra.mxu2 %v4484_v47  ;;  %v4716_v47 = vmul.f32 %v4300_v6, %v11912_v33  ;;  %v11913_v6 = vld [vmem:[#allocation224_spill] sm:$0xff] }
 0xad7   :  { %6073 = vmatmul.f32.gmra.mxu3 %v4485_v36  ;;  %v4509_v37 = vmul.f32 %v4093_v21, %v11913_v6  ;;  %v4106_v21 = vld [vmem:[#allocation12 + $0x3e0] sm:$0xff]  ;;  %v4984_v6 = vld [vmem:[#allocation13 + $0x550] sm:$0xff] }
 0xad8   :  { %5785 = vmatmul.f32.gmra.mxu0 %v4703_v55  ;;  %v4094_v55 = vld [vmem:[#allocation12 + $0x380] sm:$0xff] }
 0xad9   :  { %v5557_v54 = vpop.f32.mrf.mxu2  ;;  %v4510_v34 = vmul.f32 %v4094_v55, %v11914_v23  ;;  %v4107_v55 = vld [vmem:[#allocation12 + $0x3e8] sm:$0xff] }
 0xada   :  { %v5558_v62 = vadd.f32 %v5557_v54, %v5445_v17  ;;  %v5670_v39 = vpop.f32.mrf.mxu3  ;;  %v4989_v17 = vld [vmem:[#allocation13 + $0x578] sm:$0xff] }
 0xadb   :  { %v5447_v44 = vpop.f32.mrf.mxu1  ;;  %6152 = vmatpush.msrb.mxu0 %v4989_v17  ;;  %v4985_v17 = vld [vmem:[#allocation13 + $0x558] sm:$0xff] }
 0xadc   :  { %v10406_v28 = vadd.f32 %v5670_v39, %v5558_v62  ;;  %v5448_v36 = vadd.f32 %v5447_v44, %v5335_v4  ;;  %v4988_v39 = vld [vmem:[#allocation13 + $0x570] sm:$0xff]  ;;  %v11915_v44 = vld [vmem:[#allocation293_spill] sm:$0xff] }
 0xadd   :  { %v10409_v2 = vpop.f32.mrf.mxu0  ;;  %6153 = vmatpush.msrb.mxu0 %v4988_v39  ;;  %v4986_v4 = vld [vmem:[#allocation13 + $0x560] sm:$0xff] }
 0xade   :  { %5850 = vmatmul.f32.gmra.mxu1 %v4496_v3  ;;  %5963 = vmatmul.f32.gmra.mxu2 %v4497_v48  ;;  %v4511_v3 = vmul.f32 %v4095_v26, %v11915_v44  ;;  %v4108_v26 = vld [vmem:[#allocation12 + $0x3f0] sm:$0xff]  ;;  %v4326_v39 = vld [vmem:[#allocation12 + $0xac0] sm:$0xff] }
 0xadf   :  { %6076 = vmatmul.f32.gmra.mxu3 %v4498_v9  ;;  %v11916_v9 = vld [vmem:[#allocation234_spill] sm:$0xff]  ;;  %6154 = vmatpush.msrb.mxu0 %v4987_v24 }
 0xae0   :  { %5788 = vmatmul.f32.gmra.mxu0 %v4716_v47  ;;  %v4729_v33 = vmul.f32 %v4313_v18, %v11916_v9  ;;  %v5338_v47 = vadd.f32 %v10249_v38, %v10104_v30  ;;  %v11917_v30 = vld [vmem:[#allocation228_spill] sm:$0xff]  ;;  %v4983_v24 = vld [vmem:[#allocation13 + $0x548] sm:$0xff] }
 0xae1   :  { %v5560_v0 = vpop.f32.mrf.mxu2  ;;  %6155 = vmatpush.msrb.mxu0 %v4986_v4  ;;  %v4522_v38 = vmul.f32 %v4106_v21, %v11917_v30  ;;  %v11920_v9 = vld [vmem:[#allocation238_spill] sm:$0xff]  ;;  %v4982_v4 = vld [vmem:[#allocation13 + $0x540] sm:$0xff]  ;;  %v4980_v30 = vld [vmem:[#allocation13 + $0x530] sm:$0xff] }
 0xae2   :  { %v5561_v32 = vadd.f32 %v5560_v0, %v5448_v36  ;;  %v5673_v54 = vpop.f32.mrf.mxu3  ;;  %v4119_v21 = vld [vmem:[#allocation12 + $0x448] sm:$0xff] }
 0xae3   :  { %v5450_v62 = vpop.f32.mrf.mxu1  ;;  %6156 = vmatpush.msrb.mxu0 %v4985_v17  ;;  %v4981_v17 = vld [vmem:[#allocation13 + $0x538] sm:$0xff] }
 0xae4   :  { %v10416_v57 = vadd.f32 %v5673_v54, %v5561_v32  ;;  %v5451_v36 = vadd.f32 %v5450_v62, %v5338_v47  ;;  %v11919_v62 = vld [vmem:[#allocation297_spill] sm:$0xff]  ;;  %v5341_v47 = vadd.f32 %v10259_v42, %v10114_v53  ;;  %v11921_v53 = vld [vmem:[#allocation232_spill] sm:$0xff] }
 0xae5   :  { %v10419_v48 = vpop.f32.mrf.mxu0  ;;  %v4524_v44 = vmul.f32 %v4108_v26, %v11919_v62  ;;  %6157 = vmatpush.msrb.mxu0 %v4984_v6  ;;  %v4121_v26 = vld [vmem:[#allocation12 + $0x458] sm:$0xff]  ;;  %v4339_v6 = vld [vmem:[#allocation12 + $0xb28] sm:$0xff]  ;;  %v4535_v42 = vmul.f32 %v4119_v21, %v11921_v53  ;;  %v4352_v53 = vld [vmem:[#allocation12 + $0xb90] sm:$0xff] }
 0xae6   :  { %5853 = vmatmul.f32.gmra.mxu1 %v4509_v37  ;;  %5966 = vmatmul.f32.gmra.mxu2 %v4510_v34  ;;  %v11918_v37 = vld [vmem:[#allocation295_spill] sm:$0xff] }
 0xae7   :  { %6079 = vmatmul.f32.gmra.mxu3 %v4511_v3  ;;  %v4523_v23 = vmul.f32 %v4107_v55, %v11918_v37  ;;  %6158 = vmatpush.msrb.mxu0 %v4983_v24  ;;  %v4120_v55 = vld [vmem:[#allocation12 + $0x450] sm:$0xff]  ;;  %v4979_v24 = vld [vmem:[#allocation13 + $0x528] sm:$0xff] }
 0xae8   :  { %5791 = vmatmul.f32.gmra.mxu0 %v4729_v33  ;;  %v4742_v33 = vmul.f32 %v4326_v39, %v11920_v9  ;;  %v11924_v9 = vld [vmem:[#allocation242_spill] sm:$0xff] }
 0xae9   :  { %v5563_v0 = vpop.f32.mrf.mxu2  ;;  %6159 = vmatpush.msrb.mxu0 %v4982_v4 }
 0xaea   :  { %v5564_v32 = vadd.f32 %v5563_v0, %v5451_v36  ;;  %v5676_v54 = vpop.f32.mrf.mxu3 }
 0xaeb   :  { %v5453_v18 = vpop.f32.mrf.mxu1  ;;  %6160 = vmatpush.msrb.mxu0 %v4981_v17 }
 0xaec   :  { %v10426_v34 = vadd.f32 %v5676_v54, %v5564_v32  ;;  %v5454_v36 = vadd.f32 %v5453_v18, %v5341_v47  ;;  %v11923_v18 = vld [vmem:[#allocation301_spill] sm:$0xff]  ;;  %v11925_v47 = vld [vmem:[#allocation64_spill] sm:$0xff] }
 0xaed   :  { %v10429_v3 = vpop.f32.mrf.mxu0  ;;  %v4537_v62 = vmul.f32 %v4121_v26, %v11923_v18  ;;  %6161 = vmatpush.msrb.mxu0 %v4980_v30  ;;  %v5344_v4 = vadd.f32 %v10269_v49, %v11925_v47  ;;  %v4977_v26 = vld [vmem:[#allocation13 + $0x518] sm:$0xff]  ;;  %v11929_v47 = vld [vmem:[#allocation246_spill] sm:$0xff] }
 0xaee   :  { %5856 = vmatmul.f32.gmra.mxu1 %v4522_v38  ;;  %5969 = vmatmul.f32.gmra.mxu2 %v4523_v23  ;;  %v11922_v38 = vld [vmem:[#allocation299_spill] sm:$0xff]  ;;  %v11926_v49 = vld [vmem:[#allocation236_spill] sm:$0xff] }
 0xaef   :  { %6082 = vmatmul.f32.gmra.mxu3 %v4524_v44  ;;  %v4536_v37 = vmul.f32 %v4120_v55, %v11922_v38  ;;  %6162 = vmatpush.msrb.mxu0 %v4979_v24  ;;  %v4132_v55 = vld [vmem:[#allocation12 + $0x4b0] sm:$0xff] }
 0xaf0   :  { %5794 = vmatmul.f32.gmra.mxu0 %v4742_v33  ;;  %v4755_v33 = vmul.f32 %v4339_v6, %v11924_v9  ;;  %v4976_v38 = vld [vmem:[#allocation13 + $0x510] sm:$0xff] }
 0xaf1   :  { %v5566_v0 = vpop.f32.mrf.mxu2 }
 0xaf2   :  { %v5567_v32 = vadd.f32 %v5566_v0, %v5454_v36  ;;  %v5679_v54 = vpop.f32.mrf.mxu3  ;;  %v4978_v36 = vld [vmem:[#allocation13 + $0x520] sm:$0xff]  ;;  %v4133_v0 = vld [vmem:[#allocation12 + $0x4b8] sm:$0xff] }
 0xaf3   :  { %v5456_v39 = vpop.f32.mrf.mxu1  ;;  %6163 = vmatpush.msrb.mxu0 %v4978_v36  ;;  %v11930_v36 = vld [vmem:[#allocation138_spill] sm:$0xff] }
 0xaf4   :  { %v10436_v23 = vadd.f32 %v5679_v54, %v5567_v32  ;;  %v5457_v21 = vadd.f32 %v5456_v39, %v5344_v4  ;;  %v4134_v32 = vld [vmem:[#allocation12 + $0x4c0] sm:$0xff]  ;;  %v4768_v4 = vmul.f32 %v4352_v53, %v11929_v47  ;;  %v11931_v53 = vld [vmem:[#allocation240_spill] sm:$0xff]  ;;  %v11932_v47 = vld [vmem:[#allocation307_spill] sm:$0xff] }
 0xaf5   :  { %v10439_v44 = vpop.f32.mrf.mxu0  ;;  %6164 = vmatpush.msrb.mxu0 %v4977_v26  ;;  %v11928_v39 = vld [vmem:[#allocation305_spill] sm:$0xff] }
 0xaf6   :  { %5859 = vmatmul.f32.gmra.mxu1 %v4535_v42  ;;  %5972 = vmatmul.f32.gmra.mxu2 %v4536_v37  ;;  %v4548_v42 = vmul.f32 %v4132_v55, %v11926_v49  ;;  %v11927_v37 = vld [vmem:[#allocation303_spill] sm:$0xff]  ;;  %v4550_v24 = vmul.f32 %v4134_v32, %v11928_v39  ;;  %v4974_v55 = vld [vmem:[#allocation13 + $0x500] sm:$0xff]  ;;  %v4147_v32 = vld [vmem:[#allocation12 + $0x528] sm:$0xff] }
 0xaf7   :  { %6085 = vmatmul.f32.gmra.mxu3 %v4537_v62  ;;  %v4549_v18 = vmul.f32 %v4133_v0, %v11927_v37  ;;  %6165 = vmatpush.msrb.mxu0 %v4976_v38  ;;  %v4145_v0 = vld [vmem:[#allocation12 + $0x518] sm:$0xff]  ;;  %v4146_v26 = vld [vmem:[#allocation12 + $0x520] sm:$0xff] }
 0xaf8   :  { %5797 = vmatmul.f32.gmra.mxu0 %v4755_v33  ;;  %v4975_v33 = vld [vmem:[#allocation13 + $0x508] sm:$0xff]  ;;  %v4365_v49 = vld [vmem:[#allocation12 + $0xbf8] sm:$0xff]  ;;  %v4561_v39 = vmul.f32 %v4145_v0, %v11931_v53  ;;  %v4378_v53 = vld [vmem:[#allocation12 + $0xc60] sm:$0xff] }
 0xaf9   :  { %v5569_v17 = vpop.f32.mrf.mxu2  ;;  %6166 = vmatpush.msrb.mxu0 %v4975_v33  ;;  %v4159_v0 = vld [vmem:[#allocation12 + $0x588] sm:$0xff] }
 0xafa   :  { %v5570_v54 = vadd.f32 %v5569_v17, %v5457_v21  ;;  %v5682_v30 = vpop.f32.mrf.mxu3  ;;  %v5347_v21 = vadd.f32 %v10279_v16, %v11930_v36  ;;  %v4562_v16 = vmul.f32 %v4146_v26, %v11932_v47  ;;  %v11936_v36 = vld [vmem:[#allocation59_spill] sm:$0xff]  ;;  %v11937_v47 = vld [vmem:[#allocation244_spill] sm:$0xff] }
 0xafb   :  { %v5459_v6 = vpop.f32.mrf.mxu1  ;;  %6167 = vmatpush.msrb.mxu0 %v4974_v55  ;;  %v4160_v26 = vld [vmem:[#allocation12 + $0x590] sm:$0xff] }
 0xafc   :  { %v10446_v62 = vadd.f32 %v5682_v30, %v5570_v54  ;;  %v5460_v17 = vadd.f32 %v5459_v6, %v5347_v21  ;;  %v11935_v6 = vld [vmem:[#allocation250_spill] sm:$0xff]  ;;  %v5350_v21 = vadd.f32 %v10289_v45, %v11936_v36  ;;  %v11940_v45 = vld [vmem:[#allocation313_spill] sm:$0xff] }
 0xafd   :  { %v10449_v9 = vpop.f32.mrf.mxu0 }
 0xafe   :  { %5862 = vmatmul.f32.gmra.mxu1 %v4548_v42  ;;  %5975 = vmatmul.f32.gmra.mxu2 %v4549_v18  ;;  %v11934_v18 = vld [vmem:[#allocation309_spill] sm:$0xff] }
 0xaff   :  { %6088 = vmatmul.f32.gmra.mxu3 %v4550_v24  ;;  %v4563_v24 = vmul.f32 %v4147_v32, %v11934_v18 }
 0xb00   :  { %5800 = vmatmul.f32.gmra.mxu0 %v4768_v4  ;;  %v4781_v4 = vmul.f32 %v4365_v49, %v11935_v6 }
 0xb01   :  { %v5572_v54 = vpop.f32.mrf.mxu2 }
 0xb02   :  { %v5573_v30 = vadd.f32 %v5572_v54, %v5460_v17  ;;  %v5685_v38 = vpop.f32.mrf.mxu3  ;;  %v4158_v17 = vld [vmem:[#allocation12 + $0x580] sm:$0xff] }
 0xb03   :  { %v5462_v37 = vpop.f32.mrf.mxu1  ;;  %v4574_v18 = vmul.f32 %v4158_v17, %v11937_v47  ;;  %v4172_v17 = vld [vmem:[#allocation12 + $0x5f0] sm:$0xff]  ;;  %v11943_v47 = vld [vmem:[#allocation248_spill] sm:$0xff] }
 0xb04   :  { %v10456_v42 = vadd.f32 %v5685_v38, %v5573_v30  ;;  %v5463_v55 = vadd.f32 %v5462_v37, %v5350_v21  ;;  %v11941_v37 = vld [vmem:[#allocation254_spill] sm:$0xff] }
 0xb05   :  { %v10459_v33 = vpop.f32.mrf.mxu0 }
 0xb06   :  { %11933 = vst [vmem:[#allocation63_spill] sm:$0xff] %v10456_v42  ;;  %5865 = vmatmul.f32.gmra.mxu1 %v4561_v39  ;;  %5978 = vmatmul.f32.gmra.mxu2 %v4562_v16  ;;  %v11938_v42 = vld [vmem:[#allocation311_spill] sm:$0xff]  ;;  %v4576_v39 = vmul.f32 %v4160_v26, %v11940_v45 }
 0xb07   :  { %6091 = vmatmul.f32.gmra.mxu3 %v4563_v24  ;;  %v4575_v49 = vmul.f32 %v4159_v0, %v11938_v42  ;;  %v4794_v24 = vmul.f32 %v4378_v53, %v11941_v37  ;;  %v4173_v42 = vld [vmem:[#allocation12 + $0x5f8] sm:$0xff] }
 0xb08   :  { %5803 = vmatmul.f32.gmra.mxu0 %v4781_v4  ;;  %v11942_v4 = vld [vmem:[#allocation46_spill] sm:$0xff] }
 0xb09   :  { %v5575_v54 = vpop.f32.mrf.mxu2  ;;  %v5353_v36 = vadd.f32 %v10299_v25, %v11942_v4  ;;  %v11946_v25 = vld [vmem:[#allocation317_spill] sm:$0xff] }
 0xb0a   :  { %v5576_v30 = vadd.f32 %v5575_v54, %v5463_v55  ;;  %v5688_v38 = vpop.f32.mrf.mxu3  ;;  %v4171_v55 = vld [vmem:[#allocation12 + $0x5e8] sm:$0xff] }
 0xb0b   :  { %v5465_v32 = vpop.f32.mrf.mxu1  ;;  %v4587_v45 = vmul.f32 %v4171_v55, %v11943_v47  ;;  %v4185_v55 = vld [vmem:[#allocation12 + $0x658] sm:$0xff] }
 0xb0c   :  { %v10466_v6 = vadd.f32 %v5688_v38, %v5576_v30  ;;  %v5466_v21 = vadd.f32 %v5465_v32, %v5353_v36  ;;  %v4391_v38 = vld [vmem:[#allocation12 + $0xcc8] sm:$0xff]  ;;  %v11949_v47 = vld [vmem:[#allocation252_spill] sm:$0xff] }
 0xb0d   :  { %v10469_v16 = vpop.f32.mrf.mxu0  ;;  %v11947_v32 = vld [vmem:[#allocation258_spill] sm:$0xff] }
 0xb0e   :  { %11939 = vst [vmem:[#allocation85_spill] sm:$0xff] %v10466_v6  ;;  %5868 = vmatmul.f32.gmra.mxu1 %v4574_v18  ;;  %5981 = vmatmul.f32.gmra.mxu2 %v4575_v49  ;;  %v11944_v6 = vld [vmem:[#allocation315_spill] sm:$0xff]  ;;  %v4589_v18 = vmul.f32 %v4173_v42, %v11946_v25 }
 0xb0f   :  { %6094 = vmatmul.f32.gmra.mxu3 %v4576_v39  ;;  %v4588_v53 = vmul.f32 %v4172_v17, %v11944_v6  ;;  %v4807_v39 = vmul.f32 %v4391_v38, %v11947_v32  ;;  %v4186_v6 = vld [vmem:[#allocation12 + $0x660] sm:$0xff] }
 0xb10   :  { %5806 = vmatmul.f32.gmra.mxu0 %v4794_v24  ;;  %v11948_v24 = vld [vmem:[#allocation79_spill] sm:$0xff] }
 0xb11   :  { %v5578_v54 = vpop.f32.mrf.mxu2  ;;  %v5356_v4 = vadd.f32 %v10309_v12, %v11948_v24  ;;  %v11952_v12 = vld [vmem:[#allocation321_spill] sm:$0xff] }
 0xb12   :  { %v5579_v0 = vadd.f32 %v5578_v54, %v5466_v21  ;;  %v5691_v30 = vpop.f32.mrf.mxu3  ;;  %v4184_v21 = vld [vmem:[#allocation12 + $0x650] sm:$0xff] }
 0xb13   :  { %v5468_v26 = vpop.f32.mrf.mxu1  ;;  %v4600_v25 = vmul.f32 %v4184_v21, %v11949_v47  ;;  %v4198_v21 = vld [vmem:[#allocation12 + $0x6c0] sm:$0xff]  ;;  %v11955_v47 = vld [vmem:[#allocation256_spill] sm:$0xff] }
 0xb14   :  { %v10476_v37 = vadd.f32 %v5691_v30, %v5579_v0  ;;  %v5469_v36 = vadd.f32 %v5468_v26, %v5356_v4  ;;  %v3992_v30 = vld [vmem:[#allocation12 + $0x50] sm:$0xff]  ;;  %v11953_v26 = vld [vmem:[#allocation262_spill] sm:$0xff] }
 0xb15   :  { %v10479_v49 = vpop.f32.mrf.mxu0 }
 0xb16   :  { %11945 = vst [vmem:[#allocation151_spill] sm:$0xff] %v10476_v37  ;;  %5871 = vmatmul.f32.gmra.mxu1 %v4587_v45  ;;  %5984 = vmatmul.f32.gmra.mxu2 %v4588_v53  ;;  %v11950_v37 = vld [vmem:[#allocation319_spill] sm:$0xff]  ;;  %v4602_v45 = vmul.f32 %v4186_v6, %v11952_v12 }
 0xb17   :  { %6097 = vmatmul.f32.gmra.mxu3 %v4589_v18  ;;  %v4601_v38 = vmul.f32 %v4185_v55, %v11950_v37  ;;  %v4408_v18 = vmul.f32 %v3992_v30, %v11953_v26  ;;  %v4199_v37 = vld [vmem:[#allocation12 + $0x6c8] sm:$0xff] }
 0xb18   :  { %5809 = vmatmul.f32.gmra.mxu0 %v4807_v39  ;;  %v11954_v39 = vld [vmem:[#allocation128_spill] sm:$0xff] }
 0xb19   :  { %v5581_v54 = vpop.f32.mrf.mxu2  ;;  %v5359_v24 = vadd.f32 %v10319_v46, %v11954_v39  ;;  %v11957_v46 = vld [vmem:[#allocation325_spill] sm:$0xff] }
 0xb1a   :  { %v5582_v17 = vadd.f32 %v5581_v54, %v5469_v36  ;;  %v5694_v0 = vpop.f32.mrf.mxu3  ;;  %v4197_v36 = vld [vmem:[#allocation12 + $0x6b8] sm:$0xff] }
 0xb1b   :  { %v5471_v42 = vpop.f32.mrf.mxu1  ;;  %v4613_v12 = vmul.f32 %v4197_v36, %v11955_v47 }
 0xb1c   :  { %v10486_v32 = vadd.f32 %v5694_v0, %v5582_v17  ;;  %v5472_v4 = vadd.f32 %v5471_v42, %v5359_v24  ;;  %v4005_v0 = vld [vmem:[#allocation12 + $0xb8] sm:$0xff]  ;;  %v11958_v42 = vld [vmem:[#allocation266_spill] sm:$0xff]  ;;  %v4210_v24 = vld [vmem:[#allocation12 + $0x720] sm:$0xff] }
 0xb1d   :  { %v10489_v53 = vpop.f32.mrf.mxu0 }
 0xb1e   :  { %11951 = vst [vmem:[#allocation122_spill] sm:$0xff] %v10486_v32  ;;  %5874 = vmatmul.f32.gmra.mxu1 %v4600_v25  ;;  %5987 = vmatmul.f32.gmra.mxu2 %v4601_v38  ;;  %v11956_v32 = vld [vmem:[#allocation323_spill] sm:$0xff]  ;;  %v4615_v25 = vmul.f32 %v4199_v37, %v11957_v46 }
 0xb1f   :  { %6100 = vmatmul.f32.gmra.mxu3 %v4602_v45  ;;  %v4614_v30 = vmul.f32 %v4198_v21, %v11956_v32  ;;  %v4421_v45 = vmul.f32 %v4005_v0, %v11958_v42  ;;  %v4212_v32 = vld [vmem:[#allocation12 + $0x730] sm:$0xff] }
 0xb20   :  { %6168 = vmatmul.f32.vlgmr.msrb.gmra.mxu0 %v4408_v18  ;;  %v5718_v18 = vadd.f32 %v10329_v63, %v10186_v43  ;;  %v11960_v46 = vld [vmem:[#allocation327_spill] sm:$0xff]  ;;  %v11961_v43 = vld [vmem:[#allocation329_spill] sm:$0xff] }
 0xb21   :  { %v5584_v54 = vpop.f32.mrf.mxu2  ;;  %v4628_v63 = vmul.f32 %v4212_v32, %v11961_v43  ;;  %v11964_v43 = vld [vmem:[#allocation331_spill] sm:$0xff] }
 0xb22   :  { %v5585_v55 = vadd.f32 %v5584_v54, %v5472_v4  ;;  %v5697_v17 = vpop.f32.mrf.mxu3  ;;  %v4211_v4 = vld [vmem:[#allocation12 + $0x728] sm:$0xff] }
 0xb23   :  { %v5830_v6 = vpop.f32.mrf.mxu1  ;;  %v4627_v0 = vmul.f32 %v4211_v4, %v11960_v46  ;;  %v4225_v4 = vld [vmem:[#allocation12 + $0x798] sm:$0xff] }
 0xb24   :  { %v10496_v26 = vadd.f32 %v5697_v17, %v5585_v55  ;;  %v5831_v39 = vadd.f32 %v5830_v6, %v5718_v18  ;;  %v4018_v55 = vld [vmem:[#allocation12 + $0x120] sm:$0xff]  ;;  %v11959_v17 = vld [vmem:[#allocation260_spill] sm:$0xff]  ;;  %v11962_v6 = vld [vmem:[#allocation270_spill] sm:$0xff] }
 0xb25   :  { %v10499_v38 = vpop.f32.mrf.mxu0  ;;  %v4626_v47 = vmul.f32 %v4210_v24, %v11959_v17  ;;  %v4223_v18 = vld [vmem:[#allocation12 + $0x788] sm:$0xff]  ;;  %v11963_v17 = vld [vmem:[#allocation264_spill] sm:$0xff] }
 0xb26   :  { %5877 = vmatmul.f32.gmra.mxu1 %v4613_v12  ;;  %5990 = vmatmul.f32.gmra.mxu2 %v4614_v30  ;;  %v4434_v30 = vmul.f32 %v4018_v55, %v11962_v6  ;;  %v4639_v46 = vmul.f32 %v4223_v18, %v11963_v17  ;;  %v11967_v17 = vld [vmem:[#allocation268_spill] sm:$0xff] }
 0xb27   :  { %6103 = vmatmul.f32.gmra.mxu3 %v4615_v25  ;;  %v5721_v25 = vadd.f32 %v10339_v27, %v10196_v22  ;;  %v11965_v22 = vld [vmem:[#allocation332_spill] sm:$0xff] }
 0xb28   :  { %6171 = vmatmul.f32.gmra.mxu0 %v4421_v45  ;;  %v4641_v27 = vmul.f32 %v4225_v4, %v11965_v22  ;;  %v11968_v22 = vld [vmem:[#allocation334_spill] sm:$0xff] }
 0xb29   :  { %v5943_v36 = vpop.f32.mrf.mxu2 }
 0xb2a   :  { %v5944_v21 = vadd.f32 %v5943_v36, %v5831_v39  ;;  %v6056_v54 = vpop.f32.mrf.mxu3  ;;  %v4224_v39 = vld [vmem:[#allocation12 + $0x790] sm:$0xff] }
 0xb2b   :  { %v5833_v37 = vpop.f32.mrf.mxu1  ;;  %v4640_v55 = vmul.f32 %v4224_v39, %v11964_v43  ;;  %v4238_v39 = vld [vmem:[#allocation12 + $0x800] sm:$0xff] }
 0xb2c   :  { %v10506_v42 = vadd.f32 %v6056_v54, %v5944_v21  ;;  %v5834_v45 = vadd.f32 %v5833_v37, %v5721_v25  ;;  %v4031_v54 = vld [vmem:[#allocation12 + $0x188] sm:$0xff]  ;;  %v4236_v25 = vld [vmem:[#allocation12 + $0x7f0] sm:$0xff] }
 0xb2d   :  { %v10509_v12 = vpop.f32.mrf.mxu0  ;;  %v11966_v37 = vld [vmem:[#allocation274_spill] sm:$0xff]  ;;  %v4652_v43 = vmul.f32 %v4236_v25, %v11967_v17  ;;  %v11971_v17 = vld [vmem:[#allocation272_spill] sm:$0xff] }
 0xb2e   :  { %5880 = vmatmul.f32.gmra.mxu1 %v4626_v47  ;;  %5993 = vmatmul.f32.gmra.mxu2 %v4627_v0  ;;  %v4447_v0 = vmul.f32 %v4031_v54, %v11966_v37 }
 0xb2f   :  { %6106 = vmatmul.f32.gmra.mxu3 %v4628_v63  ;;  %v5724_v63 = vadd.f32 %v10349_v58, %v10206_v31  ;;  %v11969_v31 = vld [vmem:[#allocation335_spill] sm:$0xff] }
 0xb30   :  { %6174 = vmatmul.f32.gmra.mxu0 %v4434_v30  ;;  %v4654_v58 = vmul.f32 %v4238_v39, %v11969_v31  ;;  %v11972_v31 = vld [vmem:[#allocation337_spill] sm:$0xff] }
 0xb31   :  { %v5946_v24 = vpop.f32.mrf.mxu2 }
 0xb32   :  { %v5947_v36 = vadd.f32 %v5946_v24, %v5834_v45  ;;  %v6059_v21 = vpop.f32.mrf.mxu3  ;;  %v4237_v45 = vld [vmem:[#allocation12 + $0x7f8] sm:$0xff] }
 0xb33   :  { %v5836_v32 = vpop.f32.mrf.mxu1  ;;  %v4653_v54 = vmul.f32 %v4237_v45, %v11968_v22  ;;  %v4251_v45 = vld [vmem:[#allocation12 + $0x868] sm:$0xff] }
 0xb34   :  { %v10516_v6 = vadd.f32 %v6059_v21, %v5947_v36  ;;  %v5837_v30 = vadd.f32 %v5836_v32, %v5724_v63  ;;  %v4044_v21 = vld [vmem:[#allocation12 + $0x1f0] sm:$0xff]  ;;  %v11970_v32 = vld [vmem:[#allocation278_spill] sm:$0xff]  ;;  %v4249_v63 = vld [vmem:[#allocation12 + $0x858] sm:$0xff] }
 0xb35   :  { %v10519_v47 = vpop.f32.mrf.mxu0  ;;  %v4665_v22 = vmul.f32 %v4249_v63, %v11971_v17  ;;  %v11975_v17 = vld [vmem:[#allocation276_spill] sm:$0xff] }
 0xb36   :  { %5883 = vmatmul.f32.gmra.mxu1 %v4639_v46  ;;  %5996 = vmatmul.f32.gmra.mxu2 %v4640_v55  ;;  %v4460_v55 = vmul.f32 %v4044_v21, %v11970_v32 }
 0xb37   :  { %6109 = vmatmul.f32.gmra.mxu3 %v4641_v27  ;;  %v5727_v27 = vadd.f32 %v10359_v59, %v10216_v29  ;;  %v11973_v29 = vld [vmem:[#allocation338_spill] sm:$0xff] }
 0xb38   :  { %6177 = vmatmul.f32.gmra.mxu0 %v4447_v0  ;;  %v4667_v59 = vmul.f32 %v4251_v45, %v11973_v29  ;;  %v11976_v29 = vld [vmem:[#allocation340_spill] sm:$0xff] }
 0xb39   :  { %v5949_v18 = vpop.f32.mrf.mxu2 }
 0xb3a   :  { %v5950_v24 = vadd.f32 %v5949_v18, %v5837_v30  ;;  %v6062_v36 = vpop.f32.mrf.mxu3  ;;  %v4250_v30 = vld [vmem:[#allocation12 + $0x860] sm:$0xff] }
 0xb3b   :  { %v5839_v4 = vpop.f32.mrf.mxu1  ;;  %v4666_v21 = vmul.f32 %v4250_v30, %v11972_v31  ;;  %v4264_v30 = vld [vmem:[#allocation12 + $0x8d0] sm:$0xff] }
 0xb3c   :  { %v10526_v37 = vadd.f32 %v6062_v36, %v5950_v24  ;;  %v5840_v0 = vadd.f32 %v5839_v4, %v5727_v27  ;;  %v4057_v36 = vld [vmem:[#allocation12 + $0x258] sm:$0xff]  ;;  %v11974_v4 = vld [vmem:[#allocation282_spill] sm:$0xff]  ;;  %v4262_v27 = vld [vmem:[#allocation12 + $0x8c0] sm:$0xff] }
 0xb3d   :  { %v10529_v46 = vpop.f32.mrf.mxu0  ;;  %v4678_v31 = vmul.f32 %v4262_v27, %v11975_v17  ;;  %v11979_v17 = vld [vmem:[#allocation280_spill] sm:$0xff] }
 0xb3e   :  { %5886 = vmatmul.f32.gmra.mxu1 %v4652_v43  ;;  %5999 = vmatmul.f32.gmra.mxu2 %v4653_v54  ;;  %v4473_v54 = vmul.f32 %v4057_v36, %v11974_v4 }
 0xb3f   :  { %6112 = vmatmul.f32.gmra.mxu3 %v4654_v58  ;;  %v5730_v58 = vadd.f32 %v10369_v40, %v10226_v13  ;;  %v11977_v13 = vld [vmem:[#allocation341_spill] sm:$0xff] }
 0xb40   :  { %6180 = vmatmul.f32.gmra.mxu0 %v4460_v55  ;;  %v4680_v40 = vmul.f32 %v4264_v30, %v11977_v13  ;;  %v11980_v13 = vld [vmem:[#allocation343_spill] sm:$0xff] }
 0xb41   :  { %v5952_v25 = vpop.f32.mrf.mxu2 }
 0xb42   :  { %v5953_v18 = vadd.f32 %v5952_v25, %v5840_v0  ;;  %v6065_v24 = vpop.f32.mrf.mxu3  ;;  %v4263_v0 = vld [vmem:[#allocation12 + $0x8c8] sm:$0xff] }
 0xb43   :  { %v5842_v39 = vpop.f32.mrf.mxu1  ;;  %v4679_v36 = vmul.f32 %v4263_v0, %v11976_v29  ;;  %v4277_v0 = vld [vmem:[#allocation12 + $0x938] sm:$0xff] }
 0xb44   :  { %v10536_v32 = vadd.f32 %v6065_v24, %v5953_v18  ;;  %v5843_v55 = vadd.f32 %v5842_v39, %v5730_v58  ;;  %v4070_v24 = vld [vmem:[#allocation12 + $0x2c0] sm:$0xff]  ;;  %v11978_v39 = vld [vmem:[#allocation286_spill] sm:$0xff] }
 0xb45   :  { %v10539_v43 = vpop.f32.mrf.mxu0  ;;  %v4275_v58 = vld [vmem:[#allocation12 + $0x928] sm:$0xff] }
 0xb46   :  { %5889 = vmatmul.f32.gmra.mxu1 %v4665_v22  ;;  %6002 = vmatmul.f32.gmra.mxu2 %v4666_v21  ;;  %v4486_v21 = vmul.f32 %v4070_v24, %v11978_v39  ;;  %v4691_v29 = vmul.f32 %v4275_v58, %v11979_v17  ;;  %v11983_v17 = vld [vmem:[#allocation284_spill] sm:$0xff] }
 0xb47   :  { %6115 = vmatmul.f32.gmra.mxu3 %v4667_v59  ;;  %v5733_v59 = vadd.f32 %v10379_v19, %v10236_v35  ;;  %v11981_v35 = vld [vmem:[#allocation37_spill] sm:$0xff] }
 0xb48   :  { %6183 = vmatmul.f32.gmra.mxu0 %v4473_v54  ;;  %v4693_v19 = vmul.f32 %v4277_v0, %v11981_v35  ;;  %v11984_v35 = vld [vmem:[#allocation345_spill] sm:$0xff] }
 0xb49   :  { %v5955_v63 = vpop.f32.mrf.mxu2 }
 0xb4a   :  { %v5956_v25 = vadd.f32 %v5955_v63, %v5843_v55  ;;  %v6068_v18 = vpop.f32.mrf.mxu3  ;;  %v4276_v55 = vld [vmem:[#allocation12 + $0x930] sm:$0xff] }
 0xb4b   :  { %v5845_v45 = vpop.f32.mrf.mxu1  ;;  %v4692_v24 = vmul.f32 %v4276_v55, %v11980_v13  ;;  %v4290_v55 = vld [vmem:[#allocation12 + $0x9a0] sm:$0xff] }
 0xb4c   :  { %v10546_v4 = vadd.f32 %v6068_v18, %v5956_v25  ;;  %v5846_v54 = vadd.f32 %v5845_v45, %v5733_v59  ;;  %v4083_v18 = vld [vmem:[#allocation12 + $0x328] sm:$0xff]  ;;  %v4288_v59 = vld [vmem:[#allocation12 + $0x990] sm:$0xff] }
 0xb4d   :  { %v10549_v22 = vpop.f32.mrf.mxu0  ;;  %v11982_v45 = vld [vmem:[#allocation290_spill] sm:$0xff]  ;;  %v4704_v13 = vmul.f32 %v4288_v59, %v11983_v17  ;;  %v4302_v59 = vld [vmem:[#allocation12 + $0xa00] sm:$0xff]  ;;  %v4109_v17 = vld [vmem:[#allocation12 + $0x3f8] sm:$0xff] }
 0xb4e   :  { %5892 = vmatmul.f32.gmra.mxu1 %v4678_v31  ;;  %6005 = vmatmul.f32.gmra.mxu2 %v4679_v36  ;;  %v4499_v36 = vmul.f32 %v4083_v18, %v11982_v45 }
 0xb4f   :  { %6118 = vmatmul.f32.gmra.mxu3 %v4680_v40  ;;  %v5736_v40 = vadd.f32 %v10389_v52, %v10246_v50  ;;  %v11986_v50 = vld [vmem:[#allocation121_spill] sm:$0xff] }
 0xb50   :  { %6186 = vmatmul.f32.gmra.mxu0 %v4486_v21  ;;  %v4706_v52 = vmul.f32 %v4290_v55, %v11986_v50 }
 0xb51   :  { %v5958_v27 = vpop.f32.mrf.mxu2 }
 0xb52   :  { %v5959_v63 = vadd.f32 %v5958_v27, %v5846_v54  ;;  %v6071_v25 = vpop.f32.mrf.mxu3  ;;  %v4289_v54 = vld [vmem:[#allocation12 + $0x998] sm:$0xff] }
 0xb53   :  { %v5848_v30 = vpop.f32.mrf.mxu1  ;;  %v4705_v18 = vmul.f32 %v4289_v54, %v11984_v35  ;;  %v4303_v54 = vld [vmem:[#allocation12 + $0xa08] sm:$0xff]  ;;  %v11989_v35 = vld [vmem:[#allocation288_spill] sm:$0xff] }
 0xb54   :  { %v10556_v39 = vadd.f32 %v6071_v25, %v5959_v63  ;;  %v5849_v21 = vadd.f32 %v5848_v30, %v5736_v40  ;;  %v4096_v25 = vld [vmem:[#allocation12 + $0x390] sm:$0xff]  ;;  %v11987_v30 = vld [vmem:[#allocation294_spill] sm:$0xff] }
 0xb55   :  { %v10559_v31 = vpop.f32.mrf.mxu0 }
 0xb56   :  { %5895 = vmatmul.f32.gmra.mxu1 %v4691_v29  ;;  %6008 = vmatmul.f32.gmra.mxu2 %v4692_v24  ;;  %v4512_v24 = vmul.f32 %v4096_v25, %v11987_v30 }
 0xb57   :  { %6121 = vmatmul.f32.gmra.mxu3 %v4693_v19  ;;  %v11988_v19 = vld [vmem:[#allocation127_spill] sm:$0xff] }
 0xb58   :  { %6189 = vmatmul.f32.gmra.mxu0 %v4499_v36  ;;  %v5739_v36 = vadd.f32 %v10399_v61, %v11988_v19  ;;  %v11992_v61 = vld [vmem:[#allocation43_spill] sm:$0xff] }
 0xb59   :  { %v5961_v58 = vpop.f32.mrf.mxu2 }
 0xb5a   :  { %v5962_v27 = vadd.f32 %v5961_v58, %v5849_v21  ;;  %v6074_v63 = vpop.f32.mrf.mxu3  ;;  %v4301_v21 = vld [vmem:[#allocation12 + $0x9f8] sm:$0xff] }
 0xb5b   :  { %v5851_v0 = vpop.f32.mrf.mxu1  ;;  %v4717_v50 = vmul.f32 %v4301_v21, %v11989_v35 }
 0xb5c   :  { %v10566_v45 = vadd.f32 %v6074_v63, %v5962_v27  ;;  %v5852_v40 = vadd.f32 %v5851_v0, %v5739_v36  ;;  %v11993_v0 = vld [vmem:[#allocation298_spill] sm:$0xff]  ;;  %v5005_v36 = vld [vmem:[#allocation13 + $0x5f8] sm:$0xff] }
 0xb5d   :  { %v10569_v29 = vpop.f32.mrf.mxu0  ;;  %6265 = vmatpush.msrb.mxu1 %v5005_v36 }
 0xb5e   :  { %11985 = vst [vmem:[#allocation39_spill] sm:$0xff] %v10566_v45  ;;  %5898 = vmatmul.f32.gmra.mxu1 %v4704_v13  ;;  %6011 = vmatmul.f32.gmra.mxu2 %v4705_v18  ;;  %v11990_v45 = vld [vmem:[#allocation347_spill] sm:$0xff]  ;;  %v4719_v13 = vmul.f32 %v4303_v54, %v11992_v61  ;;  %v5019_v61 = vld [vmem:[#allocation13 + $0x668] sm:$0xff] }
 0xb5f   :  { %6124 = vmatmul.f32.gmra.mxu3 %v4706_v52  ;;  %v4718_v25 = vmul.f32 %v4302_v59, %v11990_v45  ;;  %v4525_v52 = vmul.f32 %v4109_v17, %v11993_v0  ;;  %v4315_v45 = vld [vmem:[#allocation12 + $0xa68] sm:$0xff]  ;;  %v5004_v54 = vld [vmem:[#allocation13 + $0x5f0] sm:$0xff]  ;;  %v11996_v0 = vld [vmem:[#allocation349_spill] sm:$0xff] }
 0xb60   :  { %6192 = vmatmul.f32.gmra.mxu0 %v4512_v24  ;;  %v11994_v24 = vld [vmem:[#allocation144_spill] sm:$0xff]  ;;  %6266 = vmatpush.msrb.mxu1 %v5004_v54  ;;  %v5745_v54 = vadd.f32 %v10419_v48, %v10276_v10  ;;  %v4135_v10 = vld [vmem:[#allocation12 + $0x4c8] sm:$0xff] }
 0xb61   :  { %v5964_v58 = vpop.f32.mrf.mxu2  ;;  %v5742_v19 = vadd.f32 %v10409_v2, %v11994_v24  ;;  %v4122_v2 = vld [vmem:[#allocation12 + $0x460] sm:$0xff]  ;;  %v11997_v24 = vld [vmem:[#allocation350_spill] sm:$0xff] }
 0xb62   :  { %v5965_v27 = vadd.f32 %v5964_v58, %v5852_v40  ;;  %v6077_v63 = vpop.f32.mrf.mxu3  ;;  %v5021_v40 = vld [vmem:[#allocation13 + $0x678] sm:$0xff]  ;;  %v4314_v58 = vld [vmem:[#allocation12 + $0xa60] sm:$0xff] }
 0xb63   :  { %v5854_v55 = vpop.f32.mrf.mxu1  ;;  %6378 = vmatpush.msrb.mxu2 %v5021_v40  ;;  %v5002_v40 = vld [vmem:[#allocation13 + $0x5e0] sm:$0xff] }
 0xb64   :  { %v10576_v30 = vadd.f32 %v6077_v63, %v5965_v27  ;;  %v5855_v21 = vadd.f32 %v5854_v55, %v5742_v19  ;;  %v5020_v27 = vld [vmem:[#allocation13 + $0x670] sm:$0xff] }
 0xb65   :  { %v10579_v18 = vpop.f32.mrf.mxu0  ;;  %v4316_v63 = vld [vmem:[#allocation12 + $0xa70] sm:$0xff]  ;;  %6379 = vmatpush.msrb.mxu2 %v5020_v27  ;;  %v5017_v27 = vld [vmem:[#allocation13 + $0x658] sm:$0xff] }
 0xb66   :  { %11991 = vst [vmem:[#allocation48_spill] sm:$0xff] %v10576_v30  ;;  %5901 = vmatmul.f32.gmra.mxu1 %v4717_v50  ;;  %6014 = vmatmul.f32.gmra.mxu2 %v4718_v25  ;;  %v5003_v25 = vld [vmem:[#allocation13 + $0x5e8] sm:$0xff]  ;;  %v4732_v19 = vmul.f32 %v4316_v63, %v11997_v24  ;;  %v4328_v63 = vld [vmem:[#allocation12 + $0xad0] sm:$0xff]  ;;  %v4329_v24 = vld [vmem:[#allocation12 + $0xad8] sm:$0xff] }
 0xb67   :  { %6127 = vmatmul.f32.gmra.mxu3 %v4719_v13  ;;  %v11995_v13 = vld [vmem:[#allocation292_spill] sm:$0xff]  ;;  %6267 = vmatpush.msrb.mxu1 %v5003_v25 }
 0xb68   :  { %6195 = vmatmul.f32.gmra.mxu0 %v4525_v52  ;;  %v4730_v55 = vmul.f32 %v4314_v58, %v11995_v13  ;;  %v4731_v52 = vmul.f32 %v4315_v45, %v11996_v0  ;;  %6380 = vmatpush.msrb.mxu2 %v5019_v61  ;;  %v5001_v58 = vld [vmem:[#allocation13 + $0x5d8] sm:$0xff]  ;;  %v4327_v45 = vld [vmem:[#allocation12 + $0xac8] sm:$0xff]  ;;  %v5000_v61 = vld [vmem:[#allocation13 + $0x5d0] sm:$0xff] }
 0xb69   :  { %v5967_v59 = vpop.f32.mrf.mxu2  ;;  %6268 = vmatpush.msrb.mxu1 %v5002_v40  ;;  %v5016_v0 = vld [vmem:[#allocation13 + $0x650] sm:$0xff]  ;;  %v5015_v40 = vld [vmem:[#allocation13 + $0x648] sm:$0xff] }
 0xb6a   :  { %v10584_v35 = vadd.f32 %v5967_v59, %v5855_v21  ;;  %v10586_v17 = vpop.f32.mrf.mxu3  ;;  %v5018_v21 = vld [vmem:[#allocation13 + $0x660] sm:$0xff]  ;;  %v11998_v59 = vld [vmem:[#allocation302_spill] sm:$0xff] }
 0xb6b   :  { %v5857_v50 = vpop.f32.mrf.mxu1  ;;  %v4538_v30 = vmul.f32 %v4122_v2, %v11998_v59  ;;  %6381 = vmatpush.msrb.mxu2 %v5018_v21  ;;  %6269 = vmatpush.msrb.mxu1 %v5001_v58  ;;  %v12003_v21 = vld [vmem:[#allocation353_spill] sm:$0xff] }
 0xb6c   :  { %v5858_v25 = vadd.f32 %v5857_v50, %v5745_v54  ;;  %v12002_v50 = vld [vmem:[#allocation352_spill] sm:$0xff]  ;;  %v4745_v54 = vmul.f32 %v4329_v24, %v12003_v21  ;;  %v4340_v24 = vld [vmem:[#allocation12 + $0xb30] sm:$0xff]  ;;  %v4342_v21 = vld [vmem:[#allocation12 + $0xb40] sm:$0xff] }
 0xb6d   :  { %v10591_v36 = vpop.f32.mrf.mxu0  ;;  %6382 = vmatpush.msrb.mxu2 %v5017_v27  ;;  %6270 = vmatpush.msrb.mxu1 %v5000_v61  ;;  %v5748_v27 = vadd.f32 %v10429_v3, %v10286_v14  ;;  %v5014_v61 = vld [vmem:[#allocation13 + $0x640] sm:$0xff]  ;;  %v5012_v14 = vld [vmem:[#allocation13 + $0x630] sm:$0xff] }
 0xb6e   :  { %5904 = vmatmul.f32.gmra.mxu1 %v4730_v55  ;;  %6017 = vmatmul.f32.gmra.mxu2 %v4731_v52  ;;  %v4999_v55 = vld [vmem:[#allocation13 + $0x5c8] sm:$0xff]  ;;  %v12001_v52 = vld [vmem:[#allocation296_spill] sm:$0xff]  ;;  %v4148_v3 = vld [vmem:[#allocation12 + $0x530] sm:$0xff] }
 0xb6f   :  { %6130 = vmatmul.f32.gmra.mxu3 %v4732_v19  ;;  %v4743_v19 = vmul.f32 %v4327_v45, %v12001_v52  ;;  %6383 = vmatpush.msrb.mxu2 %v5016_v0  ;;  %v4997_v45 = vld [vmem:[#allocation13 + $0x5b8] sm:$0xff] }
 0xb70   :  { %6198 = vmatmul.f32.gmra.mxu0 %v4538_v30  ;;  %v4744_v30 = vmul.f32 %v4328_v63, %v12002_v50  ;;  %6271 = vmatpush.msrb.mxu1 %v4999_v55  ;;  %v5013_v0 = vld [vmem:[#allocation13 + $0x638] sm:$0xff]  ;;  %v4996_v55 = vld [vmem:[#allocation13 + $0x5b0] sm:$0xff] }
 0xb71   :  { %v5970_v13 = vpop.f32.mrf.mxu2  ;;  %6384 = vmatpush.msrb.mxu2 %v5015_v40  ;;  %v4341_v52 = vld [vmem:[#allocation12 + $0xb38] sm:$0xff] }
 0xb72   :  { %v10596_v2 = vadd.f32 %v5970_v13, %v5858_v25  ;;  %v10598_v59 = vpop.f32.mrf.mxu3  ;;  %v4998_v25 = vld [vmem:[#allocation13 + $0x5c0] sm:$0xff]  ;;  %v12004_v13 = vld [vmem:[#allocation306_spill] sm:$0xff] }
 0xb73   :  { %12000 = vst [vmem:[#allocation106_spill] sm:$0xff] %v10598_v59  ;;  %v5860_v48 = vpop.f32.mrf.mxu1  ;;  %6272 = vmatpush.msrb.mxu1 %v4998_v25  ;;  %6385 = vmatpush.msrb.mxu2 %v5014_v61  ;;  %v12009_v25 = vld [vmem:[#allocation356_spill] sm:$0xff] }
 0xb74   :  { %11999 = vst [vmem:[#allocation68_spill] sm:$0xff] %v10596_v2  ;;  %v4551_v2 = vmul.f32 %v4135_v10, %v12004_v13  ;;  %v5861_v63 = vadd.f32 %v5860_v48, %v5748_v27  ;;  %v4758_v27 = vmul.f32 %v4342_v21, %v12009_v25  ;;  %v4353_v21 = vld [vmem:[#allocation12 + $0xb98] sm:$0xff]  ;;  %v4355_v25 = vld [vmem:[#allocation12 + $0xba8] sm:$0xff] }
 0xb75   :  { %v10603_v58 = vpop.f32.mrf.mxu0  ;;  %6273 = vmatpush.msrb.mxu1 %v4997_v45  ;;  %6386 = vmatpush.msrb.mxu2 %v5013_v0  ;;  %v5751_v45 = vadd.f32 %v10439_v44, %v10296_v8  ;;  %v4994_v0 = vld [vmem:[#allocation13 + $0x5a0] sm:$0xff]  ;;  %v4992_v8 = vld [vmem:[#allocation13 + $0x590] sm:$0xff]  ;;  %v4161_v44 = vld [vmem:[#allocation12 + $0x598] sm:$0xff] }
 0xb76   :  { %5907 = vmatmul.f32.gmra.mxu1 %v4743_v19  ;;  %6020 = vmatmul.f32.gmra.mxu2 %v4744_v30  ;;  %v12007_v30 = vld [vmem:[#allocation300_spill] sm:$0xff] }
 0xb77   :  { %6133 = vmatmul.f32.gmra.mxu3 %v4745_v54  ;;  %v4756_v48 = vmul.f32 %v4340_v24, %v12007_v30  ;;  %6274 = vmatpush.msrb.mxu1 %v4996_v55  ;;  %v4995_v54 = vld [vmem:[#allocation13 + $0x5a8] sm:$0xff]  ;;  %v5010_v24 = vld [vmem:[#allocation13 + $0x620] sm:$0xff]  ;;  %v4993_v55 = vld [vmem:[#allocation13 + $0x598] sm:$0xff] }
 0xb78   :  { %6201 = vmatmul.f32.gmra.mxu0 %v4551_v2  ;;  %v12008_v2 = vld [vmem:[#allocation355_spill] sm:$0xff]  ;;  %6387 = vmatpush.msrb.mxu2 %v5012_v14  ;;  %v4354_v30 = vld [vmem:[#allocation12 + $0xba0] sm:$0xff]  ;;  %v5009_v14 = vld [vmem:[#allocation13 + $0x618] sm:$0xff] }
 0xb79   :  { %v5973_v50 = vpop.f32.mrf.mxu2  ;;  %v4757_v40 = vmul.f32 %v4341_v52, %v12008_v2  ;;  %6275 = vmatpush.msrb.mxu1 %v4995_v54 }
 0xb7a   :  { %v10608_v10 = vadd.f32 %v5973_v50, %v5861_v63  ;;  %v10610_v13 = vpop.f32.mrf.mxu3  ;;  %v5011_v63 = vld [vmem:[#allocation13 + $0x628] sm:$0xff] }
 0xb7b   :  { %12006 = vst [vmem:[#allocation70_spill] sm:$0xff] %v10610_v13  ;;  %v5863_v19 = vpop.f32.mrf.mxu1  ;;  %v12010_v50 = vld [vmem:[#allocation310_spill] sm:$0xff]  ;;  %6388 = vmatpush.msrb.mxu2 %v5011_v63  ;;  %6276 = vmatpush.msrb.mxu1 %v4994_v0  ;;  %v12015_v63 = vld [vmem:[#allocation359_spill] sm:$0xff] }
 0xb7c   :  { %12005 = vst [vmem:[#allocation149_spill] sm:$0xff] %v10608_v10  ;;  %v4564_v59 = vmul.f32 %v4148_v3, %v12010_v50  ;;  %v5864_v52 = vadd.f32 %v5863_v19, %v5751_v45  ;;  %v4771_v45 = vmul.f32 %v4355_v25, %v12015_v63  ;;  %v4366_v25 = vld [vmem:[#allocation12 + $0xc00] sm:$0xff] }
 0xb7d   :  { %v10615_v61 = vpop.f32.mrf.mxu0  ;;  %6389 = vmatpush.msrb.mxu2 %v5010_v24  ;;  %6277 = vmatpush.msrb.mxu1 %v4993_v55  ;;  %v5754_v24 = vadd.f32 %v10449_v9, %v10306_v11  ;;  %v5007_v55 = vld [vmem:[#allocation13 + $0x608] sm:$0xff]  ;;  %v4174_v11 = vld [vmem:[#allocation12 + $0x600] sm:$0xff] }
 0xb7e   :  { %5910 = vmatmul.f32.gmra.mxu1 %v4756_v48  ;;  %6023 = vmatmul.f32.gmra.mxu2 %v4757_v40  ;;  %v12013_v40 = vld [vmem:[#allocation304_spill] sm:$0xff] }
 0xb7f   :  { %6136 = vmatmul.f32.gmra.mxu3 %v4758_v27  ;;  %v4769_v19 = vmul.f32 %v4353_v21, %v12013_v40  ;;  %6390 = vmatpush.msrb.mxu2 %v5009_v14  ;;  %v5008_v27 = vld [vmem:[#allocation13 + $0x610] sm:$0xff]  ;;  %v4990_v21 = vld [vmem:[#allocation13 + $0x580] sm:$0xff]  ;;  %v4367_v40 = vld [vmem:[#allocation12 + $0xc08] sm:$0xff] }
 0xb80   :  { %6204 = vmatmul.f32.gmra.mxu0 %v4564_v59  ;;  %v12014_v59 = vld [vmem:[#allocation358_spill] sm:$0xff]  ;;  %6278 = vmatpush.msrb.mxu1 %v4992_v8  ;;  %v5006_v14 = vld [vmem:[#allocation13 + $0x600] sm:$0xff]  ;;  %v4368_v8 = vld [vmem:[#allocation12 + $0xc10] sm:$0xff] }
 0xb81   :  { %v5976_v2 = vpop.f32.mrf.mxu2  ;;  %v4770_v54 = vmul.f32 %v4354_v30, %v12014_v59  ;;  %6391 = vmatpush.msrb.mxu2 %v5008_v27  ;;  %v12020_v27 = vld [vmem:[#allocation361_spill] sm:$0xff] }
 0xb82   :  { %v10620_v3 = vadd.f32 %v5976_v2, %v5864_v52  ;;  %v10622_v50 = vpop.f32.mrf.mxu3  ;;  %v4991_v52 = vld [vmem:[#allocation13 + $0x588] sm:$0xff] }
 0xb83   :  { %12012 = vst [vmem:[#allocation67_spill] sm:$0xff] %v10622_v50  ;;  %v5866_v48 = vpop.f32.mrf.mxu1  ;;  %v12016_v2 = vld [vmem:[#allocation314_spill] sm:$0xff]  ;;  %6279 = vmatpush.msrb.mxu1 %v4991_v52  ;;  %6392 = vmatpush.msrb.mxu2 %v5007_v55  ;;  %v5757_v55 = vadd.f32 %v10459_v33, %v10316_v20  ;;  %v12025_v20 = vld [vmem:[#allocation367_spill] sm:$0xff] }
 0xb84   :  { %12011 = vst [vmem:[#allocation129_spill] sm:$0xff] %v10620_v3  ;;  %v4577_v13 = vmul.f32 %v4161_v44, %v12016_v2  ;;  %v5867_v30 = vadd.f32 %v5866_v48, %v5754_v24  ;;  %v4783_v48 = vmul.f32 %v4367_v40, %v12020_v27  ;;  %v12022_v2 = vld [vmem:[#allocation318_spill] sm:$0xff] }
 0xb85   :  { %v10627_v0 = vpop.f32.mrf.mxu0  ;;  %6280 = vmatpush.msrb.mxu1 %v4990_v21  ;;  %6393 = vmatpush.msrb.mxu2 %v5006_v14  ;;  %v4590_v24 = vmul.f32 %v4174_v11, %v12022_v2  ;;  %v4380_v14 = vld [vmem:[#allocation12 + $0xc70] sm:$0xff]  ;;  %v12024_v2 = vld [vmem:[#allocation365_spill] sm:$0xff] }
 0xb86   :  { %5913 = vmatmul.f32.gmra.mxu1 %v4769_v19  ;;  %6026 = vmatmul.f32.gmra.mxu2 %v4770_v54  ;;  %v12019_v19 = vld [vmem:[#allocation308_spill] sm:$0xff]  ;;  %v4796_v10 = vmul.f32 %v4380_v14, %v12024_v2 }
 0xb87   :  { %6139 = vmatmul.f32.gmra.mxu3 %v4771_v45  ;;  %v4782_v54 = vmul.f32 %v4366_v25, %v12019_v19  ;;  %v4381_v25 = vld [vmem:[#allocation12 + $0xc78] sm:$0xff] }
 0xb88   :  { %6207 = vmatmul.f32.gmra.mxu0 %v4577_v13  ;;  %v12021_v13 = vld [vmem:[#allocation363_spill] sm:$0xff]  ;;  %v4797_v33 = vmul.f32 %v4381_v25, %v12025_v20  ;;  %v12027_v20 = vld [vmem:[#allocation316_spill] sm:$0xff] }
 0xb89   :  { %v5979_v59 = vpop.f32.mrf.mxu2  ;;  %v4784_v45 = vmul.f32 %v4368_v8, %v12021_v13  ;;  %v4187_v8 = vld [vmem:[#allocation12 + $0x668] sm:$0xff]  ;;  %v12023_v13 = vld [vmem:[#allocation312_spill] sm:$0xff]  ;;  %v4200_v25 = vld [vmem:[#allocation12 + $0x6d0] sm:$0xff] }
 0xb8a   :  { %v10632_v63 = vadd.f32 %v5979_v59, %v5867_v30  ;;  %v10634_v44 = vpop.f32.mrf.mxu3  ;;  %v4379_v30 = vld [vmem:[#allocation12 + $0xc68] sm:$0xff] }
 0xb8b   :  { %12018 = vst [vmem:[#allocation131_spill] sm:$0xff] %v10634_v44  ;;  %v5869_v9 = vpop.f32.mrf.mxu1  ;;  %v4795_v11 = vmul.f32 %v4379_v30, %v12023_v13  ;;  %v4394_v30 = vld [vmem:[#allocation12 + $0xce0] sm:$0xff] }
 0xb8c   :  { %12017 = vst [vmem:[#allocation126_spill] sm:$0xff] %v10632_v63  ;;  %v5870_v21 = vadd.f32 %v5869_v9, %v5757_v55  ;;  %v12026_v9 = vld [vmem:[#allocation322_spill] sm:$0xff]  ;;  %v4392_v55 = vld [vmem:[#allocation12 + $0xcd0] sm:$0xff] }
 0xb8d   :  { %v10639_v52 = vpop.f32.mrf.mxu0 }
 0xb8e   :  { %5916 = vmatmul.f32.gmra.mxu1 %v4782_v54  ;;  %6029 = vmatmul.f32.gmra.mxu2 %v4783_v48  ;;  %v4603_v48 = vmul.f32 %v4187_v8, %v12026_v9  ;;  %v4808_v8 = vmul.f32 %v4392_v55, %v12027_v20  ;;  %v12028_v9 = vld [vmem:[#allocation369_spill] sm:$0xff] }
 0xb8f   :  { %6142 = vmatmul.f32.gmra.mxu3 %v4784_v45  ;;  %v5760_v45 = vadd.f32 %v10469_v16, %v10326_v15  ;;  %v12029_v15 = vld [vmem:[#allocation118_spill] sm:$0xff] }
 0xb90   :  { %6210 = vmatmul.f32.gmra.mxu0 %v4590_v24  ;;  %v4810_v16 = vmul.f32 %v4394_v30, %v12029_v15  ;;  %v4213_v30 = vld [vmem:[#allocation12 + $0x738] sm:$0xff] }
 0xb91   :  { %v5982_v59 = vpop.f32.mrf.mxu2 }
 0xb92   :  { %v10644_v19 = vadd.f32 %v5982_v59, %v5870_v21  ;;  %v10646_v40 = vpop.f32.mrf.mxu3  ;;  %v4393_v21 = vld [vmem:[#allocation12 + $0xcd8] sm:$0xff] }
 0xb93   :  { %v5872_v27 = vpop.f32.mrf.mxu1  ;;  %v4809_v50 = vmul.f32 %v4393_v21, %v12028_v9  ;;  %v12031_v9 = vld [vmem:[#allocation320_spill] sm:$0xff] }
 0xb94   :  { %v5873_v24 = vadd.f32 %v5872_v27, %v5760_v45  ;;  %v12030_v27 = vld [vmem:[#allocation326_spill] sm:$0xff]  ;;  %v3993_v45 = vld [vmem:[#allocation12 + $0x58] sm:$0xff] }
 0xb95   :  { %v10651_v54 = vpop.f32.mrf.mxu0  ;;  %v4409_v15 = vmul.f32 %v3993_v45, %v12031_v9  ;;  %v12034_v9 = vld [vmem:[#allocation324_spill] sm:$0xff] }
 0xb96   :  { %5919 = vmatmul.f32.gmra.mxu1 %v4795_v11  ;;  %6032 = vmatmul.f32.gmra.mxu2 %v4796_v10  ;;  %v4616_v11 = vmul.f32 %v4200_v25, %v12030_v27  ;;  %v12032_v25 = vld [vmem:[#allocation372_spill] sm:$0xff] }
 0xb97   :  { %6145 = vmatmul.f32.gmra.mxu3 %v4797_v33  ;;  %v5763_v33 = vadd.f32 %v10479_v49, %v10336_v7  ;;  %v12033_v7 = vld [vmem:[#allocation330_spill] sm:$0xff] }
 0xb98   :  { %6213 = vmatmul.f32.gmra.mxu0 %v4603_v48  ;;  %v4629_v49 = vmul.f32 %v4213_v30, %v12033_v7  ;;  %v4020_v7 = vld [vmem:[#allocation12 + $0x130] sm:$0xff] }
 0xb99   :  { %v5985_v59 = vpop.f32.mrf.mxu2 }
 0xb9a   :  { %v10656_v13 = vadd.f32 %v5985_v59, %v5873_v24  ;;  %v10658_v14 = vpop.f32.mrf.mxu3  ;;  %v3994_v24 = vld [vmem:[#allocation12 + $0x60] sm:$0xff] }
 0xb9b   :  { %v5875_v2 = vpop.f32.mrf.mxu1  ;;  %v4410_v27 = vmul.f32 %v3994_v24, %v12032_v25  ;;  %v12035_v25 = vld [vmem:[#allocation66_spill] sm:$0xff] }
 0xb9c   :  { %v5876_v48 = vadd.f32 %v5875_v2, %v5763_v33 }
 0xb9d   :  { %v10663_v10 = vpop.f32.mrf.mxu0 }
 0xb9e   :  { %5922 = vmatmul.f32.gmra.mxu1 %v4808_v8  ;;  %6035 = vmatmul.f32.gmra.mxu2 %v4809_v50  ;;  %v5766_v50 = vadd.f32 %v10489_v53, %v10346_v60  ;;  %v4006_v8 = vld [vmem:[#allocation12 + $0xc0] sm:$0xff] }
 0xb9f   :  { %6148 = vmatmul.f32.gmra.mxu3 %v4810_v16  ;;  %v4007_v16 = vld [vmem:[#allocation12 + $0xc8] sm:$0xff]  ;;  %v4422_v24 = vmul.f32 %v4006_v8, %v12034_v9  ;;  %v12036_v60 = vld [vmem:[#allocation333_spill] sm:$0xff] }
 0xba0   :  { %6216 = vmatmul.f32.gmra.mxu0 %v4616_v11  ;;  %v4423_v44 = vmul.f32 %v4007_v16, %v12035_v25  ;;  %v4239_v8 = vld [vmem:[#allocation12 + $0x808] sm:$0xff] }
 0xba1   :  { %v5988_v59 = vpop.f32.mrf.mxu2 }
 0xba2   :  { %v10668_v55 = vadd.f32 %v5988_v59, %v5876_v48  ;;  %v10670_v21 = vpop.f32.mrf.mxu3  ;;  %v4226_v59 = vld [vmem:[#allocation12 + $0x7a0] sm:$0xff] }
 0xba3   :  { %v5878_v20 = vpop.f32.mrf.mxu1  ;;  %v4642_v53 = vmul.f32 %v4226_v59, %v12036_v60  ;;  %v4033_v60 = vld [vmem:[#allocation12 + $0x198] sm:$0xff] }
 0xba4   :  { %v5879_v2 = vadd.f32 %v5878_v20, %v5766_v50  ;;  %v5769_v20 = vadd.f32 %v10499_v38, %v10356_v41  ;;  %v12039_v41 = vld [vmem:[#allocation336_spill] sm:$0xff] }
 0xba5   :  { %v10674_v3 = vpop.f32.mrf.mxu0  ;;  %v4655_v38 = vmul.f32 %v4239_v8, %v12039_v41  ;;  %v4046_v41 = vld [vmem:[#allocation12 + $0x200] sm:$0xff] }
 0xba6   :  { %6281 = vmatmul.f32.vlgmr.msrb.gmra.mxu1 %v4409_v15  ;;  %6394 = vmatmul.f32.vlgmr.msrb.gmra.mxu2 %v4410_v27  ;;  %v4019_v27 = vld [vmem:[#allocation12 + $0x128] sm:$0xff] }
 0xba8   :  { %6219 = vmatmul.f32.gmra.mxu0 %v4629_v49 }
 0xba9   :  { %v5991_v11 = vpop.f32.mrf.mxu2 }
 0xbaa   :  { %v5992_v33 = vadd.f32 %v5991_v11, %v5879_v2  ;;  %v6104_v48 = vpop.f32.mrf.mxu3  ;;  %v12037_v11 = vld [vmem:[#allocation328_spill] sm:$0xff] }
 0xbab   :  { %v5881_v45 = vpop.f32.mrf.mxu1 }
 0xbac   :  { %v10681_v63 = vadd.f32 %v6104_v48, %v5992_v33  ;;  %v5882_v15 = vadd.f32 %v5881_v45, %v5769_v20  ;;  %v4435_v33 = vmul.f32 %v4019_v27, %v12037_v11  ;;  %v12038_v48 = vld [vmem:[#allocation40_spill] sm:$0xff]  ;;  %v4252_v27 = vld [vmem:[#allocation12 + $0x870] sm:$0xff] }
 0xbad   :  { %v10683_v30 = vpop.f32.mrf.mxu0  ;;  %v4436_v9 = vmul.f32 %v4020_v7, %v12038_v48 }
 0xbae   :  { %6284 = vmatmul.f32.gmra.mxu1 %v4422_v24  ;;  %6397 = vmatmul.f32.gmra.mxu2 %v4423_v44  ;;  %v5772_v44 = vadd.f32 %v10509_v12, %v10366_v5  ;;  %v4032_v24 = vld [vmem:[#allocation12 + $0x190] sm:$0xff] }
 0xbaf   :  { %v12042_v5 = vld [vmem:[#allocation339_spill] sm:$0xff] }
 0xbb0   :  { %6222 = vmatmul.f32.gmra.mxu0 %v4642_v53  ;;  %v4668_v12 = vmul.f32 %v4252_v27, %v12042_v5  ;;  %v4059_v5 = vld [vmem:[#allocation12 + $0x268] sm:$0xff] }
 0xbb1   :  { %v5994_v49 = vpop.f32.mrf.mxu2 }
 0xbb2   :  { %v5995_v50 = vadd.f32 %v5994_v49, %v5882_v15  ;;  %v6107_v2 = vpop.f32.mrf.mxu3  ;;  %v12040_v49 = vld [vmem:[#allocation56_spill] sm:$0xff] }
 0xbb3   :  { %v5884_v16 = vpop.f32.mrf.mxu1 }
 0xbb4   :  { %v10690_v25 = vadd.f32 %v6107_v2, %v5995_v50  ;;  %v5885_v45 = vadd.f32 %v5884_v16, %v5772_v44  ;;  %v4448_v50 = vmul.f32 %v4032_v24, %v12040_v49  ;;  %v12041_v2 = vld [vmem:[#allocation41_spill] sm:$0xff]  ;;  %v5775_v16 = vadd.f32 %v10519_v47, %v10376_v51  ;;  %v4265_v24 = vld [vmem:[#allocation12 + $0x8d8] sm:$0xff]  ;;  %v12045_v51 = vld [vmem:[#allocation342_spill] sm:$0xff] }
 0xbb5   :  { %v10692_v59 = vpop.f32.mrf.mxu0  ;;  %v4449_v11 = vmul.f32 %v4033_v60, %v12041_v2  ;;  %v4681_v47 = vmul.f32 %v4265_v24, %v12045_v51  ;;  %v4072_v51 = vld [vmem:[#allocation12 + $0x2d0] sm:$0xff] }
 0xbb6   :  { %6287 = vmatmul.f32.gmra.mxu1 %v4435_v33  ;;  %6400 = vmatmul.f32.gmra.mxu2 %v4436_v9  ;;  %v4045_v9 = vld [vmem:[#allocation12 + $0x1f8] sm:$0xff] }
 0xbb8   :  { %6225 = vmatmul.f32.gmra.mxu0 %v4655_v38 }
 0xbb9   :  { %v5997_v53 = vpop.f32.mrf.mxu2 }
 0xbba   :  { %v5998_v20 = vadd.f32 %v5997_v53, %v5885_v45  ;;  %v6110_v15 = vpop.f32.mrf.mxu3  ;;  %v12043_v53 = vld [vmem:[#allocation78_spill] sm:$0xff] }
 0xbbb   :  { %v5887_v7 = vpop.f32.mrf.mxu1 }
 0xbbc   :  { %v10699_v48 = vadd.f32 %v6110_v15, %v5998_v20  ;;  %v5888_v33 = vadd.f32 %v5887_v7, %v5775_v16  ;;  %v4461_v20 = vmul.f32 %v4045_v9, %v12043_v53  ;;  %v12044_v15 = vld [vmem:[#allocation47_spill] sm:$0xff]  ;;  %v5778_v7 = vadd.f32 %v10529_v46, %v10386_v56  ;;  %v4278_v9 = vld [vmem:[#allocation12 + $0x940] sm:$0xff]  ;;  %v12048_v56 = vld [vmem:[#allocation344_spill] sm:$0xff] }
 0xbbd   :  { %v10701_v8 = vpop.f32.mrf.mxu0  ;;  %v4462_v49 = vmul.f32 %v4046_v41, %v12044_v15  ;;  %v4694_v46 = vmul.f32 %v4278_v9, %v12048_v56  ;;  %v4085_v56 = vld [vmem:[#allocation12 + $0x338] sm:$0xff] }
 0xbbe   :  { %6290 = vmatmul.f32.gmra.mxu1 %v4448_v50  ;;  %6403 = vmatmul.f32.gmra.mxu2 %v4449_v11  ;;  %v4058_v11 = vld [vmem:[#allocation12 + $0x260] sm:$0xff] }
 0xbc0   :  { %6228 = vmatmul.f32.gmra.mxu0 %v4668_v12 }
 0xbc1   :  { %v6000_v38 = vpop.f32.mrf.mxu2 }
 0xbc2   :  { %v6001_v44 = vadd.f32 %v6000_v38, %v5888_v33  ;;  %v6113_v45 = vpop.f32.mrf.mxu3  ;;  %v12046_v38 = vld [vmem:[#allocation93_spill] sm:$0xff] }
 0xbc3   :  { %v5890_v60 = vpop.f32.mrf.mxu1 }
 0xbc4   :  { %v10708_v2 = vadd.f32 %v6113_v45, %v6001_v44  ;;  %v5891_v50 = vadd.f32 %v5890_v60, %v5778_v7  ;;  %v4474_v44 = vmul.f32 %v4058_v11, %v12046_v38  ;;  %v12047_v45 = vld [vmem:[#allocation105_spill] sm:$0xff]  ;;  %v5781_v60 = vadd.f32 %v10539_v43, %v10396_v1  ;;  %v4291_v11 = vld [vmem:[#allocation12 + $0x9a8] sm:$0xff] }
 0xbc5   :  { %v10710_v27 = vpop.f32.mrf.mxu0  ;;  %v4475_v53 = vmul.f32 %v4059_v5, %v12047_v45  ;;  %v12051_v1 = vld [vmem:[#allocation346_spill] sm:$0xff] }
 0xbc6   :  { %6293 = vmatmul.f32.gmra.mxu1 %v4461_v20  ;;  %6406 = vmatmul.f32.gmra.mxu2 %v4462_v49  ;;  %v4071_v49 = vld [vmem:[#allocation12 + $0x2c8] sm:$0xff]  ;;  %v4707_v43 = vmul.f32 %v4291_v11, %v12051_v1  ;;  %v6081_v11 = vadd.f32 %v10586_v17, %v10584_v35  ;;  %v4317_v35 = vld [vmem:[#allocation12 + $0xa78] sm:$0xff] }
 0xbc8   :  { %6231 = vmatmul.f32.gmra.mxu0 %v4681_v47 }
 0xbc9   :  { %v6003_v12 = vpop.f32.mrf.mxu2 }
 0xbca   :  { %v6004_v16 = vadd.f32 %v6003_v12, %v5891_v50  ;;  %v6116_v33 = vpop.f32.mrf.mxu3  ;;  %v12049_v12 = vld [vmem:[#allocation142_spill] sm:$0xff] }
 0xbcb   :  { %v5893_v41 = vpop.f32.mrf.mxu1 }
 0xbcc   :  { %v10717_v15 = vadd.f32 %v6116_v33, %v6004_v16  ;;  %v5894_v20 = vadd.f32 %v5893_v41, %v5781_v60  ;;  %v4487_v16 = vmul.f32 %v4071_v49, %v12049_v12  ;;  %v12050_v33 = vld [vmem:[#allocation119_spill] sm:$0xff]  ;;  %v5784_v41 = vadd.f32 %v10549_v22, %v10406_v28  ;;  %v12054_v22 = vld [vmem:[#allocation348_spill] sm:$0xff] }
 0xbcd   :  { %v10719_v24 = vpop.f32.mrf.mxu0  ;;  %v4488_v38 = vmul.f32 %v4072_v51, %v12050_v33  ;;  %v4304_v49 = vld [vmem:[#allocation12 + $0xa10] sm:$0xff] }
 0xbce   :  { %6296 = vmatmul.f32.gmra.mxu1 %v4474_v44  ;;  %6409 = vmatmul.f32.gmra.mxu2 %v4475_v53  ;;  %v4084_v53 = vld [vmem:[#allocation12 + $0x330] sm:$0xff] }
 0xbd0   :  { %6234 = vmatmul.f32.gmra.mxu0 %v4694_v46 }
 0xbd1   :  { %v6006_v47 = vpop.f32.mrf.mxu2 }
 0xbd2   :  { %v6007_v7 = vadd.f32 %v6006_v47, %v5894_v20  ;;  %v6119_v50 = vpop.f32.mrf.mxu3  ;;  %v12052_v47 = vld [vmem:[#allocation42_spill] sm:$0xff] }
 0xbd3   :  { %v5896_v5 = vpop.f32.mrf.mxu1 }
 0xbd4   :  { %v10726_v45 = vadd.f32 %v6119_v50, %v6007_v7  ;;  %v5897_v44 = vadd.f32 %v5896_v5, %v5784_v41  ;;  %v4500_v7 = vmul.f32 %v4084_v53, %v12052_v47  ;;  %v12053_v50 = vld [vmem:[#allocation130_spill] sm:$0xff]  ;;  %v4720_v5 = vmul.f32 %v4304_v49, %v12054_v22  ;;  %v4098_v41 = vld [vmem:[#allocation12 + $0x3a0] sm:$0xff] }
 0xbd5   :  { %v10728_v9 = vpop.f32.mrf.mxu0  ;;  %v4501_v12 = vmul.f32 %v4085_v56, %v12053_v50 }
 0xbd6   :  { %6299 = vmatmul.f32.gmra.mxu1 %v4487_v16  ;;  %6412 = vmatmul.f32.gmra.mxu2 %v4488_v38  ;;  %v5787_v16 = vadd.f32 %v10559_v31, %v10416_v57  ;;  %v12057_v31 = vld [vmem:[#allocation351_spill] sm:$0xff] }
 0xbd8   :  { %6237 = vmatmul.f32.gmra.mxu0 %v4707_v43  ;;  %v4097_v43 = vld [vmem:[#allocation12 + $0x398] sm:$0xff] }
 0xbd9   :  { %v6009_v46 = vpop.f32.mrf.mxu2 }
 0xbda   :  { %v6010_v60 = vadd.f32 %v6009_v46, %v5897_v44  ;;  %v6122_v20 = vpop.f32.mrf.mxu3  ;;  %v12055_v46 = vld [vmem:[#allocation95_spill] sm:$0xff] }
 0xbdb   :  { %v5899_v51 = vpop.f32.mrf.mxu1 }
 0xbdc   :  { %v10737_v33 = vadd.f32 %v6122_v20, %v6010_v60  ;;  %v5900_v1 = vadd.f32 %v5899_v51, %v5787_v16  ;;  %v4513_v60 = vmul.f32 %v4097_v43, %v12055_v46  ;;  %v12056_v20 = vld [vmem:[#allocation49_spill] sm:$0xff]  ;;  %v5790_v51 = vadd.f32 %v10569_v29, %v10426_v34  ;;  %v12058_v43 = vld [vmem:[#allocation60_spill] sm:$0xff]  ;;  %v12060_v34 = vld [vmem:[#allocation354_spill] sm:$0xff] }
 0xbdd   :  { %v6193_v28 = vpop.f32.mrf.mxu0  ;;  %v4514_v49 = vmul.f32 %v4098_v41, %v12056_v20  ;;  %v4124_v20 = vld [vmem:[#allocation12 + $0x470] sm:$0xff] }
 0xbde   :  { %v10742_v38 = vadd.f32 %v6193_v28, %v6081_v11  ;;  %6302 = vmatmul.f32.gmra.mxu1 %v4500_v7  ;;  %6415 = vmatmul.f32.gmra.mxu2 %v4501_v12  ;;  %v4733_v7 = vmul.f32 %v4317_v35, %v12057_v31  ;;  %v4110_v12 = vld [vmem:[#allocation12 + $0x400] sm:$0xff]  ;;  %v4111_v11 = vld [vmem:[#allocation12 + $0x408] sm:$0xff] }
 0xbdf   :  { %v4526_v41 = vmul.f32 %v4110_v12, %v12058_v43  ;;  %v4137_v43 = vld [vmem:[#allocation12 + $0x4d8] sm:$0xff] }
 0xbe0   :  { %6240 = vmatmul.f32.gmra.mxu0 %v4720_v5  ;;  %v4330_v5 = vld [vmem:[#allocation12 + $0xae0] sm:$0xff] }
 0xbe1   :  { %v6012_v44 = vpop.f32.mrf.mxu2  ;;  %v4746_v29 = vmul.f32 %v4330_v5, %v12060_v34  ;;  %v12064_v5 = vld [vmem:[#allocation357_spill] sm:$0xff] }
 0xbe2   :  { %v6013_v53 = vadd.f32 %v6012_v44, %v5900_v1  ;;  %v6125_v56 = vpop.f32.mrf.mxu3  ;;  %v12059_v44 = vld [vmem:[#allocation143_spill] sm:$0xff] }
 0xbe3   :  { %v5902_v17 = vpop.f32.mrf.mxu1 }
 0xbe4   :  { %v10746_v47 = vadd.f32 %v6125_v56, %v6013_v53  ;;  %v5903_v50 = vadd.f32 %v5902_v17, %v5790_v51  ;;  %v4527_v53 = vmul.f32 %v4111_v11, %v12059_v44  ;;  %v5793_v17 = vadd.f32 %v10579_v18, %v10436_v23  ;;  %v12063_v11 = vld [vmem:[#allocation88_spill] sm:$0xff] }
 0xbe5   :  { %v10748_v57 = vpop.f32.mrf.mxu0  ;;  %v5796_v23 = vadd.f32 %v10591_v36, %v10446_v62  ;;  %v12069_v62 = vld [vmem:[#allocation63_spill] sm:$0xff] }
 0xbe6   :  { %6305 = vmatmul.f32.gmra.mxu1 %v4513_v60  ;;  %6418 = vmatmul.f32.gmra.mxu2 %v4514_v49  ;;  %v4123_v60 = vld [vmem:[#allocation12 + $0x468] sm:$0xff]  ;;  %v5799_v36 = vadd.f32 %v10603_v58, %v12069_v62  ;;  %v12073_v58 = vld [vmem:[#allocation85_spill] sm:$0xff] }
 0xbe7   :  { %v4382_v62 = vld [vmem:[#allocation12 + $0xc80] sm:$0xff] }
 0xbe8   :  { %6243 = vmatmul.f32.gmra.mxu0 %v4733_v7  ;;  %v4343_v7 = vld [vmem:[#allocation12 + $0xb48] sm:$0xff] }
 0xbe9   :  { %v6015_v28 = vpop.f32.mrf.mxu2 }
 0xbea   :  { %v6016_v22 = vadd.f32 %v6015_v28, %v5903_v50  ;;  %v6128_v16 = vpop.f32.mrf.mxu3  ;;  %v12062_v50 = vld [vmem:[#allocation146_spill] sm:$0xff]  ;;  %v4540_v28 = vmul.f32 %v4124_v20, %v12063_v11 }
 0xbeb   :  { %v5905_v1 = vpop.f32.mrf.mxu1  ;;  %v4539_v12 = vmul.f32 %v4123_v60, %v12062_v50  ;;  %v4149_v50 = vld [vmem:[#allocation12 + $0x538] sm:$0xff] }
 0xbec   :  { %v10755_v56 = vadd.f32 %v6128_v16, %v6016_v22  ;;  %v5906_v46 = vadd.f32 %v5905_v1, %v5793_v17  ;;  %v4759_v16 = vmul.f32 %v4343_v7, %v12064_v5  ;;  %v4136_v1 = vld [vmem:[#allocation12 + $0x4d0] sm:$0xff]  ;;  %v4369_v5 = vld [vmem:[#allocation12 + $0xc18] sm:$0xff] }
 0xbed   :  { %v10757_v35 = vpop.f32.mrf.mxu0 }
 0xbee   :  { %6308 = vmatmul.f32.gmra.mxu1 %v4526_v41  ;;  %6421 = vmatmul.f32.gmra.mxu2 %v4527_v53  ;;  %v4356_v53 = vld [vmem:[#allocation12 + $0xbb0] sm:$0xff] }
 0xbf0   :  { %6246 = vmatmul.f32.gmra.mxu0 %v4746_v29  ;;  %v12066_v29 = vld [vmem:[#allocation123_spill] sm:$0xff] }
 0xbf1   :  { %v6018_v49 = vpop.f32.mrf.mxu2  ;;  %v4552_v17 = vmul.f32 %v4136_v1, %v12066_v29  ;;  %v12071_v1 = vld [vmem:[#allocation38_spill] sm:$0xff] }
 0xbf2   :  { %v10762_v31 = vadd.f32 %v6018_v49, %v5906_v46  ;;  %v12067_v46 = vld [vmem:[#allocation132_spill] sm:$0xff] }
 0xbf3   :  { %v5908_v51 = vpop.f32.mrf.mxu1  ;;  %v4553_v60 = vmul.f32 %v4137_v43, %v12067_v46  ;;  %v12068_v49 = vld [vmem:[#allocation360_spill] sm:$0xff]  ;;  %v4162_v46 = vld [vmem:[#allocation12 + $0x5a0] sm:$0xff] }
 0xbf4   :  { %12061 = vst [vmem:[#allocation107_spill] sm:$0xff] %v10762_v31  ;;  %v5909_v18 = vadd.f32 %v5908_v51, %v5796_v23  ;;  %v4772_v7 = vmul.f32 %v4356_v53, %v12068_v49  ;;  %v12070_v23 = vld [vmem:[#allocation44_spill] sm:$0xff] }
 0xbf5   :  { %v10766_v22 = vpop.f32.mrf.mxu0  ;;  %v12072_v53 = vld [vmem:[#allocation364_spill] sm:$0xff] }
 0xbf6   :  { %6311 = vmatmul.f32.gmra.mxu1 %v4539_v12  ;;  %6424 = vmatmul.f32.gmra.mxu2 %v4540_v28  ;;  %v4150_v12 = vld [vmem:[#allocation12 + $0x540] sm:$0xff]  ;;  %v4785_v29 = vmul.f32 %v4369_v5, %v12072_v53  ;;  %v12076_v5 = vld [vmem:[#allocation368_spill] sm:$0xff]  ;;  %v4176_v53 = vld [vmem:[#allocation12 + $0x610] sm:$0xff] }
 0xbf7   :  { %v4566_v43 = vmul.f32 %v4150_v12, %v12071_v1  ;;  %v12075_v12 = vld [vmem:[#allocation73_spill] sm:$0xff]  ;;  %v4798_v1 = vmul.f32 %v4382_v62, %v12076_v5  ;;  %v12080_v62 = vld [vmem:[#allocation371_spill] sm:$0xff] }
 0xbf8   :  { %6249 = vmatmul.f32.gmra.mxu0 %v4759_v16 }
 0xbf9   :  { %v6021_v41 = vpop.f32.mrf.mxu2 }
 0xbfa   :  { %v10771_v44 = vadd.f32 %v6021_v41, %v5909_v18  ;;  %v4565_v18 = vmul.f32 %v4149_v50, %v12070_v23 }
 0xbfb   :  { %v5911_v34 = vpop.f32.mrf.mxu1 }
 0xbfc   :  { %12065 = vst [vmem:[#allocation150_spill] sm:$0xff] %v10771_v44  ;;  %v5912_v51 = vadd.f32 %v5911_v34, %v5799_v36  ;;  %v12116_v44 = vld [vmem:[#allocation134_spill] sm:$0xff] }
 0xbfd   :  { %v10775_v20 = vpop.f32.mrf.mxu0 }
 0xbfe   :  { %6314 = vmatmul.f32.gmra.mxu1 %v4552_v17  ;;  %6427 = vmatmul.f32.gmra.mxu2 %v4553_v60  ;;  %v5802_v17 = vadd.f32 %v10615_v61, %v12073_v58  ;;  %v4163_v60 = vld [vmem:[#allocation12 + $0x5a8] sm:$0xff]  ;;  %v12077_v61 = vld [vmem:[#allocation151_spill] sm:$0xff] }
 0xc00   :  { %6252 = vmatmul.f32.gmra.mxu0 %v4772_v7 }
 0xc01   :  { %v6024_v11 = vpop.f32.mrf.mxu2 }
 0xc02   :  { %v10780_v28 = vadd.f32 %v6024_v11, %v5912_v51  ;;  %v12074_v51 = vld [vmem:[#allocation148_spill] sm:$0xff]  ;;  %v4579_v11 = vmul.f32 %v4163_v60, %v12075_v12 }
 0xc03   :  { %v5914_v16 = vpop.f32.mrf.mxu1  ;;  %v4578_v50 = vmul.f32 %v4162_v46, %v12074_v51  ;;  %v12078_v46 = vld [vmem:[#allocation362_spill] sm:$0xff] }
 0xc04   :  { %v5915_v34 = vadd.f32 %v5914_v16, %v5802_v17  ;;  %v4395_v17 = vld [vmem:[#allocation12 + $0xce8] sm:$0xff] }
 0xc05   :  { %v10784_v41 = vpop.f32.mrf.mxu0  ;;  %v4811_v5 = vmul.f32 %v4395_v17, %v12080_v62  ;;  %v5811_v17 = vadd.f32 %v10651_v54, %v10496_v26  ;;  %v6170_v26 = vadd.f32 %v10663_v10, %v10506_v42  ;;  %v6173_v42 = vadd.f32 %v10674_v3, %v10516_v6 }
 0xc06   :  { %6317 = vmatmul.f32.gmra.mxu1 %v4565_v18  ;;  %6430 = vmatmul.f32.gmra.mxu2 %v4566_v43  ;;  %v5805_v18 = vadd.f32 %v10627_v0, %v12077_v61  ;;  %v4175_v43 = vld [vmem:[#allocation12 + $0x608] sm:$0xff]  ;;  %v6176_v6 = vadd.f32 %v10683_v30, %v10526_v37  ;;  %v6179_v37 = vadd.f32 %v10692_v59, %v10536_v32 }
 0xc07   :  { %v4591_v60 = vmul.f32 %v4175_v43, %v12078_v46  ;;  %v12081_v0 = vld [vmem:[#allocation122_spill] sm:$0xff]  ;;  %v6182_v32 = vadd.f32 %v10701_v8, %v10546_v4  ;;  %v6185_v4 = vadd.f32 %v10710_v27, %v10556_v39 }
 0xc08   :  { %6255 = vmatmul.f32.gmra.mxu0 %v4785_v29  ;;  %v12082_v43 = vld [vmem:[#allocation366_spill] sm:$0xff] }
 0xc09   :  { %v6027_v49 = vpop.f32.mrf.mxu2 }
 0xc0a   :  { %v10789_v7 = vadd.f32 %v6027_v49, %v5915_v34  ;;  %v12079_v49 = vld [vmem:[#allocation90_spill] sm:$0xff] }
 0xc0b   :  { %v5917_v36 = vpop.f32.mrf.mxu1  ;;  %v4592_v51 = vmul.f32 %v4176_v53, %v12079_v49  ;;  %v12083_v53 = vld [vmem:[#allocation62_spill] sm:$0xff] }
 0xc0c   :  { %v5918_v16 = vadd.f32 %v5917_v36, %v5805_v18 }
 0xc0d   :  { %v10793_v23 = vpop.f32.mrf.mxu0 }
 0xc0e   :  { %6320 = vmatmul.f32.gmra.mxu1 %v4578_v50  ;;  %6433 = vmatmul.f32.gmra.mxu2 %v4579_v11  ;;  %v5808_v50 = vadd.f32 %v10639_v52, %v12081_v0  ;;  %v4188_v11 = vld [vmem:[#allocation12 + $0x670] sm:$0xff] }
 0xc10   :  { %6258 = vmatmul.f32.gmra.mxu0 %v4798_v1  ;;  %v4189_v1 = vld [vmem:[#allocation12 + $0x678] sm:$0xff] }
 0xc11   :  { %v6030_v29 = vpop.f32.mrf.mxu2  ;;  %v4605_v46 = vmul.f32 %v4189_v1, %v12083_v53 }
 0xc12   :  { %v10798_v58 = vadd.f32 %v6030_v29, %v5918_v16  ;;  %v4604_v29 = vmul.f32 %v4188_v11, %v12082_v43  ;;  %v12085_v11 = vld [vmem:[#allocation53_spill] sm:$0xff]  ;;  %v4215_v43 = vld [vmem:[#allocation12 + $0x748] sm:$0xff] }
 0xc13   :  { %v5920_v34 = vpop.f32.mrf.mxu1 }
 0xc14   :  { %v5921_v36 = vadd.f32 %v5920_v34, %v5808_v50  ;;  %v12084_v50 = vld [vmem:[#allocation370_spill] sm:$0xff] }
 0xc15   :  { %v10802_v12 = vpop.f32.mrf.mxu0 }
 0xc16   :  { %6323 = vmatmul.f32.gmra.mxu1 %v4591_v60  ;;  %6436 = vmatmul.f32.gmra.mxu2 %v4592_v51  ;;  %v4201_v60 = vld [vmem:[#allocation12 + $0x6d8] sm:$0xff]  ;;  %v4202_v51 = vld [vmem:[#allocation12 + $0x6e0] sm:$0xff] }
 0xc17   :  { %v4618_v1 = vmul.f32 %v4202_v51, %v12085_v11 }
 0xc18   :  { %6261 = vmatmul.f32.gmra.mxu0 %v4811_v5 }
 0xc19   :  { %v6033_v61 = vpop.f32.mrf.mxu2 }
 0xc1a   :  { %v10807_v18 = vadd.f32 %v6033_v61, %v5921_v36  ;;  %v4617_v36 = vmul.f32 %v4201_v60, %v12084_v50 }
 0xc1b   :  { %v5923_v16 = vpop.f32.mrf.mxu1 }
 0xc1c   :  { %v5924_v34 = vadd.f32 %v5923_v16, %v5811_v17  ;;  %v4214_v16 = vld [vmem:[#allocation12 + $0x740] sm:$0xff] }
 0xc1d   :  { %v6217_v49 = vpop.f32.mrf.mxu0 }
 0xc1e   :  { %v10814_v52 = vadd.f32 %v6217_v49, %v10681_v63  ;;  %6326 = vmatmul.f32.gmra.mxu1 %v4604_v29  ;;  %6439 = vmatmul.f32.gmra.mxu2 %v4605_v46  ;;  %v12086_v49 = vld [vmem:[#allocation101_spill] sm:$0xff] }
 0xc1f   :  { %v4630_v17 = vmul.f32 %v4214_v16, %v12086_v49 }
 0xc21   :  { %v6036_v62 = vpop.f32.mrf.mxu2 }
 0xc22   :  { %v10816_v5 = vadd.f32 %v6036_v62, %v5924_v34  ;;  %v12087_v34 = vld [vmem:[#allocation113_spill] sm:$0xff]  ;;  %v4227_v62 = vld [vmem:[#allocation12 + $0x7a8] sm:$0xff] }
 0xc23   :  { %v6282_v0 = vpop.f32.mrf.mxu1  ;;  %v4631_v60 = vmul.f32 %v4215_v43, %v12087_v34  ;;  %v4240_v43 = vld [vmem:[#allocation12 + $0x810] sm:$0xff] }
 0xc24   :  { %v6283_v54 = vadd.f32 %v6282_v0, %v6170_v26  ;;  %v4228_v0 = vld [vmem:[#allocation12 + $0x7b0] sm:$0xff]  ;;  %v12089_v26 = vld [vmem:[#allocation81_spill] sm:$0xff] }
 0xc25   :  { %v6220_v61 = vpop.f32.mrf.mxu0  ;;  %v12090_v34 = vld [vmem:[#allocation103_spill] sm:$0xff] }
 0xc26   :  { %v10823_v63 = vadd.f32 %v6220_v61, %v10690_v25  ;;  %6329 = vmatmul.f32.gmra.mxu1 %v4617_v36  ;;  %6442 = vmatmul.f32.gmra.mxu2 %v4618_v1  ;;  %v12088_v1 = vld [vmem:[#allocation139_spill] sm:$0xff] }
 0xc27   :  { %v4643_v61 = vmul.f32 %v4227_v62, %v12088_v1  ;;  %v4253_v62 = vld [vmem:[#allocation12 + $0x878] sm:$0xff] }
 0xc29   :  { %v6395_v29 = vpop.f32.mrf.mxu2 }
 0xc2a   :  { %v10825_v53 = vadd.f32 %v6395_v29, %v6283_v54  ;;  %v4644_v54 = vmul.f32 %v4228_v0, %v12089_v26  ;;  %v4241_v29 = vld [vmem:[#allocation12 + $0x818] sm:$0xff]  ;;  %v4254_v0 = vld [vmem:[#allocation12 + $0x880] sm:$0xff] }
 0xc2b   :  { %v6285_v46 = vpop.f32.mrf.mxu1 }
 0xc2c   :  { %v6286_v25 = vadd.f32 %v6285_v46, %v6173_v42 }
 0xc2d   :  { %v6223_v51 = vpop.f32.mrf.mxu0 }
 0xc2e   :  { %v10832_v10 = vadd.f32 %v6223_v51, %v10699_v48  ;;  %6332 = vmatmul.f32.gmra.mxu1 %v4630_v17  ;;  %6445 = vmatmul.f32.gmra.mxu2 %v4631_v60  ;;  %v4656_v60 = vmul.f32 %v4240_v43, %v12090_v34  ;;  %v12091_v51 = vld [vmem:[#allocation75_spill] sm:$0xff]  ;;  %v4267_v43 = vld [vmem:[#allocation12 + $0x8e8] sm:$0xff]  ;;  %v12094_v34 = vld [vmem:[#allocation140_spill] sm:$0xff] }
 0xc2f   :  { %v4657_v42 = vmul.f32 %v4241_v29, %v12091_v51  ;;  %v12095_v51 = vld [vmem:[#allocation99_spill] sm:$0xff] }
 0xc31   :  { %v6398_v50 = vpop.f32.mrf.mxu2 }
 0xc32   :  { %v10834_v36 = vadd.f32 %v6398_v50, %v6286_v25 }
 0xc33   :  { %v6288_v11 = vpop.f32.mrf.mxu1 }
 0xc34   :  { %v6289_v48 = vadd.f32 %v6288_v11, %v6176_v6 }
 0xc35   :  { %v6226_v16 = vpop.f32.mrf.mxu0 }
 0xc36   :  { %v10841_v3 = vadd.f32 %v6226_v16, %v10708_v2  ;;  %6335 = vmatmul.f32.gmra.mxu1 %v4643_v61  ;;  %6448 = vmatmul.f32.gmra.mxu2 %v4644_v54  ;;  %v12092_v61 = vld [vmem:[#allocation152_spill] sm:$0xff]  ;;  %v12093_v54 = vld [vmem:[#allocation94_spill] sm:$0xff] }
 0xc37   :  { %v4669_v26 = vmul.f32 %v4253_v62, %v12092_v61  ;;  %v4670_v16 = vmul.f32 %v4254_v0, %v12093_v54 }
 0xc39   :  { %v6401_v46 = vpop.f32.mrf.mxu2 }
 0xc3a   :  { %v10843_v49 = vadd.f32 %v6401_v46, %v6289_v48  ;;  %v4266_v48 = vld [vmem:[#allocation12 + $0x8e0] sm:$0xff] }
 0xc3b   :  { %v6291_v17 = vpop.f32.mrf.mxu1 }
 0xc3c   :  { %v6292_v2 = vadd.f32 %v6291_v17, %v6179_v37  ;;  %v4279_v37 = vld [vmem:[#allocation12 + $0x948] sm:$0xff] }
 0xc3d   :  { %v6229_v25 = vpop.f32.mrf.mxu0 }
 0xc3e   :  { %v10850_v30 = vadd.f32 %v6229_v25, %v10717_v15  ;;  %6338 = vmatmul.f32.gmra.mxu1 %v4656_v60  ;;  %6451 = vmatmul.f32.gmra.mxu2 %v4657_v42  ;;  %v4682_v60 = vmul.f32 %v4266_v48, %v12094_v34  ;;  %v4683_v42 = vmul.f32 %v4267_v43, %v12095_v51 }
 0xc41   :  { %v6404_v50 = vpop.f32.mrf.mxu2 }
 0xc42   :  { %v10852_v11 = vadd.f32 %v6404_v50, %v6292_v2  ;;  %v4280_v2 = vld [vmem:[#allocation12 + $0x950] sm:$0xff] }
 0xc43   :  { %v6294_v1 = vpop.f32.mrf.mxu1 }
 0xc44   :  { %v6295_v15 = vadd.f32 %v6294_v1, %v6182_v32  ;;  %v12096_v1 = vld [vmem:[#allocation69_spill] sm:$0xff]  ;;  %v4292_v32 = vld [vmem:[#allocation12 + $0x9b0] sm:$0xff] }
 0xc45   :  { %v6232_v6 = vpop.f32.mrf.mxu0  ;;  %v4695_v61 = vmul.f32 %v4279_v37, %v12096_v1  ;;  %v4306_v37 = vld [vmem:[#allocation12 + $0xa20] sm:$0xff]  ;;  %v12102_v1 = vld [vmem:[#allocation58_spill] sm:$0xff] }
 0xc46   :  { %v10859_v59 = vadd.f32 %v6232_v6, %v10726_v45  ;;  %6341 = vmatmul.f32.gmra.mxu1 %v4669_v26  ;;  %6454 = vmatmul.f32.gmra.mxu2 %v4670_v16  ;;  %v12097_v26 = vld [vmem:[#allocation136_spill] sm:$0xff]  ;;  %v12098_v6 = vld [vmem:[#allocation39_spill] sm:$0xff] }
 0xc47   :  { %v4696_v54 = vmul.f32 %v4280_v2, %v12097_v26  ;;  %v6188_v39 = vadd.f32 %v10719_v24, %v12098_v6  ;;  %v12103_v26 = vld [vmem:[#allocation125_spill] sm:$0xff] }
 0xc49   :  { %v6407_v29 = vpop.f32.mrf.mxu2 }
 0xc4a   :  { %v10861_v46 = vadd.f32 %v6407_v29, %v6295_v15  ;;  %v4293_v15 = vld [vmem:[#allocation12 + $0x9b8] sm:$0xff] }
 0xc4b   :  { %v6297_v17 = vpop.f32.mrf.mxu1 }
 0xc4c   :  { %v6298_v45 = vadd.f32 %v6297_v17, %v6185_v4  ;;  %v12099_v17 = vld [vmem:[#allocation86_spill] sm:$0xff] }
 0xc4d   :  { %v6235_v25 = vpop.f32.mrf.mxu0  ;;  %v4708_v34 = vmul.f32 %v4292_v32, %v12099_v17  ;;  %v12104_v32 = vld [vmem:[#allocation109_spill] sm:$0xff]  ;;  %v4331_v17 = vld [vmem:[#allocation12 + $0xae8] sm:$0xff] }
 0xc4e   :  { %v10868_v8 = vadd.f32 %v6235_v25, %v10737_v33  ;;  %6344 = vmatmul.f32.gmra.mxu1 %v4682_v60  ;;  %6457 = vmatmul.f32.gmra.mxu2 %v4683_v42  ;;  %v12100_v60 = vld [vmem:[#allocation55_spill] sm:$0xff]  ;;  %v12101_v25 = vld [vmem:[#allocation48_spill] sm:$0xff] }
 0xc4f   :  { %v4709_v51 = vmul.f32 %v4293_v15, %v12100_v60  ;;  %v6191_v24 = vadd.f32 %v10728_v9, %v12101_v25  ;;  %v4318_v9 = vld [vmem:[#allocation12 + $0xa80] sm:$0xff] }
 0xc50   :  { %v4734_v15 = vmul.f32 %v4318_v9, %v12104_v32  ;;  %v12107_v25 = vld [vmem:[#allocation77_spill] sm:$0xff] }
 0xc51   :  { %v6410_v62 = vpop.f32.mrf.mxu2 }
 0xc52   :  { %v10870_v0 = vadd.f32 %v6410_v62, %v6298_v45  ;;  %v4305_v45 = vld [vmem:[#allocation12 + $0xa18] sm:$0xff] }
 0xc53   :  { %v6300_v50 = vpop.f32.mrf.mxu1 }
 0xc54   :  { %v6301_v33 = vadd.f32 %v6300_v50, %v6188_v39 }
 0xc55   :  { %v6238_v16 = vpop.f32.mrf.mxu0 }
 0xc56   :  { %v10877_v27 = vadd.f32 %v6238_v16, %v10746_v47  ;;  %6347 = vmatmul.f32.gmra.mxu1 %v4695_v61  ;;  %6460 = vmatmul.f32.gmra.mxu2 %v4696_v54  ;;  %v4721_v61 = vmul.f32 %v4305_v45, %v12102_v1  ;;  %v4722_v54 = vmul.f32 %v4306_v37, %v12103_v26  ;;  %v4345_v45 = vld [vmem:[#allocation12 + $0xb58] sm:$0xff] }
 0xc59   :  { %v6413_v48 = vpop.f32.mrf.mxu2 }
 0xc5a   :  { %v10879_v43 = vadd.f32 %v6413_v48, %v6301_v33  ;;  %v12105_v48 = vld [vmem:[#allocation115_spill] sm:$0xff] }
 0xc5b   :  { %v6303_v29 = vpop.f32.mrf.mxu1 }
 0xc5c   :  { %v6304_v4 = vadd.f32 %v6303_v29, %v6191_v24 }
 0xc5d   :  { %v6241_v42 = vpop.f32.mrf.mxu0 }
 0xc5e   :  { %v10886_v47 = vadd.f32 %v6241_v42, %v10755_v56  ;;  %6350 = vmatmul.f32.gmra.mxu1 %v4708_v34  ;;  %6463 = vmatmul.f32.gmra.mxu2 %v4709_v51  ;;  %v4319_v56 = vld [vmem:[#allocation12 + $0xa88] sm:$0xff]  ;;  %v4332_v34 = vld [vmem:[#allocation12 + $0xaf0] sm:$0xff] }
 0xc5f   :  { %v4735_v29 = vmul.f32 %v4319_v56, %v12105_v48  ;;  %v12106_v51 = vld [vmem:[#allocation71_spill] sm:$0xff]  ;;  %v4748_v24 = vmul.f32 %v4332_v34, %v12107_v25 }
 0xc60   :  { %v4747_v42 = vmul.f32 %v4331_v17, %v12106_v51  ;;  %v4371_v17 = vld [vmem:[#allocation12 + $0xc28] sm:$0xff] }
 0xc61   :  { %v6416_v2 = vpop.f32.mrf.mxu2 }
 0xc62   :  { %v10888_v62 = vadd.f32 %v6416_v2, %v6304_v4  ;;  %v4344_v4 = vld [vmem:[#allocation12 + $0xb50] sm:$0xff] }
 0xc63   :  { %v6306_v50 = vpop.f32.mrf.mxu1 }
 0xc64   :  { %v6307_v16 = vadd.f32 %v6306_v50, %v10742_v38  ;;  %v12108_v50 = vld [vmem:[#allocation145_spill] sm:$0xff] }
 0xc65   :  { %v4760_v1 = vmul.f32 %v4344_v4, %v12108_v50  ;;  %v4384_v50 = vld [vmem:[#allocation12 + $0xc90] sm:$0xff] }
 0xc66   :  { %6353 = vmatmul.f32.gmra.mxu1 %v4721_v61  ;;  %6466 = vmatmul.f32.gmra.mxu2 %v4722_v54  ;;  %v12109_v61 = vld [vmem:[#allocation98_spill] sm:$0xff]  ;;  %v4357_v54 = vld [vmem:[#allocation12 + $0xbb8] sm:$0xff] }
 0xc67   :  { %v4761_v26 = vmul.f32 %v4345_v45, %v12109_v61  ;;  %v4383_v45 = vld [vmem:[#allocation12 + $0xc88] sm:$0xff] }
 0xc69   :  { %v6419_v6 = vpop.f32.mrf.mxu2 }
 0xc6a   :  { %v10893_v39 = vadd.f32 %v6419_v6, %v6307_v16  ;;  %v4358_v16 = vld [vmem:[#allocation12 + $0xbc0] sm:$0xff]  ;;  %v12110_v6 = vld [vmem:[#allocation51_spill] sm:$0xff] }
 0xc6b   :  { %v10895_v33 = vpop.f32.mrf.mxu1  ;;  %v4773_v32 = vmul.f32 %v4357_v54, %v12110_v6  ;;  %v12115_v6 = vld [vmem:[#allocation45_spill] sm:$0xff] }
 0xc6e   :  { %6356 = vmatmul.f32.gmra.mxu1 %v4734_v15  ;;  %6469 = vmatmul.f32.gmra.mxu2 %v4735_v29  ;;  %v12111_v15 = vld [vmem:[#allocation83_spill] sm:$0xff]  ;;  %v4370_v29 = vld [vmem:[#allocation12 + $0xc20] sm:$0xff] }
 0xc6f   :  { %v4774_v48 = vmul.f32 %v4358_v16, %v12111_v15  ;;  %v4800_v16 = vmul.f32 %v4384_v50, %v12115_v6  ;;  %v4397_v15 = vld [vmem:[#allocation12 + $0xcf8] sm:$0xff]  ;;  %v12119_v6 = vld [vmem:[#allocation131_spill] sm:$0xff] }
 0xc71   :  { %v10899_v60 = vpop.f32.mrf.mxu2 }
 0xc73   :  { %v10901_v38 = vpop.f32.mrf.mxu1 }
 0xc76   :  { %6359 = vmatmul.f32.gmra.mxu1 %v4747_v42  ;;  %6472 = vmatmul.f32.gmra.mxu2 %v4748_v24  ;;  %v12112_v42 = vld [vmem:[#allocation111_spill] sm:$0xff]  ;;  %v12113_v24 = vld [vmem:[#allocation117_spill] sm:$0xff] }
 0xc77   :  { %v4786_v25 = vmul.f32 %v4370_v29, %v12112_v42  ;;  %v4787_v4 = vmul.f32 %v4371_v17, %v12113_v24  ;;  %v12117_v42 = vld [vmem:[#allocation102_spill] sm:$0xff]  ;;  %v6099_v24 = vadd.f32 %v10658_v14, %v10656_v13  ;;  %v12121_v13 = vld [vmem:[#allocation67_spill] sm:$0xff] }
 0xc78   :  { %v4813_v17 = vmul.f32 %v4397_v15, %v12117_v42  ;;  %v12120_v15 = vld [vmem:[#allocation129_spill] sm:$0xff] }
 0xc79   :  { %v10905_v37 = vpop.f32.mrf.mxu2  ;;  %v6212_v50 = vadd.f32 %v10793_v23, %v6099_v24  ;;  %v6090_v14 = vadd.f32 %v12121_v13, %v12120_v15  ;;  %v6131_v15 = vpop.f32.mrf.mxu3 }
 0xc7b   :  { %v6315_v2 = vpop.f32.mrf.mxu1 }
 0xc7e   :  { %6362 = vmatmul.f32.gmra.mxu1 %v4760_v1  ;;  %6475 = vmatmul.f32.gmra.mxu2 %v4761_v26  ;;  %v12114_v26 = vld [vmem:[#allocation97_spill] sm:$0xff] }
 0xc7f   :  { %v4799_v54 = vmul.f32 %v4383_v45, %v12114_v26  ;;  %v6096_v45 = vadd.f32 %v10646_v40, %v10644_v19  ;;  %v12122_v40 = vld [vmem:[#allocation149_spill] sm:$0xff] }
 0xc81   :  { %v6428_v9 = vpop.f32.mrf.mxu2 }
 0xc83   :  { %v6318_v56 = vpop.f32.mrf.mxu1 }
 0xc86   :  { %6365 = vmatmul.f32.gmra.mxu1 %v4773_v32  ;;  %6478 = vmatmul.f32.gmra.mxu2 %v4774_v48  ;;  %v4396_v32 = vld [vmem:[#allocation12 + $0xcf0] sm:$0xff] }
 0xc87   :  { %v4812_v29 = vmul.f32 %v4396_v32, %v12116_v44  ;;  %v12118_v44 = vld [vmem:[#allocation126_spill] sm:$0xff]  ;;  %v6209_v32 = vadd.f32 %v10784_v41, %v6096_v45 }
 0xc89   :  { %v6431_v34 = vpop.f32.mrf.mxu2 }
 0xc8b   :  { %v6321_v51 = vpop.f32.mrf.mxu1 }
 0xc8c   :  { %v6322_v42 = vadd.f32 %v6321_v51, %v6209_v32 }
 0xc8e   :  { %6368 = vmatmul.f32.gmra.mxu1 %v4786_v25  ;;  %6481 = vmatmul.f32.gmra.mxu2 %v4787_v4  ;;  %v6102_v25 = vadd.f32 %v10670_v21, %v10668_v55 }
 0xc90   :  { %v6215_v4 = vadd.f32 %v10802_v12, %v6102_v25  ;;  %v6203_v25 = vadd.f32 %v10766_v22, %v6090_v14 }
 0xc91   :  { %v6434_v1 = vpop.f32.mrf.mxu2 }
 0xc92   :  { %v6435_v41 = vadd.f32 %v6434_v1, %v6322_v42 }
 0xc93   :  { %v6324_v61 = vpop.f32.mrf.mxu1 }
 0xc94   :  { %v6325_v55 = vadd.f32 %v6324_v61, %v6212_v50  ;;  %v12124_v61 = vld [vmem:[#allocation68_spill] sm:$0xff] }
 0xc96   :  { %6371 = vmatmul.f32.gmra.mxu1 %v4799_v54  ;;  %6484 = vmatmul.f32.gmra.mxu2 %v4800_v16  ;;  %v6093_v16 = vadd.f32 %v12119_v6, %v12118_v44 }
 0xc99   :  { %v6437_v48 = vpop.f32.mrf.mxu2 }
 0xc9b   :  { %v6327_v31 = vpop.f32.mrf.mxu1 }
 0xc9c   :  { %v6328_v26 = vadd.f32 %v6327_v31, %v6215_v4  ;;  %v12123_v31 = vld [vmem:[#allocation70_spill] sm:$0xff] }
 0xc9d   :  { %v6087_v23 = vadd.f32 %v12123_v31, %v12122_v40  ;;  %v12125_v4 = vld [vmem:[#allocation106_spill] sm:$0xff] }
 0xc9e   :  { %6374 = vmatmul.f32.gmra.mxu1 %v4812_v29  ;;  %6487 = vmatmul.f32.gmra.mxu2 %v4813_v17  ;;  %v6206_v29 = vadd.f32 %v10775_v20, %v6093_v16  ;;  %v6438_v17 = vadd.f32 %v6437_v48, %v6325_v55  ;;  %v6084_v45 = vadd.f32 %v12125_v4, %v12124_v61 }
 0xc9f   :  { %v6200_v50 = vadd.f32 %v10757_v35, %v6087_v23 }
 0xca0   :  { %v6319_v24 = vadd.f32 %v6318_v56, %v6206_v29  ;;  %v6134_v29 = vpop.f32.mrf.mxu3 }
 0xca1   :  { %v6440_v54 = vpop.f32.mrf.mxu2  ;;  %v6313_v48 = vadd.f32 %v10901_v38, %v6200_v50 }
 0xca2   :  { %v6441_v21 = vadd.f32 %v6440_v54, %v6328_v26  ;;  %v6316_v26 = vadd.f32 %v6315_v2, %v6203_v25  ;;  %v6432_v20 = vadd.f32 %v6431_v34, %v6319_v24 }
 0xca3   :  { %v6330_v12 = vpop.f32.mrf.mxu1  ;;  %v6426_v1 = vadd.f32 %v10905_v37, %v6313_v48 }
 0xca4   :  { %v6331_v19 = vadd.f32 %v6330_v12, %v10814_v52  ;;  %6497 = vmatpush.msrb.mxu3 %v6441_v21  ;;  %v6197_v52 = vadd.f32 %v10748_v57, %v6084_v45  ;;  %v6429_v54 = vadd.f32 %v6428_v9, %v6316_v26 }
 0xca6   :  { %6498 = vmatpush.msrb.mxu3 %v6438_v17  ;;  %v6310_v56 = vadd.f32 %v10895_v33, %v6197_v52 }
 0xca8   :  { %6499 = vmatpush.msrb.mxu3 %v6435_v41  ;;  %v6423_v35 = vadd.f32 %v10899_v60, %v6310_v56  ;;  %v6137_v31 = vpop.f32.mrf.mxu3  ;;  %v6491_v56 = vld [vmem:[#allocation16] sm:$0xff] }
 0xca9   :  { %v6443_v51 = vpop.f32.mrf.mxu2 }
 0xcaa   :  { %v10940_v44 = vadd.f32 %v6443_v51, %v6331_v19  ;;  %6500 = vmatpush.msrb.mxu3 %v6432_v20 }
 0xcab   :  { %v6333_v22 = vpop.f32.mrf.mxu1 }
 0xcac   :  { %v6334_v6 = vadd.f32 %v6333_v22, %v10823_v63  ;;  %6501 = vmatpush.msrb.mxu3 %v6429_v54 }
 0xcae   :  { %6502 = vmatpush.msrb.mxu3 %v6426_v1 }
 0xcb0   :  { %6503 = vmatpush.msrb.mxu3 %v6423_v35 }
 0xcb1   :  { %v6446_v2 = vpop.f32.mrf.mxu2 }
 0xcb2   :  { %v10946_v57 = vadd.f32 %v6446_v2, %v6334_v6  ;;  %6504 = vmatpush.msrb.mxu3 %v10893_v39 }
 0xcb3   :  { %v6336_v38 = vpop.f32.mrf.mxu1 }
 0xcb4   :  { %v6337_v9 = vadd.f32 %v6336_v38, %v10832_v10  ;;  %6505 = vmatpush.msrb.mxu3 %v10888_v62 }
 0xcb6   :  { %6506 = vmatpush.msrb.mxu3 %v10879_v43 }
 0xcb8   :  { %6507 = vmatpush.msrb.mxu3 %v10870_v0 }
 0xcb9   :  { %v6449_v63 = vpop.f32.mrf.mxu2 }
 0xcba   :  { %v10953_v33 = vadd.f32 %v6449_v63, %v6337_v9  ;;  %6508 = vmatpush.msrb.mxu3 %v10861_v46 }
 0xcbb   :  { %v6339_v60 = vpop.f32.mrf.mxu1 }
 0xcbc   :  { %v6340_v37 = vadd.f32 %v6339_v60, %v10841_v3  ;;  %6509 = vmatpush.msrb.mxu3 %v10852_v11 }
 0xcbe   :  { %6510 = vmatpush.msrb.mxu3 %v10843_v49 }
 0xcc0   :  { %6511 = vmatpush.msrb.mxu3 %v10834_v36 }
 0xcc1   :  { %v6452_v10 = vpop.f32.mrf.mxu2 }
 0xcc2   :  { %v10960_v62 = vadd.f32 %v6452_v10, %v6340_v37  ;;  %6512 = vmatpush.msrb.mxu3 %v10825_v53 }
 0xcc3   :  { %v6342_v0 = vpop.f32.mrf.mxu1  ;;  %6513 = vmatmul.f32.vlgmr.msrb.gmra.mxu3 %v6491_v56  ;;  %v6643_v56 = vld [vmem:[#allocation21 + $0x78] sm:$0xff] }
 0xcc4   :  { %v6343_v43 = vadd.f32 %v6342_v0, %v10850_v30  ;;  %v6244_v30 = vpop.f32.mrf.mxu0 }
 0xcc9   :  { %v6455_v39 = vpop.f32.mrf.mxu2 }
 0xcca   :  { %v10964_v34 = vadd.f32 %v6455_v39, %v6343_v43 }
 0xccb   :  { %v6345_v46 = vpop.f32.mrf.mxu1 }
 0xccc   :  { %v6346_v3 = vadd.f32 %v6345_v46, %v10859_v59  ;;  %v6247_v42 = vpop.f32.mrf.mxu0 }
 0xcd1   :  { %v6458_v16 = vpop.f32.mrf.mxu2 }
 0xcd2   :  { %v10967_v11 = vadd.f32 %v6458_v16, %v6346_v3  ;;  %v6138_v3 = vadd.f32 %v6137_v31, %v10780_v28 }
 0xcd3   :  { %v6348_v49 = vpop.f32.mrf.mxu1 }
 0xcd4   :  { %v6349_v36 = vadd.f32 %v6348_v49, %v10868_v8  ;;  %v6250_v23 = vpop.f32.mrf.mxu0 }
 0xcd9   :  { %v6461_v32 = vpop.f32.mrf.mxu2 }
 0xcda   :  { %v10970_v55 = vadd.f32 %v6461_v32, %v6349_v36 }
 0xcdb   :  { %v6351_v21 = vpop.f32.mrf.mxu1 }
 0xcdc   :  { %v6352_v53 = vadd.f32 %v6351_v21, %v10877_v27  ;;  %v6140_v27 = vpop.f32.mrf.mxu3  ;;  %v6253_v61 = vpop.f32.mrf.mxu0 }
 0xcdd   :  { %v6141_v0 = vadd.f32 %v6140_v27, %v10789_v7 }
 0xcdf   :  { %v6254_v16 = vadd.f32 %v6253_v61, %v6141_v0 }
 0xce1   :  { %v6464_v13 = vpop.f32.mrf.mxu2 }
 0xce2   :  { %v10973_v14 = vadd.f32 %v6464_v13, %v6352_v53 }
 0xce3   :  { %v6354_v12 = vpop.f32.mrf.mxu1 }
 0xce4   :  { %v6355_v59 = vadd.f32 %v6354_v12, %v10886_v47  ;;  %v6143_v50 = vpop.f32.mrf.mxu3  ;;  %v6256_v26 = vpop.f32.mrf.mxu0 }
 0xce5   :  { %v6144_v63 = vadd.f32 %v6143_v50, %v10798_v58  ;;  %v12127_v58 = vld [vmem:[#allocation107_spill] sm:$0xff] }
 0xce6   :  { %v6132_v13 = vadd.f32 %v6131_v15, %v12127_v58  ;;  %v6492_v15 = vld [vmem:[#allocation16 + $0x8] sm:$0xff] }
 0xce7   :  { %v6257_v43 = vadd.f32 %v6256_v26, %v6144_v63  ;;  %v6637_v63 = vld [vmem:[#allocation21 + $0x48] sm:$0xff] }
 0xce9   :  { %v6467_v17 = vpop.f32.mrf.mxu2 }
 0xcea   :  { %v6468_v19 = vadd.f32 %v6467_v17, %v6355_v59  ;;  %v6245_v17 = vadd.f32 %v6244_v30, %v6132_v13  ;;  %v6557_v30 = vld [vmem:[#allocation18 + $0x78] sm:$0xff] }
 0xceb   :  { %v6357_v40 = vpop.f32.mrf.mxu1 }
 0xcec   :  { %v6146_v47 = vpop.f32.mrf.mxu3  ;;  %v6259_v52 = vpop.f32.mrf.mxu0  ;;  %v6358_v28 = vadd.f32 %v6357_v40, %v6245_v17  ;;  %v6545_v40 = vld [vmem:[#allocation18 + $0x18] sm:$0xff] }
 0xced   :  { %v6147_v38 = vadd.f32 %v6146_v47, %v10807_v18  ;;  %v6251_v18 = vadd.f32 %v6250_v23, %v6138_v3  ;;  %v6543_v23 = vld [vmem:[#allocation18 + $0x8] sm:$0xff]  ;;  %v6631_v3 = vld [vmem:[#allocation21 + $0x18] sm:$0xff] }
 0xcef   :  { %v6260_v60 = vadd.f32 %v6259_v52, %v6147_v38  ;;  %v6817_v52 = vld [vmem:[#allocation19] ss:$0 sm:$0xff] }
 0xcf0   :  { %v6639_v38 = vld [vmem:[#allocation21 + $0x58] sm:$0xff] }
 0xcf1   :  { %v6470_v8 = vpop.f32.mrf.mxu2 }
 0xcf2   :  { %v6471_v61 = vadd.f32 %v6470_v8, %v6358_v28  ;;  %v6544_v8 = vld [vmem:[#allocation18 + $0x10] sm:$0xff] }
 0xcf3   :  { %v6360_v25 = vpop.f32.mrf.mxu1 }
 0xcf4   :  { %v6149_v1 = vpop.f32.mrf.mxu3  ;;  %v6262_v6 = vpop.f32.mrf.mxu0 }
 0xcf5   :  { %v6150_v35 = vadd.f32 %v6149_v1, %v10816_v5  ;;  %v12126_v5 = vld [vmem:[#allocation150_spill] sm:$0xff] }
 0xcf6   :  { %v6135_v32 = vadd.f32 %v6134_v29, %v12126_v5  ;;  %v6556_v29 = vld [vmem:[#allocation18 + $0x70] sm:$0xff]  ;;  %v6628_v5 = vld [vmem:[#allocation21] sm:$0xff] }
 0xcf7   :  { %v6263_v9 = vadd.f32 %v6262_v6, %v6150_v35  ;;  %v6642_v1 = vld [vmem:[#allocation21 + $0x70] sm:$0xff]  ;;  %v6641_v35 = vld [vmem:[#allocation21 + $0x68] sm:$0xff] }
 0xcf8   :  { %v6248_v12 = vadd.f32 %v6247_v42, %v6135_v32  ;;  %v6548_v42 = vld [vmem:[#allocation18 + $0x30] sm:$0xff] }
 0xcf9   :  { %v6473_v24 = vpop.f32.mrf.mxu2 }
 0xcfa   :  { %v6361_v27 = vadd.f32 %v6360_v25, %v6248_v12  ;;  %v6542_v25 = vld [vmem:[#allocation18] sm:$0xff] }
 0xcfb   :  { %v6363_v41 = vpop.f32.mrf.mxu1 }
 0xcfc   :  { %v6364_v59 = vadd.f32 %v6363_v41, %v6251_v18  ;;  %v6474_v31 = vadd.f32 %v6473_v24, %v6361_v27  ;;  %v6816_v41 = vld [vmem:[#allocation15] ss:$0 sm:$0xff] }
 0xd01   :  { %v6476_v4 = vpop.f32.mrf.mxu2 }
 0xd02   :  { %v6477_v50 = vadd.f32 %v6476_v4, %v6364_v59 }
 0xd03   :  { %v6366_v45 = vpop.f32.mrf.mxu1 }
 0xd04   :  { %v6367_v21 = vadd.f32 %v6366_v45, %v6254_v16  ;;  %v6630_v16 = vld [vmem:[#allocation21 + $0x10] sm:$0xff] }
 0xd09   :  { %v6479_v20 = vpop.f32.mrf.mxu2 }
 0xd0a   :  { %v6480_v7 = vadd.f32 %v6479_v20, %v6367_v21  ;;  %v6538_v20 = vld [vmem:[%s12128_s6] sm:$0xff] }
 0xd0b   :  { %v6369_v51 = vpop.f32.mrf.mxu1 }
 0xd0c   :  { %v6370_v49 = vadd.f32 %v6369_v51, %v6257_v43  ;;  %v6634_v43 = vld [vmem:[#allocation21 + $0x30] sm:$0xff] }
 0xd11   :  { %v6482_v48 = vpop.f32.mrf.mxu2 }
 0xd12   :  { %v6483_v53 = vadd.f32 %v6482_v48, %v6370_v49 }
 0xd13   :  { %v6372_v54 = vpop.f32.mrf.mxu1 }
 0xd14   :  { %v6373_v39 = vadd.f32 %v6372_v54, %v6260_v60 }
 0xd19   :  { %v6485_v22 = vpop.f32.mrf.mxu2 }
 0xd1a   :  { %v6486_v36 = vadd.f32 %v6485_v22, %v6373_v39  ;;  %v6633_v39 = vld [vmem:[#allocation21 + $0x28] sm:$0xff] }
 0xd1b   :  { %v6375_v2 = vpop.f32.mrf.mxu1 }
 0xd1c   :  { %v6376_v37 = vadd.f32 %v6375_v2, %v6263_v9  ;;  %v6640_v2 = vld [vmem:[#allocation21 + $0x60] sm:$0xff]  ;;  %v6638_v9 = vld [vmem:[#allocation21 + $0x50] sm:$0xff] }
 0xd21   :  { %v6488_v10 = vpop.f32.mrf.mxu2 }
 0xd22   :  { %v6489_v46 = vadd.f32 %v6488_v10, %v6376_v37  ;;  %v6636_v37 = vld [vmem:[#allocation21 + $0x40] sm:$0xff]  ;;  %v6635_v10 = vld [vmem:[#allocation21 + $0x38] sm:$0xff] }
 0xd24   :  { %6517 = vmatpush.msra.mxu3 %v6489_v46  ;;  %v6632_v46 = vld [vmem:[#allocation21 + $0x20] sm:$0xff] }
 0xd26   :  { %6518 = vmatpush.msra.mxu3 %v6486_v36  ;;  %v6629_v36 = vld [vmem:[#allocation21 + $0x8] sm:$0xff] }
 0xd28   :  { %6519 = vmatpush.msra.mxu3 %v6483_v53 }
 0xd2a   :  { %6520 = vmatpush.msra.mxu3 %v6480_v7 }
 0xd2c   :  { %6521 = vmatpush.msra.mxu3 %v6477_v50 }
 0xd2e   :  { %6522 = vmatpush.msra.mxu3 %v6474_v31 }
 0xd30   :  { %6523 = vmatpush.msra.mxu3 %v6471_v61 }
 0xd32   :  { %6524 = vmatpush.msra.mxu3 %v6468_v19  ;;  %v6546_v19 = vld [vmem:[#allocation18 + $0x20] sm:$0xff] }
 0xd34   :  { %6525 = vmatpush.msra.mxu3 %v10973_v14  ;;  %v6555_v14 = vld [vmem:[#allocation18 + $0x68] sm:$0xff] }
 0xd36   :  { %6526 = vmatpush.msra.mxu3 %v10970_v55  ;;  %v6554_v55 = vld [vmem:[#allocation18 + $0x60] sm:$0xff] }
 0xd38   :  { %6527 = vmatpush.msra.mxu3 %v10967_v11  ;;  %v6553_v11 = vld [vmem:[#allocation18 + $0x58] sm:$0xff] }
 0xd3a   :  { %6528 = vmatpush.msra.mxu3 %v10964_v34  ;;  %v6552_v34 = vld [vmem:[#allocation18 + $0x50] sm:$0xff] }
 0xd3c   :  { %6529 = vmatpush.msra.mxu3 %v10960_v62  ;;  %v6551_v62 = vld [vmem:[#allocation18 + $0x48] sm:$0xff] }
 0xd3e   :  { %6530 = vmatpush.msra.mxu3 %v10953_v33  ;;  %v6550_v33 = vld [vmem:[#allocation18 + $0x40] sm:$0xff] }
 0xd40   :  { %6531 = vmatpush.msra.mxu3 %v10946_v57  ;;  %v6549_v57 = vld [vmem:[#allocation18 + $0x38] sm:$0xff] }
 0xd42   :  { %6532 = vmatpush.msra.mxu3 %v10940_v44  ;;  %v6547_v44 = vld [vmem:[#allocation18 + $0x28] sm:$0xff] }
 0xd43   :  { %6533 = vmatmul.f32.vlgmr.msra.gmra.mxu3 %v6492_v15 }
 0xd44   :  { %6562 = vmatpush.msrb.mxu3 %v6557_v30 }
 0xd46   :  { %6563 = vmatpush.msrb.mxu3 %v6556_v29  ;;  %v6514_v24 = vpop.f32.mrf.mxu3 }
 0xd47   :  { %v6515_v4 = vadd.f32 %v6816_v41, %v6514_v24 }
 0xd48   :  { %6564 = vmatpush.msrb.mxu3 %v6555_v14 }
 0xd4a   :  { %6565 = vmatpush.msrb.mxu3 %v6554_v55  ;;  %v6540_v55 = vlaneseq }
 0xd4c   :  { %6566 = vmatpush.msrb.mxu3 %v6553_v11 }
 0xd4e   :  { %6567 = vmatpush.msrb.mxu3 %v6552_v34 }
 0xd50   :  { %6568 = vmatpush.msrb.mxu3 %v6551_v62 }
 0xd52   :  { %6569 = vmatpush.msrb.mxu3 %v6550_v33 }
 0xd54   :  { %6570 = vmatpush.msrb.mxu3 %v6549_v57  ;;  %v10994_v57 = vand.u32 127, %v6540_v55 }
 0xd56   :  { %6571 = vmatpush.msrb.mxu3 %v6548_v42  ;;  %vm6626_vm8 = vcmp.lt.s32.totalorder %v10994_v57, 26 }
 0xd58   :  { %6572 = vmatpush.msrb.mxu3 %v6547_v44 }
 0xd5a   :  { %6573 = vmatpush.msrb.mxu3 %v6546_v19 }
 0xd5c   :  { %6574 = vmatpush.msrb.mxu3 %v6545_v40 }
 0xd5e   :  { %6575 = vmatpush.msrb.mxu3 %v6544_v8 }
 0xd60   :  { %6576 = vmatpush.msrb.mxu3 %v6543_v23 }
 0xd62   :  { %6577 = vmatpush.msrb.mxu3 %v6542_v25  ;;  %v6818_v25 = vld [vmem:[#allocation22] ss:$0 sm:$0xff] }
 0xd64   :  { %6648 = vmatpush.msra.mxu3 %v6643_v56  ;;  %v6722_v56 = vld [vmem:[#allocation24 + $0x40] sm:$0xff] }
 0xd66   :  { %6649 = vmatpush.msra.mxu3 %v6642_v1  ;;  %v6721_v1 = vld [vmem:[#allocation24 + $0x38] sm:$0xff] }
 0xd68   :  { %6650 = vmatpush.msra.mxu3 %v6641_v35  ;;  %v6720_v35 = vld [vmem:[#allocation24 + $0x30] sm:$0xff] }
 0xd6a   :  { %6651 = vmatpush.msra.mxu3 %v6640_v2  ;;  %v6719_v2 = vld [vmem:[#allocation24 + $0x28] sm:$0xff] }
 0xd6c   :  { %6652 = vmatpush.msra.mxu3 %v6639_v38  ;;  %v6718_v38 = vld [vmem:[#allocation24 + $0x20] sm:$0xff] }
 0xd6e   :  { %6653 = vmatpush.msra.mxu3 %v6638_v9  ;;  %v6717_v9 = vld [vmem:[#allocation24 + $0x18] sm:$0xff] }
 0xd70   :  { %6654 = vmatpush.msra.mxu3 %v6637_v63  ;;  %v6716_v63 = vld [vmem:[#allocation24 + $0x10] sm:$0xff] }
 0xd72   :  { %6655 = vmatpush.msra.mxu3 %v6636_v37  ;;  %v6715_v37 = vld [vmem:[#allocation24 + $0x8] sm:$0xff] }
 0xd74   :  { %6656 = vmatpush.msra.mxu3 %v6635_v10  ;;  %v6714_v10 = vld [vmem:[#allocation24] sm:$0xff] }
 0xd76   :  { %6657 = vmatpush.msra.mxu3 %v6634_v43 }
 0xd78   :  { %6658 = vmatpush.msra.mxu3 %v6633_v39 }
 0xd7a   :  { %6659 = vmatpush.msra.mxu3 %v6632_v46 }
 0xd7c   :  { %6660 = vmatpush.msra.mxu3 %v6631_v3 }
 0xd7e   :  { %6661 = vmatpush.msra.mxu3 %v6630_v16 }
 0xd80   :  { %6662 = vmatpush.msra.mxu3 %v6629_v36 }
 0xd82   :  { %6663 = vmatpush.msra.mxu3 %v6628_v5 }
 0xdc6   :  { %v6534_v45 = vpop.f32.mrf.mxu3 }
 0xdc7   :  { %v6535_v26 = vadd.f32 %v6534_v45, %v6515_v4  ;;  %v6729_v45 = vld [vmem:[#allocation24 + $0x78] sm:$0xff] }
 0xdc9   :  { %v6537_v51 = vmax.f32 %v6535_v26, 0.0  ;;  %v6728_v26 = vld [vmem:[#allocation24 + $0x70] sm:$0xff] }
 0xdcb   :  { %v6539_v47 = vadd.f32 %v6538_v20, %v6537_v51  ;;  %v6727_v51 = vld [vmem:[#allocation24 + $0x68] sm:$0xff] }
 0xdcd   :  { %6578 = vmatmul.f32.vlgmr.msrb.gmra.mxu3 %v6539_v47  ;;  %v6726_v47 = vld [vmem:[#allocation24 + $0x60] sm:$0xff] }
 0xdce   :  { %6734 = vmatpush.msrb.mxu3 %v6729_v45 }
 0xdd0   :  { %6735 = vmatpush.msrb.mxu3 %v6728_v26 }
 0xdd2   :  { %6736 = vmatpush.msrb.mxu3 %v6727_v51 }
 0xdd4   :  { %6737 = vmatpush.msrb.mxu3 %v6726_v47 }
 0xe50   :  { %v6579_v48 = vpop.f32.mrf.mxu3 }
 0xe51   :  { %v6580_v54 = vadd.f32 %v6817_v52, %v6579_v48  ;;  %v6725_v52 = vld [vmem:[#allocation24 + $0x58] sm:$0xff]  ;;  %v6724_v48 = vld [vmem:[#allocation24 + $0x50] sm:$0xff] }
 0xe52   :  { %6738 = vmatpush.msrb.mxu3 %v6725_v52 }
 0xe53   :  { %6604 = vrot.lane.b32.xlu0 %v6580_v54, %s7273_s23  ;;  %v6582_v22 = vsub.f32 0.0, %v6580_v54 }
 0xe54   :  { %6739 = vmatpush.msrb.mxu3 %v6724_v48 }
 0xe55   :  { %v6583_v6 = vmul.f32 1.442695, %v6582_v22 }
 0xe57   :  { %6820 = vpow2.f32 %v6583_v6 }
 0xe5b   :  { %6600 = vrot.lane.b32.xlu0 %v6580_v54, %s7274_s26  ;;  %v6723_v54 = vld [vmem:[#allocation24 + $0x48] sm:$0xff] }
 0xe5c   :  { %6740 = vmatpush.msrb.mxu3 %v6723_v54 }
 0xe5d   :  { %v6821_v60 = vpop.eup %6820 }
 0xe5e   :  { %v6585_v0 = vadd.f32 1.0, %v6821_v60  ;;  %6741 = vmatpush.msrb.mxu3 %v6722_v56 }
 0xe60   :  { %6822 = vrcp.f32 %v6585_v0  ;;  %v6597_v27 = vand.u32 2147483648, %v6585_v0  ;;  %vm6591_vm1 = vweird.f32 %v6585_v0  ;;  %v6595_v50 = vand.u32 2147483647, %v6585_v0  ;;  %6742 = vmatpush.msrb.mxu3 %v6721_v1 }
 0xe62   :  { %v6598_v61 = vor.u32 1.1754944e-38, %v6597_v27  ;;  %vm6596_vm3 = vcmp.eq.f32.partialorder %v6595_v50, 8.507059e+37  ;;  %6743 = vmatpush.msrb.mxu3 %v6720_v35 }
 0xe64   :  { %6744 = vmatpush.msrb.mxu3 %v6719_v2 }
 0xe66   :  { %v6823_v49 = vpop.eup %6822  ;;  %6745 = vmatpush.msrb.mxu3 %v6718_v38 }
 0xe67   :  { %v6587_v18 = vmul.f32 %v6823_v49, %v6585_v0  ;;  %vm6592_vm0 = vweird.f32 %v6823_v49 }
 0xe68   :  { %vm6593_vm2 = vmor %vm6591_vm1, %vm6592_vm0  ;;  %6746 = vmatpush.msrb.mxu3 %v6717_v9  ;;  %vm6712_vm1 = vcmp.lt.s32.totalorder %v10994_v57, 32 }
 0xe69   :  { %v6588_v58 = vsub.f32 1.0, %v6587_v18 }
 0xe6a   :  { %6747 = vmatpush.msrb.mxu3 %v6716_v63 }
 0xe6b   :  { %v6589_v12 = vmul.f32 %v6823_v49, %v6588_v58 }
 0xe6c   :  { %6748 = vmatpush.msrb.mxu3 %v6715_v37 }
 0xe6d   :  { %v6590_v17 = vadd.f32 %v6823_v49, %v6589_v12 }
 0xe6e   :  { %6749 = vmatpush.msrb.mxu3 %v6714_v10 }
 0xe6f   :  { %v6594_v28 = vsel %vm6593_vm2, %v6823_v49, %v6590_v17 }
 0xe70   :  { %v6599_v15 = vsel %vm6596_vm3, %v6598_v61, %v6594_v28 }
 0xec5   :  { %v6605_v32 = vpop.permute.xlu0 %6604 }
 0xec6   :  { %v6606_v21 = vsub.f32 0.0, %v6605_v32 }
 0xec8   :  { %v6607_v53 = vmul.f32 1.442695, %v6606_v21 }
 0xeca   :  { %6824 = vpow2.f32 %v6607_v53 }
 0xecd   :  { %v6601_v13 = vpop.permute.xlu0 %6600 }
 0xece   :  { %6826 = vtanh.f32 %v6601_v13 }
 0xed0   :  { %v6825_v59 = vpop.eup %6824 }
 0xed1   :  { %v6609_v7 = vadd.f32 1.0, %v6825_v59 }
 0xed3   :  { %6828 = vrcp.f32 %v6609_v7  ;;  %v6621_v34 = vand.u32 2147483648, %v6609_v7  ;;  %v6619_v33 = vand.u32 2147483647, %v6609_v7  ;;  %vm6615_vm5 = vweird.f32 %v6609_v7 }
 0xed4   :  { %v6827_v31 = vpop.eup %6826 }
 0xed5   :  { %v6603_v29 = vmul.f32 %v6827_v31, %v6599_v15  ;;  %v6622_v44 = vor.u32 1.1754944e-38, %v6621_v34  ;;  %vm6620_vm7 = vcmp.eq.f32.partialorder %v6619_v33, 8.507059e+37 }
 0xed7   :  { %6830 = vtanh.f32 %v6603_v29 }
 0xed9   :  { %v6829_v30 = vpop.eup %6828 }
 0xeda   :  { %v6611_v14 = vmul.f32 %v6829_v30, %v6609_v7  ;;  %vm6616_vm4 = vweird.f32 %v6829_v30 }
 0xedb   :  { %vm6617_vm6 = vmor %vm6615_vm5, %vm6616_vm4 }
 0xedc   :  { %v6612_v11 = vsub.f32 1.0, %v6611_v14 }
 0xedd   :  { %v6831_v40 = vpop.eup %6830 }
 0xede   :  { %v6613_v62 = vmul.f32 %v6829_v30, %v6612_v11  ;;  %v6819_v11 = vld [vmem:[#allocation25] ss:$0 sm:$0xff] }
 0xee0   :  { %v6614_v42 = vadd.f32 %v6829_v30, %v6613_v62 }
 0xee2   :  { %v6618_v19 = vsel %vm6617_vm6, %v6829_v30, %v6614_v42 }
 0xee3   :  { %v6623_v8 = vsel %vm6620_vm7, %v6622_v44, %v6618_v19 }
 0xee4   :  { %v6625_v23 = vmul.f32 %v6831_v40, %v6623_v8 }
 0xee6   :  { %6786 = vmatmul.msk.f32.vlgmr.msra.gmra.mxu3 %vm6626_vm8, %v6625_v23 }
 0xf69   :  { %v6665_v24 = vpop.f32.mrf.mxu3 }
 0xf6a   :  { %v6666_v41 = vadd.f32 %v6818_v25, %v6665_v24 }
 0xf6c   :  { %6690 = vrot.lane.b32.xlu1 %v6666_v41, %s7275_s15  ;;  %v6668_v4 = vsub.f32 0.0, %v6666_v41 }
 0xf6e   :  { %v6669_v20 = vmul.f32 1.442695, %v6668_v4 }
 0xf70   :  { %6832 = vpow2.f32 %v6669_v20 }
 0xf74   :  { %6686 = vrot.lane.b32.xlu1 %v6666_v41, %s7276_s8 }
 0xf76   :  { %v6833_v22 = vpop.eup %6832 }
 0xf77   :  { %v6671_v6 = vadd.f32 1.0, %v6833_v22 }
 0xf79   :  { %6834 = vrcp.f32 %v6671_v6  ;;  %v6683_v18 = vand.u32 2147483648, %v6671_v6  ;;  %vm6677_vm10 = vweird.f32 %v6671_v6  ;;  %v6681_v21 = vand.u32 2147483647, %v6671_v6 }
 0xf7b   :  { %v6684_v13 = vor.u32 1.1754944e-38, %v6683_v18  ;;  %vm6682_vm12 = vcmp.eq.f32.partialorder %v6681_v21, 8.507059e+37 }
 0xf7f   :  { %v6835_v60 = vpop.eup %6834 }
 0xf80   :  { %v6673_v43 = vmul.f32 %v6835_v60, %v6671_v6  ;;  %vm6678_vm9 = vweird.f32 %v6835_v60 }
 0xf81   :  { %vm6679_vm11 = vmor %vm6677_vm10, %vm6678_vm9 }
 0xf82   :  { %v6674_v3 = vsub.f32 1.0, %v6673_v43 }
 0xf84   :  { %v6675_v49 = vmul.f32 %v6835_v60, %v6674_v3 }
 0xf86   :  { %v6676_v32 = vadd.f32 %v6835_v60, %v6675_v49 }
 0xf88   :  { %v6680_v53 = vsel %vm6679_vm11, %v6835_v60, %v6676_v32 }
 0xf89   :  { %v6685_v12 = vsel %vm6682_vm12, %v6684_v13, %v6680_v53 }
 0xfde   :  { %v6691_v0 = vpop.permute.xlu1 %6690 }
 0xfdf   :  { %v6692_v39 = vsub.f32 0.0, %v6691_v0 }
 0xfe1   :  { %v6693_v46 = vmul.f32 1.442695, %v6692_v39 }
 0xfe3   :  { %6836 = vpow2.f32 %v6693_v46 }
 0xfe6   :  { %v6687_v16 = vpop.permute.xlu1 %6686 }
 0xfe7   :  { %6838 = vtanh.f32 %v6687_v16 }
 0xfe9   :  { %v6837_v36 = vpop.eup %6836 }
 0xfea   :  { %v6695_v5 = vadd.f32 1.0, %v6837_v36 }
 0xfec   :  { %6840 = vrcp.f32 %v6695_v5  ;;  %v6707_v50 = vand.u32 2147483648, %v6695_v5  ;;  %v6705_v31 = vand.u32 2147483647, %v6695_v5  ;;  %vm6701_vm14 = vweird.f32 %v6695_v5 }
 0xfed   :  { %v6839_v58 = vpop.eup %6838 }
 0xfee   :  { %v6689_v7 = vmul.f32 %v6839_v58, %v6685_v12  ;;  %v6708_v15 = vor.u32 1.1754944e-38, %v6707_v50  ;;  %vm6706_vm0 = vcmp.eq.f32.partialorder %v6705_v31, 8.507059e+37 }
 0xff0   :  { %6842 = vtanh.f32 %v6689_v7 }
 0xff2   :  { %v6841_v59 = vpop.eup %6840 }
 0xff3   :  { %v6697_v17 = vmul.f32 %v6841_v59, %v6695_v5  ;;  %vm6702_vm13 = vweird.f32 %v6841_v59 }
 0xff4   :  { %vm6703_vm15 = vmor %vm6701_vm14, %vm6702_vm13 }
 0xff5   :  { %v6698_v27 = vsub.f32 1.0, %v6697_v17 }
 0xff6   :  { %v6843_v29 = vpop.eup %6842 }
 0xff7   :  { %v6699_v28 = vmul.f32 %v6841_v59, %v6698_v27 }
 0xff9   :  { %v6700_v61 = vadd.f32 %v6841_v59, %v6699_v28 }
 0xffb   :  { %v6704_v30 = vsel %vm6703_vm15, %v6841_v59, %v6700_v61 }
 0xffc   :  { %v6709_v14 = vsel %vm6706_vm0, %v6708_v15, %v6704_v30 }
 0xffd   :  { %v6711_v55 = vmul.f32 %v6843_v29, %v6709_v14 }
 0xfff   :  { %6787 = vmatmul.msk.f32.vlgmr.msrb.gmra.mxu3 %vm6712_vm1, %v6711_v55 }
0x1082   :  { %v6751_v34 = vpop.f32.mrf.mxu3 }
0x1083   :  { %v6752_v62 = vadd.f32 %v6819_v11, %v6751_v34 }
0x1085   :  { %v6754_v33 = vsub.f32 0.0, %v6752_v62 }
0x1087   :  { %v6755_v42 = vmul.f32 1.442695, %v6754_v33 }
0x1089   :  { %6844 = vpow2.f32 %v6755_v42 }
0x108f   :  { %v6845_v44 = vpop.eup %6844 }
0x1090   :  { %v6757_v19 = vadd.f32 1.0, %v6845_v44 }
0x1092   :  { %6846 = vrcp.f32 %v6757_v19  ;;  %v6769_v25 = vand.u32 2147483648, %v6757_v19  ;;  %v6767_v41 = vand.u32 2147483647, %v6757_v19  ;;  %vm6763_vm3 = vweird.f32 %v6757_v19 }
0x1094   :  { %v6770_v57 = vor.u32 1.1754944e-38, %v6769_v25  ;;  %vm6768_vm5 = vcmp.eq.f32.partialorder %v6767_v41, 8.507059e+37 }
0x1098   :  { %v6847_v40 = vpop.eup %6846 }
0x1099   :  { %v6759_v8 = vmul.f32 %v6847_v40, %v6757_v19  ;;  %vm6764_vm2 = vweird.f32 %v6847_v40 }
0x109a   :  { %vm6765_vm4 = vmor %vm6763_vm3, %vm6764_vm2 }
0x109b   :  { %v6760_v23 = vsub.f32 1.0, %v6759_v8 }
0x109d   :  { %v6761_v24 = vmul.f32 %v6847_v40, %v6760_v23 }
0x109f   :  { %v6762_v4 = vadd.f32 %v6847_v40, %v6761_v24 }
0x10a1   :  { %v6766_v45 = vsel %vm6765_vm4, %v6847_v40, %v6762_v4 }
0x10a2   :  { %v6771_v26 = vsel %vm6768_vm5, %v6770_v57, %v6766_v45 }
0x10a3   :  { %6772 = vst [vmem:[%s11019_s18] sm:$0xff] %v6771_v26 }
0x10a4   :  { %6777 = vsyncpa [#allocation3], 1 }
0x10a5   :  { %6778 = vsyncpa [#allocation5], 1 }
0x10a6   :  { %6779 = vsyncpa [#allocation8], 1 }
0x10a7   :  { %6780 = vsyncpa [#allocation11], 1 }
0x10a8   :  { %6781 = vsyncpa [#allocation14], 1 }
0x10a9   :  { %6782 = vsyncpa [#allocation17], 1 }
0x10aa   :  { %6783 = vsyncpa [#allocation20], 1 }
0x10ab   :  { %6784 = vsyncpa [#allocation23], 1 }
0x10ac   :  { %6785 = vsyncpa [#allocation26], 1 }

</bundles_post_ra>
